<compile_context>
chip_gen: v7x
topology: tpu7x:2x2x1
jax: 0.10.0
libtpu: 0.0.40
codegen_flags: <defaults>
</compile_context>

<pallas_src>
import functools

import jax
import jax.numpy as jnp
from jax.experimental import pallas as pl
from jax.experimental.pallas import tpu as pltpu


# ----------------------------- Pallas kernels ------------------------------

def _convt_matmul_kernel(x_ref, w_ref, b_ref, o_ref):
    # (tm, Cin) @ (Cin, 4*Cout) + bias  -- the 2x2 stride-2 transposed conv
    o_ref[...] = (
        jnp.dot(x_ref[...], w_ref[...], preferred_element_type=jnp.float32)
        + b_ref[0]
    ).astype(o_ref.dtype)


def _acc_conv3x3(pad_ref, w_ref, H, W):
    """3x3 'valid' conv of a zero-padded (H+2, W+2, Cin) VMEM scratch with a
    (3, 3, Cin, Cout) weight ref, accumulated as flat MXU dots.
    Returns an (H*W, Cout) float32 value."""
    cout = w_ref.shape[-1]
    acc = jnp.zeros((H * W, cout), jnp.float32)
    for dy in range(3):
        for dx in range(3):
            xv = pad_ref[dy:dy + H, dx:dx + W, :].reshape(H * W, -1)
            acc = acc + jnp.dot(xv, w_ref[dy, dx],
                                preferred_element_type=jnp.float32)
    return acc


def _fused_resconv_kernel(
        u_ref, x2_ref,
        s1u_ref, b1u_ref, s1x_ref, b1x_ref,
        w1u_ref, w1x_ref, cb1_ref,
        s2_ref, b2_ref, w2_ref, cb2_ref,
        wsu_ref, wsx_ref, sb_ref,
        o_ref,
        pa_ref, pb_ref, ph_ref, sk_ref,
        *, H, W):
    """Fused ResConv over (upsampled x1, x2) for one batch element.

    conv path : BN1+ReLU -> conv1(3x3) -> BN2+ReLU -> conv2(3x3)
    skip path : conv(3x3) with BatchNorm folded into weights/bias
    out       = conv path + skip path
    The channel concat is implicit: each conv over the concat is computed as
    conv(u_half) + conv(x2_half) with weights split along the concat axis.
    """
    f32 = jnp.float32
    zero = f32(0.0)

    u = u_ref[0].astype(f32)      # (H, W, C)
    x2 = x2_ref[0].astype(f32)    # (H, W, C)

    # zero-padded scratch (halo of 1); borders stay zero, interiors rewritten
    pa_ref[...] = jnp.zeros_like(pa_ref)
    pb_ref[...] = jnp.zeros_like(pb_ref)
    ph_ref[...] = jnp.zeros_like(ph_ref)

    # ---- skip branch: conv3x3 over the raw (pre-BN) concat ----------------
    pa_ref[1:H + 1, 1:W + 1, :] = u
    pb_ref[1:H + 1, 1:W + 1, :] = x2
    sk_ref[...] = (_acc_conv3x3(pa_ref, wsu_ref, H, W)
                   + _acc_conv3x3(pb_ref, wsx_ref, H, W)
                   + sb_ref[0])

    # ---- conv branch -------------------------------------------------------
    # BN1 + ReLU applied per concat-half BEFORE padding (halo stays zero,
    # matching PyTorch's BN->ReLU->Conv(padding=1) semantics)
    pa_ref[1:H + 1, 1:W + 1, :] = jnp.maximum(u * s1u_ref[0] + b1u_ref[0], zero)
    pb_ref[1:H + 1, 1:W + 1, :] = jnp.maximum(x2 * s1x_ref[0] + b1x_ref[0], zero)

    h = (_acc_conv3x3(pa_ref, w1u_ref, H, W)
         + _acc_conv3x3(pb_ref, w1x_ref, H, W)
         + cb1_ref[0])                                   # (H*W, C)
    h = jnp.maximum(h * s2_ref[0] + b2_ref[0], zero)     # BN2 + ReLU
    ph_ref[1:H + 1, 1:W + 1, :] = h.reshape(H, W, -1)

    out = _acc_conv3x3(ph_ref, w2_ref, H, W) + cb2_ref[0] + sk_ref[...]
    o_ref[0] = out.reshape(H, W, -1).astype(o_ref.dtype)


# ------------------------------ thin wrappers -------------------------------

def _row_tile(M, cap=512):
    """Largest multiple-of-8 divisor of M that is <= cap, preferring >= 2
    grid steps (so both v7x TensorCores get work).  Falls back to M."""
    cap = min(cap, M)
    if M >= 16:
        cap = min(cap, M // 2)
    for t in range(cap, 7, -1):
        if M % t == 0 and t % 8 == 0:
            return t
    return M


def conv_transpose2x2(x, wt, b):
    """ConvTranspose2d(kernel=2, stride=2).

    x : (N, H, W, Cin) NHWC
    wt: (Cin, Cout, 2, 2)  (PyTorch ConvTranspose2d weight layout)
    b : (Cout,)
    returns (N, 2H, 2W, Cout)
    """
    N, H, W, Cin = x.shape
    Cout = wt.shape[1]
    # columns ordered (di, dj, co): wmat[ci, (di*2+dj)*Cout + co] = wt[ci,co,di,dj]
    wmat = jnp.transpose(wt, (0, 2, 3, 1)).reshape(Cin, 4 * Cout)
    bias4 = jnp.tile(b, 4).reshape(1, 4 * Cout)

    M = N * H * W
    tm = _row_tile(M)
    xm = x.reshape(M, Cin)
    y = pl.pallas_call(
        _convt_matmul_kernel,
        out_shape=jax.ShapeDtypeStruct((M, 4 * Cout), x.dtype),
        grid=(M // tm,),
        in_specs=[
            pl.BlockSpec((tm, Cin), lambda i: (i, 0)),
            pl.BlockSpec((Cin, 4 * Cout), lambda i: (0, 0)),
            pl.BlockSpec((1, 4 * Cout), lambda i: (0, 0)),
        ],
        out_specs=pl.BlockSpec((tm, 4 * Cout), lambda i: (i, 0)),
        compiler_params=pltpu.CompilerParams(
            dimension_semantics=("parallel",)),
    )(xm, wmat, bias4)

    # 2x2 spatial interleave (tiny, left to XLA):
    # out[n, 2i+di, 2j+dj, co] = y[n, i, j, di, dj, co]
    y = y.reshape(N, H, W, 2, 2, Cout)
    return jnp.transpose(y, (0, 1, 3, 2, 4, 5)).reshape(N, 2 * H, 2 * W, Cout)


def fused_resconv(u, x2, params):
    """ResConv over the implicit channel-concat [u, x2]; gridded over batch."""
    N, H, W, C = u.shape
    assert x2.shape == (N, H, W, C), (u.shape, x2.shape)

    # split concat-axis params: channels [0:C] act on u, [C:2C] act on x2
    s1u, s1x = params["bn1_s"][:C], params["bn1_s"][C:]
    b1u, b1x = params["bn1_b"][:C], params["bn1_b"][C:]
    w1u, w1x = params["conv1_w"][:, :, :C, :], params["conv1_w"][:, :, C:, :]
    wsu, wsx = params["skip_w"][:, :, :C, :], params["skip_w"][:, :, C:, :]

    vec = lambda v: v.reshape(1, -1)
    tile4 = lambda n: (n, 0, 0, 0)
    full2 = lambda n: (0, 0)
    full4 = lambda n: (0, 0, 0, 0)

    kern = functools.partial(_fused_resconv_kernel, H=H, W=W)
    return pl.pallas_call(
        kern,
        out_shape=jax.ShapeDtypeStruct((N, H, W, C), u.dtype),
        grid=(N,),
        in_specs=[
            pl.BlockSpec((1, H, W, C), tile4),        # u (upsampled x1)
            pl.BlockSpec((1, H, W, C), tile4),        # x2
            pl.BlockSpec((1, C), full2),              # bn1 scale, u half
            pl.BlockSpec((1, C), full2),              # bn1 bias,  u half
            pl.BlockSpec((1, C), full2),              # bn1 scale, x2 half
            pl.BlockSpec((1, C), full2),              # bn1 bias,  x2 half
            pl.BlockSpec((3, 3, C, C), full4),        # conv1 w, u half
            pl.BlockSpec((3, 3, C, C), full4),        # conv1 w, x2 half
            pl.BlockSpec((1, C), full2),              # conv1 bias
            pl.BlockSpec((1, C), full2),              # bn2 scale
            pl.BlockSpec((1, C), full2),              # bn2 bias
            pl.BlockSpec((3, 3, C, C), full4),        # conv2 w
            pl.BlockSpec((1, C), full2),              # conv2 bias
            pl.BlockSpec((3, 3, C, C), full4),        # skip w, u half
            pl.BlockSpec((3, 3, C, C), full4),        # skip w, x2 half
            pl.BlockSpec((1, C), full2),              # skip bias (BN folded)
        ],
        out_specs=pl.BlockSpec((1, H, W, C), tile4),
        scratch_shapes=[
            pltpu.VMEM((H + 2, W + 2, C), jnp.float32),   # padded u / BN1(u)
            pltpu.VMEM((H + 2, W + 2, C), jnp.float32),   # padded x2 / BN1(x2)
            pltpu.VMEM((H + 2, W + 2, C), jnp.float32),   # padded conv1 output
            pltpu.VMEM((H * W, C), jnp.float32),          # skip-branch result
        ],
        compiler_params=pltpu.CompilerParams(
            dimension_semantics=("parallel",)),
    )(u, x2, vec(s1u), vec(b1u), vec(s1x), vec(b1x),
      w1u, w1x, vec(params["conv1_b"]),
      vec(params["bn2_s"]), vec(params["bn2_b"]),
      params["conv2_w"], vec(params["conv2_b"]),
      wsu, wsx, vec(params["skip_b"]))


# --------------------------- DecoderBlock forward ---------------------------

def decoder_block_forward(params, x1_nchw, x2_nchw):
    """x1: (N, cin, H, W) NCHW; x2: (N, cout, 2H, 2W) NCHW. Returns NCHW."""
    x1 = jnp.transpose(x1_nchw, (0, 2, 3, 1))   # -> NHWC
    x2 = jnp.transpose(x2_nchw, (0, 2, 3, 1))   # -> NHWC

    u = conv_transpose2x2(x1, params["up_w"], params["up_b"])
    out = fused_resconv(u, x2, params)          # implicit concat inside

    return jnp.transpose(out, (0, 3, 1, 2))     # back to NCHW


# ------------------------------- param setup --------------------------------

def make_params(key, cin, cout, eps=1e-5):
    cin_rc = 2 * cout  # ResConv input channels after concat
    ks = jax.random.split(key, 16)

    def bn_fold(kg, kb, km, kv, c):
        gamma = 1.0 + 0.1 * jax.random.normal(kg, (c,), jnp.float32)
        beta = 0.1 * jax.random.normal(kb, (c,), jnp.float32)
        mean = 0.1 * jax.random.normal(km, (c,), jnp.float32)
        var = jnp.abs(1.0 + 0.1 * jax.random.normal(kv, (c,), jnp.float32))
        scale = gamma / jnp.sqrt(var + eps)
        shift = beta - mean * scale
        return scale, shift

    # transposed conv (PyTorch weight layout (Cin, Cout, 2, 2))
    up_w = 0.1 * jax.random.normal(ks[0], (cin, cout, 2, 2), jnp.float32)
    up_b = 0.1 * jax.random.normal(ks[1], (cout,), jnp.float32)

    # BN1 over concat channels
    bn1_s, bn1_b = bn_fold(ks[2], ks[3], ks[4], ks[5], cin_rc)
    # conv1: cin_rc -> cout, 3x3 (stored as (3,3,Cin,Cout))
    conv1_w = 0.1 * jax.random.normal(ks[6], (3, 3, cin_rc, cout), jnp.float32)
    conv1_b = 0.1 * jax.random.normal(ks[7], (cout,), jnp.float32)
    # BN2 over cout
    bn2_s, bn2_b = bn_fold(ks[8], ks[9], ks[10], ks[11], cout)
    # conv2: cout -> cout
    conv2_w = 0.1 * jax.random.normal(ks[12], (3, 3, cout, cout), jnp.float32)
    conv2_b = 0.1 * jax.random.normal(ks[13], (cout,), jnp.float32)

    # skip: conv (cin_rc -> cout) followed by BN; BN folded into conv params
    skip_w_raw = 0.1 * jax.random.normal(ks[14], (3, 3, cin_rc, cout), jnp.float32)
    skip_b_raw = 0.1 * jax.random.normal(ks[15], (cout,), jnp.float32)
    sgamma = 1.0 + 0.05 * jnp.arange(cout, dtype=jnp.float32)
    sbeta = 0.05 * jnp.arange(cout, dtype=jnp.float32)
    smean = jnp.zeros((cout,), jnp.float32)
    svar = jnp.ones((cout,), jnp.float32)
    sscale = sgamma / jnp.sqrt(svar + eps)
    skip_w = skip_w_raw * sscale                # per-output-channel scale
    skip_b = (skip_b_raw - smean) * sscale + sbeta

    return dict(
        up_w=up_w, up_b=up_b,
        bn1_s=bn1_s, bn1_b=bn1_b,
        conv1_w=conv1_w, conv1_b=conv1_b,
        bn2_s=bn2_s, bn2_b=bn2_b,
        conv2_w=conv2_w, conv2_b=conv2_b,
        skip_w=skip_w, skip_b=skip_b,
    )


# ----------------------------- pure-JAX reference ----------------------------

def _ref_conv3x3(x, w, b):
    N, H, W, _ = x.shape
    xp = jnp.pad(x, ((0, 0), (1, 1), (1, 1), (0, 0)))
    out = jnp.zeros((N, H, W, w.shape[-1]), jnp.float32)
    for dy in range(3):
        for dx in range(3):
            out = out + jnp.einsum("nhwc,cf->nhwf",
                                   xp[:, dy:dy + H, dx:dx + W, :], w[dy, dx])
    return out + b


def _ref_forward(params, x1_nchw, x2_nchw):
    x1 = jnp.transpose(x1_nchw, (0, 2, 3, 1))
    x2 = jnp.transpose(x2_nchw, (0, 2, 3, 1))
    N, H, W, _ = x1.shape
    cout = params["up_w"].shape[1]
    u = jnp.einsum("nhwi,iopq->nhpwqo", x1, params["up_w"])
    u = u.reshape(N, 2 * H, 2 * W, cout) + params["up_b"]
    x = jnp.concatenate([u, x2], axis=-1)
    h = jnp.maximum(x * params["bn1_s"] + params["bn1_b"], 0.0)
    h = _ref_conv3x3(h, params["conv1_w"], params["conv1_b"])
    h = jnp.maximum(h * params["bn2_s"] + params["bn2_b"], 0.0)
    h = _ref_conv3x3(h, params["conv2_w"], params["conv2_b"])
    s = _ref_conv3x3(x, params["skip_w"], params["skip_b"])
    return jnp.transpose(h + s, (0, 3, 1, 2))


# ----------------------------------- main ------------------------------------

if __name__ == "__main__":
    key = jax.random.PRNGKey(0)
    k_par, k_x1, k_x2 = jax.random.split(key, 3)

    cin, cout = 8, 4
    N, H, W = 2, 8, 8  # x1 spatial; x2 spatial is twice that

    params = make_params(k_par, cin, cout)
    x1 = jax.random.normal(k_x1, (N, cin, H, W), jnp.float32)            # NCHW
    x2 = jax.random.normal(k_x2, (N, cout, 2 * H, 2 * W), jnp.float32)   # NCHW

    fwd = jax.jit(decoder_block_forward)
    out = jax.block_until_ready(fwd(params, x1, x2))

    assert out.shape == (N, cout, 2 * H, 2 * W), out.shape
    assert bool(jnp.all(jnp.isfinite(out)))

    ref = _ref_forward(params, x1, x2)
    assert bool(jnp.allclose(out, ref, rtol=1e-3, atol=1e-3)), \
        float(jnp.max(jnp.abs(out - ref)))

    print("KERNEL_OK")
</pallas_src>

<mosaic_0001>
module attributes {stable_mosaic.version = 11 : i64} {
  func.func @_convt_matmul_kernel(%arg0: i32, %arg1: memref<64x8xf32, #tpu.memory_space<vmem>>, %arg2: memref<8x16xf32, #tpu.memory_space<vmem>>, %arg3: memref<1x16xf32, #tpu.memory_space<vmem>>, %arg4: memref<64x16xf32, #tpu.memory_space<vmem>>) attributes {dimension_semantics = [#tpu.dimension_semantics<parallel>], iteration_bounds = array<i64: 2>, scalar_prefetch = 0 : i64, scratch_operands = 0 : i64, tpu.core_type = #tpu.core_type<tc>, window_params = [{transform_indices = @transform_0, window_bounds = array<i64: 64, 8>}, {pipeline_mode = #tpu.pipeline_mode<synchronous>, transform_indices = @transform_1, window_bounds = array<i64: 8, 16>}, {pipeline_mode = #tpu.pipeline_mode<synchronous>, transform_indices = @transform_2, window_bounds = array<i64: 1, 16>}, {transform_indices = @transform_3, window_bounds = array<i64: 64, 16>}]} {
    %c0 = arith.constant 0 : index
    %c0_0 = arith.constant 0 : index
    %0 = vector.load %arg1[%c0, %c0_0] : memref<64x8xf32, #tpu.memory_space<vmem>>, vector<64x8xf32>
    %c0_1 = arith.constant 0 : index
    %c0_2 = arith.constant 0 : index
    %1 = vector.load %arg2[%c0_1, %c0_2] : memref<8x16xf32, #tpu.memory_space<vmem>>, vector<8x16xf32>
    %cst = arith.constant dense<0.000000e+00> : vector<64x16xf32>
    %2 = tpu.matmul %0, %1, %cst {dimension_numbers = #tpu.dot_dimension_numbers<[1], [0], [0], [1], [0, 0, 1, 1], [], []>} : vector<64x8xf32>, vector<8x16xf32>, vector<64x16xf32> -> vector<64x16xf32>
    %c0_3 = arith.constant 0 : index
    %c0_4 = arith.constant 0 : index
    %3 = vector.load %arg3[%c0_3, %c0_4] : memref<1x16xf32, #tpu.memory_space<vmem>>, vector<1x16xf32>
    %4 = vector.shape_cast %3 : vector<1x16xf32> to vector<16xf32>
    %5 = vector.shape_cast %4 : vector<16xf32> to vector<1x16xf32>
    %6 = vector.broadcast %5 : vector<1x16xf32> to vector<64x16xf32>
    %7 = arith.addf %2, %6 : vector<64x16xf32>
    %c0_5 = arith.constant 0 : index
    %c0_6 = arith.constant 0 : index
    %8 = vector.load %arg4[%c0_5, %c0_6] : memref<64x16xf32, #tpu.memory_space<vmem>>, vector<64x16xf32>
    tpu.vector_store %arg4[%c0_5, %c0_6], %7 {strides = array<i32>} : memref<64x16xf32, #tpu.memory_space<vmem>>, vector<64x16xf32>,
    return
  }
  func.func @transform_0(%arg0: i32) -> (i32, i32) {
    %c0_i32 = arith.constant 0 : i32
    %c0_i32_0 = arith.constant 0 : i32
    return %arg0, %c0_i32 : i32, i32
  }
  func.func @transform_1(%arg0: i32) -> (i32, i32) {
    %c0_i32 = arith.constant 0 : i32
    %c0_i32_0 = arith.constant 0 : i32
    %c0_i32_1 = arith.constant 0 : i32
    return %c0_i32, %c0_i32_0 : i32, i32
  }
  func.func @transform_2(%arg0: i32) -> (i32, i32) {
    %c0_i32 = arith.constant 0 : i32
    %c0_i32_0 = arith.constant 0 : i32
    %c0_i32_1 = arith.constant 0 : i32
    return %c0_i32, %c0_i32_0 : i32, i32
  }
  func.func @transform_3(%arg0: i32) -> (i32, i32) {
    %c0_i32 = arith.constant 0 : i32
    %c0_i32_0 = arith.constant 0 : i32
    return %arg0, %c0_i32 : i32, i32
  }
}

module attributes {stable_mosaic.version = 11 : i64} {
  func.func @_fused_resconv_kernel(%arg0: i32, %arg1: memref<1x16x16x4xf32, #tpu.memory_space<vmem>>, %arg2: memref<1x16x16x4xf32, #tpu.memory_space<vmem>>, %arg3: memref<1x4xf32, #tpu.memory_space<vmem>>, %arg4: memref<1x4xf32, #tpu.memory_space<vmem>>, %arg5: memref<1x4xf32, #tpu.memory_space<vmem>>, %arg6: memref<1x4xf32, #tpu.memory_space<vmem>>, %arg7: memref<3x3x4x4xf32, #tpu.memory_space<vmem>>, %arg8: memref<3x3x4x4xf32, #tpu.memory_space<vmem>>, %arg9: memref<1x4xf32, #tpu.memory_space<vmem>>, %arg10: memref<1x4xf32, #tpu.memory_space<vmem>>, %arg11: memref<1x4xf32, #tpu.memory_space<vmem>>, %arg12: memref<3x3x4x4xf32, #tpu.memory_space<vmem>>, %arg13: memref<1x4xf32, #tpu.memory_space<vmem>>, %arg14: memref<3x3x4x4xf32, #tpu.memory_space<vmem>>, %arg15: memref<3x3x4x4xf32, #tpu.memory_space<vmem>>, %arg16: memref<1x4xf32, #tpu.memory_space<vmem>>, %arg17: memref<1x16x16x4xf32, #tpu.memory_space<vmem>>, %arg18: memref<18x18x4xf32, #tpu.memory_space<vmem>>, %arg19: memref<18x18x4xf32, #tpu.memory_space<vmem>>, %arg20: memref<18x18x4xf32, #tpu.memory_space<vmem>>, %arg21: memref<256x4xf32, #tpu.memory_space<vmem>>) attributes {dimension_semantics = [#tpu.dimension_semantics<parallel>], iteration_bounds = array<i64: 2>, scalar_prefetch = 0 : i64, scratch_operands = 4 : i64, tpu.core_type = #tpu.core_type<tc>, window_params = [{transform_indices = @transform_0, window_bounds = array<i64: 1, 16, 16, 4>}, {transform_indices = @transform_1, window_bounds = array<i64: 1, 16, 16, 4>}, {pipeline_mode = #tpu.pipeline_mode<synchronous>, transform_indices = @transform_2, window_bounds = array<i64: 1, 4>}, {pipeline_mode = #tpu.pipeline_mode<synchronous>, transform_indices = @transform_3, window_bounds = array<i64: 1, 4>}, {pipeline_mode = #tpu.pipeline_mode<synchronous>, transform_indices = @transform_4, window_bounds = array<i64: 1, 4>}, {pipeline_mode = #tpu.pipeline_mode<synchronous>, transform_indices = @transform_5, window_bounds = array<i64: 1, 4>}, {pipeline_mode = #tpu.pipeline_mode<synchronous>, transform_indices = @transform_6, window_bounds = array<i64: 3, 3, 4, 4>}, {pipeline_mode = #tpu.pipeline_mode<synchronous>, transform_indices = @transform_7, window_bounds = array<i64: 3, 3, 4, 4>}, {pipeline_mode = #tpu.pipeline_mode<synchronous>, transform_indices = @transform_8, window_bounds = array<i64: 1, 4>}, {pipeline_mode = #tpu.pipeline_mode<synchronous>, transform_indices = @transform_9, window_bounds = array<i64: 1, 4>}, {pipeline_mode = #tpu.pipeline_mode<synchronous>, transform_indices = @transform_10, window_bounds = array<i64: 1, 4>}, {pipeline_mode = #tpu.pipeline_mode<synchronous>, transform_indices = @transform_11, window_bounds = array<i64: 3, 3, 4, 4>}, {pipeline_mode = #tpu.pipeline_mode<synchronous>, transform_indices = @transform_12, window_bounds = array<i64: 1, 4>}, {pipeline_mode = #tpu.pipeline_mode<synchronous>, transform_indices = @transform_13, window_bounds = array<i64: 3, 3, 4, 4>}, {pipeline_mode = #tpu.pipeline_mode<synchronous>, transform_indices = @transform_14, window_bounds = array<i64: 3, 3, 4, 4>}, {pipeline_mode = #tpu.pipeline_mode<synchronous>, transform_indices = @transform_15, window_bounds = array<i64: 1, 4>}, {transform_indices = @transform_16, window_bounds = array<i64: 1, 16, 16, 4>}]} {
    %c0 = arith.constant 0 : index
    %c0_0 = arith.constant 0 : index
    %c0_1 = arith.constant 0 : index
    %c0_2 = arith.constant 0 : index
    %0 = vector.load %arg1[%c0, %c0_0, %c0_1, %c0_2] : memref<1x16x16x4xf32, #tpu.memory_space<vmem>>, vector<1x16x16x4xf32>
    %1 = vector.shape_cast %0 : vector<1x16x16x4xf32> to vector<16x16x4xf32>
    %c0_3 = arith.constant 0 : index
    %c0_4 = arith.constant 0 : index
    %c0_5 = arith.constant 0 : index
    %c0_6 = arith.constant 0 : index
    %2 = vector.load %arg2[%c0_3, %c0_4, %c0_5, %c0_6] : memref<1x16x16x4xf32, #tpu.memory_space<vmem>>, vector<1x16x16x4xf32>
    %3 = vector.shape_cast %2 : vector<1x16x16x4xf32> to vector<16x16x4xf32>
    %cst = arith.constant 0.000000e+00 : f32
    %4 = vector.broadcast %cst : f32 to vector<18x18x4xf32>
    %c0_7 = arith.constant 0 : index
    %c0_8 = arith.constant 0 : index
    %c0_9 = arith.constant 0 : index
    %5 = vector.load %arg18[%c0_7, %c0_8, %c0_9] : memref<18x18x4xf32, #tpu.memory_space<vmem>>, vector<18x18x4xf32>
    tpu.vector_store %arg18[%c0_7, %c0_8, %c0_9], %4 {strides = array<i32>} : memref<18x18x4xf32, #tpu.memory_space<vmem>>, vector<18x18x4xf32>,
    %cst_10 = arith.constant 0.000000e+00 : f32
    %6 = vector.broadcast %cst_10 : f32 to vector<18x18x4xf32>
    %c0_11 = arith.constant 0 : index
    %c0_12 = arith.constant 0 : index
    %c0_13 = arith.constant 0 : index
    %7 = vector.load %arg19[%c0_11, %c0_12, %c0_13] : memref<18x18x4xf32, #tpu.memory_space<vmem>>, vector<18x18x4xf32>
    tpu.vector_store %arg19[%c0_11, %c0_12, %c0_13], %6 {strides = array<i32>} : memref<18x18x4xf32, #tpu.memory_space<vmem>>, vector<18x18x4xf32>,
    %cst_14 = arith.constant 0.000000e+00 : f32
    %8 = vector.broadcast %cst_14 : f32 to vector<18x18x4xf32>
    %c0_15 = arith.constant 0 : index
    %c0_16 = arith.constant 0 : index
    %c0_17 = arith.constant 0 : index
    %9 = vector.load %arg20[%c0_15, %c0_16, %c0_17] : memref<18x18x4xf32, #tpu.memory_space<vmem>>, vector<18x18x4xf32>
    tpu.vector_store %arg20[%c0_15, %c0_16, %c0_17], %8 {strides = array<i32>} : memref<18x18x4xf32, #tpu.memory_space<vmem>>, vector<18x18x4xf32>,
    %c1 = arith.constant 1 : index
    %c1_18 = arith.constant 1 : index
    %c0_19 = arith.constant 0 : index
    %10 = vector.load %arg18[%c1, %c1_18, %c0_19] : memref<18x18x4xf32, #tpu.memory_space<vmem>>, vector<16x16x4xf32>
    tpu.vector_store %arg18[%c1, %c1_18, %c0_19], %1 {strides = array<i32>} : memref<18x18x4xf32, #tpu.memory_space<vmem>>, vector<16x16x4xf32>,
    %c1_20 = arith.constant 1 : index
    %c1_21 = arith.constant 1 : index
    %c0_22 = arith.constant 0 : index
    %11 = vector.load %arg19[%c1_20, %c1_21, %c0_22] : memref<18x18x4xf32, #tpu.memory_space<vmem>>, vector<16x16x4xf32>
    tpu.vector_store %arg19[%c1_20, %c1_21, %c0_22], %3 {strides = array<i32>} : memref<18x18x4xf32, #tpu.memory_space<vmem>>, vector<16x16x4xf32>,
    %cst_23 = arith.constant 0.000000e+00 : f32
    %12 = vector.broadcast %cst_23 : f32 to vector<256x4xf32>
    %c0_24 = arith.constant 0 : index
    %c0_25 = arith.constant 0 : index
    %c0_26 = arith.constant 0 : index
    %13 = vector.load %arg18[%c0_24, %c0_25, %c0_26] : memref<18x18x4xf32, #tpu.memory_space<vmem>>, vector<16x16x4xf32>
    %14 = vector.shape_cast %13 : vector<16x16x4xf32> to vector<256x4xf32>
    %c0_27 = arith.constant 0 : index
    %c0_28 = arith.constant 0 : index
    %c0_29 = arith.constant 0 : index
    %c0_30 = arith.constant 0 : index
    %15 = vector.load %arg14[%c0_27, %c0_28, %c0_29, %c0_30] : memref<3x3x4x4xf32, #tpu.memory_space<vmem>>, vector<1x1x4x4xf32>
    %16 = vector.shape_cast %15 : vector<1x1x4x4xf32> to vector<4x4xf32>
    %cst_31 = arith.constant dense<0.000000e+00> : vector<256x4xf32>
    %17 = tpu.matmul %14, %16, %cst_31 {dimension_numbers = #tpu.dot_dimension_numbers<[1], [0], [0], [1], [0, 0, 1, 1], [], []>} : vector<256x4xf32>, vector<4x4xf32>, vector<256x4xf32> -> vector<256x4xf32>
    %18 = arith.addf %12, %17 : vector<256x4xf32>
    %c0_32 = arith.constant 0 : index
    %c1_33 = arith.constant 1 : index
    %c0_34 = arith.constant 0 : index
    %19 = vector.load %arg18[%c0_32, %c1_33, %c0_34] : memref<18x18x4xf32, #tpu.memory_space<vmem>>, vector<16x16x4xf32>
    %20 = vector.shape_cast %19 : vector<16x16x4xf32> to vector<256x4xf32>
    %c0_35 = arith.constant 0 : index
    %c1_36 = arith.constant 1 : index
    %c0_37 = arith.constant 0 : index
    %c0_38 = arith.constant 0 : index
    %21 = vector.load %arg14[%c0_35, %c1_36, %c0_37, %c0_38] : memref<3x3x4x4xf32, #tpu.memory_space<vmem>>, vector<1x1x4x4xf32>
    %22 = vector.shape_cast %21 : vector<1x1x4x4xf32> to vector<4x4xf32>
    %cst_39 = arith.constant dense<0.000000e+00> : vector<256x4xf32>
    %23 = tpu.matmul %20, %22, %cst_39 {dimension_numbers = #tpu.dot_dimension_numbers<[1], [0], [0], [1], [0, 0, 1, 1], [], []>} : vector<256x4xf32>, vector<4x4xf32>, vector<256x4xf32> -> vector<256x4xf32>
    %24 = arith.addf %18, %23 : vector<256x4xf32>
    %c0_40 = arith.constant 0 : index
    %c2 = arith.constant 2 : index
    %c0_41 = arith.constant 0 : index
    %25 = vector.load %arg18[%c0_40, %c2, %c0_41] : memref<18x18x4xf32, #tpu.memory_space<vmem>>, vector<16x16x4xf32>
    %26 = vector.shape_cast %25 : vector<16x16x4xf32> to vector<256x4xf32>
    %c0_42 = arith.constant 0 : index
    %c2_43 = arith.constant 2 : index
    %c0_44 = arith.constant 0 : index
    %c0_45 = arith.constant 0 : index
    %27 = vector.load %arg14[%c0_42, %c2_43, %c0_44, %c0_45] : memref<3x3x4x4xf32, #tpu.memory_space<vmem>>, vector<1x1x4x4xf32>
    %28 = vector.shape_cast %27 : vector<1x1x4x4xf32> to vector<4x4xf32>
    %cst_46 = arith.constant dense<0.000000e+00> : vector<256x4xf32>
    %29 = tpu.matmul %26, %28, %cst_46 {dimension_numbers = #tpu.dot_dimension_numbers<[1], [0], [0], [1], [0, 0, 1, 1], [], []>} : vector<256x4xf32>, vector<4x4xf32>, vector<256x4xf32> -> vector<256x4xf32>
    %30 = arith.addf %24, %29 : vector<256x4xf32>
    %c1_47 = arith.constant 1 : index
    %c0_48 = arith.constant 0 : index
    %c0_49 = arith.constant 0 : index
    %31 = vector.load %arg18[%c1_47, %c0_48, %c0_49] : memref<18x18x4xf32, #tpu.memory_space<vmem>>, vector<16x16x4xf32>
    %32 = vector.shape_cast %31 : vector<16x16x4xf32> to vector<256x4xf32>
    %c1_50 = arith.constant 1 : index
    %c0_51 = arith.constant 0 : index
    %c0_52 = arith.constant 0 : index
    %c0_53 = arith.constant 0 : index
    %33 = vector.load %arg14[%c1_50, %c0_51, %c0_52, %c0_53] : memref<3x3x4x4xf32, #tpu.memory_space<vmem>>, vector<1x1x4x4xf32>
    %34 = vector.shape_cast %33 : vector<1x1x4x4xf32> to vector<4x4xf32>
    %cst_54 = arith.constant dense<0.000000e+00> : vector<256x4xf32>
    %35 = tpu.matmul %32, %34, %cst_54 {dimension_numbers = #tpu.dot_dimension_numbers<[1], [0], [0], [1], [0, 0, 1, 1], [], []>} : vector<256x4xf32>, vector<4x4xf32>, vector<256x4xf32> -> vector<256x4xf32>
    %36 = arith.addf %30, %35 : vector<256x4xf32>
    %c1_55 = arith.constant 1 : index
    %c1_56 = arith.constant 1 : index
    %c0_57 = arith.constant 0 : index
    %37 = vector.load %arg18[%c1_55, %c1_56, %c0_57] : memref<18x18x4xf32, #tpu.memory_space<vmem>>, vector<16x16x4xf32>
    %38 = vector.shape_cast %37 : vector<16x16x4xf32> to vector<256x4xf32>
    %c1_58 = arith.constant 1 : index
    %c1_59 = arith.constant 1 : index
    %c0_60 = arith.constant 0 : index
    %c0_61 = arith.constant 0 : index
    %39 = vector.load %arg14[%c1_58, %c1_59, %c0_60, %c0_61] : memref<3x3x4x4xf32, #tpu.memory_space<vmem>>, vector<1x1x4x4xf32>
    %40 = vector.shape_cast %39 : vector<1x1x4x4xf32> to vector<4x4xf32>
    %cst_62 = arith.constant dense<0.000000e+00> : vector<256x4xf32>
    %41 = tpu.matmul %38, %40, %cst_62 {dimension_numbers = #tpu.dot_dimension_numbers<[1], [0], [0], [1], [0, 0, 1, 1], [], []>} : vector<256x4xf32>, vector<4x4xf32>, vector<256x4xf32> -> vector<256x4xf32>
    %42 = arith.addf %36, %41 : vector<256x4xf32>
    %c1_63 = arith.constant 1 : index
    %c2_64 = arith.constant 2 : index
    %c0_65 = arith.constant 0 : index
    %43 = vector.load %arg18[%c1_63, %c2_64, %c0_65] : memref<18x18x4xf32, #tpu.memory_space<vmem>>, vector<16x16x4xf32>
    %44 = vector.shape_cast %43 : vector<16x16x4xf32> to vector<256x4xf32>
    %c1_66 = arith.constant 1 : index
    %c2_67 = arith.constant 2 : index
    %c0_68 = arith.constant 0 : index
    %c0_69 = arith.constant 0 : index
    %45 = vector.load %arg14[%c1_66, %c2_67, %c0_68, %c0_69] : memref<3x3x4x4xf32, #tpu.memory_space<vmem>>, vector<1x1x4x4xf32>
    %46 = vector.shape_cast %45 : vector<1x1x4x4xf32> to vector<4x4xf32>
    %cst_70 = arith.constant dense<0.000000e+00> : vector<256x4xf32>
    %47 = tpu.matmul %44, %46, %cst_70 {dimension_numbers = #tpu.dot_dimension_numbers<[1], [0], [0], [1], [0, 0, 1, 1], [], []>} : vector<256x4xf32>, vector<4x4xf32>, vector<256x4xf32> -> vector<256x4xf32>
    %48 = arith.addf %42, %47 : vector<256x4xf32>
    %c2_71 = arith.constant 2 : index
    %c0_72 = arith.constant 0 : index
    %c0_73 = arith.constant 0 : index
    %49 = vector.load %arg18[%c2_71, %c0_72, %c0_73] : memref<18x18x4xf32, #tpu.memory_space<vmem>>, vector<16x16x4xf32>
    %50 = vector.shape_cast %49 : vector<16x16x4xf32> to vector<256x4xf32>
    %c2_74 = arith.constant 2 : index
    %c0_75 = arith.constant 0 : index
    %c0_76 = arith.constant 0 : index
    %c0_77 = arith.constant 0 : index
    %51 = vector.load %arg14[%c2_74, %c0_75, %c0_76, %c0_77] : memref<3x3x4x4xf32, #tpu.memory_space<vmem>>, vector<1x1x4x4xf32>
    %52 = vector.shape_cast %51 : vector<1x1x4x4xf32> to vector<4x4xf32>
    %cst_78 = arith.constant dense<0.000000e+00> : vector<256x4xf32>
    %53 = tpu.matmul %50, %52, %cst_78 {dimension_numbers = #tpu.dot_dimension_numbers<[1], [0], [0], [1], [0, 0, 1, 1], [], []>} : vector<256x4xf32>, vector<4x4xf32>, vector<256x4xf32> -> vector<256x4xf32>
    %54 = arith.addf %48, %53 : vector<256x4xf32>
    %c2_79 = arith.constant 2 : index
    %c1_80 = arith.constant 1 : index
    %c0_81 = arith.constant 0 : index
    %55 = vector.load %arg18[%c2_79, %c1_80, %c0_81] : memref<18x18x4xf32, #tpu.memory_space<vmem>>, vector<16x16x4xf32>
    %56 = vector.shape_cast %55 : vector<16x16x4xf32> to vector<256x4xf32>
    %c2_82 = arith.constant 2 : index
    %c1_83 = arith.constant 1 : index
    %c0_84 = arith.constant 0 : index
    %c0_85 = arith.constant 0 : index
    %57 = vector.load %arg14[%c2_82, %c1_83, %c0_84, %c0_85] : memref<3x3x4x4xf32, #tpu.memory_space<vmem>>, vector<1x1x4x4xf32>
    %58 = vector.shape_cast %57 : vector<1x1x4x4xf32> to vector<4x4xf32>
    %cst_86 = arith.constant dense<0.000000e+00> : vector<256x4xf32>
    %59 = tpu.matmul %56, %58, %cst_86 {dimension_numbers = #tpu.dot_dimension_numbers<[1], [0], [0], [1], [0, 0, 1, 1], [], []>} : vector<256x4xf32>, vector<4x4xf32>, vector<256x4xf32> -> vector<256x4xf32>
    %60 = arith.addf %54, %59 : vector<256x4xf32>
    %c2_87 = arith.constant 2 : index
    %c2_88 = arith.constant 2 : index
    %c0_89 = arith.constant 0 : index
    %61 = vector.load %arg18[%c2_87, %c2_88, %c0_89] : memref<18x18x4xf32, #tpu.memory_space<vmem>>, vector<16x16x4xf32>
    %62 = vector.shape_cast %61 : vector<16x16x4xf32> to vector<256x4xf32>
    %c2_90 = arith.constant 2 : index
    %c2_91 = arith.constant 2 : index
    %c0_92 = arith.constant 0 : index
    %c0_93 = arith.constant 0 : index
    %63 = vector.load %arg14[%c2_90, %c2_91, %c0_92, %c0_93] : memref<3x3x4x4xf32, #tpu.memory_space<vmem>>, vector<1x1x4x4xf32>
    %64 = vector.shape_cast %63 : vector<1x1x4x4xf32> to vector<4x4xf32>
    %cst_94 = arith.constant dense<0.000000e+00> : vector<256x4xf32>
    %65 = tpu.matmul %62, %64, %cst_94 {dimension_numbers = #tpu.dot_dimension_numbers<[1], [0], [0], [1], [0, 0, 1, 1], [], []>} : vector<256x4xf32>, vector<4x4xf32>, vector<256x4xf32> -> vector<256x4xf32>
    %66 = arith.addf %60, %65 : vector<256x4xf32>
    %cst_95 = arith.constant 0.000000e+00 : f32
    %67 = vector.broadcast %cst_95 : f32 to vector<256x4xf32>
    %c0_96 = arith.constant 0 : index
    %c0_97 = arith.constant 0 : index
    %c0_98 = arith.constant 0 : index
    %68 = vector.load %arg19[%c0_96, %c0_97, %c0_98] : memref<18x18x4xf32, #tpu.memory_space<vmem>>, vector<16x16x4xf32>
    %69 = vector.shape_cast %68 : vector<16x16x4xf32> to vector<256x4xf32>
    %c0_99 = arith.constant 0 : index
    %c0_100 = arith.constant 0 : index
    %c0_101 = arith.constant 0 : index
    %c0_102 = arith.constant 0 : index
    %70 = vector.load %arg15[%c0_99, %c0_100, %c0_101, %c0_102] : memref<3x3x4x4xf32, #tpu.memory_space<vmem>>, vector<1x1x4x4xf32>
    %71 = vector.shape_cast %70 : vector<1x1x4x4xf32> to vector<4x4xf32>
    %cst_103 = arith.constant dense<0.000000e+00> : vector<256x4xf32>
    %72 = tpu.matmul %69, %71, %cst_103 {dimension_numbers = #tpu.dot_dimension_numbers<[1], [0], [0], [1], [0, 0, 1, 1], [], []>} : vector<256x4xf32>, vector<4x4xf32>, vector<256x4xf32> -> vector<256x4xf32>
    %73 = arith.addf %67, %72 : vector<256x4xf32>
    %c0_104 = arith.constant 0 : index
    %c1_105 = arith.constant 1 : index
    %c0_106 = arith.constant 0 : index
    %74 = vector.load %arg19[%c0_104, %c1_105, %c0_106] : memref<18x18x4xf32, #tpu.memory_space<vmem>>, vector<16x16x4xf32>
    %75 = vector.shape_cast %74 : vector<16x16x4xf32> to vector<256x4xf32>
    %c0_107 = arith.constant 0 : index
    %c1_108 = arith.constant 1 : index
    %c0_109 = arith.constant 0 : index
    %c0_110 = arith.constant 0 : index
    %76 = vector.load %arg15[%c0_107, %c1_108, %c0_109, %c0_110] : memref<3x3x4x4xf32, #tpu.memory_space<vmem>>, vector<1x1x4x4xf32>
    %77 = vector.shape_cast %76 : vector<1x1x4x4xf32> to vector<4x4xf32>
    %cst_111 = arith.constant dense<0.000000e+00> : vector<256x4xf32>
    %78 = tpu.matmul %75, %77, %cst_111 {dimension_numbers = #tpu.dot_dimension_numbers<[1], [0], [0], [1], [0, 0, 1, 1], [], []>} : vector<256x4xf32>, vector<4x4xf32>, vector<256x4xf32> -> vector<256x4xf32>
    %79 = arith.addf %73, %78 : vector<256x4xf32>
    %c0_112 = arith.constant 0 : index
    %c2_113 = arith.constant 2 : index
    %c0_114 = arith.constant 0 : index
    %80 = vector.load %arg19[%c0_112, %c2_113, %c0_114] : memref<18x18x4xf32, #tpu.memory_space<vmem>>, vector<16x16x4xf32>
    %81 = vector.shape_cast %80 : vector<16x16x4xf32> to vector<256x4xf32>
    %c0_115 = arith.constant 0 : index
    %c2_116 = arith.constant 2 : index
    %c0_117 = arith.constant 0 : index
    %c0_118 = arith.constant 0 : index
    %82 = vector.load %arg15[%c0_115, %c2_116, %c0_117, %c0_118] : memref<3x3x4x4xf32, #tpu.memory_space<vmem>>, vector<1x1x4x4xf32>
    %83 = vector.shape_cast %82 : vector<1x1x4x4xf32> to vector<4x4xf32>
    %cst_119 = arith.constant dense<0.000000e+00> : vector<256x4xf32>
    %84 = tpu.matmul %81, %83, %cst_119 {dimension_numbers = #tpu.dot_dimension_numbers<[1], [0], [0], [1], [0, 0, 1, 1], [], []>} : vector<256x4xf32>, vector<4x4xf32>, vector<256x4xf32> -> vector<256x4xf32>
    %85 = arith.addf %79, %84 : vector<256x4xf32>
    %c1_120 = arith.constant 1 : index
    %c0_121 = arith.constant 0 : index
    %c0_122 = arith.constant 0 : index
    %86 = vector.load %arg19[%c1_120, %c0_121, %c0_122] : memref<18x18x4xf32, #tpu.memory_space<vmem>>, vector<16x16x4xf32>
    %87 = vector.shape_cast %86 : vector<16x16x4xf32> to vector<256x4xf32>
    %c1_123 = arith.constant 1 : index
    %c0_124 = arith.constant 0 : index
    %c0_125 = arith.constant 0 : index
    %c0_126 = arith.constant 0 : index
    %88 = vector.load %arg15[%c1_123, %c0_124, %c0_125, %c0_126] : memref<3x3x4x4xf32, #tpu.memory_space<vmem>>, vector<1x1x4x4xf32>
    %89 = vector.shape_cast %88 : vector<1x1x4x4xf32> to vector<4x4xf32>
    %cst_127 = arith.constant dense<0.000000e+00> : vector<256x4xf32>
    %90 = tpu.matmul %87, %89, %cst_127 {dimension_numbers = #tpu.dot_dimension_numbers<[1], [0], [0], [1], [0, 0, 1, 1], [], []>} : vector<256x4xf32>, vector<4x4xf32>, vector<256x4xf32> -> vector<256x4xf32>
    %91 = arith.addf %85, %90 : vector<256x4xf32>
    %c1_128 = arith.constant 1 : index
    %c1_129 = arith.constant 1 : index
    %c0_130 = arith.constant 0 : index
    %92 = vector.load %arg19[%c1_128, %c1_129, %c0_130] : memref<18x18x4xf32, #tpu.memory_space<vmem>>, vector<16x16x4xf32>
    %93 = vector.shape_cast %92 : vector<16x16x4xf32> to vector<256x4xf32>
    %c1_131 = arith.constant 1 : index
    %c1_132 = arith.constant 1 : index
    %c0_133 = arith.constant 0 : index
    %c0_134 = arith.constant 0 : index
    %94 = vector.load %arg15[%c1_131, %c1_132, %c0_133, %c0_134] : memref<3x3x4x4xf32, #tpu.memory_space<vmem>>, vector<1x1x4x4xf32>
    %95 = vector.shape_cast %94 : vector<1x1x4x4xf32> to vector<4x4xf32>
    %cst_135 = arith.constant dense<0.000000e+00> : vector<256x4xf32>
    %96 = tpu.matmul %93, %95, %cst_135 {dimension_numbers = #tpu.dot_dimension_numbers<[1], [0], [0], [1], [0, 0, 1, 1], [], []>} : vector<256x4xf32>, vector<4x4xf32>, vector<256x4xf32> -> vector<256x4xf32>
    %97 = arith.addf %91, %96 : vector<256x4xf32>
    %c1_136 = arith.constant 1 : index
    %c2_137 = arith.constant 2 : index
    %c0_138 = arith.constant 0 : index
    %98 = vector.load %arg19[%c1_136, %c2_137, %c0_138] : memref<18x18x4xf32, #tpu.memory_space<vmem>>, vector<16x16x4xf32>
    %99 = vector.shape_cast %98 : vector<16x16x4xf32> to vector<256x4xf32>
    %c1_139 = arith.constant 1 : index
    %c2_140 = arith.constant 2 : index
    %c0_141 = arith.constant 0 : index
    %c0_142 = arith.constant 0 : index
    %100 = vector.load %arg15[%c1_139, %c2_140, %c0_141, %c0_142] : memref<3x3x4x4xf32, #tpu.memory_space<vmem>>, vector<1x1x4x4xf32>
    %101 = vector.shape_cast %100 : vector<1x1x4x4xf32> to vector<4x4xf32>
    %cst_143 = arith.constant dense<0.000000e+00> : vector<256x4xf32>
    %102 = tpu.matmul %99, %101, %cst_143 {dimension_numbers = #tpu.dot_dimension_numbers<[1], [0], [0], [1], [0, 0, 1, 1], [], []>} : vector<256x4xf32>, vector<4x4xf32>, vector<256x4xf32> -> vector<256x4xf32>
    %103 = arith.addf %97, %102 : vector<256x4xf32>
    %c2_144 = arith.constant 2 : index
    %c0_145 = arith.constant 0 : index
    %c0_146 = arith.constant 0 : index
    %104 = vector.load %arg19[%c2_144, %c0_145, %c0_146] : memref<18x18x4xf32, #tpu.memory_space<vmem>>, vector<16x16x4xf32>
    %105 = vector.shape_cast %104 : vector<16x16x4xf32> to vector<256x4xf32>
    %c2_147 = arith.constant 2 : index
    %c0_148 = arith.constant 0 : index
    %c0_149 = arith.constant 0 : index
    %c0_150 = arith.constant 0 : index
    %106 = vector.load %arg15[%c2_147, %c0_148, %c0_149, %c0_150] : memref<3x3x4x4xf32, #tpu.memory_space<vmem>>, vector<1x1x4x4xf32>
    %107 = vector.shape_cast %106 : vector<1x1x4x4xf32> to vector<4x4xf32>
    %cst_151 = arith.constant dense<0.000000e+00> : vector<256x4xf32>
    %108 = tpu.matmul %105, %107, %cst_151 {dimension_numbers = #tpu.dot_dimension_numbers<[1], [0], [0], [1], [0, 0, 1, 1], [], []>} : vector<256x4xf32>, vector<4x4xf32>, vector<256x4xf32> -> vector<256x4xf32>
    %109 = arith.addf %103, %108 : vector<256x4xf32>
    %c2_152 = arith.constant 2 : index
    %c1_153 = arith.constant 1 : index
    %c0_154 = arith.constant 0 : index
    %110 = vector.load %arg19[%c2_152, %c1_153, %c0_154] : memref<18x18x4xf32, #tpu.memory_space<vmem>>, vector<16x16x4xf32>
    %111 = vector.shape_cast %110 : vector<16x16x4xf32> to vector<256x4xf32>
    %c2_155 = arith.constant 2 : index
    %c1_156 = arith.constant 1 : index
    %c0_157 = arith.constant 0 : index
    %c0_158 = arith.constant 0 : index
    %112 = vector.load %arg15[%c2_155, %c1_156, %c0_157, %c0_158] : memref<3x3x4x4xf32, #tpu.memory_space<vmem>>, vector<1x1x4x4xf32>
    %113 = vector.shape_cast %112 : vector<1x1x4x4xf32> to vector<4x4xf32>
    %cst_159 = arith.constant dense<0.000000e+00> : vector<256x4xf32>
    %114 = tpu.matmul %111, %113, %cst_159 {dimension_numbers = #tpu.dot_dimension_numbers<[1], [0], [0], [1], [0, 0, 1, 1], [], []>} : vector<256x4xf32>, vector<4x4xf32>, vector<256x4xf32> -> vector<256x4xf32>
    %115 = arith.addf %109, %114 : vector<256x4xf32>
    %c2_160 = arith.constant 2 : index
    %c2_161 = arith.constant 2 : index
    %c0_162 = arith.constant 0 : index
    %116 = vector.load %arg19[%c2_160, %c2_161, %c0_162] : memref<18x18x4xf32, #tpu.memory_space<vmem>>, vector<16x16x4xf32>
    %117 = vector.shape_cast %116 : vector<16x16x4xf32> to vector<256x4xf32>
    %c2_163 = arith.constant 2 : index
    %c2_164 = arith.constant 2 : index
    %c0_165 = arith.constant 0 : index
    %c0_166 = arith.constant 0 : index
    %118 = vector.load %arg15[%c2_163, %c2_164, %c0_165, %c0_166] : memref<3x3x4x4xf32, #tpu.memory_space<vmem>>, vector<1x1x4x4xf32>
    %119 = vector.shape_cast %118 : vector<1x1x4x4xf32> to vector<4x4xf32>
    %cst_167 = arith.constant dense<0.000000e+00> : vector<256x4xf32>
    %120 = tpu.matmul %117, %119, %cst_167 {dimension_numbers = #tpu.dot_dimension_numbers<[1], [0], [0], [1], [0, 0, 1, 1], [], []>} : vector<256x4xf32>, vector<4x4xf32>, vector<256x4xf32> -> vector<256x4xf32>
    %121 = arith.addf %115, %120 : vector<256x4xf32>
    %122 = arith.addf %66, %121 : vector<256x4xf32>
    %c0_168 = arith.constant 0 : index
    %c0_169 = arith.constant 0 : index
    %123 = vector.load %arg16[%c0_168, %c0_169] : memref<1x4xf32, #tpu.memory_space<vmem>>, vector<1x4xf32>
    %124 = vector.shape_cast %123 : vector<1x4xf32> to vector<4xf32>
    %125 = vector.shape_cast %124 : vector<4xf32> to vector<1x4xf32>
    %126 = vector.broadcast %125 : vector<1x4xf32> to vector<256x4xf32>
    %127 = arith.addf %122, %126 : vector<256x4xf32>
    %c0_170 = arith.constant 0 : index
    %c0_171 = arith.constant 0 : index
    %128 = vector.load %arg21[%c0_170, %c0_171] : memref<256x4xf32, #tpu.memory_space<vmem>>, vector<256x4xf32>
    tpu.vector_store %arg21[%c0_170, %c0_171], %127 {strides = array<i32>} : memref<256x4xf32, #tpu.memory_space<vmem>>, vector<256x4xf32>,
    %c0_172 = arith.constant 0 : index
    %c0_173 = arith.constant 0 : index
    %129 = vector.load %arg3[%c0_172, %c0_173] : memref<1x4xf32, #tpu.memory_space<vmem>>, vector<1x4xf32>
    %130 = vector.shape_cast %129 : vector<1x4xf32> to vector<4xf32>
    %131 = vector.shape_cast %130 : vector<4xf32> to vector<1x1x4xf32>
    %132 = vector.broadcast %131 : vector<1x1x4xf32> to vector<16x16x4xf32>
    %133 = arith.mulf %1, %132 : vector<16x16x4xf32>
    %c0_174 = arith.constant 0 : index
    %c0_175 = arith.constant 0 : index
    %134 = vector.load %arg4[%c0_174, %c0_175] : memref<1x4xf32, #tpu.memory_space<vmem>>, vector<1x4xf32>
    %135 = vector.shape_cast %134 : vector<1x4xf32> to vector<4xf32>
    %136 = vector.shape_cast %135 : vector<4xf32> to vector<1x1x4xf32>
    %137 = vector.broadcast %136 : vector<1x1x4xf32> to vector<16x16x4xf32>
    %138 = arith.addf %133, %137 : vector<16x16x4xf32>
    %cst_176 = arith.constant 0.000000e+00 : f32
    %139 = vector.broadcast %cst_176 : f32 to vector<16x16x4xf32>
    %140 = arith.maximumf %138, %139 : vector<16x16x4xf32>
    %c1_177 = arith.constant 1 : index
    %c1_178 = arith.constant 1 : index
    %c0_179 = arith.constant 0 : index
    %141 = vector.load %arg18[%c1_177, %c1_178, %c0_179] : memref<18x18x4xf32, #tpu.memory_space<vmem>>, vector<16x16x4xf32>
    tpu.vector_store %arg18[%c1_177, %c1_178, %c0_179], %140 {strides = array<i32>} : memref<18x18x4xf32, #tpu.memory_space<vmem>>, vector<16x16x4xf32>,
    %c0_180 = arith.constant 0 : index
    %c0_181 = arith.constant 0 : index
    %142 = vector.load %arg5[%c0_180, %c0_181] : memref<1x4xf32, #tpu.memory_space<vmem>>, vector<1x4xf32>
    %143 = vector.shape_cast %142 : vector<1x4xf32> to vector<4xf32>
    %144 = vector.shape_cast %143 : vector<4xf32> to vector<1x1x4xf32>
    %145 = vector.broadcast %144 : vector<1x1x4xf32> to vector<16x16x4xf32>
    %146 = arith.mulf %3, %145 : vector<16x16x4xf32>
    %c0_182 = arith.constant 0 : index
    %c0_183 = arith.constant 0 : index
    %147 = vector.load %arg6[%c0_182, %c0_183] : memref<1x4xf32, #tpu.memory_space<vmem>>, vector<1x4xf32>
    %148 = vector.shape_cast %147 : vector<1x4xf32> to vector<4xf32>
    %149 = vector.shape_cast %148 : vector<4xf32> to vector<1x1x4xf32>
    %150 = vector.broadcast %149 : vector<1x1x4xf32> to vector<16x16x4xf32>
    %151 = arith.addf %146, %150 : vector<16x16x4xf32>
    %cst_184 = arith.constant 0.000000e+00 : f32
    %152 = vector.broadcast %cst_184 : f32 to vector<16x16x4xf32>
    %153 = arith.maximumf %151, %152 : vector<16x16x4xf32>
    %c1_185 = arith.constant 1 : index
    %c1_186 = arith.constant 1 : index
    %c0_187 = arith.constant 0 : index
    %154 = vector.load %arg19[%c1_185, %c1_186, %c0_187] : memref<18x18x4xf32, #tpu.memory_space<vmem>>, vector<16x16x4xf32>
    tpu.vector_store %arg19[%c1_185, %c1_186, %c0_187], %153 {strides = array<i32>} : memref<18x18x4xf32, #tpu.memory_space<vmem>>, vector<16x16x4xf32>,
    %cst_188 = arith.constant 0.000000e+00 : f32
    %155 = vector.broadcast %cst_188 : f32 to vector<256x4xf32>
    %c0_189 = arith.constant 0 : index
    %c0_190 = arith.constant 0 : index
    %c0_191 = arith.constant 0 : index
    %156 = vector.load %arg18[%c0_189, %c0_190, %c0_191] : memref<18x18x4xf32, #tpu.memory_space<vmem>>, vector<16x16x4xf32>
    %157 = vector.shape_cast %156 : vector<16x16x4xf32> to vector<256x4xf32>
    %c0_192 = arith.constant 0 : index
    %c0_193 = arith.constant 0 : index
    %c0_194 = arith.constant 0 : index
    %c0_195 = arith.constant 0 : index
    %158 = vector.load %arg7[%c0_192, %c0_193, %c0_194, %c0_195] : memref<3x3x4x4xf32, #tpu.memory_space<vmem>>, vector<1x1x4x4xf32>
    %159 = vector.shape_cast %158 : vector<1x1x4x4xf32> to vector<4x4xf32>
    %cst_196 = arith.constant dense<0.000000e+00> : vector<256x4xf32>
    %160 = tpu.matmul %157, %159, %cst_196 {dimension_numbers = #tpu.dot_dimension_numbers<[1], [0], [0], [1], [0, 0, 1, 1], [], []>} : vector<256x4xf32>, vector<4x4xf32>, vector<256x4xf32> -> vector<256x4xf32>
    %161 = arith.addf %155, %160 : vector<256x4xf32>
    %c0_197 = arith.constant 0 : index
    %c1_198 = arith.constant 1 : index
    %c0_199 = arith.constant 0 : index
    %162 = vector.load %arg18[%c0_197, %c1_198, %c0_199] : memref<18x18x4xf32, #tpu.memory_space<vmem>>, vector<16x16x4xf32>
    %163 = vector.shape_cast %162 : vector<16x16x4xf32> to vector<256x4xf32>
    %c0_200 = arith.constant 0 : index
    %c1_201 = arith.constant 1 : index
    %c0_202 = arith.constant 0 : index
    %c0_203 = arith.constant 0 : index
    %164 = vector.load %arg7[%c0_200, %c1_201, %c0_202, %c0_203] : memref<3x3x4x4xf32, #tpu.memory_space<vmem>>, vector<1x1x4x4xf32>
    %165 = vector.shape_cast %164 : vector<1x1x4x4xf32> to vector<4x4xf32>
    %cst_204 = arith.constant dense<0.000000e+00> : vector<256x4xf32>
    %166 = tpu.matmul %163, %165, %cst_204 {dimension_numbers = #tpu.dot_dimension_numbers<[1], [0], [0], [1], [0, 0, 1, 1], [], []>} : vector<256x4xf32>, vector<4x4xf32>, vector<256x4xf32> -> vector<256x4xf32>
    %167 = arith.addf %161, %166 : vector<256x4xf32>
    %c0_205 = arith.constant 0 : index
    %c2_206 = arith.constant 2 : index
    %c0_207 = arith.constant 0 : index
    %168 = vector.load %arg18[%c0_205, %c2_206, %c0_207] : memref<18x18x4xf32, #tpu.memory_space<vmem>>, vector<16x16x4xf32>
    %169 = vector.shape_cast %168 : vector<16x16x4xf32> to vector<256x4xf32>
    %c0_208 = arith.constant 0 : index
    %c2_209 = arith.constant 2 : index
    %c0_210 = arith.constant 0 : index
    %c0_211 = arith.constant 0 : index
    %170 = vector.load %arg7[%c0_208, %c2_209, %c0_210, %c0_211] : memref<3x3x4x4xf32, #tpu.memory_space<vmem>>, vector<1x1x4x4xf32>
    %171 = vector.shape_cast %170 : vector<1x1x4x4xf32> to vector<4x4xf32>
    %cst_212 = arith.constant dense<0.000000e+00> : vector<256x4xf32>
    %172 = tpu.matmul %169, %171, %cst_212 {dimension_numbers = #tpu.dot_dimension_numbers<[1], [0], [0], [1], [0, 0, 1, 1], [], []>} : vector<256x4xf32>, vector<4x4xf32>, vector<256x4xf32> -> vector<256x4xf32>
    %173 = arith.addf %167, %172 : vector<256x4xf32>
    %c1_213 = arith.constant 1 : index
    %c0_214 = arith.constant 0 : index
    %c0_215 = arith.constant 0 : index
    %174 = vector.load %arg18[%c1_213, %c0_214, %c0_215] : memref<18x18x4xf32, #tpu.memory_space<vmem>>, vector<16x16x4xf32>
    %175 = vector.shape_cast %174 : vector<16x16x4xf32> to vector<256x4xf32>
    %c1_216 = arith.constant 1 : index
    %c0_217 = arith.constant 0 : index
    %c0_218 = arith.constant 0 : index
    %c0_219 = arith.constant 0 : index
    %176 = vector.load %arg7[%c1_216, %c0_217, %c0_218, %c0_219] : memref<3x3x4x4xf32, #tpu.memory_space<vmem>>, vector<1x1x4x4xf32>
    %177 = vector.shape_cast %176 : vector<1x1x4x4xf32> to vector<4x4xf32>
    %cst_220 = arith.constant dense<0.000000e+00> : vector<256x4xf32>
    %178 = tpu.matmul %175, %177, %cst_220 {dimension_numbers = #tpu.dot_dimension_numbers<[1], [0], [0], [1], [0, 0, 1, 1], [], []>} : vector<256x4xf32>, vector<4x4xf32>, vector<256x4xf32> -> vector<256x4xf32>
    %179 = arith.addf %173, %178 : vector<256x4xf32>
    %c1_221 = arith.constant 1 : index
    %c1_222 = arith.constant 1 : index
    %c0_223 = arith.constant 0 : index
    %180 = vector.load %arg18[%c1_221, %c1_222, %c0_223] : memref<18x18x4xf32, #tpu.memory_space<vmem>>, vector<16x16x4xf32>
    %181 = vector.shape_cast %180 : vector<16x16x4xf32> to vector<256x4xf32>
    %c1_224 = arith.constant 1 : index
    %c1_225 = arith.constant 1 : index
    %c0_226 = arith.constant 0 : index
    %c0_227 = arith.constant 0 : index
    %182 = vector.load %arg7[%c1_224, %c1_225, %c0_226, %c0_227] : memref<3x3x4x4xf32, #tpu.memory_space<vmem>>, vector<1x1x4x4xf32>
    %183 = vector.shape_cast %182 : vector<1x1x4x4xf32> to vector<4x4xf32>
    %cst_228 = arith.constant dense<0.000000e+00> : vector<256x4xf32>
    %184 = tpu.matmul %181, %183, %cst_228 {dimension_numbers = #tpu.dot_dimension_numbers<[1], [0], [0], [1], [0, 0, 1, 1], [], []>} : vector<256x4xf32>, vector<4x4xf32>, vector<256x4xf32> -> vector<256x4xf32>
    %185 = arith.addf %179, %184 : vector<256x4xf32>
    %c1_229 = arith.constant 1 : index
    %c2_230 = arith.constant 2 : index
    %c0_231 = arith.constant 0 : index
    %186 = vector.load %arg18[%c1_229, %c2_230, %c0_231] : memref<18x18x4xf32, #tpu.memory_space<vmem>>, vector<16x16x4xf32>
    %187 = vector.shape_cast %186 : vector<16x16x4xf32> to vector<256x4xf32>
    %c1_232 = arith.constant 1 : index
    %c2_233 = arith.constant 2 : index
    %c0_234 = arith.constant 0 : index
    %c0_235 = arith.constant 0 : index
    %188 = vector.load %arg7[%c1_232, %c2_233, %c0_234, %c0_235] : memref<3x3x4x4xf32, #tpu.memory_space<vmem>>, vector<1x1x4x4xf32>
    %189 = vector.shape_cast %188 : vector<1x1x4x4xf32> to vector<4x4xf32>
    %cst_236 = arith.constant dense<0.000000e+00> : vector<256x4xf32>
    %190 = tpu.matmul %187, %189, %cst_236 {dimension_numbers = #tpu.dot_dimension_numbers<[1], [0], [0], [1], [0, 0, 1, 1], [], []>} : vector<256x4xf32>, vector<4x4xf32>, vector<256x4xf32> -> vector<256x4xf32>
    %191 = arith.addf %185, %190 : vector<256x4xf32>
    %c2_237 = arith.constant 2 : index
    %c0_238 = arith.constant 0 : index
    %c0_239 = arith.constant 0 : index
    %192 = vector.load %arg18[%c2_237, %c0_238, %c0_239] : memref<18x18x4xf32, #tpu.memory_space<vmem>>, vector<16x16x4xf32>
    %193 = vector.shape_cast %192 : vector<16x16x4xf32> to vector<256x4xf32>
    %c2_240 = arith.constant 2 : index
    %c0_241 = arith.constant 0 : index
    %c0_242 = arith.constant 0 : index
    %c0_243 = arith.constant 0 : index
    %194 = vector.load %arg7[%c2_240, %c0_241, %c0_242, %c0_243] : memref<3x3x4x4xf32, #tpu.memory_space<vmem>>, vector<1x1x4x4xf32>
    %195 = vector.shape_cast %194 : vector<1x1x4x4xf32> to vector<4x4xf32>
    %cst_244 = arith.constant dense<0.000000e+00> : vector<256x4xf32>
    %196 = tpu.matmul %193, %195, %cst_244 {dimension_numbers = #tpu.dot_dimension_numbers<[1], [0], [0], [1], [0, 0, 1, 1], [], []>} : vector<256x4xf32>, vector<4x4xf32>, vector<256x4xf32> -> vector<256x4xf32>
    %197 = arith.addf %191, %196 : vector<256x4xf32>
    %c2_245 = arith.constant 2 : index
    %c1_246 = arith.constant 1 : index
    %c0_247 = arith.constant 0 : index
    %198 = vector.load %arg18[%c2_245, %c1_246, %c0_247] : memref<18x18x4xf32, #tpu.memory_space<vmem>>, vector<16x16x4xf32>
    %199 = vector.shape_cast %198 : vector<16x16x4xf32> to vector<256x4xf32>
    %c2_248 = arith.constant 2 : index
    %c1_249 = arith.constant 1 : index
    %c0_250 = arith.constant 0 : index
    %c0_251 = arith.constant 0 : index
    %200 = vector.load %arg7[%c2_248, %c1_249, %c0_250, %c0_251] : memref<3x3x4x4xf32, #tpu.memory_space<vmem>>, vector<1x1x4x4xf32>
    %201 = vector.shape_cast %200 : vector<1x1x4x4xf32> to vector<4x4xf32>
    %cst_252 = arith.constant dense<0.000000e+00> : vector<256x4xf32>
    %202 = tpu.matmul %199, %201, %cst_252 {dimension_numbers = #tpu.dot_dimension_numbers<[1], [0], [0], [1], [0, 0, 1, 1], [], []>} : vector<256x4xf32>, vector<4x4xf32>, vector<256x4xf32> -> vector<256x4xf32>
    %203 = arith.addf %197, %202 : vector<256x4xf32>
    %c2_253 = arith.constant 2 : index
    %c2_254 = arith.constant 2 : index
    %c0_255 = arith.constant 0 : index
    %204 = vector.load %arg18[%c2_253, %c2_254, %c0_255] : memref<18x18x4xf32, #tpu.memory_space<vmem>>, vector<16x16x4xf32>
    %205 = vector.shape_cast %204 : vector<16x16x4xf32> to vector<256x4xf32>
    %c2_256 = arith.constant 2 : index
    %c2_257 = arith.constant 2 : index
    %c0_258 = arith.constant 0 : index
    %c0_259 = arith.constant 0 : index
    %206 = vector.load %arg7[%c2_256, %c2_257, %c0_258, %c0_259] : memref<3x3x4x4xf32, #tpu.memory_space<vmem>>, vector<1x1x4x4xf32>
    %207 = vector.shape_cast %206 : vector<1x1x4x4xf32> to vector<4x4xf32>
    %cst_260 = arith.constant dense<0.000000e+00> : vector<256x4xf32>
    %208 = tpu.matmul %205, %207, %cst_260 {dimension_numbers = #tpu.dot_dimension_numbers<[1], [0], [0], [1], [0, 0, 1, 1], [], []>} : vector<256x4xf32>, vector<4x4xf32>, vector<256x4xf32> -> vector<256x4xf32>
    %209 = arith.addf %203, %208 : vector<256x4xf32>
    %cst_261 = arith.constant 0.000000e+00 : f32
    %210 = vector.broadcast %cst_261 : f32 to vector<256x4xf32>
    %c0_262 = arith.constant 0 : index
    %c0_263 = arith.constant 0 : index
    %c0_264 = arith.constant 0 : index
    %211 = vector.load %arg19[%c0_262, %c0_263, %c0_264] : memref<18x18x4xf32, #tpu.memory_space<vmem>>, vector<16x16x4xf32>
    %212 = vector.shape_cast %211 : vector<16x16x4xf32> to vector<256x4xf32>
    %c0_265 = arith.constant 0 : index
    %c0_266 = arith.constant 0 : index
    %c0_267 = arith.constant 0 : index
    %c0_268 = arith.constant 0 : index
    %213 = vector.load %arg8[%c0_265, %c0_266, %c0_267, %c0_268] : memref<3x3x4x4xf32, #tpu.memory_space<vmem>>, vector<1x1x4x4xf32>
    %214 = vector.shape_cast %213 : vector<1x1x4x4xf32> to vector<4x4xf32>
    %cst_269 = arith.constant dense<0.000000e+00> : vector<256x4xf32>
    %215 = tpu.matmul %212, %214, %cst_269 {dimension_numbers = #tpu.dot_dimension_numbers<[1], [0], [0], [1], [0, 0, 1, 1], [], []>} : vector<256x4xf32>, vector<4x4xf32>, vector<256x4xf32> -> vector<256x4xf32>
    %216 = arith.addf %210, %215 : vector<256x4xf32>
    %c0_270 = arith.constant 0 : index
    %c1_271 = arith.constant 1 : index
    %c0_272 = arith.constant 0 : index
    %217 = vector.load %arg19[%c0_270, %c1_271, %c0_272] : memref<18x18x4xf32, #tpu.memory_space<vmem>>, vector<16x16x4xf32>
    %218 = vector.shape_cast %217 : vector<16x16x4xf32> to vector<256x4xf32>
    %c0_273 = arith.constant 0 : index
    %c1_274 = arith.constant 1 : index
    %c0_275 = arith.constant 0 : index
    %c0_276 = arith.constant 0 : index
    %219 = vector.load %arg8[%c0_273, %c1_274, %c0_275, %c0_276] : memref<3x3x4x4xf32, #tpu.memory_space<vmem>>, vector<1x1x4x4xf32>
    %220 = vector.shape_cast %219 : vector<1x1x4x4xf32> to vector<4x4xf32>
    %cst_277 = arith.constant dense<0.000000e+00> : vector<256x4xf32>
    %221 = tpu.matmul %218, %220, %cst_277 {dimension_numbers = #tpu.dot_dimension_numbers<[1], [0], [0], [1], [0, 0, 1, 1], [], []>} : vector<256x4xf32>, vector<4x4xf32>, vector<256x4xf32> -> vector<256x4xf32>
    %222 = arith.addf %216, %221 : vector<256x4xf32>
    %c0_278 = arith.constant 0 : index
    %c2_279 = arith.constant 2 : index
    %c0_280 = arith.constant 0 : index
    %223 = vector.load %arg19[%c0_278, %c2_279, %c0_280] : memref<18x18x4xf32, #tpu.memory_space<vmem>>, vector<16x16x4xf32>
    %224 = vector.shape_cast %223 : vector<16x16x4xf32> to vector<256x4xf32>
    %c0_281 = arith.constant 0 : index
    %c2_282 = arith.constant 2 : index
    %c0_283 = arith.constant 0 : index
    %c0_284 = arith.constant 0 : index
    %225 = vector.load %arg8[%c0_281, %c2_282, %c0_283, %c0_284] : memref<3x3x4x4xf32, #tpu.memory_space<vmem>>, vector<1x1x4x4xf32>
    %226 = vector.shape_cast %225 : vector<1x1x4x4xf32> to vector<4x4xf32>
    %cst_285 = arith.constant dense<0.000000e+00> : vector<256x4xf32>
    %227 = tpu.matmul %224, %226, %cst_285 {dimension_numbers = #tpu.dot_dimension_numbers<[1], [0], [0], [1], [0, 0, 1, 1], [], []>} : vector<256x4xf32>, vector<4x4xf32>, vector<256x4xf32> -> vector<256x4xf32>
    %228 = arith.addf %222, %227 : vector<256x4xf32>
    %c1_286 = arith.constant 1 : index
    %c0_287 = arith.constant 0 : index
    %c0_288 = arith.constant 0 : index
    %229 = vector.load %arg19[%c1_286, %c0_287, %c0_288] : memref<18x18x4xf32, #tpu.memory_space<vmem>>, vector<16x16x4xf32>
    %230 = vector.shape_cast %229 : vector<16x16x4xf32> to vector<256x4xf32>
    %c1_289 = arith.constant 1 : index
    %c0_290 = arith.constant 0 : index
    %c0_291 = arith.constant 0 : index
    %c0_292 = arith.constant 0 : index
    %231 = vector.load %arg8[%c1_289, %c0_290, %c0_291, %c0_292] : memref<3x3x4x4xf32, #tpu.memory_space<vmem>>, vector<1x1x4x4xf32>
    %232 = vector.shape_cast %231 : vector<1x1x4x4xf32> to vector<4x4xf32>
    %cst_293 = arith.constant dense<0.000000e+00> : vector<256x4xf32>
    %233 = tpu.matmul %230, %232, %cst_293 {dimension_numbers = #tpu.dot_dimension_numbers<[1], [0], [0], [1], [0, 0, 1, 1], [], []>} : vector<256x4xf32>, vector<4x4xf32>, vector<256x4xf32> -> vector<256x4xf32>
    %234 = arith.addf %228, %233 : vector<256x4xf32>
    %c1_294 = arith.constant 1 : index
    %c1_295 = arith.constant 1 : index
    %c0_296 = arith.constant 0 : index
    %235 = vector.load %arg19[%c1_294, %c1_295, %c0_296] : memref<18x18x4xf32, #tpu.memory_space<vmem>>, vector<16x16x4xf32>
    %236 = vector.shape_cast %235 : vector<16x16x4xf32> to vector<256x4xf32>
    %c1_297 = arith.constant 1 : index
    %c1_298 = arith.constant 1 : index
    %c0_299 = arith.constant 0 : index
    %c0_300 = arith.constant 0 : index
    %237 = vector.load %arg8[%c1_297, %c1_298, %c0_299, %c0_300] : memref<3x3x4x4xf32, #tpu.memory_space<vmem>>, vector<1x1x4x4xf32>
    %238 = vector.shape_cast %237 : vector<1x1x4x4xf32> to vector<4x4xf32>
    %cst_301 = arith.constant dense<0.000000e+00> : vector<256x4xf32>
    %239 = tpu.matmul %236, %238, %cst_301 {dimension_numbers = #tpu.dot_dimension_numbers<[1], [0], [0], [1], [0, 0, 1, 1], [], []>} : vector<256x4xf32>, vector<4x4xf32>, vector<256x4xf32> -> vector<256x4xf32>
    %240 = arith.addf %234, %239 : vector<256x4xf32>
    %c1_302 = arith.constant 1 : index
    %c2_303 = arith.constant 2 : index
    %c0_304 = arith.constant 0 : index
    %241 = vector.load %arg19[%c1_302, %c2_303, %c0_304] : memref<18x18x4xf32, #tpu.memory_space<vmem>>, vector<16x16x4xf32>
    %242 = vector.shape_cast %241 : vector<16x16x4xf32> to vector<256x4xf32>
    %c1_305 = arith.constant 1 : index
    %c2_306 = arith.constant 2 : index
    %c0_307 = arith.constant 0 : index
    %c0_308 = arith.constant 0 : index
    %243 = vector.load %arg8[%c1_305, %c2_306, %c0_307, %c0_308] : memref<3x3x4x4xf32, #tpu.memory_space<vmem>>, vector<1x1x4x4xf32>
    %244 = vector.shape_cast %243 : vector<1x1x4x4xf32> to vector<4x4xf32>
    %cst_309 = arith.constant dense<0.000000e+00> : vector<256x4xf32>
    %245 = tpu.matmul %242, %244, %cst_309 {dimension_numbers = #tpu.dot_dimension_numbers<[1], [0], [0], [1], [0, 0, 1, 1], [], []>} : vector<256x4xf32>, vector<4x4xf32>, vector<256x4xf32> -> vector<256x4xf32>
    %246 = arith.addf %240, %245 : vector<256x4xf32>
    %c2_310 = arith.constant 2 : index
    %c0_311 = arith.constant 0 : index
    %c0_312 = arith.constant 0 : index
    %247 = vector.load %arg19[%c2_310, %c0_311, %c0_312] : memref<18x18x4xf32, #tpu.memory_space<vmem>>, vector<16x16x4xf32>
    %248 = vector.shape_cast %247 : vector<16x16x4xf32> to vector<256x4xf32>
    %c2_313 = arith.constant 2 : index
    %c0_314 = arith.constant 0 : index
    %c0_315 = arith.constant 0 : index
    %c0_316 = arith.constant 0 : index
    %249 = vector.load %arg8[%c2_313, %c0_314, %c0_315, %c0_316] : memref<3x3x4x4xf32, #tpu.memory_space<vmem>>, vector<1x1x4x4xf32>
    %250 = vector.shape_cast %249 : vector<1x1x4x4xf32> to vector<4x4xf32>
    %cst_317 = arith.constant dense<0.000000e+00> : vector<256x4xf32>
    %251 = tpu.matmul %248, %250, %cst_317 {dimension_numbers = #tpu.dot_dimension_numbers<[1], [0], [0], [1], [0, 0, 1, 1], [], []>} : vector<256x4xf32>, vector<4x4xf32>, vector<256x4xf32> -> vector<256x4xf32>
    %252 = arith.addf %246, %251 : vector<256x4xf32>
    %c2_318 = arith.constant 2 : index
    %c1_319 = arith.constant 1 : index
    %c0_320 = arith.constant 0 : index
    %253 = vector.load %arg19[%c2_318, %c1_319, %c0_320] : memref<18x18x4xf32, #tpu.memory_space<vmem>>, vector<16x16x4xf32>
    %254 = vector.shape_cast %253 : vector<16x16x4xf32> to vector<256x4xf32>
    %c2_321 = arith.constant 2 : index
    %c1_322 = arith.constant 1 : index
    %c0_323 = arith.constant 0 : index
    %c0_324 = arith.constant 0 : index
    %255 = vector.load %arg8[%c2_321, %c1_322, %c0_323, %c0_324] : memref<3x3x4x4xf32, #tpu.memory_space<vmem>>, vector<1x1x4x4xf32>
    %256 = vector.shape_cast %255 : vector<1x1x4x4xf32> to vector<4x4xf32>
    %cst_325 = arith.constant dense<0.000000e+00> : vector<256x4xf32>
    %257 = tpu.matmul %254, %256, %cst_325 {dimension_numbers = #tpu.dot_dimension_numbers<[1], [0], [0], [1], [0, 0, 1, 1], [], []>} : vector<256x4xf32>, vector<4x4xf32>, vector<256x4xf32> -> vector<256x4xf32>
    %258 = arith.addf %252, %257 : vector<256x4xf32>
    %c2_326 = arith.constant 2 : index
    %c2_327 = arith.constant 2 : index
    %c0_328 = arith.constant 0 : index
    %259 = vector.load %arg19[%c2_326, %c2_327, %c0_328] : memref<18x18x4xf32, #tpu.memory_space<vmem>>, vector<16x16x4xf32>
    %260 = vector.shape_cast %259 : vector<16x16x4xf32> to vector<256x4xf32>
    %c2_329 = arith.constant 2 : index
    %c2_330 = arith.constant 2 : index
    %c0_331 = arith.constant 0 : index
    %c0_332 = arith.constant 0 : index
    %261 = vector.load %arg8[%c2_329, %c2_330, %c0_331, %c0_332] : memref<3x3x4x4xf32, #tpu.memory_space<vmem>>, vector<1x1x4x4xf32>
    %262 = vector.shape_cast %261 : vector<1x1x4x4xf32> to vector<4x4xf32>
    %cst_333 = arith.constant dense<0.000000e+00> : vector<256x4xf32>
    %263 = tpu.matmul %260, %262, %cst_333 {dimension_numbers = #tpu.dot_dimension_numbers<[1], [0], [0], [1], [0, 0, 1, 1], [], []>} : vector<256x4xf32>, vector<4x4xf32>, vector<256x4xf32> -> vector<256x4xf32>
    %264 = arith.addf %258, %263 : vector<256x4xf32>
    %265 = arith.addf %209, %264 : vector<256x4xf32>
    %c0_334 = arith.constant 0 : index
    %c0_335 = arith.constant 0 : index
    %266 = vector.load %arg9[%c0_334, %c0_335] : memref<1x4xf32, #tpu.memory_space<vmem>>, vector<1x4xf32>
    %267 = vector.shape_cast %266 : vector<1x4xf32> to vector<4xf32>
    %268 = vector.shape_cast %267 : vector<4xf32> to vector<1x4xf32>
    %269 = vector.broadcast %268 : vector<1x4xf32> to vector<256x4xf32>
    %270 = arith.addf %265, %269 : vector<256x4xf32>
    %c0_336 = arith.constant 0 : index
    %c0_337 = arith.constant 0 : index
    %271 = vector.load %arg10[%c0_336, %c0_337] : memref<1x4xf32, #tpu.memory_space<vmem>>, vector<1x4xf32>
    %272 = vector.shape_cast %271 : vector<1x4xf32> to vector<4xf32>
    %273 = vector.shape_cast %272 : vector<4xf32> to vector<1x4xf32>
    %274 = vector.broadcast %273 : vector<1x4xf32> to vector<256x4xf32>
    %275 = arith.mulf %270, %274 : vector<256x4xf32>
    %c0_338 = arith.constant 0 : index
    %c0_339 = arith.constant 0 : index
    %276 = vector.load %arg11[%c0_338, %c0_339] : memref<1x4xf32, #tpu.memory_space<vmem>>, vector<1x4xf32>
    %277 = vector.shape_cast %276 : vector<1x4xf32> to vector<4xf32>
    %278 = vector.shape_cast %277 : vector<4xf32> to vector<1x4xf32>
    %279 = vector.broadcast %278 : vector<1x4xf32> to vector<256x4xf32>
    %280 = arith.addf %275, %279 : vector<256x4xf32>
    %cst_340 = arith.constant 0.000000e+00 : f32
    %281 = vector.broadcast %cst_340 : f32 to vector<256x4xf32>
    %282 = arith.maximumf %280, %281 : vector<256x4xf32>
    %283 = vector.shape_cast %282 : vector<256x4xf32> to vector<16x16x4xf32>
    %c1_341 = arith.constant 1 : index
    %c1_342 = arith.constant 1 : index
    %c0_343 = arith.constant 0 : index
    %284 = vector.load %arg20[%c1_341, %c1_342, %c0_343] : memref<18x18x4xf32, #tpu.memory_space<vmem>>, vector<16x16x4xf32>
    tpu.vector_store %arg20[%c1_341, %c1_342, %c0_343], %283 {strides = array<i32>} : memref<18x18x4xf32, #tpu.memory_space<vmem>>, vector<16x16x4xf32>,
    %cst_344 = arith.constant 0.000000e+00 : f32
    %285 = vector.broadcast %cst_344 : f32 to vector<256x4xf32>
    %c0_345 = arith.constant 0 : index
    %c0_346 = arith.constant 0 : index
    %c0_347 = arith.constant 0 : index
    %286 = vector.load %arg20[%c0_345, %c0_346, %c0_347] : memref<18x18x4xf32, #tpu.memory_space<vmem>>, vector<16x16x4xf32>
    %287 = vector.shape_cast %286 : vector<16x16x4xf32> to vector<256x4xf32>
    %c0_348 = arith.constant 0 : index
    %c0_349 = arith.constant 0 : index
    %c0_350 = arith.constant 0 : index
    %c0_351 = arith.constant 0 : index
    %288 = vector.load %arg12[%c0_348, %c0_349, %c0_350, %c0_351] : memref<3x3x4x4xf32, #tpu.memory_space<vmem>>, vector<1x1x4x4xf32>
    %289 = vector.shape_cast %288 : vector<1x1x4x4xf32> to vector<4x4xf32>
    %cst_352 = arith.constant dense<0.000000e+00> : vector<256x4xf32>
    %290 = tpu.matmul %287, %289, %cst_352 {dimension_numbers = #tpu.dot_dimension_numbers<[1], [0], [0], [1], [0, 0, 1, 1], [], []>} : vector<256x4xf32>, vector<4x4xf32>, vector<256x4xf32> -> vector<256x4xf32>
    %291 = arith.addf %285, %290 : vector<256x4xf32>
    %c0_353 = arith.constant 0 : index
    %c1_354 = arith.constant 1 : index
    %c0_355 = arith.constant 0 : index
    %292 = vector.load %arg20[%c0_353, %c1_354, %c0_355] : memref<18x18x4xf32, #tpu.memory_space<vmem>>, vector<16x16x4xf32>
    %293 = vector.shape_cast %292 : vector<16x16x4xf32> to vector<256x4xf32>
    %c0_356 = arith.constant 0 : index
    %c1_357 = arith.constant 1 : index
    %c0_358 = arith.constant 0 : index
    %c0_359 = arith.constant 0 : index
    %294 = vector.load %arg12[%c0_356, %c1_357, %c0_358, %c0_359] : memref<3x3x4x4xf32, #tpu.memory_space<vmem>>, vector<1x1x4x4xf32>
    %295 = vector.shape_cast %294 : vector<1x1x4x4xf32> to vector<4x4xf32>
    %cst_360 = arith.constant dense<0.000000e+00> : vector<256x4xf32>
    %296 = tpu.matmul %293, %295, %cst_360 {dimension_numbers = #tpu.dot_dimension_numbers<[1], [0], [0], [1], [0, 0, 1, 1], [], []>} : vector<256x4xf32>, vector<4x4xf32>, vector<256x4xf32> -> vector<256x4xf32>
    %297 = arith.addf %291, %296 : vector<256x4xf32>
    %c0_361 = arith.constant 0 : index
    %c2_362 = arith.constant 2 : index
    %c0_363 = arith.constant 0 : index
    %298 = vector.load %arg20[%c0_361, %c2_362, %c0_363] : memref<18x18x4xf32, #tpu.memory_space<vmem>>, vector<16x16x4xf32>
    %299 = vector.shape_cast %298 : vector<16x16x4xf32> to vector<256x4xf32>
    %c0_364 = arith.constant 0 : index
    %c2_365 = arith.constant 2 : index
    %c0_366 = arith.constant 0 : index
    %c0_367 = arith.constant 0 : index
    %300 = vector.load %arg12[%c0_364, %c2_365, %c0_366, %c0_367] : memref<3x3x4x4xf32, #tpu.memory_space<vmem>>, vector<1x1x4x4xf32>
    %301 = vector.shape_cast %300 : vector<1x1x4x4xf32> to vector<4x4xf32>
    %cst_368 = arith.constant dense<0.000000e+00> : vector<256x4xf32>
    %302 = tpu.matmul %299, %301, %cst_368 {dimension_numbers = #tpu.dot_dimension_numbers<[1], [0], [0], [1], [0, 0, 1, 1], [], []>} : vector<256x4xf32>, vector<4x4xf32>, vector<256x4xf32> -> vector<256x4xf32>
    %303 = arith.addf %297, %302 : vector<256x4xf32>
    %c1_369 = arith.constant 1 : index
    %c0_370 = arith.constant 0 : index
    %c0_371 = arith.constant 0 : index
    %304 = vector.load %arg20[%c1_369, %c0_370, %c0_371] : memref<18x18x4xf32, #tpu.memory_space<vmem>>, vector<16x16x4xf32>
    %305 = vector.shape_cast %304 : vector<16x16x4xf32> to vector<256x4xf32>
    %c1_372 = arith.constant 1 : index
    %c0_373 = arith.constant 0 : index
    %c0_374 = arith.constant 0 : index
    %c0_375 = arith.constant 0 : index
    %306 = vector.load %arg12[%c1_372, %c0_373, %c0_374, %c0_375] : memref<3x3x4x4xf32, #tpu.memory_space<vmem>>, vector<1x1x4x4xf32>
    %307 = vector.shape_cast %306 : vector<1x1x4x4xf32> to vector<4x4xf32>
    %cst_376 = arith.constant dense<0.000000e+00> : vector<256x4xf32>
    %308 = tpu.matmul %305, %307, %cst_376 {dimension_numbers = #tpu.dot_dimension_numbers<[1], [0], [0], [1], [0, 0, 1, 1], [], []>} : vector<256x4xf32>, vector<4x4xf32>, vector<256x4xf32> -> vector<256x4xf32>
    %309 = arith.addf %303, %308 : vector<256x4xf32>
    %c1_377 = arith.constant 1 : index
    %c1_378 = arith.constant 1 : index
    %c0_379 = arith.constant 0 : index
    %310 = vector.load %arg20[%c1_377, %c1_378, %c0_379] : memref<18x18x4xf32, #tpu.memory_space<vmem>>, vector<16x16x4xf32>
    %311 = vector.shape_cast %310 : vector<16x16x4xf32> to vector<256x4xf32>
    %c1_380 = arith.constant 1 : index
    %c1_381 = arith.constant 1 : index
    %c0_382 = arith.constant 0 : index
    %c0_383 = arith.constant 0 : index
    %312 = vector.load %arg12[%c1_380, %c1_381, %c0_382, %c0_383] : memref<3x3x4x4xf32, #tpu.memory_space<vmem>>, vector<1x1x4x4xf32>
    %313 = vector.shape_cast %312 : vector<1x1x4x4xf32> to vector<4x4xf32>
    %cst_384 = arith.constant dense<0.000000e+00> : vector<256x4xf32>
    %314 = tpu.matmul %311, %313, %cst_384 {dimension_numbers = #tpu.dot_dimension_numbers<[1], [0], [0], [1], [0, 0, 1, 1], [], []>} : vector<256x4xf32>, vector<4x4xf32>, vector<256x4xf32> -> vector<256x4xf32>
    %315 = arith.addf %309, %314 : vector<256x4xf32>
    %c1_385 = arith.constant 1 : index
    %c2_386 = arith.constant 2 : index
    %c0_387 = arith.constant 0 : index
    %316 = vector.load %arg20[%c1_385, %c2_386, %c0_387] : memref<18x18x4xf32, #tpu.memory_space<vmem>>, vector<16x16x4xf32>
    %317 = vector.shape_cast %316 : vector<16x16x4xf32> to vector<256x4xf32>
    %c1_388 = arith.constant 1 : index
    %c2_389 = arith.constant 2 : index
    %c0_390 = arith.constant 0 : index
    %c0_391 = arith.constant 0 : index
    %318 = vector.load %arg12[%c1_388, %c2_389, %c0_390, %c0_391] : memref<3x3x4x4xf32, #tpu.memory_space<vmem>>, vector<1x1x4x4xf32>
    %319 = vector.shape_cast %318 : vector<1x1x4x4xf32> to vector<4x4xf32>
    %cst_392 = arith.constant dense<0.000000e+00> : vector<256x4xf32>
    %320 = tpu.matmul %317, %319, %cst_392 {dimension_numbers = #tpu.dot_dimension_numbers<[1], [0], [0], [1], [0, 0, 1, 1], [], []>} : vector<256x4xf32>, vector<4x4xf32>, vector<256x4xf32> -> vector<256x4xf32>
    %321 = arith.addf %315, %320 : vector<256x4xf32>
    %c2_393 = arith.constant 2 : index
    %c0_394 = arith.constant 0 : index
    %c0_395 = arith.constant 0 : index
    %322 = vector.load %arg20[%c2_393, %c0_394, %c0_395] : memref<18x18x4xf32, #tpu.memory_space<vmem>>, vector<16x16x4xf32>
    %323 = vector.shape_cast %322 : vector<16x16x4xf32> to vector<256x4xf32>
    %c2_396 = arith.constant 2 : index
    %c0_397 = arith.constant 0 : index
    %c0_398 = arith.constant 0 : index
    %c0_399 = arith.constant 0 : index
    %324 = vector.load %arg12[%c2_396, %c0_397, %c0_398, %c0_399] : memref<3x3x4x4xf32, #tpu.memory_space<vmem>>, vector<1x1x4x4xf32>
    %325 = vector.shape_cast %324 : vector<1x1x4x4xf32> to vector<4x4xf32>
    %cst_400 = arith.constant dense<0.000000e+00> : vector<256x4xf32>
    %326 = tpu.matmul %323, %325, %cst_400 {dimension_numbers = #tpu.dot_dimension_numbers<[1], [0], [0], [1], [0, 0, 1, 1], [], []>} : vector<256x4xf32>, vector<4x4xf32>, vector<256x4xf32> -> vector<256x4xf32>
    %327 = arith.addf %321, %326 : vector<256x4xf32>
    %c2_401 = arith.constant 2 : index
    %c1_402 = arith.constant 1 : index
    %c0_403 = arith.constant 0 : index
    %328 = vector.load %arg20[%c2_401, %c1_402, %c0_403] : memref<18x18x4xf32, #tpu.memory_space<vmem>>, vector<16x16x4xf32>
    %329 = vector.shape_cast %328 : vector<16x16x4xf32> to vector<256x4xf32>
    %c2_404 = arith.constant 2 : index
    %c1_405 = arith.constant 1 : index
    %c0_406 = arith.constant 0 : index
    %c0_407 = arith.constant 0 : index
    %330 = vector.load %arg12[%c2_404, %c1_405, %c0_406, %c0_407] : memref<3x3x4x4xf32, #tpu.memory_space<vmem>>, vector<1x1x4x4xf32>
    %331 = vector.shape_cast %330 : vector<1x1x4x4xf32> to vector<4x4xf32>
    %cst_408 = arith.constant dense<0.000000e+00> : vector<256x4xf32>
    %332 = tpu.matmul %329, %331, %cst_408 {dimension_numbers = #tpu.dot_dimension_numbers<[1], [0], [0], [1], [0, 0, 1, 1], [], []>} : vector<256x4xf32>, vector<4x4xf32>, vector<256x4xf32> -> vector<256x4xf32>
    %333 = arith.addf %327, %332 : vector<256x4xf32>
    %c2_409 = arith.constant 2 : index
    %c2_410 = arith.constant 2 : index
    %c0_411 = arith.constant 0 : index
    %334 = vector.load %arg20[%c2_409, %c2_410, %c0_411] : memref<18x18x4xf32, #tpu.memory_space<vmem>>, vector<16x16x4xf32>
    %335 = vector.shape_cast %334 : vector<16x16x4xf32> to vector<256x4xf32>
    %c2_412 = arith.constant 2 : index
    %c2_413 = arith.constant 2 : index
    %c0_414 = arith.constant 0 : index
    %c0_415 = arith.constant 0 : index
    %336 = vector.load %arg12[%c2_412, %c2_413, %c0_414, %c0_415] : memref<3x3x4x4xf32, #tpu.memory_space<vmem>>, vector<1x1x4x4xf32>
    %337 = vector.shape_cast %336 : vector<1x1x4x4xf32> to vector<4x4xf32>
    %cst_416 = arith.constant dense<0.000000e+00> : vector<256x4xf32>
    %338 = tpu.matmul %335, %337, %cst_416 {dimension_numbers = #tpu.dot_dimension_numbers<[1], [0], [0], [1], [0, 0, 1, 1], [], []>} : vector<256x4xf32>, vector<4x4xf32>, vector<256x4xf32> -> vector<256x4xf32>
    %339 = arith.addf %333, %338 : vector<256x4xf32>
    %c0_417 = arith.constant 0 : index
    %c0_418 = arith.constant 0 : index
    %340 = vector.load %arg13[%c0_417, %c0_418] : memref<1x4xf32, #tpu.memory_space<vmem>>, vector<1x4xf32>
    %341 = vector.shape_cast %340 : vector<1x4xf32> to vector<4xf32>
    %342 = vector.shape_cast %341 : vector<4xf32> to vector<1x4xf32>
    %343 = vector.broadcast %342 : vector<1x4xf32> to vector<256x4xf32>
    %344 = arith.addf %339, %343 : vector<256x4xf32>
    %c0_419 = arith.constant 0 : index
    %c0_420 = arith.constant 0 : index
    %345 = vector.load %arg21[%c0_419, %c0_420] : memref<256x4xf32, #tpu.memory_space<vmem>>, vector<256x4xf32>
    %346 = arith.addf %344, %345 : vector<256x4xf32>
    %347 = vector.shape_cast %346 : vector<256x4xf32> to vector<16x16x4xf32>
    %c0_421 = arith.constant 0 : index
    %c0_422 = arith.constant 0 : index
    %c0_423 = arith.constant 0 : index
    %c0_424 = arith.constant 0 : index
    %348 = vector.load %arg17[%c0_421, %c0_422, %c0_423, %c0_424] : memref<1x16x16x4xf32, #tpu.memory_space<vmem>>, vector<1x16x16x4xf32>
    %349 = vector.shape_cast %348 : vector<1x16x16x4xf32> to vector<16x16x4xf32>
    %350 = vector.shape_cast %347 : vector<16x16x4xf32> to vector<1x16x16x4xf32>
    tpu.vector_store %arg17[%c0_421, %c0_422, %c0_423, %c0_424], %350 {strides = array<i32>} : memref<1x16x16x4xf32, #tpu.memory_space<vmem>>, vector<1x16x16x4xf32>,
    return
  }
  func.func @transform_0(%arg0: i32) -> (i32, i32, i32, i32) {
    %c0_i32 = arith.constant 0 : i32
    %c0_i32_0 = arith.constant 0 : i32
    %c0_i32_1 = arith.constant 0 : i32
    %c0_i32_2 = arith.constant 0 : i32
    return %arg0, %c0_i32, %c0_i32_0, %c0_i32_1 : i32, i32, i32, i32
  }
  func.func @transform_1(%arg0: i32) -> (i32, i32, i32, i32) {
    %c0_i32 = arith.constant 0 : i32
    %c0_i32_0 = arith.constant 0 : i32
    %c0_i32_1 = arith.constant 0 : i32
    %c0_i32_2 = arith.constant 0 : i32
    return %arg0, %c0_i32, %c0_i32_0, %c0_i32_1 : i32, i32, i32, i32
  }
  func.func @transform_2(%arg0: i32) -> (i32, i32) {
    %c0_i32 = arith.constant 0 : i32
    %c0_i32_0 = arith.constant 0 : i32
    %c0_i32_1 = arith.constant 0 : i32
    return %c0_i32, %c0_i32_0 : i32, i32
  }
  func.func @transform_3(%arg0: i32) -> (i32, i32) {
    %c0_i32 = arith.constant 0 : i32
    %c0_i32_0 = arith.constant 0 : i32
    %c0_i32_1 = arith.constant 0 : i32
    return %c0_i32, %c0_i32_0 : i32, i32
  }
  func.func @transform_4(%arg0: i32) -> (i32, i32) {
    %c0_i32 = arith.constant 0 : i32
    %c0_i32_0 = arith.constant 0 : i32
    %c0_i32_1 = arith.constant 0 : i32
    return %c0_i32, %c0_i32_0 : i32, i32
  }
  func.func @transform_5(%arg0: i32) -> (i32, i32) {
    %c0_i32 = arith.constant 0 : i32
    %c0_i32_0 = arith.constant 0 : i32
    %c0_i32_1 = arith.constant 0 : i32
    return %c0_i32, %c0_i32_0 : i32, i32
  }
  func.func @transform_6(%arg0: i32) -> (i32, i32, i32, i32) {
    %c0_i32 = arith.constant 0 : i32
    %c0_i32_0 = arith.constant 0 : i32
    %c0_i32_1 = arith.constant 0 : i32
    %c0_i32_2 = arith.constant 0 : i32
    %c0_i32_3 = arith.constant 0 : i32
    return %c0_i32, %c0_i32_0, %c0_i32_1, %c0_i32_2 : i32, i32, i32, i32
  }
  func.func @transform_7(%arg0: i32) -> (i32, i32, i32, i32) {
    %c0_i32 = arith.constant 0 : i32
    %c0_i32_0 = arith.constant 0 : i32
    %c0_i32_1 = arith.constant 0 : i32
    %c0_i32_2 = arith.constant 0 : i32
    %c0_i32_3 = arith.constant 0 : i32
    return %c0_i32, %c0_i32_0, %c0_i32_1, %c0_i32_2 : i32, i32, i32, i32
  }
  func.func @transform_8(%arg0: i32) -> (i32, i32) {
    %c0_i32 = arith.constant 0 : i32
    %c0_i32_0 = arith.constant 0 : i32
    %c0_i32_1 = arith.constant 0 : i32
    return %c0_i32, %c0_i32_0 : i32, i32
  }
  func.func @transform_9(%arg0: i32) -> (i32, i32) {
    %c0_i32 = arith.constant 0 : i32
    %c0_i32_0 = arith.constant 0 : i32
    %c0_i32_1 = arith.constant 0 : i32
    return %c0_i32, %c0_i32_0 : i32, i32
  }
  func.func @transform_10(%arg0: i32) -> (i32, i32) {
    %c0_i32 = arith.constant 0 : i32
    %c0_i32_0 = arith.constant 0 : i32
    %c0_i32_1 = arith.constant 0 : i32
    return %c0_i32, %c0_i32_0 : i32, i32
  }
  func.func @transform_11(%arg0: i32) -> (i32, i32, i32, i32) {
    %c0_i32 = arith.constant 0 : i32
    %c0_i32_0 = arith.constant 0 : i32
    %c0_i32_1 = arith.constant 0 : i32
    %c0_i32_2 = arith.constant 0 : i32
    %c0_i32_3 = arith.constant 0 : i32
    return %c0_i32, %c0_i32_0, %c0_i32_1, %c0_i32_2 : i32, i32, i32, i32
  }
  func.func @transform_12(%arg0: i32) -> (i32, i32) {
    %c0_i32 = arith.constant 0 : i32
    %c0_i32_0 = arith.constant 0 : i32
    %c0_i32_1 = arith.constant 0 : i32
    return %c0_i32, %c0_i32_0 : i32, i32
  }
  func.func @transform_13(%arg0: i32) -> (i32, i32, i32, i32) {
    %c0_i32 = arith.constant 0 : i32
    %c0_i32_0 = arith.constant 0 : i32
    %c0_i32_1 = arith.constant 0 : i32
    %c0_i32_2 = arith.constant 0 : i32
    %c0_i32_3 = arith.constant 0 : i32
    return %c0_i32, %c0_i32_0, %c0_i32_1, %c0_i32_2 : i32, i32, i32, i32
  }
  func.func @transform_14(%arg0: i32) -> (i32, i32, i32, i32) {
    %c0_i32 = arith.constant 0 : i32
    %c0_i32_0 = arith.constant 0 : i32
    %c0_i32_1 = arith.constant 0 : i32
    %c0_i32_2 = arith.constant 0 : i32
    %c0_i32_3 = arith.constant 0 : i32
    return %c0_i32, %c0_i32_0, %c0_i32_1, %c0_i32_2 : i32, i32, i32, i32
  }
  func.func @transform_15(%arg0: i32) -> (i32, i32) {
    %c0_i32 = arith.constant 0 : i32
    %c0_i32_0 = arith.constant 0 : i32
    %c0_i32_1 = arith.constant 0 : i32
    return %c0_i32, %c0_i32_0 : i32, i32
  }
  func.func @transform_16(%arg0: i32) -> (i32, i32, i32, i32) {
    %c0_i32 = arith.constant 0 : i32
    %c0_i32_0 = arith.constant 0 : i32
    %c0_i32_1 = arith.constant 0 : i32
    %c0_i32_2 = arith.constant 0 : i32
    return %arg0, %c0_i32, %c0_i32_0, %c0_i32_1 : i32, i32, i32, i32
  }
}

</mosaic_0001>

<bundles_post_ra>
// kernel: tile.8
= control target key start
LH: loop header
LB: loop body
LE: loop exit
PB: predicated region body
PF: predicated region fallthrough
CT: control target
= control target key end

     0   :  { %s22_s0 = inlined_call_operand.vmem [shape: f32[4], index: 0, kind: input, shape index: {}]   ;;  %s23_s1 = inlined_call_operand.vmem [shape: f32[4,4], index: 1, kind: output, shape index: {}]  }
   0x1   :  { %v4_v0 = vld [vmem:[%s22_s0] ss:$0 sm:$0xff] }
   0x2   :  { %5 = vst [vmem:[%s23_s1] sm:$0xf] %v4_v0 }

// kernel: tile.9
= control target key start
LH: loop header
LB: loop body
LE: loop exit
PB: predicated region body
PF: predicated region fallthrough
CT: control target
= control target key end

     0   :  { %vm7_vm0 = vcmask 31744   ;;  %s37_s8 = smov 4   ;;  %s38_s9 = smov 8   ;;  %vm13_vm1 = vcmask 130144   ;;  %vm19_vm2 = vcmask 97344   ;;  %vm25_vm3 = vcmask 64544   ;;  %s55_s0 = inlined_call_operand.vmem [shape: f32[4,4], index: 0, kind: input, shape index: {}]   ;;  %s56_s1 = inlined_call_operand.vmem [shape: f32[1,16], index: 1, kind: output, shape index: {}]  }
   0x1   :  { %v4_v0 = vld [vmem:[%s55_s0] sm:$0xf]  ;;  %s36_s0 = smov 12  }
   0x2   :  { %5 = vst [vmem:[#allocation1] sm:$0xf] %v4_v0 }
   0x9   :  { %v10_v1 = vld [vmem:[#allocation1 + $0x3] sm:$0x1]   ;;  %v22_v2 = vld [vmem:[#allocation1 + $0x1] sm:$0x1]   ;;  %v6_v3 = vld [vmem:[#allocation1] sm:$0x1]  }
   0xa   :  { %11 = vrot.lane.b32.xlu0 %v10_v1, %s36_s0  ;;  %23 = vrot.lane.b32.xlu1 %v22_v2, %s37_s8  ;;  %v16_v4 = vld [vmem:[#allocation1 + $0x2] sm:$0x1]   ;;  %8 = vst.msk [vmem:[#allocation0] sm:$0x1] %vm7_vm0, %v6_v3  }
   0xe   :  { %17 = vrot.lane.b32.xlu0 %v16_v4, %s38_s9 }
  0x7c   :  { %v12_v5 = vpop.permute.xlu0 %11   ;;  %v24_v6 = vpop.permute.xlu1 %23  }
  0x7d   :  { %14 = vst.msk [vmem:[#allocation0] sm:$0x1] %vm13_vm1, %v12_v5  }
  0x80   :  { %v18_v7 = vpop.permute.xlu0 %17  }
  0x81   :  { %20 = vst.msk [vmem:[#allocation0] sm:$0x1] %vm19_vm2, %v18_v7  }
  0x82   :  { %26 = vst.msk [vmem:[#allocation0] sm:$0x1] %vm25_vm3, %v24_v6  }
  0x89   :  { %v30_v8 = vld [vmem:[#allocation0] sm:$0x1] }
  0x8a   :  { %32 = vst [vmem:[%s56_s1] sm:$0x1] %v30_v8 }

// kernel: decoder_block_forward.2
= control target key start
LH: loop header
LB: loop body
LE: loop exit
PB: predicated region body
PF: predicated region fallthrough
CT: control target
= control target key end

     0   :  { %s466_s12 = smov 0   ;;  %s505_s0 = inlined_call_operand.vmem [shape: f32[128,8], index: 0, kind: input, shape index: {}]   ;;  %s506_s1 = inlined_call_operand.vmem [shape: f32[8,16], index: 1, kind: input, shape index: {}]   ;;  %s507_s2 = inlined_call_operand.vmem [shape: f32[1,16], index: 2, kind: input, shape index: {}]   ;;  %s508_s3 = inlined_call_operand.vmem [shape: f32[128,16], index: 3, kind: output, shape index: {}]  }
   0x1 LB: > { %s385_s13 = sadd.s32 4294967295, %s444_s12   ;;  %p389_p0 = scmp.ge.s32.totalorder %s444_s12, 1  ;;  %s444_s12 = sphi %s466_s12, %s13_s12  }
   0x2   : > { %p138_p1 = scmp.lt.s32.totalorder %s444_s12, 3 }
   0x4   : > { %p139_p2 = pnand %p389_p0, %p138_p1 }
   0x5   : > { %v182_v0 = vld [vmem:[%s506_s1] sm:$0xff] (!%p139_p2)  ;;  %s390_s16 = sshll.u32 (!%p139_p2), %s385_s13, 3  ;;  %vm190_vm0 = vcmask (!%p139_p2), 64512   ;;  %vm320_vm1 = vcmask (!%p139_p2), 130048  }
   0x6   : > { %142 = sbr.rel (%p139_p2) target bundleno = 239 (0xef), region = 32  ;;  %414 = vmatprep.subr.mxu0 (!%p139_p2), %v182_v0  ;;  %428 = vmatprep.subr.mxu1 (!%p139_p2), %v182_v0  ;;  %p163_p3 = scmp.lt.s32.totalorder (!%p139_p2), %s390_s16, 15  ;;  %v394_v9 = vld [vmem:[%s507_s2] ss:$0 sm:$0xff] (!%p139_p2) }
   0x7   : > { %415 = vmatpush3.msra.mxu0 (!%p139_p2), %v182_v0  ;;  %429 = vmatpush3.msra.mxu1 (!%p139_p2), %v182_v0 }
   0xd   : > { %s510_s16 = smov (!%p163_p3, %s390_s16), 15 }
   0xe   : > { %s391_s17 = sshll.u32 %s510_s16, 3 }
   0xf   : > { %s166_s20 = scalar_lea.vmem %s505_s0, %s391_s17  ;;  %s172_s25 = scalar_lea.vmem %s508_s3, %s391_s17 }
  0x10   : > { %v174_v1 = vld [vmem:[%s166_s20] sm:$0xff]  ;;  %v175_v3 = vld [vmem:[%s166_s20 + $0x8] sm:$0xff]  ;;  %v176_v5 = vld [vmem:[%s166_s20 + $0x10] sm:$0xff] }
  0x11   : > { %v178_v2 = vld [vmem:[%s166_s20 + $0x20] sm:$0xff]  ;;  %416 = vmatprep.mubr.msk.f32.mxu0 %vm190_vm0, %v174_v1  ;;  %v179_v4 = vld [vmem:[%s166_s20 + $0x28] sm:$0xff]  ;;  %v180_v6 = vld [vmem:[%s166_s20 + $0x30] sm:$0xff] }
  0x12   : > { %422 = vmatprep.mubr.msk.f32.mxu1 %vm190_vm0, %v178_v2  ;;  %417 = vmatmul.mubr.msk.f32.vlgmr.msra.gmra.mrb[0].mxu0 %vm190_vm0, %v175_v3  ;;  %v177_v7 = vld [vmem:[%s166_s20 + $0x18] sm:$0xff] }
  0x13   : > { %423 = vmatmul.mubr.msk.f32.vlgmr.msra.gmra.mrb[0].mxu1 %vm190_vm0, %v179_v4  ;;  %419 = vmatprep.mubr.msk.f32.mxu0 %vm190_vm0, %v176_v5  ;;  %v181_v8 = vld [vmem:[%s166_s20 + $0x38] sm:$0xff] }
  0x14   : > { %425 = vmatprep.mubr.msk.f32.mxu1 %vm190_vm0, %v180_v6 }
  0x16   : > { %420 = vmatmul.mubr.msk.f32.gmra.mrb[2].mxu0 %vm190_vm0, %v177_v7 }
  0x17   : > { %426 = vmatmul.mubr.msk.f32.gmra.mrb[2].mxu1 %vm190_vm0, %v181_v8 }
  0xe5   : > { %v418_v10 = vpop.f32.mrb[0].mxu0 }
  0xe6   : > { %v424_v11 = vpop.f32.mrb[0].mxu1  ;;  %v287_v12 = vadd.f32 %v418_v10, %v394_v9  ;;  %v281_v14 = vpop.f32.mrb[1].mxu0 }
  0xe7   : > { %v307_v13 = vadd.f32 %v424_v11, %v394_v9  ;;  %v301_v15 = vpop.f32.mrb[1].mxu1  ;;  %v282_v16 = vadd.f32 %v394_v9, %v281_v14 }
  0xe8   : > { %v302_v17 = vadd.f32 %v394_v9, %v301_v15  ;;  %322 = vst.msk [vmem:[%s172_s25 + $0x8] sm:$0xff] %vm320_vm1, %v287_v12 }
  0xe9   : > { %326 = vst.msk [vmem:[%s172_s25 + $0x28] sm:$0xff] %vm320_vm1, %v307_v13  ;;  %321 = vst.msk [vmem:[%s172_s25] sm:$0xff] %vm320_vm1, %v282_v16  ;;  %v421_v18 = vpop.f32.mrb[2].mxu0 }
  0xea   : > { %325 = vst.msk [vmem:[%s172_s25 + $0x20] sm:$0xff] %vm320_vm1, %v302_v17  ;;  %v427_v19 = vpop.f32.mrb[2].mxu1  ;;  %v297_v20 = vadd.f32 %v421_v18, %v394_v9  ;;  %v291_v22 = vpop.f32.mrb[3].mxu0 }
  0xeb   : > { %v317_v21 = vadd.f32 %v427_v19, %v394_v9  ;;  %v311_v23 = vpop.f32.mrb[3].mxu1  ;;  %v292_v24 = vadd.f32 %v394_v9, %v291_v22 }
  0xec   : > { %v312_v25 = vadd.f32 %v394_v9, %v311_v23  ;;  %324 = vst.msk [vmem:[%s172_s25 + $0x18] sm:$0xff] %vm320_vm1, %v297_v20 }
  0xed   : > { %328 = vst.msk [vmem:[%s172_s25 + $0x38] sm:$0xff] %vm320_vm1, %v317_v21  ;;  %323 = vst.msk [vmem:[%s172_s25 + $0x10] sm:$0xff] %vm320_vm1, %v292_v24 }
  0xee   : > { %327 = vst.msk [vmem:[%s172_s25 + $0x30] sm:$0xff] %vm320_vm1, %v312_v25 }
  0xef PF: > { %s13_s12 = sadd.s32 1, %s444_s12  }
  0xf0   : > { %p10_p4 = scmp.ge.s32.totalorder %s13_s12, 4  }
  0xf2   :  { %12 = sbr.rel (!%p10_p4) target bundleno = 1 (0x1), region = 62 }

// kernel: decoder_block_forward.3
= control target key start
LH: loop header
LB: loop body
LE: loop exit
PB: predicated region body
PF: predicated region fallthrough
CT: control target
= control target key end

     0   :  { %s25605_s21 = smov 0   ;;  %s31020_s0 = inlined_call_operand.vmem [shape: f32[2,16,16,4], index: 0, kind: input, shape index: {}]   ;;  %s31021_s1 = inlined_call_operand.vmem [shape: f32[2,16,16,4], index: 1, kind: input, shape index: {}]   ;;  %s31022_s2 = inlined_call_operand.vmem [shape: f32[1,4], index: 2, kind: input, shape index: {}]   ;;  %s31023_s3 = inlined_call_operand.vmem [shape: f32[1,4], index: 3, kind: input, shape index: {}]   ;;  %s31024_s4 = inlined_call_operand.vmem [shape: f32[1,4], index: 4, kind: input, shape index: {}]   ;;  %s31025_s5 = inlined_call_operand.vmem [shape: f32[1,4], index: 5, kind: input, shape index: {}]   ;;  %s31026_s6 = inlined_call_operand.vmem [shape: f32[3,3,4,4], index: 6, kind: input, shape index: {}]   ;;  %s31027_s7 = inlined_call_operand.vmem [shape: f32[3,3,4,4], index: 7, kind: input, shape index: {}]   ;;  %s31028_s8 = inlined_call_operand.vmem [shape: f32[1,4], index: 8, kind: input, shape index: {}]   ;;  %s31029_s9 = inlined_call_operand.vmem [shape: f32[1,4], index: 9, kind: input, shape index: {}]   ;;  %s31030_s10 = inlined_call_operand.vmem [shape: f32[1,4], index: 10, kind: input, shape index: {}]   ;;  %s31031_s11 = inlined_call_operand.vmem [shape: f32[3,3,4,4], index: 11, kind: input, shape index: {}]   ;;  %s31032_s12 = inlined_call_operand.vmem [shape: f32[1,4], index: 12, kind: input, shape index: {}]   ;;  %s31033_s13 = inlined_call_operand.vmem [shape: f32[3,3,4,4], index: 13, kind: input, shape index: {}]   ;;  %s31034_s14 = inlined_call_operand.vmem [shape: f32[3,3,4,4], index: 14, kind: input, shape index: {}]   ;;  %s31035_s15 = inlined_call_operand.vmem [shape: f32[1,4], index: 15, kind: input, shape index: {}]   ;;  %s31036_s16 = inlined_call_operand.vmem [shape: f32[2,16,16,4], index: 16, kind: output, shape index: {}]  }
   0x1   :  { %31331 = sst [smem:[#allocation145_spill]] %s31020_s0 }
   0x2 LB: > { %s18868_s22 = sadd.s32 4294967295, %s25517_s21   ;;  %p18872_p0 = scmp.ge.s32.totalorder %s25517_s21, 1  ;;  %s25517_s21 = sphi %s25605_s21, %s26_s21  }
   0x3   : > { %p472_p1 = scmp.lt.s32.totalorder %s25517_s21, 3 }
   0x5   : > { %p473_p2 = pnand %p18872_p0, %p472_p1 }
   0x7   : > { %476 = sbr.rel (%p473_p2) target bundleno = 2493 (0x9bd), region = 84 }
   0xe   : > { %v25616_v0 = vld [vmem:[%s31033_s13 + $0x4] sm:$0xf]  ;;  %vm999_vm0 = vcmask 1043456   ;;  %vm606_vm1 = vcmask 31744   ;;  %vm609_vm2 = vcmask 25600   ;;  %v25519_v1 = vmov 0.0  }
   0xf   : > { %21903 = vmatprep.subr.msk.mxu1 %vm999_vm0, %v25616_v0  ;;  %607 = vst.msk [vmem:[#allocation2] sm:$0xff] %vm606_vm1, %v25519_v1  ;;  %608 = vst.msk [vmem:[#allocation2 + $0x8] sm:$0xff] %vm606_vm1, %v25519_v1  ;;  %v25839_v2 = vld [vmem:[%s31033_s13] sm:$0xf]  ;;  %v25952_v3 = vld [vmem:[%s31033_s13 + $0x10] sm:$0xf] }
  0x10   : > { %611 = vst.msk [vmem:[#allocation2 + $0x18] sm:$0xff] %vm606_vm1, %v25519_v1  ;;  %612 = vst.msk [vmem:[#allocation2 + $0x20] sm:$0xff] %vm606_vm1, %v25519_v1  ;;  %p527_p3 = scmp.lt.s32.totalorder %s18868_s22, 1  ;;  %21904 = vmatpush3.msk.msra.mxu1 %vm999_vm0, %v25616_v0  ;;  %22103 = vmatprep.subr.msk.mxu0 %vm999_vm0, %v25952_v3  ;;  %v25963_v4 = vld [vmem:[%s31033_s13 + $0x14] sm:$0xf]  ;;  %s31332_s19 = sld [smem:[#allocation145_spill]] }
  0x11   : > { %614 = vst.msk [vmem:[#allocation2 + $0x30] sm:$0xff] %vm606_vm1, %v25519_v1  ;;  %615 = vst.msk [vmem:[#allocation2 + $0x38] sm:$0xff] %vm606_vm1, %v25519_v1  ;;  %21953 = vmatprep.subr.msk.mxu1 %vm999_vm0, %v25839_v2  ;;  %22104 = vmatpush3.msk.msra.mxu0 %vm999_vm0, %v25952_v3  ;;  %v25989_v8 = vld [vmem:[%s31033_s13 + $0x8] sm:$0xf]  ;;  %v26043_v21 = vld [vmem:[%s31022_s2] ss:$0 sm:$0xff] }
  0x12   : > { %617 = vst.msk [vmem:[#allocation2 + $0x48] sm:$0xff] %vm606_vm1, %v25519_v1  ;;  %618 = vst.msk [vmem:[#allocation2 + $0x50] sm:$0xff] %vm606_vm1, %v25519_v1  ;;  %s31945_s22 = smov (!%p527_p3, %s18868_s22), 1  ;;  %22153 = vmatprep.subr.msk.mxu0 %vm999_vm0, %v25963_v4  ;;  %v26091_v36 = vld [vmem:[%s31033_s13 + $0x18] sm:$0xf] }
  0x13   : > { %620 = vst.msk [vmem:[#allocation2 + $0x60] sm:$0xff] %vm606_vm1, %v25519_v1  ;;  %621 = vst.msk [vmem:[#allocation2 + $0x68] sm:$0xff] %vm606_vm1, %v25519_v1  ;;  %s25973_s0 = sshll.u32 %s31945_s22, 8  ;;  %v26096_v37 = vld [vmem:[%s31023_s3] ss:$0 sm:$0xff] }
  0x14   : > { %623 = vst.msk [vmem:[#allocation2 + $0x78] sm:$0xff] %vm606_vm1, %v25519_v1  ;;  %624 = vst.msk [vmem:[#allocation2 + $0x80] sm:$0xff] %vm606_vm1, %v25519_v1  ;;  %s26870_s25 = scalar_lea.vmem %s31021_s1, %s25973_s0  ;;  %s30920_s30 = scalar_lea.vmem %s31036_s16, %s25973_s0 }
  0x15   : > { %626 = vst.msk [vmem:[#allocation2 + $0x90] sm:$0xff] %vm606_vm1, %v25519_v1  ;;  %627 = vst.msk [vmem:[#allocation2 + $0x98] sm:$0xff] %vm606_vm1, %v25519_v1 }
  0x16   : > { %629 = vst.msk [vmem:[#allocation2 + $0xa8] sm:$0xff] %vm606_vm1, %v25519_v1  ;;  %630 = vst.msk [vmem:[#allocation2 + $0xb0] sm:$0xff] %vm606_vm1, %v25519_v1  ;;  %s25979_s20 = scalar_lea.vmem %s31332_s19, %s25973_s0  ;;  %v869_v9 = vld [vmem:[#allocation2 + $0x1] sm:$0xff] }
  0x17   : > { %632 = vst.msk [vmem:[#allocation2 + $0xc0] sm:$0xff] %vm606_vm1, %v25519_v1  ;;  %633 = vst.msk [vmem:[#allocation2 + $0xc8] sm:$0xff] %vm606_vm1, %v25519_v1  ;;  %v542_v5 = vld [vmem:[%s25979_s20] sm:$0xff]  ;;  %v543_v6 = vld [vmem:[%s25979_s20 + $0x8] sm:$0xff]  ;;  %21905 = vmatprep.mubr.msk.f32.mxu1 %vm606_vm1, %v869_v9 }
  0x18   : > { %635 = vst.msk [vmem:[#allocation2 + $0xd8] sm:$0xff] %vm606_vm1, %v25519_v1  ;;  %636 = vst.msk [vmem:[#allocation2 + $0xe0] sm:$0xff] %vm606_vm1, %v25519_v1  ;;  %v25984_v7 = vld [vmem:[%s25979_s20 + $0x10] sm:$0xff]  ;;  %v545_v11 = vld [vmem:[%s25979_s20 + $0x18] sm:$0xff]  ;;  %v7839_v34 = vmul.f32 %v26043_v21, %v542_v5  ;;  %v7840_v35 = vmul.f32 %v26043_v21, %v543_v6 }
  0x19   : > { %638 = vst.msk [vmem:[#allocation2 + $0xf0] sm:$0xff] %vm606_vm1, %v25519_v1  ;;  %639 = vst.msk [vmem:[#allocation2 + $0xf8] sm:$0xff] %vm606_vm1, %v25519_v1  ;;  %v25999_v12 = vld [vmem:[%s25979_s20 + $0x20] sm:$0xff]  ;;  %v26002_v13 = vld [vmem:[%s25979_s20 + $0x28] sm:$0xff]  ;;  %v7841_v39 = vmul.f32 %v26043_v21, %v25984_v7  ;;  %v7842_v41 = vmul.f32 %v26043_v21, %v545_v11 }
  0x1a   : > { %641 = vst.msk [vmem:[#allocation2 + $0x108] sm:$0xff] %vm606_vm1, %v25519_v1  ;;  %642 = vst.msk [vmem:[#allocation2 + $0x110] sm:$0xff] %vm606_vm1, %v25519_v1  ;;  %v26005_v14 = vld [vmem:[%s25979_s20 + $0x30] sm:$0xff]  ;;  %v26015_v15 = vld [vmem:[%s25979_s20 + $0x38] sm:$0xff]  ;;  %v26117_v45 = vadd.f32 %v26096_v37, %v7839_v34  ;;  %v26120_v46 = vadd.f32 %v26096_v37, %v7840_v35  ;;  %v7843_v58 = vmul.f32 %v26043_v21, %v25999_v12 }
  0x1b   : > { %644 = vst.msk [vmem:[#allocation2 + $0x120] sm:$0xff] %vm606_vm1, %v25519_v1  ;;  %645 = vst.msk [vmem:[#allocation2 + $0x128] sm:$0xff] %vm606_vm1, %v25519_v1  ;;  %v26018_v16 = vld [vmem:[%s25979_s20 + $0x40] sm:$0xff]  ;;  %v26021_v17 = vld [vmem:[%s25979_s20 + $0x48] sm:$0xff]  ;;  %v26143_v52 = vadd.f32 %v26096_v37, %v7841_v39  ;;  %v26153_v57 = vadd.f32 %v26096_v37, %v7842_v41  ;;  %v7844_v59 = vmul.f32 %v26043_v21, %v26002_v13 }
  0x1c   : > { %647 = vst.msk [vmem:[#allocation2 + $0x138] sm:$0xff] %vm606_vm1, %v25519_v1  ;;  %648 = vst.msk [vmem:[#allocation2 + $0x140] sm:$0xff] %vm606_vm1, %v25519_v1  ;;  %v26032_v18 = vld [vmem:[%s25979_s20 + $0x50] sm:$0xff]  ;;  %v26035_v19 = vld [vmem:[%s25979_s20 + $0x58] sm:$0xff]  ;;  %v7845_v60 = vmul.f32 %v26043_v21, %v26005_v14 }
  0x1d   : > { %650 = vst.msk [vmem:[#allocation2 + $0x150] sm:$0xff] %vm606_vm1, %v25519_v1  ;;  %651 = vst.msk [vmem:[#allocation2 + $0x158] sm:$0xff] %vm606_vm1, %v25519_v1  ;;  %v26038_v20 = vld [vmem:[%s25979_s20 + $0x60] sm:$0xff]  ;;  %v26052_v22 = vld [vmem:[%s25979_s20 + $0x68] sm:$0xff]  ;;  %v7913_v39 = vmax.f32 %v26153_v57, 0.0 }
  0x1e   : > { %653 = vst.msk [vmem:[#allocation2 + $0x168] sm:$0xff] %vm606_vm1, %v25519_v1  ;;  %654 = vst.msk [vmem:[#allocation2 + $0x170] sm:$0xff] %vm606_vm1, %v25519_v1  ;;  %v26055_v23 = vld [vmem:[%s25979_s20 + $0x70] sm:$0xff]  ;;  %v26058_v24 = vld [vmem:[%s25979_s20 + $0x78] sm:$0xff] }
  0x1f   : > { %656 = vst.msk [vmem:[#allocation2 + $0x180] sm:$0xff] %vm606_vm1, %v25519_v1  ;;  %657 = vst.msk [vmem:[#allocation2 + $0x188] sm:$0xff] %vm606_vm1, %v25519_v1  ;;  %v558_v25 = vld [vmem:[%s25979_s20 + $0x80] sm:$0xff]  ;;  %v559_v26 = vld [vmem:[%s25979_s20 + $0x88] sm:$0xff] }
  0x20   : > { %659 = vst.msk [vmem:[#allocation2 + $0x198] sm:$0xff] %vm606_vm1, %v25519_v1  ;;  %660 = vst.msk [vmem:[#allocation2 + $0x1a0] sm:$0xff] %vm606_vm1, %v25519_v1  ;;  %v560_v27 = vld [vmem:[%s25979_s20 + $0x90] sm:$0xff]  ;;  %v561_v28 = vld [vmem:[%s25979_s20 + $0x98] sm:$0xff]  ;;  %v7855_v42 = vmul.f32 %v26043_v21, %v558_v25  ;;  %v7856_v43 = vmul.f32 %v26043_v21, %v559_v26 }
  0x21   : > { %662 = vst.msk [vmem:[#allocation3] sm:$0xff] %vm606_vm1, %v25519_v1  ;;  %663 = vst.msk [vmem:[#allocation3 + $0x8] sm:$0xff] %vm606_vm1, %v25519_v1  ;;  %v562_v29 = vld [vmem:[%s25979_s20 + $0xa0] sm:$0xff]  ;;  %v563_v30 = vld [vmem:[%s25979_s20 + $0xa8] sm:$0xff]  ;;  %v7857_v44 = vmul.f32 %v26043_v21, %v560_v27  ;;  %v7858_v47 = vmul.f32 %v26043_v21, %v561_v28 }
  0x22   : > { %665 = vst.msk [vmem:[#allocation3 + $0x18] sm:$0xff] %vm606_vm1, %v25519_v1  ;;  %666 = vst.msk [vmem:[#allocation3 + $0x20] sm:$0xff] %vm606_vm1, %v25519_v1  ;;  %v26134_v49 = vadd.f32 %v26096_v37, %v7855_v42  ;;  %v26137_v50 = vadd.f32 %v26096_v37, %v7856_v43  ;;  %v7859_v55 = vmul.f32 %v26043_v21, %v562_v29  ;;  %v564_v61 = vld [vmem:[%s25979_s20 + $0xb0] sm:$0xff]  ;;  %v571_v35 = vld [vmem:[%s25979_s20 + $0xe8] sm:$0xff] }
  0x23   : > { %668 = vst.msk [vmem:[#allocation3 + $0x30] sm:$0xff] %vm606_vm1, %v25519_v1  ;;  %669 = vst.msk [vmem:[#allocation3 + $0x38] sm:$0xff] %vm606_vm1, %v25519_v1  ;;  %v26140_v51 = vadd.f32 %v26096_v37, %v7857_v44  ;;  %v26148_v54 = vadd.f32 %v26096_v37, %v7858_v47  ;;  %v7860_v56 = vmul.f32 %v26043_v21, %v563_v30 }
  0x24   : > { %671 = vst.msk [vmem:[#allocation3 + $0x48] sm:$0xff] %vm606_vm1, %v25519_v1  ;;  %672 = vst.msk [vmem:[#allocation3 + $0x50] sm:$0xff] %vm606_vm1, %v25519_v1  ;;  %v26167_v62 = vadd.f32 %v26096_v37, %v7859_v55  ;;  %v7861_v0 = vmul.f32 %v26043_v21, %v564_v61  ;;  %v7849_v42 = vmul.f32 %v26043_v21, %v26032_v18 }
  0x25   : > { %674 = vst.msk [vmem:[#allocation3 + $0x60] sm:$0xff] %vm606_vm1, %v25519_v1  ;;  %675 = vst.msk [vmem:[#allocation3 + $0x68] sm:$0xff] %vm606_vm1, %v25519_v1  ;;  %v26170_v63 = vadd.f32 %v26096_v37, %v7860_v56  ;;  %v7850_v43 = vmul.f32 %v26043_v21, %v26035_v19  ;;  %v26256_v47 = vadd.f32 %v26096_v37, %v7845_v60 }
  0x26   : > { %677 = vst.msk [vmem:[#allocation3 + $0x78] sm:$0xff] %vm606_vm1, %v25519_v1  ;;  %678 = vst.msk [vmem:[#allocation3 + $0x80] sm:$0xff] %vm606_vm1, %v25519_v1  ;;  %v7853_v60 = vmul.f32 %v26043_v21, %v26055_v23 }
  0x27   : > { %680 = vst.msk [vmem:[#allocation3 + $0x90] sm:$0xff] %vm606_vm1, %v25519_v1  ;;  %681 = vst.msk [vmem:[#allocation3 + $0x98] sm:$0xff] %vm606_vm1, %v25519_v1 }
  0x28   : > { %683 = vst.msk [vmem:[#allocation3 + $0xa8] sm:$0xff] %vm606_vm1, %v25519_v1  ;;  %684 = vst.msk [vmem:[#allocation3 + $0xb0] sm:$0xff] %vm606_vm1, %v25519_v1 }
  0x29   : > { %686 = vst.msk [vmem:[#allocation3 + $0xc0] sm:$0xff] %vm606_vm1, %v25519_v1  ;;  %687 = vst.msk [vmem:[#allocation3 + $0xc8] sm:$0xff] %vm606_vm1, %v25519_v1 }
  0x2a   : > { %689 = vst.msk [vmem:[#allocation3 + $0xd8] sm:$0xff] %vm606_vm1, %v25519_v1  ;;  %690 = vst.msk [vmem:[#allocation3 + $0xe0] sm:$0xff] %vm606_vm1, %v25519_v1 }
  0x2b   : > { %692 = vst.msk [vmem:[#allocation3 + $0xf0] sm:$0xff] %vm606_vm1, %v25519_v1  ;;  %693 = vst.msk [vmem:[#allocation3 + $0xf8] sm:$0xff] %vm606_vm1, %v25519_v1 }
  0x2c   : > { %695 = vst.msk [vmem:[#allocation3 + $0x108] sm:$0xff] %vm606_vm1, %v25519_v1  ;;  %696 = vst.msk [vmem:[#allocation3 + $0x110] sm:$0xff] %vm606_vm1, %v25519_v1 }
  0x2d   : > { %698 = vst.msk [vmem:[#allocation3 + $0x120] sm:$0xff] %vm606_vm1, %v25519_v1  ;;  %699 = vst.msk [vmem:[#allocation3 + $0x128] sm:$0xff] %vm606_vm1, %v25519_v1 }
  0x2e   : > { %701 = vst.msk [vmem:[#allocation3 + $0x138] sm:$0xff] %vm606_vm1, %v25519_v1  ;;  %702 = vst.msk [vmem:[#allocation3 + $0x140] sm:$0xff] %vm606_vm1, %v25519_v1 }
  0x2f   : > { %704 = vst.msk [vmem:[#allocation3 + $0x150] sm:$0xff] %vm606_vm1, %v25519_v1  ;;  %705 = vst.msk [vmem:[#allocation3 + $0x158] sm:$0xff] %vm606_vm1, %v25519_v1 }
  0x30   : > { %707 = vst.msk [vmem:[#allocation3 + $0x168] sm:$0xff] %vm606_vm1, %v25519_v1  ;;  %708 = vst.msk [vmem:[#allocation3 + $0x170] sm:$0xff] %vm606_vm1, %v25519_v1 }
  0x31   : > { %710 = vst.msk [vmem:[#allocation3 + $0x180] sm:$0xff] %vm606_vm1, %v25519_v1  ;;  %711 = vst.msk [vmem:[#allocation3 + $0x188] sm:$0xff] %vm606_vm1, %v25519_v1 }
  0x32   : > { %713 = vst.msk [vmem:[#allocation3 + $0x198] sm:$0xff] %vm606_vm1, %v25519_v1  ;;  %714 = vst.msk [vmem:[#allocation3 + $0x1a0] sm:$0xff] %vm606_vm1, %v25519_v1 }
  0x33   : > { %716 = vst.msk [vmem:[#allocation4] sm:$0xff] %vm606_vm1, %v25519_v1  ;;  %717 = vst.msk [vmem:[#allocation4 + $0x8] sm:$0xff] %vm606_vm1, %v25519_v1 }
  0x34   : > { %719 = vst.msk [vmem:[#allocation4 + $0x18] sm:$0xff] %vm606_vm1, %v25519_v1  ;;  %720 = vst.msk [vmem:[#allocation4 + $0x20] sm:$0xff] %vm606_vm1, %v25519_v1 }
  0x35   : > { %722 = vst.msk [vmem:[#allocation4 + $0x30] sm:$0xff] %vm606_vm1, %v25519_v1  ;;  %723 = vst.msk [vmem:[#allocation4 + $0x38] sm:$0xff] %vm606_vm1, %v25519_v1 }
  0x36   : > { %725 = vst.msk [vmem:[#allocation4 + $0x48] sm:$0xff] %vm606_vm1, %v25519_v1  ;;  %726 = vst.msk [vmem:[#allocation4 + $0x50] sm:$0xff] %vm606_vm1, %v25519_v1 }
  0x37   : > { %728 = vst.msk [vmem:[#allocation4 + $0x60] sm:$0xff] %vm606_vm1, %v25519_v1  ;;  %729 = vst.msk [vmem:[#allocation4 + $0x68] sm:$0xff] %vm606_vm1, %v25519_v1 }
  0x38   : > { %731 = vst.msk [vmem:[#allocation4 + $0x78] sm:$0xff] %vm606_vm1, %v25519_v1  ;;  %732 = vst.msk [vmem:[#allocation4 + $0x80] sm:$0xff] %vm606_vm1, %v25519_v1 }
  0x39   : > { %734 = vst.msk [vmem:[#allocation4 + $0x90] sm:$0xff] %vm606_vm1, %v25519_v1  ;;  %735 = vst.msk [vmem:[#allocation4 + $0x98] sm:$0xff] %vm606_vm1, %v25519_v1 }
  0x3a   : > { %737 = vst.msk [vmem:[#allocation4 + $0xa8] sm:$0xff] %vm606_vm1, %v25519_v1  ;;  %738 = vst.msk [vmem:[#allocation4 + $0xb0] sm:$0xff] %vm606_vm1, %v25519_v1 }
  0x3b   : > { %740 = vst.msk [vmem:[#allocation4 + $0xc0] sm:$0xff] %vm606_vm1, %v25519_v1  ;;  %741 = vst.msk [vmem:[#allocation4 + $0xc8] sm:$0xff] %vm606_vm1, %v25519_v1 }
  0x3c   : > { %743 = vst.msk [vmem:[#allocation4 + $0xd8] sm:$0xff] %vm606_vm1, %v25519_v1  ;;  %744 = vst.msk [vmem:[#allocation4 + $0xe0] sm:$0xff] %vm606_vm1, %v25519_v1 }
  0x3d   : > { %746 = vst.msk [vmem:[#allocation4 + $0xf0] sm:$0xff] %vm606_vm1, %v25519_v1  ;;  %747 = vst.msk [vmem:[#allocation4 + $0xf8] sm:$0xff] %vm606_vm1, %v25519_v1 }
  0x3e   : > { %749 = vst.msk [vmem:[#allocation4 + $0x108] sm:$0xff] %vm606_vm1, %v25519_v1  ;;  %750 = vst.msk [vmem:[#allocation4 + $0x110] sm:$0xff] %vm606_vm1, %v25519_v1 }
  0x3f   : > { %752 = vst.msk [vmem:[#allocation4 + $0x120] sm:$0xff] %vm606_vm1, %v25519_v1  ;;  %753 = vst.msk [vmem:[#allocation4 + $0x128] sm:$0xff] %vm606_vm1, %v25519_v1 }
  0x40   : > { %755 = vst.msk [vmem:[#allocation4 + $0x138] sm:$0xff] %vm606_vm1, %v25519_v1  ;;  %756 = vst.msk [vmem:[#allocation4 + $0x140] sm:$0xff] %vm606_vm1, %v25519_v1 }
  0x41   : > { %758 = vst.msk [vmem:[#allocation4 + $0x150] sm:$0xff] %vm606_vm1, %v25519_v1  ;;  %759 = vst.msk [vmem:[#allocation4 + $0x158] sm:$0xff] %vm606_vm1, %v25519_v1 }
  0x42   : > { %761 = vst.msk [vmem:[#allocation4 + $0x168] sm:$0xff] %vm606_vm1, %v25519_v1  ;;  %762 = vst.msk [vmem:[#allocation4 + $0x170] sm:$0xff] %vm606_vm1, %v25519_v1 }
  0x43   : > { %764 = vst.msk [vmem:[#allocation4 + $0x180] sm:$0xff] %vm606_vm1, %v25519_v1  ;;  %765 = vst.msk [vmem:[#allocation4 + $0x188] sm:$0xff] %vm606_vm1, %v25519_v1 }
  0x44   : > { %767 = vst.msk [vmem:[#allocation4 + $0x198] sm:$0xff] %vm606_vm1, %v25519_v1  ;;  %768 = vst.msk [vmem:[#allocation4 + $0x1a0] sm:$0xff] %vm606_vm1, %v25519_v1 }
  0x45   : > { %610 = vst.msk [vmem:[#allocation2 + $0x10] sm:$0x3] %vm609_vm2, %v25519_v1  ;;  %613 = vst.msk [vmem:[#allocation2 + $0x28] sm:$0x3] %vm609_vm2, %v25519_v1 }
  0x46   : > { %616 = vst.msk [vmem:[#allocation2 + $0x40] sm:$0x3] %vm609_vm2, %v25519_v1  ;;  %619 = vst.msk [vmem:[#allocation2 + $0x58] sm:$0x3] %vm609_vm2, %v25519_v1 }
  0x47   : > { %622 = vst.msk [vmem:[#allocation2 + $0x70] sm:$0x3] %vm609_vm2, %v25519_v1  ;;  %625 = vst.msk [vmem:[#allocation2 + $0x88] sm:$0x3] %vm609_vm2, %v25519_v1 }
  0x48   : > { %628 = vst.msk [vmem:[#allocation2 + $0xa0] sm:$0x3] %vm609_vm2, %v25519_v1  ;;  %631 = vst.msk [vmem:[#allocation2 + $0xb8] sm:$0x3] %vm609_vm2, %v25519_v1 }
  0x49   : > { %634 = vst.msk [vmem:[#allocation2 + $0xd0] sm:$0x3] %vm609_vm2, %v25519_v1  ;;  %637 = vst.msk [vmem:[#allocation2 + $0xe8] sm:$0x3] %vm609_vm2, %v25519_v1 }
  0x4a   : > { %640 = vst.msk [vmem:[#allocation2 + $0x100] sm:$0x3] %vm609_vm2, %v25519_v1  ;;  %643 = vst.msk [vmem:[#allocation2 + $0x118] sm:$0x3] %vm609_vm2, %v25519_v1 }
  0x4b   : > { %646 = vst.msk [vmem:[#allocation2 + $0x130] sm:$0x3] %vm609_vm2, %v25519_v1  ;;  %649 = vst.msk [vmem:[#allocation2 + $0x148] sm:$0x3] %vm609_vm2, %v25519_v1 }
  0x4c   : > { %652 = vst.msk [vmem:[#allocation2 + $0x160] sm:$0x3] %vm609_vm2, %v25519_v1  ;;  %655 = vst.msk [vmem:[#allocation2 + $0x178] sm:$0x3] %vm609_vm2, %v25519_v1  ;;  %v870_v10 = vld [vmem:[#allocation2 + $0x9] sm:$0xff] }
  0x4d   : > { %658 = vst.msk [vmem:[#allocation2 + $0x190] sm:$0x3] %vm609_vm2, %v25519_v1  ;;  %661 = vst.msk [vmem:[#allocation2 + $0x1a8] sm:$0x3] %vm609_vm2, %v25519_v1  ;;  %21906 = vmatmul.mubr.msk.f32.vlgmr.msra.gmra.mrb[0].mxu1 %vm606_vm1, %v870_v10  ;;  %v567_v10 = vld [vmem:[%s25979_s20 + $0xc8] sm:$0xff] }
  0x4e   : > { %664 = vst.msk [vmem:[#allocation3 + $0x10] sm:$0x3] %vm609_vm2, %v25519_v1  ;;  %667 = vst.msk [vmem:[#allocation3 + $0x28] sm:$0x3] %vm609_vm2, %v25519_v1  ;;  %21954 = vmatpush3.msk.msra.mxu1 %vm999_vm0, %v25839_v2  ;;  %v566_v2 = vld [vmem:[%s25979_s20 + $0xc0] sm:$0xff] }
  0x4f   : > { %670 = vst.msk [vmem:[#allocation3 + $0x40] sm:$0x3] %vm609_vm2, %v25519_v1  ;;  %673 = vst.msk [vmem:[#allocation3 + $0x58] sm:$0x3] %vm609_vm2, %v25519_v1  ;;  %22003 = vmatprep.subr.msk.mxu1 %vm999_vm0, %v25989_v8  ;;  %v7863_v9 = vmul.f32 %v26043_v21, %v566_v2 }
  0x50   : > { %676 = vst.msk [vmem:[#allocation3 + $0x70] sm:$0x3] %vm609_vm2, %v25519_v1  ;;  %679 = vst.msk [vmem:[#allocation3 + $0x88] sm:$0x3] %vm609_vm2, %v25519_v1 }
  0x51   : > { %682 = vst.msk [vmem:[#allocation3 + $0xa0] sm:$0x3] %vm609_vm2, %v25519_v1  ;;  %685 = vst.msk [vmem:[#allocation3 + $0xb8] sm:$0x3] %vm609_vm2, %v25519_v1 }
  0x52   : > { %688 = vst.msk [vmem:[#allocation3 + $0xd0] sm:$0x3] %vm609_vm2, %v25519_v1  ;;  %691 = vst.msk [vmem:[#allocation3 + $0xe8] sm:$0x3] %vm609_vm2, %v25519_v1 }
  0x53   : > { %694 = vst.msk [vmem:[#allocation3 + $0x100] sm:$0x3] %vm609_vm2, %v25519_v1  ;;  %697 = vst.msk [vmem:[#allocation3 + $0x118] sm:$0x3] %vm609_vm2, %v25519_v1 }
  0x54   : > { %700 = vst.msk [vmem:[#allocation3 + $0x130] sm:$0x3] %vm609_vm2, %v25519_v1  ;;  %703 = vst.msk [vmem:[#allocation3 + $0x148] sm:$0x3] %vm609_vm2, %v25519_v1 }
  0x55   : > { %706 = vst.msk [vmem:[#allocation3 + $0x160] sm:$0x3] %vm609_vm2, %v25519_v1  ;;  %709 = vst.msk [vmem:[#allocation3 + $0x178] sm:$0x3] %vm609_vm2, %v25519_v1 }
  0x56   : > { %712 = vst.msk [vmem:[#allocation3 + $0x190] sm:$0x3] %vm609_vm2, %v25519_v1  ;;  %715 = vst.msk [vmem:[#allocation3 + $0x1a8] sm:$0x3] %vm609_vm2, %v25519_v1 }
  0x57   : > { %718 = vst.msk [vmem:[#allocation4 + $0x10] sm:$0x3] %vm609_vm2, %v25519_v1  ;;  %721 = vst.msk [vmem:[#allocation4 + $0x28] sm:$0x3] %vm609_vm2, %v25519_v1 }
  0x58   : > { %724 = vst.msk [vmem:[#allocation4 + $0x40] sm:$0x3] %vm609_vm2, %v25519_v1  ;;  %727 = vst.msk [vmem:[#allocation4 + $0x58] sm:$0x3] %vm609_vm2, %v25519_v1 }
  0x59   : > { %730 = vst.msk [vmem:[#allocation4 + $0x70] sm:$0x3] %vm609_vm2, %v25519_v1  ;;  %733 = vst.msk [vmem:[#allocation4 + $0x88] sm:$0x3] %vm609_vm2, %v25519_v1 }
  0x5a   : > { %736 = vst.msk [vmem:[#allocation4 + $0xa0] sm:$0x3] %vm609_vm2, %v25519_v1  ;;  %739 = vst.msk [vmem:[#allocation4 + $0xb8] sm:$0x3] %vm609_vm2, %v25519_v1 }
  0x5b   : > { %742 = vst.msk [vmem:[#allocation4 + $0xd0] sm:$0x3] %vm609_vm2, %v25519_v1  ;;  %745 = vst.msk [vmem:[#allocation4 + $0xe8] sm:$0x3] %vm609_vm2, %v25519_v1 }
  0x5c   : > { %748 = vst.msk [vmem:[#allocation4 + $0x100] sm:$0x3] %vm609_vm2, %v25519_v1  ;;  %751 = vst.msk [vmem:[#allocation4 + $0x118] sm:$0x3] %vm609_vm2, %v25519_v1 }
  0x5d   : > { %754 = vst.msk [vmem:[#allocation4 + $0x130] sm:$0x3] %vm609_vm2, %v25519_v1  ;;  %757 = vst.msk [vmem:[#allocation4 + $0x148] sm:$0x3] %vm609_vm2, %v25519_v1 }
  0x5e   : > { %760 = vst.msk [vmem:[#allocation4 + $0x160] sm:$0x3] %vm609_vm2, %v25519_v1  ;;  %763 = vst.msk [vmem:[#allocation4 + $0x178] sm:$0x3] %vm609_vm2, %v25519_v1 }
  0x5f   : > { %766 = vst.msk [vmem:[#allocation4 + $0x190] sm:$0x3] %vm609_vm2, %v25519_v1  ;;  %769 = vst.msk [vmem:[#allocation4 + $0x1a8] sm:$0x3] %vm609_vm2, %v25519_v1  ;;  %v565_v1 = vld [vmem:[%s25979_s20 + $0xb8] sm:$0xff] }
  0x60   : > { %771 = vst.msk [vmem:[#allocation2 + $0x19] sm:$0xff] %vm606_vm1, %v542_v5  ;;  %772 = vst.msk [vmem:[#allocation2 + $0x21] sm:$0xff] %vm606_vm1, %v543_v6  ;;  %v7846_v6 = vmul.f32 %v26043_v21, %v26015_v15 }
  0x61   : > { %773 = vst.msk [vmem:[#allocation2 + $0x31] sm:$0xff] %vm606_vm1, %v25984_v7  ;;  %774 = vst.msk [vmem:[#allocation2 + $0x39] sm:$0xff] %vm606_vm1, %v545_v11  ;;  %v7862_v7 = vmul.f32 %v26043_v21, %v565_v1  ;;  %v7911_v11 = vmax.f32 %v26120_v46, 0.0 }
  0x62   : > { %775 = vst.msk [vmem:[#allocation2 + $0x49] sm:$0xff] %vm606_vm1, %v25999_v12  ;;  %776 = vst.msk [vmem:[#allocation2 + $0x51] sm:$0xff] %vm606_vm1, %v26002_v13  ;;  %v7847_v13 = vmul.f32 %v26043_v21, %v26018_v16 }
  0x63   : > { %777 = vst.msk [vmem:[#allocation2 + $0x61] sm:$0xff] %vm606_vm1, %v26005_v14  ;;  %778 = vst.msk [vmem:[#allocation2 + $0x69] sm:$0xff] %vm606_vm1, %v26015_v15  ;;  %v26196_v14 = vadd.f32 %v26096_v37, %v7861_v0  ;;  %v7864_v15 = vmul.f32 %v26043_v21, %v567_v10 }
  0x64   : > { %779 = vst.msk [vmem:[#allocation2 + $0x79] sm:$0xff] %vm606_vm1, %v26018_v16  ;;  %780 = vst.msk [vmem:[#allocation2 + $0x81] sm:$0xff] %vm606_vm1, %v26021_v17 }
  0x65   : > { %781 = vst.msk [vmem:[#allocation2 + $0x91] sm:$0xff] %vm606_vm1, %v26032_v18  ;;  %782 = vst.msk [vmem:[#allocation2 + $0x99] sm:$0xff] %vm606_vm1, %v26035_v19  ;;  %v26231_v34 = vadd.f32 %v26096_v37, %v7864_v15  ;;  %v7851_v18 = vmul.f32 %v26043_v21, %v26038_v20  ;;  %v7852_v19 = vmul.f32 %v26043_v21, %v26052_v22 }
  0x66   : > { %783 = vst.msk [vmem:[#allocation2 + $0xa9] sm:$0xff] %vm606_vm1, %v26038_v20  ;;  %784 = vst.msk [vmem:[#allocation2 + $0xb1] sm:$0xff] %vm606_vm1, %v26052_v22 }
  0x67   : > { %785 = vst.msk [vmem:[#allocation2 + $0xc1] sm:$0xff] %vm606_vm1, %v26055_v23  ;;  %786 = vst.msk [vmem:[#allocation2 + $0xc9] sm:$0xff] %vm606_vm1, %v26058_v24  ;;  %v871_v31 = vld [vmem:[#allocation2 + $0x19] sm:$0xff]  ;;  %v872_v32 = vld [vmem:[#allocation2 + $0x21] sm:$0xff] }
  0x68   : > { %787 = vst.msk [vmem:[#allocation2 + $0xd9] sm:$0xff] %vm606_vm1, %v558_v25  ;;  %788 = vst.msk [vmem:[#allocation2 + $0xe1] sm:$0xff] %vm606_vm1, %v559_v26  ;;  %v26077_v33 = vld [vmem:[#allocation2 + $0x31] sm:$0xff]  ;;  %21908 = vmatprep.mubr.msk.f32.mxu1 %vm606_vm1, %v871_v31  ;;  %22105 = vmatprep.mubr.msk.f32.mxu0 %vm606_vm1, %v871_v31  ;;  %v26102_v38 = vld [vmem:[#allocation2 + $0x39] sm:$0xff]  ;;  %v7912_v31 = vmax.f32 %v26143_v52, 0.0  ;;  %v26259_v52 = vadd.f32 %v26096_v37, %v7846_v6 }
  0x69   : > { %789 = vst.msk [vmem:[#allocation2 + $0xf1] sm:$0xff] %vm606_vm1, %v560_v27  ;;  %31333 = vst [vmem:[#allocation6_spill] sm:$0xff] %v26077_v33  ;;  %21909 = vmatmul.mubr.msk.f32.gmra.mrb[2].mxu1 %vm606_vm1, %v872_v32  ;;  %22106 = vmatmul.mubr.msk.f32.vlgmr.msra.gmra.mrb[0].mxu0 %vm606_vm1, %v872_v32  ;;  %v26106_v40 = vld [vmem:[#allocation2 + $0x49] sm:$0xff]  ;;  %v26131_v48 = vld [vmem:[#allocation2 + $0x51] sm:$0xff]  ;;  %v7848_v27 = vmul.f32 %v26043_v21, %v26021_v17  ;;  %v26221_v32 = vadd.f32 %v26096_v37, %v7843_v58 }
  0x6a   : > { %790 = vst.msk [vmem:[#allocation2 + $0xf9] sm:$0xff] %vm606_vm1, %v561_v28  ;;  %791 = vst.msk [vmem:[#allocation2 + $0x109] sm:$0xff] %vm606_vm1, %v562_v29  ;;  %21911 = vmatprep.mubr.msk.f32.mxu1 %vm606_vm1, %v26077_v33  ;;  %22108 = vmatprep.mubr.msk.f32.mxu0 %vm606_vm1, %v26077_v33  ;;  %v26145_v53 = vld [vmem:[#allocation2 + $0x61] sm:$0xff]  ;;  %v26181_v5 = vld [vmem:[#allocation2 + $0x69] sm:$0xff]  ;;  %v26207_v28 = vadd.f32 %v26096_v37, %v7862_v7  ;;  %v26210_v29 = vadd.f32 %v26096_v37, %v7863_v9  ;;  %v7916_v7 = vmax.f32 %v26256_v47, 0.0 }
  0x6b   : > { %792 = vst.msk [vmem:[#allocation2 + $0x111] sm:$0xff] %vm606_vm1, %v563_v30  ;;  %31334 = vst [vmem:[#allocation7_spill] sm:$0xff] %v26102_v38  ;;  %22154 = vmatpush3.msk.msra.mxu0 %vm999_vm0, %v25963_v4  ;;  %v7910_v4 = vmax.f32 %v26117_v45, 0.0  ;;  %v26191_v12 = vld [vmem:[#allocation2 + $0x79] sm:$0xff]  ;;  %v568_v25 = vld [vmem:[%s25979_s20 + $0xd0] sm:$0xff]  ;;  %v26224_v17 = vadd.f32 %v26096_v37, %v7844_v59  ;;  %v26272_v58 = vadd.f32 %v26096_v37, %v7847_v13  ;;  %v7914_v20 = vmax.f32 %v26221_v32, 0.0 }
  0x6c   : > { %31335 = vst [vmem:[#allocation8_spill] sm:$0xff] %v26106_v40  ;;  %22203 = vmatprep.subr.msk.mxu0 %vm999_vm0, %v26091_v36  ;;  %31336 = vst [vmem:[#allocation9_spill] sm:$0xff] %v26131_v48  ;;  %v26202_v26 = vld [vmem:[%s25979_s20 + $0xd8] sm:$0xff]  ;;  %v7865_v16 = vmul.f32 %v26043_v21, %v568_v25  ;;  %v26217_v30 = vld [vmem:[%s25979_s20 + $0xe0] sm:$0xff]  ;;  %v26275_v59 = vadd.f32 %v26096_v37, %v7848_v27  ;;  %v7917_v9 = vmax.f32 %v26259_v52, 0.0 }
  0x6d   : > { %21912 = vmatmul.mubr.msk.f32.gmra.mrb[4].mxu1 %vm606_vm1, %v26102_v38  ;;  %22109 = vmatmul.mubr.msk.f32.gmra.mrb[2].mxu0 %vm606_vm1, %v26102_v38  ;;  %31337 = vst [vmem:[#allocation10_spill] sm:$0xff] %v26145_v53  ;;  %793 = vst.msk [vmem:[#allocation2 + $0x121] sm:$0xff] %vm606_vm1, %v564_v61  ;;  %v26241_v41 = vld [vmem:[#allocation2 + $0x81] sm:$0xff]  ;;  %v26261_v55 = vld [vmem:[#allocation2 + $0x91] sm:$0xff]  ;;  %v7854_v61 = vmul.f32 %v26043_v21, %v26058_v24  ;;  %v7915_v22 = vmax.f32 %v26224_v17, 0.0  ;;  %v26296_v24 = vadd.f32 %v26096_v37, %v7849_v42 }
  0x6e   : > { %21914 = vmatprep.mubr.msk.f32.mxu1 %vm606_vm1, %v26106_v40  ;;  %22111 = vmatprep.mubr.msk.f32.mxu0 %vm606_vm1, %v26106_v40  ;;  %31338 = vst [vmem:[#allocation11_spill] sm:$0xff] %v26181_v5  ;;  %794 = vst.msk [vmem:[#allocation2 + $0x129] sm:$0xff] %vm606_vm1, %v565_v1  ;;  %v26247_v44 = vld [vmem:[#allocation2 + $0x1a] sm:$0xff]  ;;  %v26249_v45 = vld [vmem:[#allocation2 + $0x22] sm:$0xff]  ;;  %v26252_v46 = vadd.f32 %v26096_v37, %v7865_v16  ;;  %v26301_v1 = vadd.f32 %v26096_v37, %v7850_v43  ;;  %v7919_v27 = vmax.f32 %v26275_v59, 0.0 }
  0x6f   : > { %795 = vst.msk [vmem:[#allocation2 + $0x139] sm:$0xff] %vm606_vm1, %v566_v2  ;;  %31339 = vst [vmem:[#allocation12_spill] sm:$0xff] %v26191_v12  ;;  %v26267_v56 = vld [vmem:[#allocation2 + $0x18] sm:$0xff]  ;;  %v26269_v57 = vld [vmem:[#allocation2 + $0x20] sm:$0xff]  ;;  %v26317_v13 = vadd.f32 %v26096_v37, %v7852_v19  ;;  %v26328_v32 = vadd.f32 %v26096_v37, %v7853_v60  ;;  %v26331_v17 = vadd.f32 %v26096_v37, %v7854_v61  ;;  %v7920_v59 = vmax.f32 %v26296_v24, 0.0 }
  0x70   : > { %796 = vst.msk [vmem:[#allocation2 + $0x141] sm:$0xff] %vm606_vm1, %v567_v10  ;;  %797 = vst.msk [vmem:[#allocation2 + $0x151] sm:$0xff] %vm606_vm1, %v568_v25  ;;  %v26289_v0 = vld [vmem:[#allocation2 + $0x99] sm:$0xff]  ;;  %v26311_v10 = vld [vmem:[#allocation2 + $0xa9] sm:$0xff]  ;;  %v7918_v25 = vmax.f32 %v26272_v58, 0.0  ;;  %v7867_v19 = vmul.f32 %v26043_v21, %v26217_v30  ;;  %v7868_v58 = vmul.f32 %v26043_v21, %v571_v35  ;;  %v7921_v60 = vmax.f32 %v26301_v1, 0.0 }
  0x71   : > { %21915 = vmatmul.mubr.msk.f32.gmra.mrb[6].mxu1 %vm606_vm1, %v26131_v48  ;;  %22112 = vmatmul.mubr.msk.f32.gmra.mrb[4].mxu0 %vm606_vm1, %v26131_v48  ;;  %798 = vst.msk [vmem:[#allocation2 + $0x159] sm:$0xff] %vm606_vm1, %v26202_v26  ;;  %31340 = vst [vmem:[#allocation13_spill] sm:$0xff] %v26231_v34  ;;  %v26291_v23 = vld [vmem:[#allocation2 + $0x32] sm:$0xff]  ;;  %v26303_v2 = vld [vmem:[#allocation2 + $0x3a] sm:$0xff] }
  0x72   : > { %21917 = vmatprep.mubr.msk.f32.mxu1 %vm606_vm1, %v26145_v53  ;;  %22114 = vmatprep.mubr.msk.f32.mxu0 %vm606_vm1, %v26145_v53  ;;  %799 = vst.msk [vmem:[#allocation2 + $0x169] sm:$0xff] %vm606_vm1, %v26217_v30  ;;  %31341 = vst [vmem:[#allocation14_spill] sm:$0xff] %v26241_v41  ;;  %v26307_v6 = vld [vmem:[#allocation2 + $0x38] sm:$0xff]  ;;  %v26319_v15 = vld [vmem:[#allocation2 + $0x4a] sm:$0xff] }
  0x73   : > { %31342 = vst [vmem:[#allocation15_spill] sm:$0xff] %v26252_v46  ;;  %800 = vst.msk [vmem:[#allocation2 + $0x171] sm:$0xff] %vm606_vm1, %v571_v35  ;;  %v26325_v16 = vld [vmem:[#allocation2 + $0xb1] sm:$0xff]  ;;  %v26335_v43 = vld [vmem:[#allocation2 + $0x48] sm:$0xff] }
  0x74   : > { %31343 = vst [vmem:[#allocation16_spill] sm:$0xff] %v26261_v55  ;;  %31344 = vst [vmem:[#allocation17_spill] sm:$0xff] %v26267_v56  ;;  %v26333_v42 = vld [vmem:[#allocation2 + $0x52] sm:$0xff]  ;;  %v26347_v52 = vld [vmem:[#allocation2 + $0x6a] sm:$0xff] }
  0x75   : > { %21918 = vmatmul.mubr.msk.f32.gmra.mrb[8].mxu1 %vm606_vm1, %v26181_v5  ;;  %22115 = vmatmul.mubr.msk.f32.gmra.mrb[6].mxu0 %vm606_vm1, %v26181_v5  ;;  %31345 = vst [vmem:[#allocation18_spill] sm:$0xff] %v26269_v57  ;;  %7942 = vst.msk [vmem:[#allocation2 + $0x19] sm:$0xff] %vm606_vm1, %v7910_v4  ;;  %v26305_v4 = vld [vmem:[#allocation2 + $0x30] sm:$0xff]  ;;  %v26364_v61 = vld [vmem:[#allocation2 + $0x60] sm:$0xff] }
  0x76   : > { %21920 = vmatprep.mubr.msk.f32.mxu1 %vm606_vm1, %v26191_v12  ;;  %22117 = vmatprep.mubr.msk.f32.mxu0 %vm606_vm1, %v26191_v12  ;;  %7943 = vst.msk [vmem:[#allocation2 + $0x21] sm:$0xff] %vm606_vm1, %v7911_v11  ;;  %31346 = vst [vmem:[#allocation19_spill] sm:$0xff] %v26289_v0  ;;  %v26314_v11 = vadd.f32 %v26096_v37, %v7851_v18  ;;  %v26337_v47 = vld [vmem:[#allocation2 + $0x50] sm:$0xff]  ;;  %v7866_v18 = vmul.f32 %v26043_v21, %v26202_v26  ;;  %v26362_v26 = vld [vmem:[#allocation2 + $0x7a] sm:$0xff] }
  0x77   : > { %31347 = vst [vmem:[#allocation20_spill] sm:$0xff] %v26311_v10  ;;  %7944 = vst.msk [vmem:[#allocation2 + $0x31] sm:$0xff] %vm606_vm1, %v7912_v31  ;;  %v26343_v31 = vld [vmem:[#allocation2 + $0xc1] sm:$0xff]  ;;  %v26372_v24 = vld [vmem:[#allocation2 + $0x78] sm:$0xff] }
  0x78   : > { %7945 = vst.msk [vmem:[#allocation2 + $0x39] sm:$0xff] %vm606_vm1, %v7913_v39  ;;  %31348 = vst [vmem:[#allocation21_spill] sm:$0xff] %v26325_v16  ;;  %v26345_v39 = vld [vmem:[#allocation2 + $0x62] sm:$0xff]  ;;  %v7922_v35 = vmax.f32 %v26314_v11, 0.0  ;;  %v7905_v11 = vadd.f32 %v26096_v37, %v7866_v18  ;;  %v26401_v12 = vld [vmem:[#allocation2 + $0x98] sm:$0xff] }
  0x79   : > { %21921 = vmatmul.mubr.msk.f32.gmra.mrb[10].mxu1 %vm606_vm1, %v26241_v41  ;;  %22118 = vmatmul.mubr.msk.f32.gmra.mrb[8].mxu0 %vm606_vm1, %v26241_v41  ;;  %31349 = vst [vmem:[#allocation22_spill] sm:$0xff] %v26335_v43  ;;  %31350 = vst [vmem:[#allocation23_spill] sm:$0xff] %v26337_v47  ;;  %v26366_v30 = vld [vmem:[#allocation2 + $0x68] sm:$0xff]  ;;  %v26374_v1 = vld [vmem:[#allocation2 + $0x80] sm:$0xff] }
  0x7a   : > { %21923 = vmatprep.mubr.msk.f32.mxu1 %vm606_vm1, %v26261_v55  ;;  %22120 = vmatprep.mubr.msk.f32.mxu0 %vm606_vm1, %v26261_v55  ;;  %31351 = vst [vmem:[#allocation24_spill] sm:$0xff] %v26343_v31  ;;  %7946 = vst.msk [vmem:[#allocation2 + $0x49] sm:$0xff] %vm606_vm1, %v7914_v20  ;;  %v7923_v20 = vmax.f32 %v26317_v13, 0.0  ;;  %v26381_v55 = vld [vmem:[#allocation2 + $0x92] sm:$0xff]  ;;  %v26383_v41 = vld [vmem:[#allocation2 + $0x9a] sm:$0xff]  ;;  %v7906_v13 = vadd.f32 %v26096_v37, %v7867_v19  ;;  %v7937_v40 = vmax.f32 %v7905_v11, 0.0 }
  0x7b   : > { %7947 = vst.msk [vmem:[#allocation2 + $0x51] sm:$0xff] %vm606_vm1, %v7915_v22  ;;  %31352 = vst [vmem:[#allocation25_spill] sm:$0xff] %v26364_v61  ;;  %v26370_v22 = vld [vmem:[#allocation2 + $0x82] sm:$0xff]  ;;  %v26411_v18 = vld [vmem:[#allocation2 + $0xb0] sm:$0xff] }
  0x7c   : > { %31353 = vst [vmem:[#allocation26_spill] sm:$0xff] %v26366_v30  ;;  %31354 = vst [vmem:[#allocation27_spill] sm:$0xff] %v26374_v1  ;;  %v26415_v19 = vld [vmem:[#allocation2 + $0xc2] sm:$0xff]  ;;  %v573_v5 = vld [vmem:[%s25979_s20 + $0xf8] sm:$0xff]  ;;  %v7938_v38 = vmax.f32 %v7906_v13, 0.0 }
  0x7d   : > { %21924 = vmatmul.mubr.msk.f32.gmra.mrb[12].mxu1 %vm606_vm1, %v26289_v0  ;;  %22121 = vmatmul.mubr.msk.f32.gmra.mrb[10].mxu0 %vm606_vm1, %v26289_v0  ;;  %7948 = vst.msk [vmem:[#allocation2 + $0x61] sm:$0xff] %vm606_vm1, %v7916_v7  ;;  %7949 = vst.msk [vmem:[#allocation2 + $0x69] sm:$0xff] %vm606_vm1, %v7917_v9  ;;  %v26379_v0 = vld [vmem:[#allocation2 + $0xc9] sm:$0xff]  ;;  %v7925_v7 = vmax.f32 %v26331_v17, 0.0  ;;  %v26392_v9 = vld [vmem:[#allocation2 + $0xd9] sm:$0xff] }
  0x7e   : > { %21926 = vmatprep.mubr.msk.f32.mxu1 %vm606_vm1, %v26311_v10  ;;  %22123 = vmatprep.mubr.msk.f32.mxu0 %vm606_vm1, %v26311_v10  ;;  %v7924_v10 = vmax.f32 %v26328_v32, 0.0  ;;  %31355 = vst [vmem:[#allocation28_spill] sm:$0xff] %v26379_v0  ;;  %7950 = vst.msk [vmem:[#allocation2 + $0x79] sm:$0xff] %vm606_vm1, %v7918_v25  ;;  %v26396_v32 = vld [vmem:[#allocation2 + $0xaa] sm:$0xff]  ;;  %v7907_v25 = vadd.f32 %v26096_v37, %v7868_v58  ;;  %v26407_v17 = vld [vmem:[#allocation2 + $0xb2] sm:$0xff] }
  0x7f   : > { %7951 = vst.msk [vmem:[#allocation2 + $0x81] sm:$0xff] %vm606_vm1, %v7919_v27  ;;  %31356 = vst [vmem:[#allocation29_spill] sm:$0xff] %v26392_v9  ;;  %v26399_v27 = vld [vmem:[#allocation2 + $0x90] sm:$0xff]  ;;  %v26429_v48 = vld [vmem:[#allocation2 + $0xc8] sm:$0xff] }
  0x80   : > { %31357 = vst [vmem:[#allocation30_spill] sm:$0xff] %v26399_v27  ;;  %31358 = vst [vmem:[#allocation31_spill] sm:$0xff] %v26401_v12  ;;  %v572_v58 = vld [vmem:[%s25979_s20 + $0xf0] sm:$0xff]  ;;  %v7939_v33 = vmax.f32 %v7907_v25, 0.0  ;;  %v26467_v46 = vld [vmem:[#allocation2 + $0x168] sm:$0xff] }
  0x81   : > { %21927 = vmatmul.mubr.msk.f32.gmra.mrb[14].mxu1 %vm606_vm1, %v26325_v16  ;;  %22124 = vmatmul.mubr.msk.f32.gmra.mrb[12].mxu0 %vm606_vm1, %v26325_v16  ;;  %v26409_v16 = vld [vmem:[#allocation2 + $0xa8] sm:$0xff]  ;;  %31360 = vst [vmem:[#allocation33_spill] sm:$0xff] %v26411_v18  ;;  %7952 = vst.msk [vmem:[#allocation2 + $0x91] sm:$0xff] %vm606_vm1, %v7920_v59  ;;  %v7869_v59 = vmul.f32 %v26043_v21, %v572_v58  ;;  %v26463_v25 = vld [vmem:[#allocation2 + $0x172] sm:$0xff] }
  0x82   : > { %21929 = vmatprep.mubr.msk.f32.mxu1 %vm606_vm1, %v26343_v31  ;;  %22126 = vmatprep.mubr.msk.f32.mxu0 %vm606_vm1, %v26343_v31  ;;  %31359 = vst [vmem:[#allocation32_spill] sm:$0xff] %v26409_v16  ;;  %7953 = vst.msk [vmem:[#allocation2 + $0x99] sm:$0xff] %vm606_vm1, %v7921_v60  ;;  %v26421_v53 = vld [vmem:[#allocation2 + $0xca] sm:$0xff]  ;;  %v26423_v31 = vld [vmem:[#allocation2 + $0xc0] sm:$0xff]  ;;  %v7870_v60 = vmul.f32 %v26043_v21, %v573_v5 }
  0x83   : > { %7954 = vst.msk [vmem:[#allocation2 + $0xa9] sm:$0xff] %vm606_vm1, %v7922_v35  ;;  %7955 = vst.msk [vmem:[#allocation2 + $0xb1] sm:$0xff] %vm606_vm1, %v7923_v20  ;;  %v26435_v35 = vld [vmem:[#allocation2 + $0xe1] sm:$0xff]  ;;  %v26437_v20 = vld [vmem:[#allocation2 + $0xf1] sm:$0xff]  ;;  %v26454_v11 = vadd.f32 %v26096_v37, %v7869_v59 }
  0x84   : > { %31361 = vst [vmem:[#allocation34_spill] sm:$0xff] %v26423_v31  ;;  %801 = vst.msk [vmem:[#allocation2 + $0x181] sm:$0xff] %vm606_vm1, %v572_v58  ;;  %v26445_v21 = vld [vmem:[#allocation2 + $0x159] sm:$0xff]  ;;  %v26449_v58 = vld [vmem:[#allocation2 + $0x171] sm:$0xff] }
  0x85   : > { %802 = vst.msk [vmem:[#allocation2 + $0x189] sm:$0xff] %vm606_vm1, %v573_v5  ;;  %21930 = vmatmul.mubr.msk.f32.gmra.mrb[16].mxu1 %vm606_vm1, %v26379_v0  ;;  %22127 = vmatmul.mubr.msk.f32.gmra.mrb[14].mxu0 %vm606_vm1, %v26379_v0  ;;  %31362 = vst [vmem:[#allocation35_spill] sm:$0xff] %v26435_v35  ;;  %v26447_v5 = vld [vmem:[#allocation2 + $0x169] sm:$0xff]  ;;  %v26451_v0 = vld [vmem:[#allocation2 + $0x152] sm:$0xff] }
  0x86   : > { %31363 = vst [vmem:[#allocation36_spill] sm:$0xff] %v26437_v20  ;;  %7956 = vst.msk [vmem:[#allocation2 + $0xc1] sm:$0xff] %vm606_vm1, %v7924_v10  ;;  %21932 = vmatprep.mubr.msk.f32.mxu1 %vm606_vm1, %v26392_v9  ;;  %22155 = vmatprep.mubr.msk.f32.mxu0 %vm606_vm1, %v26247_v44  ;;  %v26457_v10 = vadd.f32 %v26096_v37, %v7870_v60  ;;  %v26461_v13 = vld [vmem:[#allocation2 + $0x16a] sm:$0xff]  ;;  %v26465_v9 = vld [vmem:[#allocation2 + $0x158] sm:$0xff] }
  0x87   : > { %7957 = vst.msk [vmem:[#allocation2 + $0xc9] sm:$0xff] %vm606_vm1, %v7925_v7  ;;  %31364 = vst [vmem:[#allocation37_spill] sm:$0xff] %v26445_v21  ;;  %v26459_v7 = vld [vmem:[#allocation2 + $0x15a] sm:$0xff]  ;;  %v26469_v34 = vld [vmem:[#allocation2 + $0x170] sm:$0xff] }
  0x88   : > { %31365 = vst [vmem:[#allocation38_spill] sm:$0xff] %v26447_v5  ;;  %31366 = vst [vmem:[#allocation39_spill] sm:$0xff] %v26449_v58  ;;  %v26482_v37 = vld [vmem:[#allocation2 + $0xf9] sm:$0xff]  ;;  %v26489_v60 = vld [vmem:[#allocation2 + $0x109] sm:$0xff] }
  0x89   : > { %31367 = vst [vmem:[#allocation40_spill] sm:$0xff] %v26451_v0  ;;  %31368 = vst [vmem:[#allocation41_spill] sm:$0xff] %v26459_v7  ;;  %21933 = vmatmul.mubr.msk.f32.gmra.mrb[18].mxu1 %vm606_vm1, %v26435_v35  ;;  %22156 = vmatmul.mubr.msk.f32.vlgmr.msra.gmra.mrb[0].mxu0 %vm606_vm1, %v26249_v45  ;;  %v26487_v59 = vld [vmem:[%s31033_s13 + $0x1c] sm:$0xf]  ;;  %v7940_v35 = vmax.f32 %v26454_v11, 0.0 }
  0x8a   : > { %31369 = vst [vmem:[#allocation42_spill] sm:$0xff] %v26461_v13  ;;  %31370 = vst [vmem:[#allocation43_spill] sm:$0xff] %v26463_v25  ;;  %21935 = vmatprep.mubr.msk.f32.mxu1 %vm606_vm1, %v26437_v20  ;;  %22158 = vmatprep.mubr.msk.f32.mxu0 %vm606_vm1, %v26291_v23  ;;  %v26620_v20 = vld [vmem:[#allocation2 + $0x142] sm:$0xff] }
  0x8b   : > { %7969 = vst.msk [vmem:[#allocation2 + $0x159] sm:$0xff] %vm606_vm1, %v7937_v40  ;;  %7970 = vst.msk [vmem:[#allocation2 + $0x169] sm:$0xff] %vm606_vm1, %v7938_v38  ;;  %22204 = vmatpush3.msk.msra.mxu0 %vm999_vm0, %v26091_v36  ;;  %v26505_v38 = vld [vmem:[#allocation2 + $0x121] sm:$0xff]  ;;  %v26515_v36 = vld [vmem:[#allocation2 + $0x129] sm:$0xff] }
  0x8c   : > { %7971 = vst.msk [vmem:[#allocation2 + $0x171] sm:$0xff] %vm606_vm1, %v7939_v33  ;;  %31371 = vst [vmem:[#allocation44_spill] sm:$0xff] %v26482_v37  ;;  %22253 = vmatprep.subr.msk.mxu0 %vm999_vm0, %v26487_v59  ;;  %v26503_v33 = vld [vmem:[#allocation2 + $0x111] sm:$0xff]  ;;  %v26517_v40 = vld [vmem:[#allocation2 + $0x139] sm:$0xff] }
  0x8d   : > { %31372 = vst [vmem:[#allocation45_spill] sm:$0xff] %v26489_v60  ;;  %21936 = vmatmul.mubr.msk.f32.gmra.mrb[20].mxu1 %vm606_vm1, %v26482_v37  ;;  %22159 = vmatmul.mubr.msk.f32.gmra.mrb[2].mxu0 %vm606_vm1, %v26303_v2  ;;  %31373 = vst [vmem:[#allocation46_spill] sm:$0xff] %v26503_v33  ;;  %v26610_v37 = vld [vmem:[#allocation2 + $0x13a] sm:$0xff] }
  0x8e   : > { %21938 = vmatprep.mubr.msk.f32.mxu1 %vm606_vm1, %v26489_v60  ;;  %22161 = vmatprep.mubr.msk.f32.mxu0 %vm606_vm1, %v26319_v15  ;;  %31374 = vst [vmem:[#allocation47_spill] sm:$0xff] %v26505_v38  ;;  %31375 = vst [vmem:[#allocation48_spill] sm:$0xff] %v26515_v36  ;;  %v26608_v60 = vld [vmem:[#allocation2 + $0x12a] sm:$0xff]  ;;  %v26646_v11 = vld [vmem:[#allocation2 + $0x181] sm:$0xff] }
  0x8f   : > { %31376 = vst [vmem:[#allocation49_spill] sm:$0xff] %v26517_v40  ;;  %31379 = vst [vmem:[#allocation52_spill] sm:$0xff] %v26610_v37 }
  0x90   : > { %31380 = vst [vmem:[#allocation53_spill] sm:$0xff] %v26620_v20  ;;  %31382 = vst [vmem:[#allocation55_spill] sm:$0xff] %v26646_v11  ;;  %v26705_v11 = vld [vmem:[#allocation2 + $0x110] sm:$0xff] }
  0x91   : > { %21939 = vmatmul.mubr.msk.f32.gmra.mrb[22].mxu1 %vm606_vm1, %v26503_v33  ;;  %22162 = vmatmul.mubr.msk.f32.gmra.mrb[4].mxu0 %vm606_vm1, %v26333_v42  ;;  %v26529_v33 = vld [vmem:[#allocation2 + $0x151] sm:$0xff] }
  0x92   : > { %21941 = vmatprep.mubr.msk.f32.mxu1 %vm606_vm1, %v26505_v38  ;;  %22164 = vmatprep.mubr.msk.f32.mxu0 %vm606_vm1, %v26345_v39  ;;  %v26527_v38 = vld [vmem:[#allocation2 + $0x141] sm:$0xff]  ;;  %31378 = vst [vmem:[#allocation51_spill] sm:$0xff] %v26529_v33 }
  0x93   : > { %31377 = vst [vmem:[#allocation50_spill] sm:$0xff] %v26527_v38 }
  0x95   : > { %21942 = vmatmul.mubr.msk.f32.gmra.mrb[24].mxu1 %vm606_vm1, %v26515_v36  ;;  %22165 = vmatmul.mubr.msk.f32.gmra.mrb[6].mxu0 %vm606_vm1, %v26347_v52  ;;  %v26598_v36 = vld [vmem:[#allocation2 + $0x122] sm:$0xff] }
  0x96   : > { %21944 = vmatprep.mubr.msk.f32.mxu1 %vm606_vm1, %v26517_v40  ;;  %22167 = vmatprep.mubr.msk.f32.mxu0 %vm606_vm1, %v26362_v26  ;;  %v26596_v40 = vld [vmem:[#allocation2 + $0x112] sm:$0xff] }
  0x99   : > { %21945 = vmatmul.mubr.msk.f32.gmra.mrb[26].mxu1 %vm606_vm1, %v26527_v38  ;;  %22168 = vmatmul.mubr.msk.f32.gmra.mrb[8].mxu0 %vm606_vm1, %v26370_v22  ;;  %v836_v38 = vld [vmem:[#allocation2] sm:$0xff] }
  0x9a   : > { %21947 = vmatprep.mubr.msk.f32.mxu1 %vm606_vm1, %v26529_v33  ;;  %22170 = vmatprep.mubr.msk.f32.mxu0 %vm606_vm1, %v26381_v55  ;;  %v26554_v33 = vld [vmem:[#allocation2 + $0xda] sm:$0xff] }
  0x9d   : > { %21948 = vmatmul.mubr.msk.f32.gmra.mrb[28].mxu1 %vm606_vm1, %v26445_v21  ;;  %22171 = vmatmul.mubr.msk.f32.gmra.mrb[10].mxu0 %vm606_vm1, %v26383_v41  ;;  %v837_v21 = vld [vmem:[#allocation2 + $0x8] sm:$0xff] }
  0x9e   : > { %21950 = vmatprep.mubr.msk.f32.mxu1 %vm606_vm1, %v26447_v5  ;;  %22173 = vmatprep.mubr.msk.f32.mxu0 %vm606_vm1, %v26396_v32  ;;  %v26559_v5 = vld [vmem:[%s31033_s13 + $0xc] sm:$0xf] }
  0xa1   : > { %21951 = vmatmul.mubr.msk.f32.gmra.mrb[30].mxu1 %vm606_vm1, %v26449_v58  ;;  %22174 = vmatmul.mubr.msk.f32.gmra.mrb[12].mxu0 %vm606_vm1, %v26407_v17  ;;  %v26572_v58 = vld [vmem:[#allocation2 + $0xf2] sm:$0xff] }
  0xa2   : > { %21955 = vmatprep.mubr.msk.f32.mxu1 %vm606_vm1, %v836_v38  ;;  %22176 = vmatprep.mubr.msk.f32.mxu0 %vm606_vm1, %v26415_v19  ;;  %v26568_v38 = vld [vmem:[#allocation2 + $0xe2] sm:$0xff] }
  0xa5   : > { %21956 = vmatmul.mubr.msk.f32.vlgmr.msra.gmra.mrb[0].mxu1 %vm606_vm1, %v837_v21  ;;  %22177 = vmatmul.mubr.msk.f32.gmra.mrb[14].mxu0 %vm606_vm1, %v26421_v53  ;;  %v26586_v21 = vld [vmem:[#allocation2 + $0x10a] sm:$0xff] }
  0xa6   : > { %22004 = vmatpush3.msk.msra.mxu1 %vm999_vm0, %v25989_v8  ;;  %21958 = vmatprep.mubr.msk.f32.mxu1 %vm606_vm1, %v26267_v56  ;;  %v26584_v8 = vld [vmem:[#allocation2 + $0xfa] sm:$0xff]  ;;  %v7941_v56 = vmax.f32 %v26457_v10, 0.0 }
  0xa7   : > { %22179 = vmatprep.mubr.msk.f32.mxu0 %vm606_vm1, %v26554_v33  ;;  %22053 = vmatprep.subr.msk.mxu1 %vm999_vm0, %v26559_v5  ;;  %v26662_v10 = vld [vmem:[#allocation2 + $0xd8] sm:$0xff] }
  0xa9   : > { %21959 = vmatmul.mubr.msk.f32.gmra.mrb[2].mxu1 %vm606_vm1, %v26269_v57  ;;  %22180 = vmatmul.mubr.msk.f32.gmra.mrb[16].mxu0 %vm606_vm1, %v26568_v38  ;;  %v26635_v57 = vld [vmem:[#allocation2 + $0x182] sm:$0xff] }
  0xaa   : > { %21961 = vmatprep.mubr.msk.f32.mxu1 %vm606_vm1, %v26305_v4  ;;  %22182 = vmatprep.mubr.msk.f32.mxu0 %vm606_vm1, %v26572_v58  ;;  %31381 = vst [vmem:[#allocation54_spill] sm:$0xff] %v26635_v57 }
  0xad   : > { %21962 = vmatmul.mubr.msk.f32.gmra.mrb[4].mxu1 %vm606_vm1, %v26307_v6  ;;  %22183 = vmatmul.mubr.msk.f32.gmra.mrb[18].mxu0 %vm606_vm1, %v26584_v8 }
  0xae   : > { %21964 = vmatprep.mubr.msk.f32.mxu1 %vm606_vm1, %v26335_v43  ;;  %22185 = vmatprep.mubr.msk.f32.mxu0 %vm606_vm1, %v26586_v21 }
  0xb1   : > { %21965 = vmatmul.mubr.msk.f32.gmra.mrb[6].mxu1 %vm606_vm1, %v26337_v47  ;;  %22186 = vmatmul.mubr.msk.f32.gmra.mrb[20].mxu0 %vm606_vm1, %v26596_v40 }
  0xb2   : > { %21967 = vmatprep.mubr.msk.f32.mxu1 %vm606_vm1, %v26364_v61  ;;  %22188 = vmatprep.mubr.msk.f32.mxu0 %vm606_vm1, %v26598_v36 }
  0xb5   : > { %21968 = vmatmul.mubr.msk.f32.gmra.mrb[8].mxu1 %vm606_vm1, %v26366_v30  ;;  %22189 = vmatmul.mubr.msk.f32.gmra.mrb[22].mxu0 %vm606_vm1, %v26608_v60 }
  0xb6   : > { %21970 = vmatprep.mubr.msk.f32.mxu1 %vm606_vm1, %v26372_v24  ;;  %22191 = vmatprep.mubr.msk.f32.mxu0 %vm606_vm1, %v26610_v37  ;;  %v26649_v37 = vld [vmem:[#allocation2 + $0x18a] sm:$0xff] }
  0xb7   : > { %31383 = vst [vmem:[#allocation56_spill] sm:$0xff] %v26649_v37 }
  0xb9   : > { %21971 = vmatmul.mubr.msk.f32.gmra.mrb[10].mxu1 %vm606_vm1, %v26374_v1  ;;  %22192 = vmatmul.mubr.msk.f32.gmra.mrb[24].mxu0 %vm606_vm1, %v26620_v20  ;;  %v26642_v20 = vld [vmem:[#allocation2 + $0x180] sm:$0xff] }
  0xba   : > { %21973 = vmatprep.mubr.msk.f32.mxu1 %vm606_vm1, %v26399_v27  ;;  %22194 = vmatprep.mubr.msk.f32.mxu0 %vm606_vm1, %v26451_v0  ;;  %v26644_v0 = vld [vmem:[#allocation2 + $0x188] sm:$0xff] }
  0xbb   : > { %7972 = vst.msk [vmem:[#allocation2 + $0x181] sm:$0xff] %vm606_vm1, %v7940_v35  ;;  %v26674_v35 = vld [vmem:[#allocation2 + $0xf0] sm:$0xff] }
  0xbd   : > { %21974 = vmatmul.mubr.msk.f32.gmra.mrb[12].mxu1 %vm606_vm1, %v26401_v12  ;;  %22195 = vmatmul.mubr.msk.f32.gmra.mrb[26].mxu0 %vm606_vm1, %v26459_v7  ;;  %v26651_v7 = vld [vmem:[#allocation2 + $0x189] sm:$0xff] }
  0xbe   : > { %21976 = vmatprep.mubr.msk.f32.mxu1 %vm606_vm1, %v26409_v16  ;;  %22197 = vmatprep.mubr.msk.f32.mxu0 %vm606_vm1, %v26461_v13  ;;  %31384 = vst [vmem:[#allocation57_spill] sm:$0xff] %v26651_v7  ;;  %7973 = vst.msk [vmem:[#allocation2 + $0x189] sm:$0xff] %vm606_vm1, %v7941_v56  ;;  %v26672_v56 = vld [vmem:[#allocation2 + $0xe0] sm:$0xff]  ;;  %v26691_v7 = vld [vmem:[#allocation2 + $0x108] sm:$0xff] }
  0xc1   : > { %21977 = vmatmul.mubr.msk.f32.gmra.mrb[14].mxu1 %vm606_vm1, %v26411_v18  ;;  %22198 = vmatmul.mubr.msk.f32.gmra.mrb[28].mxu0 %vm606_vm1, %v26463_v25 }
  0xc2   : > { %21979 = vmatprep.mubr.msk.f32.mxu1 %vm606_vm1, %v26423_v31  ;;  %22200 = vmatprep.mubr.msk.f32.mxu0 %vm606_vm1, %v26635_v57  ;;  %v26689_v57 = vld [vmem:[#allocation2 + $0xf8] sm:$0xff] }
  0xc5   : > { %21980 = vmatmul.mubr.msk.f32.gmra.mrb[16].mxu1 %vm606_vm1, %v26429_v48  ;;  %22201 = vmatmul.mubr.msk.f32.gmra.mrb[30].mxu0 %vm606_vm1, %v26649_v37  ;;  %v26683_v37 = vld [vmem:[%s31033_s13 + $0x20] sm:$0xf] }
  0xc6   : > { %21982 = vmatprep.mubr.msk.f32.mxu1 %vm606_vm1, %v26662_v10  ;;  %22205 = vmatprep.mubr.msk.f32.mxu0 %vm606_vm1, %v26305_v4 }
  0xc9   : > { %21983 = vmatmul.mubr.msk.f32.gmra.mrb[18].mxu1 %vm606_vm1, %v26672_v56  ;;  %22206 = vmatmul.mubr.msk.f32.vlgmr.msra.gmra.mrb[0].mxu0 %vm606_vm1, %v26307_v6 }
  0xca   : > { %21985 = vmatprep.mubr.msk.f32.mxu1 %vm606_vm1, %v26674_v35  ;;  %22208 = vmatprep.mubr.msk.f32.mxu0 %vm606_vm1, %v26335_v43  ;;  %v26707_v43 = vld [vmem:[#allocation2 + $0x120] sm:$0xff] }
  0xcb   : > { %22254 = vmatpush3.msk.msra.mxu0 %vm999_vm0, %v26487_v59  ;;  %v26717_v59 = vld [vmem:[#allocation2 + $0x128] sm:$0xff] }
  0xcc   : > { %22303 = vmatprep.subr.msk.mxu0 %vm999_vm0, %v26683_v37 }
  0xcd   : > { %21986 = vmatmul.mubr.msk.f32.gmra.mrb[20].mxu1 %vm606_vm1, %v26689_v57  ;;  %22209 = vmatmul.mubr.msk.f32.gmra.mrb[2].mxu0 %vm606_vm1, %v26337_v47  ;;  %v26719_v47 = vld [vmem:[#allocation2 + $0x138] sm:$0xff] }
  0xce   : > { %21988 = vmatprep.mubr.msk.f32.mxu1 %vm606_vm1, %v26691_v7  ;;  %22211 = vmatprep.mubr.msk.f32.mxu0 %vm606_vm1, %v26364_v61  ;;  %v26731_v61 = vld [vmem:[#allocation2 + $0x150] sm:$0xff] }
  0xd1   : > { %21989 = vmatmul.mubr.msk.f32.gmra.mrb[22].mxu1 %vm606_vm1, %v26705_v11  ;;  %22212 = vmatmul.mubr.msk.f32.gmra.mrb[4].mxu0 %vm606_vm1, %v26366_v30  ;;  %v26729_v30 = vld [vmem:[#allocation2 + $0x140] sm:$0xff] }
  0xd2   : > { %21991 = vmatprep.mubr.msk.f32.mxu1 %vm606_vm1, %v26707_v43  ;;  %22214 = vmatprep.mubr.msk.f32.mxu0 %vm606_vm1, %v26372_v24 }
  0xd5   : > { %21992 = vmatmul.mubr.msk.f32.gmra.mrb[24].mxu1 %vm606_vm1, %v26717_v59  ;;  %22215 = vmatmul.mubr.msk.f32.gmra.mrb[6].mxu0 %vm606_vm1, %v26374_v1  ;;  %v1552_v1 = vld [vmem:[#allocation2 + $0x2] sm:$0xff] }
  0xd6   : > { %21994 = vmatprep.mubr.msk.f32.mxu1 %vm606_vm1, %v26719_v47  ;;  %22217 = vmatprep.mubr.msk.f32.mxu0 %vm606_vm1, %v26399_v27  ;;  %v7926_v27 = vmax.f32 %v26134_v49, 0.0  ;;  %v1553_v49 = vld [vmem:[#allocation2 + $0xa] sm:$0xff] }
  0xd9   : > { %21995 = vmatmul.mubr.msk.f32.gmra.mrb[26].mxu1 %vm606_vm1, %v26729_v30  ;;  %22218 = vmatmul.mubr.msk.f32.gmra.mrb[8].mxu0 %vm606_vm1, %v26401_v12  ;;  %v7927_v12 = vmax.f32 %v26137_v50, 0.0  ;;  %v7928_v50 = vmax.f32 %v26140_v51, 0.0  ;;  %v7931_v51 = vmax.f32 %v26170_v63, 0.0  ;;  %v7932_v63 = vmax.f32 %v26196_v14, 0.0  ;;  %v26805_v14 = vld [vmem:[#allocation2 + $0x121] sm:$0xff] }
  0xda   : > { %21997 = vmatprep.mubr.msk.f32.mxu1 %vm606_vm1, %v26731_v61  ;;  %22220 = vmatprep.mubr.msk.f32.mxu0 %vm606_vm1, %v26409_v16  ;;  %v26755_v16 = vld [vmem:[#allocation2 + $0xd9] sm:$0xff] }
  0xdb   : > { %7958 = vst.msk [vmem:[#allocation2 + $0xd9] sm:$0xff] %vm606_vm1, %v7926_v27  ;;  %v26774_v27 = vld [vmem:[#allocation2 + $0xf1] sm:$0xff]  ;;  %7964 = vst.msk [vmem:[#allocation2 + $0x121] sm:$0xff] %vm606_vm1, %v7932_v63  ;;  %v3144_v63 = vld [vmem:[#allocation2 + $0x1a0] sm:$0xff] }
  0xdc   : > { %7960 = vst.msk [vmem:[#allocation2 + $0xf1] sm:$0xff] %vm606_vm1, %v7928_v50  ;;  %v26829_v50 = vld [vmem:[#allocation2 + $0x141] sm:$0xff] }
  0xdd   : > { %21998 = vmatmul.mubr.msk.f32.gmra.mrb[28].mxu1 %vm606_vm1, %v26465_v9  ;;  %22221 = vmatmul.mubr.msk.f32.gmra.mrb[10].mxu0 %vm606_vm1, %v26411_v18  ;;  %v7929_v18 = vmax.f32 %v26148_v54, 0.0  ;;  %v26782_v54 = vld [vmem:[#allocation2 + $0xf9] sm:$0xff] }
  0xde   : > { %22000 = vmatprep.mubr.msk.f32.mxu1 %vm606_vm1, %v26467_v46  ;;  %22223 = vmatprep.mubr.msk.f32.mxu0 %vm606_vm1, %v26423_v31  ;;  %v26761_v31 = vld [vmem:[#allocation2 + $0xe1] sm:$0xff] }
  0xdf   : > { %7959 = vst.msk [vmem:[#allocation2 + $0xe1] sm:$0xff] %vm606_vm1, %v7927_v12  ;;  %7961 = vst.msk [vmem:[#allocation2 + $0xf9] sm:$0xff] %vm606_vm1, %v7929_v18  ;;  %v7933_v12 = vmax.f32 %v26207_v28, 0.0  ;;  %v26813_v28 = vld [vmem:[#allocation2 + $0x129] sm:$0xff] }
  0xe1   : > { %22001 = vmatmul.mubr.msk.f32.gmra.mrb[30].mxu1 %vm606_vm1, %v26469_v34  ;;  %22224 = vmatmul.mubr.msk.f32.gmra.mrb[12].mxu0 %vm606_vm1, %v26429_v48  ;;  %7965 = vst.msk [vmem:[#allocation2 + $0x129] sm:$0xff] %vm606_vm1, %v7933_v12  ;;  %v26873_v12 = vld [vmem:[%s26870_s25] sm:$0xff] }
  0xe2   : > { %22005 = vmatprep.mubr.msk.f32.mxu1 %vm606_vm1, %v1552_v1  ;;  %22226 = vmatprep.mubr.msk.f32.mxu0 %vm606_vm1, %v26662_v10  ;;  %v7930_v1 = vmax.f32 %v26167_v62, 0.0  ;;  %v26789_v62 = vld [vmem:[#allocation2 + $0x109] sm:$0xff]  ;;  %804 = vst.msk [vmem:[#allocation3 + $0x19] sm:$0xff] %vm606_vm1, %v26873_v12 }
  0xe4   : > { %7962 = vst.msk [vmem:[#allocation2 + $0x109] sm:$0xff] %vm606_vm1, %v7930_v1  ;;  %v26836_v1 = vld [vmem:[#allocation2 + $0x151] sm:$0xff] }
  0xe5   : > { %22006 = vmatmul.mubr.msk.f32.vlgmr.msra.gmra.mrb[0].mxu1 %vm606_vm1, %v1553_v49  ;;  %22227 = vmatmul.mubr.msk.f32.gmra.mrb[14].mxu0 %vm606_vm1, %v26672_v56 }
  0xe6   : > { %22054 = vmatpush3.msk.msra.mxu1 %vm999_vm0, %v26559_v5  ;;  %22008 = vmatprep.mubr.msk.f32.mxu1 %vm606_vm1, %v26247_v44  ;;  %v7934_v44 = vmax.f32 %v26210_v29, 0.0  ;;  %v26821_v29 = vld [vmem:[#allocation2 + $0x139] sm:$0xff] }
  0xe7   : > { %22229 = vmatprep.mubr.msk.f32.mxu0 %vm606_vm1, %v26674_v35  ;;  %24153 = vmatprep.subr.msk.mxu1 %vm999_vm0, %v25952_v3  ;;  %v26797_v3 = vld [vmem:[#allocation2 + $0x111] sm:$0xff] }
  0xe8   : > { %7963 = vst.msk [vmem:[#allocation2 + $0x111] sm:$0xff] %vm606_vm1, %v7931_v51  ;;  %v31386_v5 = vld [vmem:[#allocation15_spill] sm:$0xff]  ;;  %7966 = vst.msk [vmem:[#allocation2 + $0x139] sm:$0xff] %vm606_vm1, %v7934_v44  ;;  %v26878_v44 = vld [vmem:[%s26870_s25 + $0x8] sm:$0xff] }
  0xe9   : > { %22009 = vmatmul.mubr.msk.f32.gmra.mrb[2].mxu1 %vm606_vm1, %v26249_v45  ;;  %22230 = vmatmul.mubr.msk.f32.gmra.mrb[16].mxu0 %vm606_vm1, %v26689_v57  ;;  %v31385_v45 = vld [vmem:[#allocation13_spill] sm:$0xff]  ;;  %v7936_v49 = vmax.f32 %v31386_v5, 0.0  ;;  %v3143_v51 = vld [vmem:[#allocation2 + $0x198] sm:$0xff]  ;;  %31388 = vst [vmem:[#allocation15_spill] sm:$0xff] %v26873_v12  ;;  %31389 = vst [vmem:[#allocation58_spill] sm:$0xff] %v26878_v44 }
  0xea   : > { %22011 = vmatprep.mubr.msk.f32.mxu1 %vm606_vm1, %v26291_v23  ;;  %22232 = vmatprep.mubr.msk.f32.mxu0 %vm606_vm1, %v26691_v7  ;;  %v7935_v18 = vmax.f32 %v31385_v45, 0.0  ;;  %31387 = vst [vmem:[#allocation13_spill] sm:$0xff] %v26836_v1  ;;  %805 = vst.msk [vmem:[#allocation3 + $0x21] sm:$0xff] %vm606_vm1, %v26878_v44  ;;  %v31390_v45 = vld [vmem:[#allocation6_spill] sm:$0xff]  ;;  %v26895_v5 = vld [vmem:[%s26870_s25 + $0x18] sm:$0xff] }
  0xeb   : > { %7968 = vst.msk [vmem:[#allocation2 + $0x151] sm:$0xff] %vm606_vm1, %v7936_v49  ;;  %31392 = vst [vmem:[#allocation59_spill] sm:$0xff] %v26895_v5  ;;  %v31393_v49 = vld [vmem:[#allocation7_spill] sm:$0xff]  ;;  %v31410_v44 = vld [vmem:[#allocation53_spill] sm:$0xff] }
  0xec   : > { %7967 = vst.msk [vmem:[#allocation2 + $0x141] sm:$0xff] %vm606_vm1, %v7935_v18  ;;  %v26890_v18 = vld [vmem:[%s26870_s25 + $0x10] sm:$0xff]  ;;  %807 = vst.msk [vmem:[#allocation3 + $0x39] sm:$0xff] %vm606_vm1, %v26895_v5  ;;  %v31397_v5 = vld [vmem:[#allocation9_spill] sm:$0xff] }
  0xed   : > { %22012 = vmatmul.mubr.msk.f32.gmra.mrb[4].mxu1 %vm606_vm1, %v26303_v2  ;;  %22233 = vmatmul.mubr.msk.f32.gmra.mrb[18].mxu0 %vm606_vm1, %v26705_v11  ;;  %31391 = vst [vmem:[#allocation6_spill] sm:$0xff] %v26890_v18  ;;  %806 = vst.msk [vmem:[#allocation3 + $0x31] sm:$0xff] %vm606_vm1, %v26890_v18  ;;  %v26971_v18 = vld [vmem:[%s26870_s25 + $0x50] sm:$0xff]  ;;  %v26989_v12 = vld [vmem:[%s26870_s25 + $0x60] sm:$0xff] }
  0xee   : > { %22014 = vmatprep.mubr.msk.f32.mxu1 %vm606_vm1, %v26319_v15  ;;  %22235 = vmatprep.mubr.msk.f32.mxu0 %vm606_vm1, %v26707_v43  ;;  %814 = vst.msk [vmem:[#allocation3 + $0x91] sm:$0xff] %vm606_vm1, %v26971_v18  ;;  %816 = vst.msk [vmem:[#allocation3 + $0xa9] sm:$0xff] %vm606_vm1, %v26989_v12  ;;  %v31416_v1 = vld [vmem:[#allocation41_spill] sm:$0xff] }
  0xf1   : > { %22015 = vmatmul.mubr.msk.f32.gmra.mrb[6].mxu1 %vm606_vm1, %v26333_v42  ;;  %22236 = vmatmul.mubr.msk.f32.gmra.mrb[20].mxu0 %vm606_vm1, %v26717_v59 }
  0xf2   : > { %22017 = vmatprep.mubr.msk.f32.mxu1 %vm606_vm1, %v26345_v39  ;;  %22238 = vmatprep.mubr.msk.f32.mxu0 %vm606_vm1, %v26719_v47 }
  0xf5   : > { %22018 = vmatmul.mubr.msk.f32.gmra.mrb[8].mxu1 %vm606_vm1, %v26347_v52  ;;  %22239 = vmatmul.mubr.msk.f32.gmra.mrb[22].mxu0 %vm606_vm1, %v26729_v30 }
  0xf6   : > { %22020 = vmatprep.mubr.msk.f32.mxu1 %vm606_vm1, %v26362_v26  ;;  %22241 = vmatprep.mubr.msk.f32.mxu0 %vm606_vm1, %v26731_v61 }
  0xf9   : > { %22021 = vmatmul.mubr.msk.f32.gmra.mrb[10].mxu1 %vm606_vm1, %v26370_v22  ;;  %22242 = vmatmul.mubr.msk.f32.gmra.mrb[24].mxu0 %vm606_vm1, %v26465_v9 }
  0xfa   : > { %22023 = vmatprep.mubr.msk.f32.mxu1 %vm606_vm1, %v26381_v55  ;;  %22244 = vmatprep.mubr.msk.f32.mxu0 %vm606_vm1, %v26467_v46 }
  0xfd   : > { %22024 = vmatmul.mubr.msk.f32.gmra.mrb[12].mxu1 %vm606_vm1, %v26383_v41  ;;  %22245 = vmatmul.mubr.msk.f32.gmra.mrb[26].mxu0 %vm606_vm1, %v26469_v34 }
  0xfe   : > { %22026 = vmatprep.mubr.msk.f32.mxu1 %vm606_vm1, %v26396_v32  ;;  %22247 = vmatprep.mubr.msk.f32.mxu0 %vm606_vm1, %v26642_v20 }
 0x101   : > { %22027 = vmatmul.mubr.msk.f32.gmra.mrb[14].mxu1 %vm606_vm1, %v26407_v17  ;;  %22248 = vmatmul.mubr.msk.f32.gmra.mrb[28].mxu0 %vm606_vm1, %v26644_v0 }
 0x102   : > { %22029 = vmatprep.mubr.msk.f32.mxu1 %vm606_vm1, %v26415_v19  ;;  %22250 = vmatprep.mubr.msk.f32.mxu0 %vm606_vm1, %v3143_v51  ;;  %v26904_v51 = vld [vmem:[%s31034_s14 + $0x4] sm:$0xf] }
 0x105   : > { %22030 = vmatmul.mubr.msk.f32.gmra.mrb[16].mxu1 %vm606_vm1, %v26421_v53  ;;  %22251 = vmatmul.mubr.msk.f32.gmra.mrb[30].mxu0 %vm606_vm1, %v3144_v63  ;;  %v31394_v63 = vld [vmem:[#allocation8_spill] sm:$0xff] }
 0x106   : > { %22032 = vmatprep.mubr.msk.f32.mxu1 %vm606_vm1, %v26554_v33  ;;  %22255 = vmatprep.mubr.msk.f32.mxu0 %vm606_vm1, %v31390_v45  ;;  %v26915_v45 = vld [vmem:[%s26870_s25 + $0x20] sm:$0xff] }
 0x107   : > { %31395 = vst [vmem:[#allocation7_spill] sm:$0xff] %v26915_v45  ;;  %808 = vst.msk [vmem:[#allocation3 + $0x49] sm:$0xff] %vm606_vm1, %v26915_v45  ;;  %v26940_v45 = vld [vmem:[%s26870_s25 + $0x38] sm:$0xff] }
 0x108   : > { %811 = vst.msk [vmem:[#allocation3 + $0x69] sm:$0xff] %vm606_vm1, %v26940_v45 }
 0x109   : > { %22033 = vmatmul.mubr.msk.f32.gmra.mrb[18].mxu1 %vm606_vm1, %v26568_v38  ;;  %22256 = vmatmul.mubr.msk.f32.vlgmr.msra.gmra.mrb[0].mxu0 %vm606_vm1, %v31393_v49  ;;  %v26922_v49 = vld [vmem:[%s26870_s25 + $0x28] sm:$0xff] }
 0x10a   : > { %22035 = vmatprep.mubr.msk.f32.mxu1 %vm606_vm1, %v26572_v58  ;;  %22258 = vmatprep.mubr.msk.f32.mxu0 %vm606_vm1, %v31394_v63  ;;  %31396 = vst [vmem:[#allocation8_spill] sm:$0xff] %v26922_v49  ;;  %809 = vst.msk [vmem:[#allocation3 + $0x51] sm:$0xff] %vm606_vm1, %v26922_v49  ;;  %v26935_v63 = vld [vmem:[%s26870_s25 + $0x30] sm:$0xff]  ;;  %v26953_v49 = vld [vmem:[%s26870_s25 + $0x40] sm:$0xff] }
 0x10b   : > { %22304 = vmatpush3.msk.msra.mxu0 %vm999_vm0, %v26683_v37  ;;  %v31398_v37 = vld [vmem:[#allocation10_spill] sm:$0xff]  ;;  %31399 = vst [vmem:[#allocation9_spill] sm:$0xff] %v26935_v63  ;;  %810 = vst.msk [vmem:[#allocation3 + $0x61] sm:$0xff] %vm606_vm1, %v26935_v63  ;;  %v26958_v63 = vld [vmem:[%s26870_s25 + $0x48] sm:$0xff] }
 0x10c   : > { %22353 = vmatprep.subr.msk.mxu0 %vm999_vm0, %v26904_v51  ;;  %31400 = vst [vmem:[#allocation10_spill] sm:$0xff] %v26940_v45  ;;  %812 = vst.msk [vmem:[#allocation3 + $0x79] sm:$0xff] %vm606_vm1, %v26953_v49  ;;  %v31406_v45 = vld [vmem:[#allocation52_spill] sm:$0xff] }
 0x10d   : > { %22036 = vmatmul.mubr.msk.f32.gmra.mrb[20].mxu1 %vm606_vm1, %v26584_v8  ;;  %22259 = vmatmul.mubr.msk.f32.gmra.mrb[2].mxu0 %vm606_vm1, %v31397_v5  ;;  %v31401_v5 = vld [vmem:[#allocation11_spill] sm:$0xff]  ;;  %813 = vst.msk [vmem:[#allocation3 + $0x81] sm:$0xff] %vm606_vm1, %v26958_v63 }
 0x10e   : > { %22038 = vmatprep.mubr.msk.f32.mxu1 %vm606_vm1, %v26586_v21  ;;  %22261 = vmatprep.mubr.msk.f32.mxu0 %vm606_vm1, %v31398_v37  ;;  %v31402_v37 = vld [vmem:[#allocation12_spill] sm:$0xff]  ;;  %31403 = vst [vmem:[#allocation11_spill] sm:$0xff] %v26953_v49  ;;  %v26976_v49 = vld [vmem:[%s26870_s25 + $0x58] sm:$0xff] }
 0x10f   : > { %31404 = vst [vmem:[#allocation12_spill] sm:$0xff] %v26958_v63  ;;  %31409 = vst [vmem:[#allocation52_spill] sm:$0xff] %v26976_v49  ;;  %v31412_v63 = vld [vmem:[#allocation40_spill] sm:$0xff] }
 0x110   : > { %815 = vst.msk [vmem:[#allocation3 + $0x99] sm:$0xff] %vm606_vm1, %v26976_v49  ;;  %v27007_v49 = vld [vmem:[%s26870_s25 + $0x70] sm:$0xff] }
 0x111   : > { %22039 = vmatmul.mubr.msk.f32.gmra.mrb[22].mxu1 %vm606_vm1, %v26596_v40  ;;  %22262 = vmatmul.mubr.msk.f32.gmra.mrb[4].mxu0 %vm606_vm1, %v31401_v5  ;;  %v31405_v5 = vld [vmem:[#allocation14_spill] sm:$0xff]  ;;  %818 = vst.msk [vmem:[#allocation3 + $0xc1] sm:$0xff] %vm606_vm1, %v27007_v49 }
 0x112   : > { %22041 = vmatprep.mubr.msk.f32.mxu1 %vm606_vm1, %v26598_v36  ;;  %22264 = vmatprep.mubr.msk.f32.mxu0 %vm606_vm1, %v31402_v37  ;;  %v31407_v37 = vld [vmem:[#allocation16_spill] sm:$0xff]  ;;  %31408 = vst [vmem:[#allocation14_spill] sm:$0xff] %v26971_v18  ;;  %v26994_v18 = vld [vmem:[%s26870_s25 + $0x68] sm:$0xff] }
 0x113   : > { %31414 = vst [vmem:[#allocation16_spill] sm:$0xff] %v26989_v12  ;;  %31415 = vst [vmem:[#allocation53_spill] sm:$0xff] %v26994_v18  ;;  %v27012_v12 = vld [vmem:[%s26870_s25 + $0x78] sm:$0xff] }
 0x114   : > { %817 = vst.msk [vmem:[#allocation3 + $0xb1] sm:$0xff] %vm606_vm1, %v26994_v18  ;;  %31420 = vst [vmem:[#allocation40_spill] sm:$0xff] %v27012_v12  ;;  %v31422_v18 = vld [vmem:[#allocation17_spill] sm:$0xff] }
 0x115   : > { %22042 = vmatmul.mubr.msk.f32.gmra.mrb[24].mxu1 %vm606_vm1, %v26608_v60  ;;  %22265 = vmatmul.mubr.msk.f32.gmra.mrb[6].mxu0 %vm606_vm1, %v31405_v5  ;;  %v31411_v5 = vld [vmem:[#allocation19_spill] sm:$0xff]  ;;  %819 = vst.msk [vmem:[#allocation3 + $0xc9] sm:$0xff] %vm606_vm1, %v27012_v12  ;;  %v31426_v12 = vld [vmem:[#allocation18_spill] sm:$0xff] }
 0x116   : > { %22044 = vmatprep.mubr.msk.f32.mxu1 %vm606_vm1, %v31406_v45  ;;  %22267 = vmatprep.mubr.msk.f32.mxu0 %vm606_vm1, %v31407_v37  ;;  %v31413_v37 = vld [vmem:[#allocation20_spill] sm:$0xff]  ;;  %31419 = vst [vmem:[#allocation19_spill] sm:$0xff] %v27007_v49 }
 0x117   : > { %v27025_v49 = vld [vmem:[%s26870_s25 + $0x80] sm:$0xff] }
 0x118   : > { %31424 = vst [vmem:[#allocation20_spill] sm:$0xff] %v27025_v49  ;;  %820 = vst.msk [vmem:[#allocation3 + $0xd9] sm:$0xff] %vm606_vm1, %v27025_v49  ;;  %v31428_v49 = vld [vmem:[#allocation36_spill] sm:$0xff] }
 0x119   : > { %22045 = vmatmul.mubr.msk.f32.gmra.mrb[26].mxu1 %vm606_vm1, %v31410_v44  ;;  %22268 = vmatmul.mubr.msk.f32.gmra.mrb[8].mxu0 %vm606_vm1, %v31411_v5  ;;  %v31417_v5 = vld [vmem:[#allocation21_spill] sm:$0xff] }
 0x11a   : > { %22047 = vmatprep.mubr.msk.f32.mxu1 %vm606_vm1, %v31412_v63  ;;  %22270 = vmatprep.mubr.msk.f32.mxu0 %vm606_vm1, %v31413_v37  ;;  %v31418_v37 = vld [vmem:[#allocation24_spill] sm:$0xff] }
 0x11d   : > { %22048 = vmatmul.mubr.msk.f32.gmra.mrb[28].mxu1 %vm606_vm1, %v31416_v1  ;;  %22271 = vmatmul.mubr.msk.f32.gmra.mrb[10].mxu0 %vm606_vm1, %v31417_v5  ;;  %v31421_v5 = vld [vmem:[#allocation28_spill] sm:$0xff] }
 0x11e   : > { %22050 = vmatprep.mubr.msk.f32.mxu1 %vm606_vm1, %v26461_v13  ;;  %22273 = vmatprep.mubr.msk.f32.mxu0 %vm606_vm1, %v31418_v37  ;;  %v31423_v37 = vld [vmem:[#allocation29_spill] sm:$0xff]  ;;  %v3533_v13 = vld [vmem:[#allocation2 + $0x199] sm:$0xff] }
 0x121   : > { %22051 = vmatmul.mubr.msk.f32.gmra.mrb[30].mxu1 %vm606_vm1, %v26463_v25  ;;  %22274 = vmatmul.mubr.msk.f32.gmra.mrb[12].mxu0 %vm606_vm1, %v31421_v5  ;;  %v27030_v25 = vld [vmem:[%s31026_s6 + $0x4] sm:$0xf]  ;;  %v27035_v5 = vld [vmem:[%s26870_s25 + $0x88] sm:$0xff] }
 0x122   : > { %22055 = vmatprep.mubr.msk.f32.mxu1 %vm606_vm1, %v31422_v18  ;;  %22276 = vmatprep.mubr.msk.f32.mxu0 %vm606_vm1, %v31423_v37  ;;  %31425 = vst [vmem:[#allocation41_spill] sm:$0xff] %v27035_v5  ;;  %v31427_v18 = vld [vmem:[#allocation35_spill] sm:$0xff]  ;;  %821 = vst.msk [vmem:[#allocation3 + $0xe1] sm:$0xff] %vm606_vm1, %v27035_v5  ;;  %v25508_v37 = vld [vmem:[%s31033_s13 + $0x10] sm:$0xf] }
 0x123   : > { %v27072_v5 = vld [vmem:[%s26870_s25 + $0xa0] sm:$0xff] }
 0x124   : > { %31434 = vst [vmem:[#allocation28_spill] sm:$0xff] %v27072_v5  ;;  %824 = vst.msk [vmem:[#allocation3 + $0x109] sm:$0xff] %vm606_vm1, %v27072_v5  ;;  %v27095_v5 = vld [vmem:[%s26870_s25 + $0xb8] sm:$0xff] }
 0x125   : > { %22056 = vmatmul.mubr.msk.f32.vlgmr.msra.gmra.mrb[0].mxu1 %vm606_vm1, %v31426_v12  ;;  %22277 = vmatmul.mubr.msk.f32.gmra.mrb[14].mxu0 %vm606_vm1, %v31427_v18  ;;  %v27054_v12 = vld [vmem:[%s26870_s25 + $0x90] sm:$0xff]  ;;  %v27059_v18 = vld [vmem:[%s26870_s25 + $0x98] sm:$0xff]  ;;  %31441 = vst [vmem:[#allocation18_spill] sm:$0xff] %v27095_v5  ;;  %827 = vst.msk [vmem:[#allocation3 + $0x129] sm:$0xff] %vm606_vm1, %v27095_v5 }
 0x126   : > { %24154 = vmatpush3.msk.msra.mxu1 %vm999_vm0, %v25508_v37  ;;  %22058 = vmatprep.mubr.msk.f32.mxu1 %vm606_vm1, %v26305_v4  ;;  %31429 = vst [vmem:[#allocation21_spill] sm:$0xff] %v27054_v12  ;;  %822 = vst.msk [vmem:[#allocation3 + $0xf1] sm:$0xff] %vm606_vm1, %v27054_v12  ;;  %v31431_v37 = vld [vmem:[#allocation44_spill] sm:$0xff]  ;;  %v31432_v4 = vld [vmem:[#allocation22_spill] sm:$0xff] }
 0x127   : > { %22279 = vmatprep.mubr.msk.f32.mxu0 %vm606_vm1, %v31428_v49  ;;  %22803 = vmatprep.subr.msk.mxu1 %vm999_vm0, %v27030_v25  ;;  %31430 = vst [vmem:[#allocation24_spill] sm:$0xff] %v27059_v18  ;;  %823 = vst.msk [vmem:[#allocation3 + $0xf9] sm:$0xff] %vm606_vm1, %v27059_v18  ;;  %v31433_v49 = vld [vmem:[#allocation45_spill] sm:$0xff]  ;;  %v27090_v18 = vld [vmem:[%s26870_s25 + $0xb0] sm:$0xff] }
 0x128   : > { %v27077_v12 = vld [vmem:[%s26870_s25 + $0xa8] sm:$0xff]  ;;  %31440 = vst [vmem:[#allocation29_spill] sm:$0xff] %v27090_v18  ;;  %826 = vst.msk [vmem:[#allocation3 + $0x121] sm:$0xff] %vm606_vm1, %v27090_v18  ;;  %v27126_v5 = vld [vmem:[%s26870_s25 + $0xd0] sm:$0xff] }
 0x129   : > { %22059 = vmatmul.mubr.msk.f32.gmra.mrb[2].mxu1 %vm606_vm1, %v26307_v6  ;;  %22280 = vmatmul.mubr.msk.f32.gmra.mrb[16].mxu0 %vm606_vm1, %v31431_v37  ;;  %31435 = vst [vmem:[#allocation17_spill] sm:$0xff] %v27077_v12  ;;  %v31436_v6 = vld [vmem:[#allocation23_spill] sm:$0xff]  ;;  %v31437_v37 = vld [vmem:[#allocation46_spill] sm:$0xff]  ;;  %825 = vst.msk [vmem:[#allocation3 + $0x111] sm:$0xff] %vm606_vm1, %v27077_v12 }
 0x12a   : > { %22061 = vmatprep.mubr.msk.f32.mxu1 %vm606_vm1, %v31432_v4  ;;  %22282 = vmatprep.mubr.msk.f32.mxu0 %vm606_vm1, %v31433_v49  ;;  %v31438_v4 = vld [vmem:[#allocation25_spill] sm:$0xff]  ;;  %v31439_v49 = vld [vmem:[#allocation47_spill] sm:$0xff]  ;;  %31451 = vst [vmem:[#allocation44_spill] sm:$0xff] %v27126_v5  ;;  %830 = vst.msk [vmem:[#allocation3 + $0x151] sm:$0xff] %vm606_vm1, %v27126_v5 }
 0x12b   : > { %v27113_v18 = vld [vmem:[%s26870_s25 + $0xc8] sm:$0xff]  ;;  %v31460_v12 = vld [vmem:[#allocation39_spill] sm:$0xff] }
 0x12c   : > { %31446 = vst [vmem:[#allocation36_spill] sm:$0xff] %v27113_v18  ;;  %829 = vst.msk [vmem:[#allocation3 + $0x141] sm:$0xff] %vm606_vm1, %v27113_v18  ;;  %v27144_v18 = vld [vmem:[%s26870_s25 + $0xe0] sm:$0xff]  ;;  %v27149_v5 = vld [vmem:[%s26870_s25 + $0xe8] sm:$0xff] }
 0x12d   : > { %22062 = vmatmul.mubr.msk.f32.gmra.mrb[4].mxu1 %vm606_vm1, %v31436_v6  ;;  %22283 = vmatmul.mubr.msk.f32.gmra.mrb[18].mxu0 %vm606_vm1, %v31437_v37  ;;  %v31442_v6 = vld [vmem:[#allocation26_spill] sm:$0xff]  ;;  %v31443_v37 = vld [vmem:[#allocation48_spill] sm:$0xff]  ;;  %31457 = vst [vmem:[#allocation45_spill] sm:$0xff] %v27144_v18  ;;  %832 = vst.msk [vmem:[#allocation3 + $0x169] sm:$0xff] %vm606_vm1, %v27144_v18 }
 0x12e   : > { %22064 = vmatprep.mubr.msk.f32.mxu1 %vm606_vm1, %v31438_v4  ;;  %22285 = vmatprep.mubr.msk.f32.mxu0 %vm606_vm1, %v31439_v49  ;;  %v31444_v4 = vld [vmem:[#allocation49_spill] sm:$0xff]  ;;  %v27108_v49 = vld [vmem:[%s26870_s25 + $0xc0] sm:$0xff]  ;;  %31458 = vst [vmem:[#allocation23_spill] sm:$0xff] %v27149_v5  ;;  %833 = vst.msk [vmem:[#allocation3 + $0x171] sm:$0xff] %vm606_vm1, %v27149_v5 }
 0x12f   : > { %31445 = vst [vmem:[#allocation35_spill] sm:$0xff] %v27108_v49  ;;  %828 = vst.msk [vmem:[#allocation3 + $0x139] sm:$0xff] %vm606_vm1, %v27108_v49  ;;  %v27131_v49 = vld [vmem:[%s26870_s25 + $0xd8] sm:$0xff]  ;;  %v31463_v18 = vld [vmem:[#allocation57_spill] sm:$0xff] }
 0x130   : > { %31452 = vst [vmem:[#allocation22_spill] sm:$0xff] %v27131_v49  ;;  %831 = vst.msk [vmem:[#allocation3 + $0x159] sm:$0xff] %vm606_vm1, %v27131_v49  ;;  %v31462_v49 = vld [vmem:[#allocation55_spill] sm:$0xff]  ;;  %v31482_v5 = vld [vmem:[#allocation58_spill] sm:$0xff] }
 0x131   : > { %22065 = vmatmul.mubr.msk.f32.gmra.mrb[6].mxu1 %vm606_vm1, %v31442_v6  ;;  %22286 = vmatmul.mubr.msk.f32.gmra.mrb[20].mxu0 %vm606_vm1, %v31443_v37  ;;  %v31447_v6 = vld [vmem:[#allocation27_spill] sm:$0xff]  ;;  %v31448_v37 = vld [vmem:[#allocation50_spill] sm:$0xff] }
 0x132   : > { %22067 = vmatprep.mubr.msk.f32.mxu1 %vm606_vm1, %v26372_v24  ;;  %22288 = vmatprep.mubr.msk.f32.mxu0 %vm606_vm1, %v31444_v4  ;;  %v31449_v24 = vld [vmem:[#allocation30_spill] sm:$0xff]  ;;  %v31450_v4 = vld [vmem:[#allocation51_spill] sm:$0xff] }
 0x135   : > { %22068 = vmatmul.mubr.msk.f32.gmra.mrb[8].mxu1 %vm606_vm1, %v31447_v6  ;;  %22289 = vmatmul.mubr.msk.f32.gmra.mrb[22].mxu0 %vm606_vm1, %v31448_v37  ;;  %v31453_v6 = vld [vmem:[#allocation31_spill] sm:$0xff]  ;;  %v31454_v37 = vld [vmem:[#allocation37_spill] sm:$0xff] }
 0x136   : > { %22070 = vmatprep.mubr.msk.f32.mxu1 %vm606_vm1, %v31449_v24  ;;  %22291 = vmatprep.mubr.msk.f32.mxu0 %vm606_vm1, %v31450_v4  ;;  %v31455_v24 = vld [vmem:[#allocation32_spill] sm:$0xff]  ;;  %v31456_v4 = vld [vmem:[#allocation38_spill] sm:$0xff] }
 0x139   : > { %22071 = vmatmul.mubr.msk.f32.gmra.mrb[10].mxu1 %vm606_vm1, %v31453_v6  ;;  %22292 = vmatmul.mubr.msk.f32.gmra.mrb[24].mxu0 %vm606_vm1, %v31454_v37  ;;  %v31459_v6 = vld [vmem:[#allocation33_spill] sm:$0xff] }
 0x13a   : > { %22073 = vmatprep.mubr.msk.f32.mxu1 %vm606_vm1, %v31455_v24  ;;  %22294 = vmatprep.mubr.msk.f32.mxu0 %vm606_vm1, %v31456_v4  ;;  %v31461_v24 = vld [vmem:[#allocation34_spill] sm:$0xff] }
 0x13d   : > { %22074 = vmatmul.mubr.msk.f32.gmra.mrb[12].mxu1 %vm606_vm1, %v31459_v6  ;;  %22295 = vmatmul.mubr.msk.f32.gmra.mrb[26].mxu0 %vm606_vm1, %v31460_v12  ;;  %v3534_v6 = vld [vmem:[#allocation2 + $0x1a1] sm:$0xff] }
 0x13e   : > { %22076 = vmatprep.mubr.msk.f32.mxu1 %vm606_vm1, %v31461_v24  ;;  %22297 = vmatprep.mubr.msk.f32.mxu0 %vm606_vm1, %v31462_v49  ;;  %v4340_v24 = vld [vmem:[#allocation3 + $0x121] sm:$0xff] }
 0x141   : > { %22077 = vmatmul.mubr.msk.f32.gmra.mrb[14].mxu1 %vm606_vm1, %v26429_v48  ;;  %22298 = vmatmul.mubr.msk.f32.gmra.mrb[28].mxu0 %vm606_vm1, %v31463_v18  ;;  %v27182_v48 = vld [vmem:[%s31034_s14] sm:$0xf] }
 0x142   : > { %22079 = vmatprep.mubr.msk.f32.mxu1 %vm606_vm1, %v26662_v10  ;;  %22300 = vmatprep.mubr.msk.f32.mxu0 %vm606_vm1, %v3533_v13  ;;  %v4324_v13 = vld [vmem:[#allocation3 + $0x61] sm:$0xff]  ;;  %v4329_v10 = vld [vmem:[#allocation3 + $0x99] sm:$0xff] }
 0x145   : > { %22080 = vmatmul.mubr.msk.f32.gmra.mrb[16].mxu1 %vm606_vm1, %v26672_v56  ;;  %22301 = vmatmul.mubr.msk.f32.gmra.mrb[30].mxu0 %vm606_vm1, %v3534_v6  ;;  %v8164_v56 = vld [vmem:[#allocation2 + $0xb1] sm:$0xff]  ;;  %v8175_v6 = vld [vmem:[#allocation2 + $0x139] sm:$0xff] }
 0x146   : > { %22082 = vmatprep.mubr.msk.f32.mxu1 %vm606_vm1, %v26674_v35  ;;  %22305 = vmatprep.mubr.msk.f32.mxu0 %vm606_vm1, %v26291_v23  ;;  %v31468_v23 = vld [vmem:[#allocation56_spill] sm:$0xff] }
 0x147   : > { %v4330_v35 = vld [vmem:[#allocation3 + $0xa9] sm:$0xff] }
 0x149   : > { %22083 = vmatmul.mubr.msk.f32.gmra.mrb[18].mxu1 %vm606_vm1, %v26689_v57  ;;  %22306 = vmatmul.mubr.msk.f32.vlgmr.msra.gmra.mrb[0].mxu0 %vm606_vm1, %v26303_v2  ;;  %v3923_v57 = vld [vmem:[#allocation2 + $0x19a] sm:$0xff]  ;;  %v3924_v2 = vld [vmem:[#allocation2 + $0x1a2] sm:$0xff] }
 0x14a   : > { %22085 = vmatprep.mubr.msk.f32.mxu1 %vm606_vm1, %v26691_v7  ;;  %22308 = vmatprep.mubr.msk.f32.mxu0 %vm606_vm1, %v26319_v15  ;;  %v8150_v15 = vld [vmem:[#allocation2 + $0x9] sm:$0xff] }
 0x14b   : > { %22354 = vmatpush3.msk.msra.mxu0 %vm999_vm0, %v26904_v51  ;;  %v8158_v7 = vld [vmem:[#allocation2 + $0x69] sm:$0xff]  ;;  %v4336_v51 = vld [vmem:[#allocation3 + $0xf1] sm:$0xff] }
 0x14c   : > { %22403 = vmatprep.subr.msk.mxu0 %vm999_vm0, %v27182_v48 }
 0x14d   : > { %22086 = vmatmul.mubr.msk.f32.gmra.mrb[20].mxu1 %vm606_vm1, %v26705_v11  ;;  %22309 = vmatmul.mubr.msk.f32.gmra.mrb[2].mxu0 %vm606_vm1, %v26333_v42  ;;  %v8151_v42 = vld [vmem:[#allocation2 + $0x19] sm:$0xff]  ;;  %v8163_v11 = vld [vmem:[#allocation2 + $0xa9] sm:$0xff] }
 0x14e   : > { %22088 = vmatprep.mubr.msk.f32.mxu1 %vm606_vm1, %v26707_v43  ;;  %22311 = vmatprep.mubr.msk.f32.mxu0 %vm606_vm1, %v26345_v39  ;;  %v27311_v43 = vld [vmem:[%s31026_s6 + $0x8] sm:$0xf] }
 0x14f   : > { %v4318_v39 = vld [vmem:[#allocation3 + $0x19] sm:$0xff] }
 0x151   : > { %22089 = vmatmul.mubr.msk.f32.gmra.mrb[22].mxu1 %vm606_vm1, %v26717_v59  ;;  %22312 = vmatmul.mubr.msk.f32.gmra.mrb[4].mxu0 %vm606_vm1, %v26347_v52  ;;  %v8153_v52 = vld [vmem:[#allocation2 + $0x31] sm:$0xff]  ;;  %v8165_v59 = vld [vmem:[#allocation2 + $0xc1] sm:$0xff] }
 0x152   : > { %22091 = vmatprep.mubr.msk.f32.mxu1 %vm606_vm1, %v26719_v47  ;;  %22314 = vmatprep.mubr.msk.f32.mxu0 %vm606_vm1, %v26362_v26  ;;  %v4317_v47 = vld [vmem:[#allocation3 + $0x9] sm:$0xff]  ;;  %v27325_v26 = vld [vmem:[%s31034_s14 + $0x8] sm:$0xf] }
 0x155   : > { %22092 = vmatmul.mubr.msk.f32.gmra.mrb[24].mxu1 %vm606_vm1, %v26729_v30  ;;  %22315 = vmatmul.mubr.msk.f32.gmra.mrb[6].mxu0 %vm606_vm1, %v26370_v22  ;;  %v8154_v30 = vld [vmem:[#allocation2 + $0x39] sm:$0xff]  ;;  %v4320_v22 = vld [vmem:[#allocation3 + $0x31] sm:$0xff] }
 0x156   : > { %22094 = vmatprep.mubr.msk.f32.mxu1 %vm606_vm1, %v26731_v61  ;;  %22317 = vmatprep.mubr.msk.f32.mxu0 %vm606_vm1, %v26381_v55  ;;  %v31467_v55 = vld [vmem:[#allocation54_spill] sm:$0xff] }
 0x157   : > { %v4319_v61 = vld [vmem:[#allocation3 + $0x21] sm:$0xff] }
 0x159   : > { %22095 = vmatmul.mubr.msk.f32.gmra.mrb[26].mxu1 %vm606_vm1, %v26465_v9  ;;  %22318 = vmatmul.mubr.msk.f32.gmra.mrb[8].mxu0 %vm606_vm1, %v26383_v41  ;;  %v31465_v41 = vld [vmem:[#allocation42_spill] sm:$0xff] }
 0x15a   : > { %22097 = vmatprep.mubr.msk.f32.mxu1 %vm606_vm1, %v26467_v46  ;;  %22320 = vmatprep.mubr.msk.f32.mxu0 %vm606_vm1, %v26396_v32  ;;  %v31466_v46 = vld [vmem:[#allocation43_spill] sm:$0xff]  ;;  %v8155_v9 = vld [vmem:[#allocation2 + $0x49] sm:$0xff] }
 0x15b   : > { %v4321_v32 = vld [vmem:[#allocation3 + $0x39] sm:$0xff] }
 0x15d   : > { %22098 = vmatmul.mubr.msk.f32.gmra.mrb[28].mxu1 %vm606_vm1, %v26469_v34  ;;  %22321 = vmatmul.mubr.msk.f32.gmra.mrb[10].mxu0 %vm606_vm1, %v26407_v17  ;;  %v8148_v34 = vld [vmem:[%s31026_s6] sm:$0xf]  ;;  %v8156_v17 = vld [vmem:[#allocation2 + $0x51] sm:$0xff] }
 0x15e   : > { %22100 = vmatprep.mubr.msk.f32.mxu1 %vm606_vm1, %v26642_v20  ;;  %22323 = vmatprep.mubr.msk.f32.mxu0 %vm606_vm1, %v26415_v19  ;;  %v4322_v19 = vld [vmem:[#allocation3 + $0x49] sm:$0xff]  ;;  %v8157_v20 = vld [vmem:[#allocation2 + $0x61] sm:$0xff] }
 0x161   : > { %22101 = vmatmul.mubr.msk.f32.gmra.mrb[30].mxu1 %vm606_vm1, %v26644_v0  ;;  %22324 = vmatmul.mubr.msk.f32.gmra.mrb[12].mxu0 %vm606_vm1, %v26421_v53  ;;  %v31464_v53 = vld [vmem:[#allocation13_spill] sm:$0xff] }
 0x162   : > { %22129 = vmatprep.mubr.msk.f32.mxu1 %vm606_vm1, %v26755_v16  ;;  %22326 = vmatprep.mubr.msk.f32.mxu0 %vm606_vm1, %v26554_v33  ;;  %v8149_v0 = vld [vmem:[#allocation2 + $0x1] sm:$0xff]  ;;  %v4316_v16 = vld [vmem:[#allocation3 + $0x1] sm:$0xff] }
 0x163   : > { %v8160_v33 = vld [vmem:[#allocation2 + $0x81] sm:$0xff] }
 0x165   : > { %22130 = vmatmul.mubr.msk.f32.vlgmr.msra.gmra.mrb[16].mxu1 %vm606_vm1, %v26761_v31  ;;  %22327 = vmatmul.mubr.msk.f32.gmra.mrb[14].mxu0 %vm606_vm1, %v26568_v38  ;;  %v8152_v31 = vld [vmem:[#allocation2 + $0x21] sm:$0xff]  ;;  %v4327_v38 = vld [vmem:[#allocation3 + $0x81] sm:$0xff] }
 0x166   : > { %22804 = vmatpush3.msk.msra.mxu1 %vm999_vm0, %v27030_v25  ;;  %22132 = vmatprep.mubr.msk.f32.mxu1 %vm606_vm1, %v26774_v27  ;;  %v8159_v25 = vld [vmem:[#allocation2 + $0x79] sm:$0xff]  ;;  %v4331_v27 = vld [vmem:[#allocation3 + $0xb1] sm:$0xff] }
 0x167   : > { %22329 = vmatprep.mubr.msk.f32.mxu0 %vm606_vm1, %v26572_v58  ;;  %22853 = vmatprep.subr.msk.mxu1 %vm999_vm0, %v8148_v34  ;;  %v4323_v58 = vld [vmem:[#allocation3 + $0x51] sm:$0xff] }
 0x169   : > { %22133 = vmatmul.mubr.msk.f32.gmra.mrb[18].mxu1 %vm606_vm1, %v26782_v54  ;;  %22330 = vmatmul.mubr.msk.f32.gmra.mrb[16].mxu0 %vm606_vm1, %v26584_v8  ;;  %v8162_v8 = vld [vmem:[#allocation2 + $0x99] sm:$0xff]  ;;  %v8166_v54 = vld [vmem:[#allocation2 + $0xc9] sm:$0xff] }
 0x16a   : > { %22135 = vmatprep.mubr.msk.f32.mxu1 %vm606_vm1, %v26789_v62  ;;  %22332 = vmatprep.mubr.msk.f32.mxu0 %vm606_vm1, %v26586_v21  ;;  %v4328_v21 = vld [vmem:[#allocation3 + $0x91] sm:$0xff]  ;;  %v4332_v62 = vld [vmem:[#allocation3 + $0xc1] sm:$0xff] }
 0x16d   : > { %22136 = vmatmul.mubr.msk.f32.gmra.mrb[20].mxu1 %vm606_vm1, %v26797_v3  ;;  %22333 = vmatmul.mubr.msk.f32.gmra.mrb[18].mxu0 %vm606_vm1, %v26596_v40  ;;  %v8161_v40 = vld [vmem:[#allocation2 + $0x91] sm:$0xff]  ;;  %v8167_v3 = vld [vmem:[#allocation2 + $0xd9] sm:$0xff] }
 0x16e   : > { %22138 = vmatprep.mubr.msk.f32.mxu1 %vm606_vm1, %v26805_v14  ;;  %22335 = vmatprep.mubr.msk.f32.mxu0 %vm606_vm1, %v26598_v36  ;;  %v4326_v36 = vld [vmem:[#allocation3 + $0x79] sm:$0xff]  ;;  %v4333_v14 = vld [vmem:[#allocation3 + $0xc9] sm:$0xff] }
 0x171   : > { %22139 = vmatmul.mubr.msk.f32.gmra.mrb[22].mxu1 %vm606_vm1, %v26813_v28  ;;  %22336 = vmatmul.mubr.msk.f32.gmra.mrb[20].mxu0 %vm606_vm1, %v26608_v60  ;;  %v4325_v60 = vld [vmem:[#allocation3 + $0x69] sm:$0xff]  ;;  %v8168_v28 = vld [vmem:[#allocation2 + $0xe1] sm:$0xff] }
 0x172   : > { %22141 = vmatprep.mubr.msk.f32.mxu1 %vm606_vm1, %v26821_v29  ;;  %22338 = vmatprep.mubr.msk.f32.mxu0 %vm606_vm1, %v31406_v45  ;;  %v4334_v29 = vld [vmem:[#allocation3 + $0xd9] sm:$0xff] }
 0x173   : > { %v8171_v45 = vld [vmem:[#allocation2 + $0x109] sm:$0xff] }
 0x175   : > { %22142 = vmatmul.mubr.msk.f32.gmra.mrb[24].mxu1 %vm606_vm1, %v26829_v50  ;;  %22339 = vmatmul.mubr.msk.f32.gmra.mrb[22].mxu0 %vm606_vm1, %v31410_v44  ;;  %v8169_v50 = vld [vmem:[#allocation2 + $0xf1] sm:$0xff]  ;;  %v8170_v44 = vld [vmem:[#allocation2 + $0xf9] sm:$0xff] }
 0x176   : > { %22144 = vmatprep.mubr.msk.f32.mxu1 %vm606_vm1, %v31464_v53  ;;  %22341 = vmatprep.mubr.msk.f32.mxu0 %vm606_vm1, %v31412_v63  ;;  %v4337_v63 = vld [vmem:[#allocation3 + $0xf9] sm:$0xff] }
 0x177   : > { %v4342_v53 = vld [vmem:[#allocation3 + $0x139] sm:$0xff] }
 0x179   : > { %22145 = vmatmul.mubr.msk.f32.gmra.mrb[26].mxu1 %vm606_vm1, %v31454_v37  ;;  %22342 = vmatmul.mubr.msk.f32.gmra.mrb[24].mxu0 %vm606_vm1, %v31416_v1  ;;  %v4335_v1 = vld [vmem:[#allocation3 + $0xe1] sm:$0xff]  ;;  %v4339_v37 = vld [vmem:[#allocation3 + $0x111] sm:$0xff] }
 0x17a   : > { %22147 = vmatprep.mubr.msk.f32.mxu1 %vm606_vm1, %v31456_v4  ;;  %22344 = vmatprep.mubr.msk.f32.mxu0 %vm606_vm1, %v31465_v41  ;;  %v8174_v4 = vld [vmem:[#allocation2 + $0x129] sm:$0xff]  ;;  %v8177_v41 = vld [vmem:[#allocation2 + $0x151] sm:$0xff] }
 0x17d   : > { %22148 = vmatmul.mubr.msk.f32.gmra.mrb[28].mxu1 %vm606_vm1, %v31460_v12  ;;  %22345 = vmatmul.mubr.msk.f32.gmra.mrb[26].mxu0 %vm606_vm1, %v31466_v46  ;;  %v8172_v12 = vld [vmem:[#allocation2 + $0x111] sm:$0xff] }
 0x17e   : > { %22150 = vmatprep.mubr.msk.f32.mxu1 %vm606_vm1, %v31462_v49  ;;  %22347 = vmatprep.mubr.msk.f32.mxu0 %vm606_vm1, %v31467_v55  ;;  %v8173_v49 = vld [vmem:[#allocation2 + $0x121] sm:$0xff]  ;;  %v4343_v46 = vld [vmem:[#allocation3 + $0x141] sm:$0xff]  ;;  %v8178_v55 = vld [vmem:[#allocation2 + $0x159] sm:$0xff] }
 0x181   : > { %22151 = vmatmul.mubr.msk.f32.gmra.mrb[30].mxu1 %vm606_vm1, %v31463_v18  ;;  %22348 = vmatmul.mubr.msk.f32.gmra.mrb[28].mxu0 %vm606_vm1, %v31468_v23  ;;  %v4338_v18 = vld [vmem:[#allocation3 + $0x109] sm:$0xff]  ;;  %v4345_v23 = vld [vmem:[#allocation3 + $0x159] sm:$0xff] }
 0x182   : > { %22350 = vmatprep.mubr.msk.f32.mxu0 %vm606_vm1, %v3923_v57  ;;  %22805 = vmatprep.mubr.msk.f32.mxu1 %vm606_vm1, %v8149_v0  ;;  %v4344_v57 = vld [vmem:[#allocation3 + $0x151] sm:$0xff]  ;;  %v8179_v0 = vld [vmem:[#allocation2 + $0x169] sm:$0xff] }
 0x185   : > { %22351 = vmatmul.mubr.msk.f32.gmra.mrb[30].mxu0 %vm606_vm1, %v3924_v2  ;;  %22806 = vmatmul.mubr.msk.f32.vlgmr.msra.gmra.mrb[32].mxu1 %vm606_vm1, %v8150_v15  ;;  %v8180_v2 = vld [vmem:[#allocation2 + $0x171] sm:$0xff]  ;;  %v4346_v15 = vld [vmem:[#allocation3 + $0x169] sm:$0xff] }
 0x186   : > { %22854 = vmatpush3.msk.msra.mxu1 %vm999_vm0, %v8148_v34  ;;  %22355 = vmatprep.mubr.msk.f32.mxu0 %vm606_vm1, %v4316_v16  ;;  %v8176_v34 = vld [vmem:[#allocation2 + $0x141] sm:$0xff] }
 0x187   : > { %22808 = vmatprep.mubr.msk.f32.mxu1 %vm606_vm1, %v8151_v42  ;;  %22903 = vmatprep.subr.msk.mxu1 %vm999_vm0, %v27311_v43  ;;  %v8116_v16 = vld [vmem:[#allocation2] sm:$0xff] }
 0x188   : > { %v4347_v42 = vld [vmem:[#allocation3 + $0x171] sm:$0xff] }
 0x189   : > { %22356 = vmatmul.mubr.msk.f32.vlgmr.msra.gmra.mrb[0].mxu0 %vm606_vm1, %v4317_v47  ;;  %22809 = vmatmul.mubr.msk.f32.gmra.mrb[34].mxu1 %vm606_vm1, %v8152_v31  ;;  %v8117_v47 = vld [vmem:[#allocation2 + $0x8] sm:$0xff]  ;;  %v4283_v31 = vld [vmem:[#allocation3] sm:$0xff] }
 0x18a   : > { %22358 = vmatprep.mubr.msk.f32.mxu0 %vm606_vm1, %v4318_v39  ;;  %22811 = vmatprep.mubr.msk.f32.mxu1 %vm606_vm1, %v8153_v52  ;;  %v27389_v39 = vld [vmem:[#allocation2 + $0x18] sm:$0xff]  ;;  %v27394_v52 = vld [vmem:[%s31026_s6 + $0xc] sm:$0xf] }
 0x18b   : > { %22404 = vmatpush3.msk.msra.mxu0 %vm999_vm0, %v27182_v48  ;;  %v4341_v48 = vld [vmem:[#allocation3 + $0x129] sm:$0xff] }
 0x18c   : > { %22453 = vmatprep.subr.msk.mxu0 %vm999_vm0, %v27325_v26 }
 0x18d   : > { %22359 = vmatmul.mubr.msk.f32.gmra.mrb[2].mxu0 %vm606_vm1, %v4319_v61  ;;  %22812 = vmatmul.mubr.msk.f32.gmra.mrb[36].mxu1 %vm606_vm1, %v8154_v30  ;;  %v4284_v61 = vld [vmem:[#allocation3 + $0x8] sm:$0xff]  ;;  %v27401_v30 = vld [vmem:[#allocation2 + $0x20] sm:$0xff] }
 0x18e   : > { %22361 = vmatprep.mubr.msk.f32.mxu0 %vm606_vm1, %v4320_v22  ;;  %22814 = vmatprep.mubr.msk.f32.mxu1 %vm606_vm1, %v8155_v9  ;;  %v27405_v22 = vld [vmem:[#allocation3 + $0x18] sm:$0xff]  ;;  %v27407_v9 = vld [vmem:[#allocation2 + $0x30] sm:$0xff] }
 0x191   : > { %22362 = vmatmul.mubr.msk.f32.gmra.mrb[4].mxu0 %vm606_vm1, %v4321_v32  ;;  %22815 = vmatmul.mubr.msk.f32.gmra.mrb[38].mxu1 %vm606_vm1, %v8156_v17  ;;  %v27423_v32 = vld [vmem:[#allocation3 + $0x20] sm:$0xff]  ;;  %v27425_v17 = vld [vmem:[#allocation2 + $0x38] sm:$0xff] }
 0x192   : > { %22364 = vmatprep.mubr.msk.f32.mxu0 %vm606_vm1, %v4322_v19  ;;  %22817 = vmatprep.mubr.msk.f32.mxu1 %vm606_vm1, %v8157_v20  ;;  %v27427_v19 = vld [vmem:[#allocation3 + $0x30] sm:$0xff]  ;;  %v27429_v20 = vld [vmem:[#allocation2 + $0x48] sm:$0xff] }
 0x195   : > { %22365 = vmatmul.mubr.msk.f32.gmra.mrb[6].mxu0 %vm606_vm1, %v4323_v58  ;;  %22818 = vmatmul.mubr.msk.f32.gmra.mrb[40].mxu1 %vm606_vm1, %v8158_v7  ;;  %v27443_v58 = vld [vmem:[#allocation3 + $0x38] sm:$0xff]  ;;  %v27445_v7 = vld [vmem:[#allocation2 + $0x50] sm:$0xff] }
 0x196   : > { %22367 = vmatprep.mubr.msk.f32.mxu0 %vm606_vm1, %v4324_v13  ;;  %22820 = vmatprep.mubr.msk.f32.mxu1 %vm606_vm1, %v8159_v25  ;;  %v27449_v13 = vld [vmem:[#allocation2 + $0x60] sm:$0xff] }
 0x197   : > { %v27459_v25 = vld [vmem:[#allocation3 + $0x50] sm:$0xff] }
 0x199   : > { %22368 = vmatmul.mubr.msk.f32.gmra.mrb[8].mxu0 %vm606_vm1, %v4325_v60  ;;  %22821 = vmatmul.mubr.msk.f32.gmra.mrb[42].mxu1 %vm606_vm1, %v8160_v33  ;;  %v27461_v60 = vld [vmem:[#allocation2 + $0x68] sm:$0xff]  ;;  %v27463_v33 = vld [vmem:[#allocation3 + $0x60] sm:$0xff] }
 0x19a   : > { %22370 = vmatprep.mubr.msk.f32.mxu0 %vm606_vm1, %v4326_v36  ;;  %22823 = vmatprep.mubr.msk.f32.mxu1 %vm606_vm1, %v8161_v40  ;;  %v27465_v36 = vld [vmem:[#allocation2 + $0x78] sm:$0xff] }
 0x19b   : > { %v27475_v40 = vld [vmem:[#allocation3 + $0x68] sm:$0xff] }
 0x19d   : > { %22371 = vmatmul.mubr.msk.f32.gmra.mrb[10].mxu0 %vm606_vm1, %v4327_v38  ;;  %22824 = vmatmul.mubr.msk.f32.gmra.mrb[44].mxu1 %vm606_vm1, %v8162_v8  ;;  %v27477_v38 = vld [vmem:[#allocation2 + $0x80] sm:$0xff]  ;;  %v27479_v8 = vld [vmem:[#allocation3 + $0x78] sm:$0xff] }
 0x19e   : > { %22373 = vmatprep.mubr.msk.f32.mxu0 %vm606_vm1, %v4328_v21  ;;  %22826 = vmatprep.mubr.msk.f32.mxu1 %vm606_vm1, %v8163_v11  ;;  %v27481_v21 = vld [vmem:[#allocation2 + $0x90] sm:$0xff] }
 0x19f   : > { %v27491_v11 = vld [vmem:[#allocation3 + $0x80] sm:$0xff] }
 0x1a1   : > { %22374 = vmatmul.mubr.msk.f32.gmra.mrb[12].mxu0 %vm606_vm1, %v4329_v10  ;;  %22827 = vmatmul.mubr.msk.f32.gmra.mrb[46].mxu1 %vm606_vm1, %v8164_v56  ;;  %v27493_v10 = vld [vmem:[#allocation2 + $0x98] sm:$0xff]  ;;  %v27495_v56 = vld [vmem:[#allocation3 + $0x90] sm:$0xff] }
 0x1a2   : > { %22376 = vmatprep.mubr.msk.f32.mxu0 %vm606_vm1, %v4330_v35  ;;  %22829 = vmatprep.mubr.msk.f32.mxu1 %vm606_vm1, %v8165_v59  ;;  %v27497_v35 = vld [vmem:[#allocation2 + $0xa8] sm:$0xff] }
 0x1a3   : > { %v27507_v59 = vld [vmem:[#allocation3 + $0x98] sm:$0xff] }
 0x1a5   : > { %22377 = vmatmul.mubr.msk.f32.gmra.mrb[14].mxu0 %vm606_vm1, %v4331_v27  ;;  %22830 = vmatmul.mubr.msk.f32.gmra.mrb[48].mxu1 %vm606_vm1, %v8166_v54  ;;  %v27509_v27 = vld [vmem:[#allocation2 + $0xb0] sm:$0xff]  ;;  %v27511_v54 = vld [vmem:[#allocation3 + $0xa8] sm:$0xff] }
 0x1a6   : > { %22379 = vmatprep.mubr.msk.f32.mxu0 %vm606_vm1, %v4332_v62  ;;  %22832 = vmatprep.mubr.msk.f32.mxu1 %vm606_vm1, %v8167_v3  ;;  %v27513_v62 = vld [vmem:[#allocation2 + $0xc0] sm:$0xff] }
 0x1a7   : > { %v27523_v3 = vld [vmem:[#allocation3 + $0xb0] sm:$0xff] }
 0x1a9   : > { %22380 = vmatmul.mubr.msk.f32.gmra.mrb[16].mxu0 %vm606_vm1, %v4333_v14  ;;  %22833 = vmatmul.mubr.msk.f32.gmra.mrb[50].mxu1 %vm606_vm1, %v8168_v28  ;;  %v27525_v14 = vld [vmem:[#allocation2 + $0xc8] sm:$0xff]  ;;  %v27527_v28 = vld [vmem:[#allocation3 + $0xc0] sm:$0xff] }
 0x1aa   : > { %22382 = vmatprep.mubr.msk.f32.mxu0 %vm606_vm1, %v4334_v29  ;;  %22835 = vmatprep.mubr.msk.f32.mxu1 %vm606_vm1, %v8169_v50  ;;  %v27529_v29 = vld [vmem:[#allocation2 + $0xd8] sm:$0xff] }
 0x1ab   : > { %v27539_v50 = vld [vmem:[#allocation3 + $0xc8] sm:$0xff] }
 0x1ad   : > { %22383 = vmatmul.mubr.msk.f32.gmra.mrb[18].mxu0 %vm606_vm1, %v4335_v1  ;;  %22836 = vmatmul.mubr.msk.f32.gmra.mrb[52].mxu1 %vm606_vm1, %v8170_v44  ;;  %v27541_v1 = vld [vmem:[#allocation2 + $0xe0] sm:$0xff]  ;;  %v27543_v44 = vld [vmem:[#allocation3 + $0xd8] sm:$0xff] }
 0x1ae   : > { %22385 = vmatprep.mubr.msk.f32.mxu0 %vm606_vm1, %v4336_v51  ;;  %22838 = vmatprep.mubr.msk.f32.mxu1 %vm606_vm1, %v8171_v45  ;;  %v27545_v51 = vld [vmem:[#allocation2 + $0xf0] sm:$0xff] }
 0x1af   : > { %v27555_v45 = vld [vmem:[#allocation3 + $0xe0] sm:$0xff] }
 0x1b1   : > { %22386 = vmatmul.mubr.msk.f32.gmra.mrb[20].mxu0 %vm606_vm1, %v4337_v63  ;;  %22839 = vmatmul.mubr.msk.f32.gmra.mrb[54].mxu1 %vm606_vm1, %v8172_v12  ;;  %v27557_v63 = vld [vmem:[#allocation2 + $0xf8] sm:$0xff]  ;;  %v27559_v12 = vld [vmem:[#allocation3 + $0xf0] sm:$0xff] }
 0x1b2   : > { %22388 = vmatprep.mubr.msk.f32.mxu0 %vm606_vm1, %v4338_v18  ;;  %22841 = vmatprep.mubr.msk.f32.mxu1 %vm606_vm1, %v8173_v49  ;;  %v27561_v18 = vld [vmem:[#allocation2 + $0x108] sm:$0xff] }
 0x1b3   : > { %v27571_v49 = vld [vmem:[#allocation3 + $0xf8] sm:$0xff] }
 0x1b5   : > { %22389 = vmatmul.mubr.msk.f32.gmra.mrb[22].mxu0 %vm606_vm1, %v4339_v37  ;;  %22842 = vmatmul.mubr.msk.f32.gmra.mrb[56].mxu1 %vm606_vm1, %v8174_v4  ;;  %v27573_v37 = vld [vmem:[#allocation2 + $0x110] sm:$0xff]  ;;  %v27575_v4 = vld [vmem:[#allocation3 + $0x108] sm:$0xff] }
 0x1b6   : > { %22391 = vmatprep.mubr.msk.f32.mxu0 %vm606_vm1, %v4340_v24  ;;  %22844 = vmatprep.mubr.msk.f32.mxu1 %vm606_vm1, %v8175_v6  ;;  %v27577_v24 = vld [vmem:[#allocation2 + $0x120] sm:$0xff] }
 0x1b7   : > { %v27587_v6 = vld [vmem:[#allocation3 + $0x110] sm:$0xff] }
 0x1b9   : > { %22392 = vmatmul.mubr.msk.f32.gmra.mrb[24].mxu0 %vm606_vm1, %v4341_v48  ;;  %22845 = vmatmul.mubr.msk.f32.gmra.mrb[58].mxu1 %vm606_vm1, %v8176_v34  ;;  %v27589_v48 = vld [vmem:[#allocation2 + $0x128] sm:$0xff]  ;;  %v27591_v34 = vld [vmem:[#allocation3 + $0x120] sm:$0xff] }
 0x1ba   : > { %22394 = vmatprep.mubr.msk.f32.mxu0 %vm606_vm1, %v4342_v53  ;;  %22847 = vmatprep.mubr.msk.f32.mxu1 %vm606_vm1, %v8177_v41  ;;  %v27593_v53 = vld [vmem:[#allocation2 + $0x138] sm:$0xff] }
 0x1bb   : > { %v27603_v41 = vld [vmem:[#allocation3 + $0x128] sm:$0xff] }
 0x1bd   : > { %22395 = vmatmul.mubr.msk.f32.gmra.mrb[26].mxu0 %vm606_vm1, %v4343_v46  ;;  %22848 = vmatmul.mubr.msk.f32.gmra.mrb[60].mxu1 %vm606_vm1, %v8178_v55  ;;  %v27605_v46 = vld [vmem:[#allocation2 + $0x140] sm:$0xff]  ;;  %v27607_v55 = vld [vmem:[#allocation3 + $0x138] sm:$0xff] }
 0x1be   : > { %22397 = vmatprep.mubr.msk.f32.mxu0 %vm606_vm1, %v4344_v57  ;;  %22850 = vmatprep.mubr.msk.f32.mxu1 %vm606_vm1, %v8179_v0  ;;  %31469 = vst [vmem:[#allocation46_spill] sm:$0xff] %v27605_v46  ;;  %31470 = vst [vmem:[#allocation25_spill] sm:$0xff] %v27607_v55  ;;  %v27609_v57 = vld [vmem:[#allocation2 + $0x150] sm:$0xff]  ;;  %v27614_v0 = vld [vmem:[%s31024_s4] ss:$0 sm:$0xff] }
 0x1bf   : > { %31471 = vst [vmem:[#allocation47_spill] sm:$0xff] %v27609_v57  ;;  %31472 = vst [vmem:[#allocation26_spill] sm:$0xff] %v27614_v0 }
 0x1c1   : > { %22398 = vmatmul.mubr.msk.f32.gmra.mrb[28].mxu0 %vm606_vm1, %v4345_v23  ;;  %22851 = vmatmul.mubr.msk.f32.gmra.mrb[62].mxu1 %vm606_vm1, %v8180_v2 }
 0x1c2   : > { %22400 = vmatprep.mubr.msk.f32.mxu0 %vm606_vm1, %v4346_v15  ;;  %22855 = vmatprep.mubr.msk.f32.mxu1 %vm606_vm1, %v8116_v16  ;;  %v27628_v15 = vld [vmem:[#allocation3 + $0x140] sm:$0xff]  ;;  %v27630_v16 = vld [vmem:[#allocation2 + $0x158] sm:$0xff] }
 0x1c3   : > { %31475 = vst [vmem:[#allocation27_spill] sm:$0xff] %v27628_v15  ;;  %31476 = vst [vmem:[#allocation50_spill] sm:$0xff] %v27630_v16 }
 0x1c5   : > { %22401 = vmatmul.mubr.msk.f32.gmra.mrb[30].mxu0 %vm606_vm1, %v4347_v42  ;;  %22856 = vmatmul.mubr.msk.f32.vlgmr.msra.gmra.mrb[32].mxu1 %vm606_vm1, %v8117_v47  ;;  %v31477_v42 = vld [vmem:[#allocation15_spill] sm:$0xff] }
 0x1c6   : > { %22904 = vmatpush3.msk.msra.mxu1 %vm999_vm0, %v27311_v43  ;;  %22405 = vmatprep.mubr.msk.f32.mxu0 %vm606_vm1, %v4283_v31  ;;  %v27417_v43 = vld [vmem:[%s31034_s14 + $0xc] sm:$0xf]  ;;  %v7981_v47 = vmul.f32 %v27614_v0, %v31477_v42  ;;  %v27634_v31 = vld [vmem:[#allocation3 + $0x150] sm:$0xff]  ;;  %v27653_v42 = vld [vmem:[%s26870_s25 + $0xf8] sm:$0xff] }
 0x1c7   : > { %22858 = vmatprep.mubr.msk.f32.mxu1 %vm606_vm1, %v27389_v39  ;;  %22953 = vmatprep.subr.msk.mxu1 %vm999_vm0, %v27394_v52  ;;  %31478 = vst [vmem:[#allocation30_spill] sm:$0xff] %v27634_v31  ;;  %31484 = vst [vmem:[#allocation38_spill] sm:$0xff] %v27653_v42 }
 0x1c8   : > { %835 = vst.msk [vmem:[#allocation3 + $0x189] sm:$0xff] %vm606_vm1, %v27653_v42 }
 0x1c9   : > { %22406 = vmatmul.mubr.msk.f32.vlgmr.msra.gmra.mrb[0].mxu0 %vm606_vm1, %v4284_v61  ;;  %22859 = vmatmul.mubr.msk.f32.gmra.mrb[34].mxu1 %vm606_vm1, %v27401_v30  ;;  %v27636_v61 = vld [vmem:[#allocation2 + $0x168] sm:$0xff] }
 0x1ca   : > { %22408 = vmatprep.mubr.msk.f32.mxu0 %vm606_vm1, %v27405_v22  ;;  %22861 = vmatprep.mubr.msk.f32.mxu1 %vm606_vm1, %v27407_v9  ;;  %31479 = vst [vmem:[#allocation51_spill] sm:$0xff] %v27636_v61 }
 0x1cb   : > { %22454 = vmatpush3.msk.msra.mxu0 %vm999_vm0, %v27325_v26  ;;  %v27447_v26 = vld [vmem:[#allocation3 + $0x48] sm:$0xff] }
 0x1cc   : > { %22503 = vmatprep.subr.msk.mxu0 %vm999_vm0, %v27417_v43 }
 0x1cd   : > { %22409 = vmatmul.mubr.msk.f32.gmra.mrb[2].mxu0 %vm606_vm1, %v27423_v32  ;;  %22862 = vmatmul.mubr.msk.f32.gmra.mrb[36].mxu1 %vm606_vm1, %v27425_v17 }
 0x1ce   : > { %22411 = vmatprep.mubr.msk.f32.mxu0 %vm606_vm1, %v27427_v19  ;;  %22864 = vmatprep.mubr.msk.f32.mxu1 %vm606_vm1, %v27429_v20 }
 0x1d1   : > { %22412 = vmatmul.mubr.msk.f32.gmra.mrb[4].mxu0 %vm606_vm1, %v27443_v58  ;;  %22865 = vmatmul.mubr.msk.f32.gmra.mrb[38].mxu1 %vm606_vm1, %v27445_v7 }
 0x1d2   : > { %22414 = vmatprep.mubr.msk.f32.mxu0 %vm606_vm1, %v27447_v26  ;;  %22867 = vmatprep.mubr.msk.f32.mxu1 %vm606_vm1, %v27449_v13 }
 0x1d5   : > { %22415 = vmatmul.mubr.msk.f32.gmra.mrb[6].mxu0 %vm606_vm1, %v27459_v25  ;;  %22868 = vmatmul.mubr.msk.f32.gmra.mrb[40].mxu1 %vm606_vm1, %v27461_v60 }
 0x1d6   : > { %22417 = vmatprep.mubr.msk.f32.mxu0 %vm606_vm1, %v27463_v33  ;;  %22870 = vmatprep.mubr.msk.f32.mxu1 %vm606_vm1, %v27465_v36 }
 0x1d9   : > { %22418 = vmatmul.mubr.msk.f32.gmra.mrb[8].mxu0 %vm606_vm1, %v27475_v40  ;;  %22871 = vmatmul.mubr.msk.f32.gmra.mrb[42].mxu1 %vm606_vm1, %v27477_v38 }
 0x1da   : > { %22420 = vmatprep.mubr.msk.f32.mxu0 %vm606_vm1, %v27479_v8  ;;  %22873 = vmatprep.mubr.msk.f32.mxu1 %vm606_vm1, %v27481_v21 }
 0x1dd   : > { %22421 = vmatmul.mubr.msk.f32.gmra.mrb[10].mxu0 %vm606_vm1, %v27491_v11  ;;  %22874 = vmatmul.mubr.msk.f32.gmra.mrb[44].mxu1 %vm606_vm1, %v27493_v10 }
 0x1de   : > { %22423 = vmatprep.mubr.msk.f32.mxu0 %vm606_vm1, %v27495_v56  ;;  %22876 = vmatprep.mubr.msk.f32.mxu1 %vm606_vm1, %v27497_v35 }
 0x1e1   : > { %22424 = vmatmul.mubr.msk.f32.gmra.mrb[12].mxu0 %vm606_vm1, %v27507_v59  ;;  %22877 = vmatmul.mubr.msk.f32.gmra.mrb[46].mxu1 %vm606_vm1, %v27509_v27 }
 0x1e2   : > { %22426 = vmatprep.mubr.msk.f32.mxu0 %vm606_vm1, %v27511_v54  ;;  %22879 = vmatprep.mubr.msk.f32.mxu1 %vm606_vm1, %v27513_v62 }
 0x1e5   : > { %22427 = vmatmul.mubr.msk.f32.gmra.mrb[14].mxu0 %vm606_vm1, %v27523_v3  ;;  %22880 = vmatmul.mubr.msk.f32.gmra.mrb[48].mxu1 %vm606_vm1, %v27525_v14 }
 0x1e6   : > { %22429 = vmatprep.mubr.msk.f32.mxu0 %vm606_vm1, %v27527_v28  ;;  %22882 = vmatprep.mubr.msk.f32.mxu1 %vm606_vm1, %v27529_v29 }
 0x1e9   : > { %22430 = vmatmul.mubr.msk.f32.gmra.mrb[16].mxu0 %vm606_vm1, %v27539_v50  ;;  %22883 = vmatmul.mubr.msk.f32.gmra.mrb[50].mxu1 %vm606_vm1, %v27541_v1 }
 0x1ea   : > { %22432 = vmatprep.mubr.msk.f32.mxu0 %vm606_vm1, %v27543_v44  ;;  %22885 = vmatprep.mubr.msk.f32.mxu1 %vm606_vm1, %v27545_v51 }
 0x1ed   : > { %22433 = vmatmul.mubr.msk.f32.gmra.mrb[18].mxu0 %vm606_vm1, %v27555_v45  ;;  %22886 = vmatmul.mubr.msk.f32.gmra.mrb[52].mxu1 %vm606_vm1, %v27557_v63 }
 0x1ee   : > { %22435 = vmatprep.mubr.msk.f32.mxu0 %vm606_vm1, %v27559_v12  ;;  %22888 = vmatprep.mubr.msk.f32.mxu1 %vm606_vm1, %v27561_v18 }
 0x1f1   : > { %22436 = vmatmul.mubr.msk.f32.gmra.mrb[20].mxu0 %vm606_vm1, %v27571_v49  ;;  %22889 = vmatmul.mubr.msk.f32.gmra.mrb[54].mxu1 %vm606_vm1, %v27573_v37 }
 0x1f2   : > { %22438 = vmatprep.mubr.msk.f32.mxu0 %vm606_vm1, %v27575_v4  ;;  %22891 = vmatprep.mubr.msk.f32.mxu1 %vm606_vm1, %v27577_v24 }
 0x1f5   : > { %22439 = vmatmul.mubr.msk.f32.gmra.mrb[22].mxu0 %vm606_vm1, %v27587_v6  ;;  %22892 = vmatmul.mubr.msk.f32.gmra.mrb[56].mxu1 %vm606_vm1, %v27589_v48 }
 0x1f6   : > { %22441 = vmatprep.mubr.msk.f32.mxu0 %vm606_vm1, %v27591_v34  ;;  %22894 = vmatprep.mubr.msk.f32.mxu1 %vm606_vm1, %v27593_v53 }
 0x1f8   : > { %v27616_v23 = vpop.f32.mrb[0].mxu1 }
 0x1f9   : > { %31473 = vst [vmem:[#allocation48_spill] sm:$0xff] %v27616_v23  ;;  %v27618_v2 = vpop.f32.mrb[1].mxu1  ;;  %22442 = vmatmul.mubr.msk.f32.gmra.mrb[24].mxu0 %vm606_vm1, %v27603_v41  ;;  %22895 = vmatmul.mubr.msk.f32.gmra.mrb[58].mxu1 %vm606_vm1, %v27605_v46  ;;  %v27644_v23 = vld [vmem:[%s31025_s5] ss:$0 sm:$0xff] }
 0x1fa   : > { %31474 = vst [vmem:[#allocation49_spill] sm:$0xff] %v27618_v2  ;;  %22444 = vmatprep.mubr.msk.f32.mxu0 %vm606_vm1, %v27607_v55  ;;  %22897 = vmatprep.mubr.msk.f32.mxu1 %vm606_vm1, %v27609_v57  ;;  %v27639_v2 = vld [vmem:[%s26870_s25 + $0xf0] sm:$0xff]  ;;  %31481 = vst [vmem:[#allocation37_spill] sm:$0xff] %v27644_v23  ;;  %v7982_v57 = vmul.f32 %v27614_v0, %v31482_v5  ;;  %v27667_v5 = vld [vmem:[#allocation3 + $0x158] sm:$0xff] }
 0x1fb   : > { %31480 = vst [vmem:[#allocation31_spill] sm:$0xff] %v27639_v2  ;;  %834 = vst.msk [vmem:[#allocation3 + $0x181] sm:$0xff] %vm606_vm1, %v27639_v2  ;;  %v27672_v0 = vld [vmem:[#allocation3 + $0x168] sm:$0xff] }
 0x1fc   : > { %v27648_v55 = vpop.f32.mrb[2].mxu1  ;;  %31486 = vst [vmem:[#allocation39_spill] sm:$0xff] %v27667_v5 }
 0x1fd   : > { %31483 = vst [vmem:[#allocation32_spill] sm:$0xff] %v27648_v55  ;;  %v27655_v46 = vpop.f32.mrb[3].mxu1  ;;  %22445 = vmatmul.mubr.msk.f32.gmra.mrb[26].mxu0 %vm606_vm1, %v27628_v15  ;;  %22898 = vmatmul.mubr.msk.f32.gmra.mrb[60].mxu1 %vm606_vm1, %v27630_v16  ;;  %v27669_v55 = vld [vmem:[#allocation2 + $0x170] sm:$0xff]  ;;  %v8831_v15 = vld [vmem:[#allocation2 + $0x2] sm:$0xff]  ;;  %v8021_v16 = vadd.f32 %v27644_v23, %v7982_v57 }
 0x1fe   : > { %31485 = vst [vmem:[#allocation33_spill] sm:$0xff] %v27655_v46  ;;  %22447 = vmatprep.mubr.msk.f32.mxu0 %vm606_vm1, %v27634_v31  ;;  %22900 = vmatprep.mubr.msk.f32.mxu1 %vm606_vm1, %v27636_v61  ;;  %31487 = vst [vmem:[#allocation34_spill] sm:$0xff] %v27669_v55  ;;  %v8020_v46 = vadd.f32 %v27644_v23, %v7981_v47  ;;  %v27686_v47 = vld [vmem:[#allocation3 + $0x170] sm:$0xff]  ;;  %v8832_v61 = vld [vmem:[#allocation2 + $0xa] sm:$0xff] }
 0x1ff   : > { %31490 = vst [vmem:[#allocation13_spill] sm:$0xff] %v27686_v47  ;;  %v4998_v57 = vld [vmem:[#allocation3 + $0x2] sm:$0xff]  ;;  %v8053_v23 = vmax.f32 %v8021_v16, 0.0  ;;  %v27707_v16 = vld [vmem:[#allocation3 + $0x1a] sm:$0xff] }
 0x200   : > { %v27675_v2 = vpop.f32.mrb[4].mxu1  ;;  %v8052_v31 = vmax.f32 %v8020_v46, 0.0  ;;  %v27705_v46 = vld [vmem:[#allocation2 + $0x22] sm:$0xff]  ;;  %31494 = vst [vmem:[#allocation56_spill] sm:$0xff] %v27707_v16 }
 0x201   : > { %31488 = vst [vmem:[#allocation55_spill] sm:$0xff] %v27675_v2  ;;  %v27677_v42 = vpop.f32.mrb[5].mxu1  ;;  %22448 = vmatmul.mubr.msk.f32.gmra.mrb[28].mxu0 %vm606_vm1, %v27667_v5  ;;  %22901 = vmatmul.mubr.msk.f32.gmra.mrb[62].mxu1 %vm606_vm1, %v27669_v55  ;;  %v27695_v5 = vld [vmem:[%s31026_s6 + $0x10] sm:$0xf] }
 0x202   : > { %31489 = vst [vmem:[#allocation57_spill] sm:$0xff] %v27677_v42  ;;  %22450 = vmatprep.mubr.msk.f32.mxu0 %vm606_vm1, %v27672_v0  ;;  %22905 = vmatprep.mubr.msk.f32.mxu1 %vm606_vm1, %v8831_v15  ;;  %v27690_v42 = vld [vmem:[#allocation2 + $0x1a] sm:$0xff] }
 0x203   : > { %31492 = vst [vmem:[#allocation43_spill] sm:$0xff] %v27690_v42  ;;  %v4999_v15 = vld [vmem:[#allocation3 + $0xa] sm:$0xff] }
 0x204   : > { %v27688_v2 = vpop.f32.mrb[6].mxu1 }
 0x205   : > { %31491 = vst [vmem:[#allocation42_spill] sm:$0xff] %v27688_v2  ;;  %v27697_v55 = vpop.f32.mrb[7].mxu1  ;;  %22451 = vmatmul.mubr.msk.f32.gmra.mrb[30].mxu0 %vm606_vm1, %v27686_v47  ;;  %22906 = vmatmul.mubr.msk.f32.vlgmr.msra.gmra.mrb[32].mxu1 %vm606_vm1, %v8832_v61  ;;  %v27709_v2 = vld [vmem:[#allocation3 + $0x19] sm:$0xff]  ;;  %v27715_v47 = vld [vmem:[#allocation3 + $0x22] sm:$0xff] }
 0x206   : > { %31493 = vst [vmem:[#allocation54_spill] sm:$0xff] %v27697_v55  ;;  %22954 = vmatpush3.msk.msra.mxu1 %vm999_vm0, %v27394_v52  ;;  %22455 = vmatprep.mubr.msk.f32.mxu0 %vm606_vm1, %v4998_v57  ;;  %v27713_v55 = vld [vmem:[#allocation2 + $0x32] sm:$0xff]  ;;  %31496 = vst [vmem:[#allocation58_spill] sm:$0xff] %v27715_v47 }
 0x207   : > { %22908 = vmatprep.mubr.msk.f32.mxu1 %vm606_vm1, %v27690_v42  ;;  %31495 = vst [vmem:[#allocation15_spill] sm:$0xff] %v27713_v55  ;;  %23003 = vmatprep.subr.msk.mxu1 %vm999_vm0, %v27695_v5  ;;  %v27719_v61 = vld [vmem:[#allocation3 + $0x21] sm:$0xff]  ;;  %8084 = vst.msk [vmem:[#allocation3 + $0x19] sm:$0xff] %vm606_vm1, %v8052_v31  ;;  %v27739_v31 = vld [vmem:[#allocation2 + $0x3a] sm:$0xff] }
 0x208   : > { %v27722_v52 = vpop.f32.mrb[8].mxu1  ;;  %8085 = vst.msk [vmem:[#allocation3 + $0x21] sm:$0xff] %vm606_vm1, %v8053_v23  ;;  %v27733_v42 = vld [vmem:[%s31034_s14 + $0x10] sm:$0xf]  ;;  %31499 = vst [vmem:[#allocation62_spill] sm:$0xff] %v27739_v31  ;;  %v27741_v23 = vld [vmem:[#allocation3 + $0x32] sm:$0xff] }
 0x209   : > { %31497 = vst [vmem:[#allocation60_spill] sm:$0xff] %v27722_v52  ;;  %v27725_v57 = vpop.f32.mrb[9].mxu1  ;;  %22456 = vmatmul.mubr.msk.f32.vlgmr.msra.gmra.mrb[0].mxu0 %vm606_vm1, %v4999_v15  ;;  %22909 = vmatmul.mubr.msk.f32.gmra.mrb[34].mxu1 %vm606_vm1, %v27705_v46  ;;  %31500 = vst [vmem:[#allocation63_spill] sm:$0xff] %v27741_v23 }
 0x20a   : > { %31498 = vst [vmem:[#allocation61_spill] sm:$0xff] %v27725_v57  ;;  %22458 = vmatprep.mubr.msk.f32.mxu0 %vm606_vm1, %v27707_v16  ;;  %22911 = vmatprep.mubr.msk.f32.mxu1 %vm606_vm1, %v27713_v55  ;;  %v27743_v57 = vld [vmem:[#allocation2 + $0x4a] sm:$0xff]  ;;  %v27765_v55 = vld [vmem:[#allocation3 + $0x4a] sm:$0xff]  ;;  %v27767_v16 = vld [vmem:[#allocation2 + $0x62] sm:$0xff] }
 0x20b   : > { %31501 = vst [vmem:[#allocation64_spill] sm:$0xff] %v27743_v57  ;;  %22504 = vmatpush3.msk.msra.mxu0 %vm999_vm0, %v27417_v43  ;;  %v27761_v43 = vld [vmem:[#allocation3 + $0x3a] sm:$0xff]  ;;  %31506 = vst [vmem:[#allocation69_spill] sm:$0xff] %v27765_v55 }
 0x20c   : > { %v27747_v15 = vpop.f32.mrb[10].mxu1  ;;  %22553 = vmatprep.subr.msk.mxu0 %vm999_vm0, %v27733_v42  ;;  %31504 = vst [vmem:[#allocation67_spill] sm:$0xff] %v27761_v43  ;;  %31507 = vst [vmem:[#allocation70_spill] sm:$0xff] %v27767_v16 }
 0x20d   : > { %31502 = vst [vmem:[#allocation65_spill] sm:$0xff] %v27747_v15  ;;  %v27751_v52 = vpop.f32.mrb[11].mxu1  ;;  %22459 = vmatmul.mubr.msk.f32.gmra.mrb[2].mxu0 %vm606_vm1, %v27715_v47  ;;  %22912 = vmatmul.mubr.msk.f32.gmra.mrb[36].mxu1 %vm606_vm1, %v27739_v31  ;;  %v27763_v15 = vld [vmem:[#allocation2 + $0x52] sm:$0xff] }
 0x20e   : > { %31503 = vst [vmem:[#allocation66_spill] sm:$0xff] %v27751_v52  ;;  %22461 = vmatprep.mubr.msk.f32.mxu0 %vm606_vm1, %v27741_v23  ;;  %22914 = vmatprep.mubr.msk.f32.mxu1 %vm606_vm1, %v27743_v57  ;;  %31505 = vst [vmem:[#allocation68_spill] sm:$0xff] %v27763_v15  ;;  %v27781_v57 = vld [vmem:[#allocation3 + $0x52] sm:$0xff]  ;;  %v27783_v23 = vld [vmem:[#allocation2 + $0x6a] sm:$0xff] }
 0x20f   : > { %31510 = vst [vmem:[#allocation73_spill] sm:$0xff] %v27781_v57  ;;  %31511 = vst [vmem:[#allocation74_spill] sm:$0xff] %v27783_v23  ;;  %v27785_v31 = vld [vmem:[#allocation3 + $0x62] sm:$0xff] }
 0x210   : > { %v27769_v52 = vpop.f32.mrb[12].mxu1  ;;  %31512 = vst [vmem:[#allocation75_spill] sm:$0xff] %v27785_v31 }
 0x211   : > { %31508 = vst [vmem:[#allocation71_spill] sm:$0xff] %v27769_v52  ;;  %v27771_v47 = vpop.f32.mrb[13].mxu1  ;;  %22462 = vmatmul.mubr.msk.f32.gmra.mrb[4].mxu0 %vm606_vm1, %v27761_v43  ;;  %22915 = vmatmul.mubr.msk.f32.gmra.mrb[38].mxu1 %vm606_vm1, %v27763_v15  ;;  %v27787_v52 = vld [vmem:[#allocation2 + $0x7a] sm:$0xff]  ;;  %v27805_v15 = vld [vmem:[#allocation3 + $0x7a] sm:$0xff] }
 0x212   : > { %31509 = vst [vmem:[#allocation72_spill] sm:$0xff] %v27771_v47  ;;  %22464 = vmatprep.mubr.msk.f32.mxu0 %vm606_vm1, %v27765_v55  ;;  %22917 = vmatprep.mubr.msk.f32.mxu1 %vm606_vm1, %v27767_v16  ;;  %31513 = vst [vmem:[#allocation76_spill] sm:$0xff] %v27787_v52  ;;  %v27801_v16 = vld [vmem:[#allocation3 + $0x6a] sm:$0xff]  ;;  %v27803_v55 = vld [vmem:[#allocation2 + $0x82] sm:$0xff] }
 0x213   : > { %31516 = vst [vmem:[#allocation79_spill] sm:$0xff] %v27801_v16  ;;  %31517 = vst [vmem:[#allocation80_spill] sm:$0xff] %v27803_v55 }
 0x214   : > { %v27789_v47 = vpop.f32.mrb[14].mxu1  ;;  %31518 = vst [vmem:[#allocation81_spill] sm:$0xff] %v27805_v15 }
 0x215   : > { %31514 = vst [vmem:[#allocation77_spill] sm:$0xff] %v27789_v47  ;;  %v27791_v43 = vpop.f32.mrb[15].mxu1  ;;  %22465 = vmatmul.mubr.msk.f32.gmra.mrb[6].mxu0 %vm606_vm1, %v27781_v57  ;;  %22918 = vmatmul.mubr.msk.f32.gmra.mrb[40].mxu1 %vm606_vm1, %v27783_v23  ;;  %v27807_v47 = vld [vmem:[#allocation2 + $0x92] sm:$0xff]  ;;  %v27823_v23 = vld [vmem:[#allocation2 + $0xaa] sm:$0xff] }
 0x216   : > { %31515 = vst [vmem:[#allocation78_spill] sm:$0xff] %v27791_v43  ;;  %22467 = vmatprep.mubr.msk.f32.mxu0 %vm606_vm1, %v27785_v31  ;;  %22920 = vmatprep.mubr.msk.f32.mxu1 %vm606_vm1, %v27787_v52  ;;  %31519 = vst [vmem:[#allocation82_spill] sm:$0xff] %v27807_v47  ;;  %v27817_v43 = vld [vmem:[#allocation3 + $0x82] sm:$0xff]  ;;  %v27819_v52 = vld [vmem:[#allocation2 + $0x9a] sm:$0xff] }
 0x217   : > { %31520 = vst [vmem:[#allocation83_spill] sm:$0xff] %v27817_v43  ;;  %31521 = vst [vmem:[#allocation84_spill] sm:$0xff] %v27819_v52  ;;  %v27821_v31 = vld [vmem:[#allocation3 + $0x92] sm:$0xff] }
 0x218   : > { %31522 = vst [vmem:[#allocation85_spill] sm:$0xff] %v27821_v31  ;;  %31523 = vst [vmem:[#allocation86_spill] sm:$0xff] %v27823_v23 }
 0x219   : > { %22468 = vmatmul.mubr.msk.f32.gmra.mrb[8].mxu0 %vm606_vm1, %v27801_v16  ;;  %22921 = vmatmul.mubr.msk.f32.gmra.mrb[42].mxu1 %vm606_vm1, %v27803_v55  ;;  %v27837_v55 = vld [vmem:[#allocation3 + $0xaa] sm:$0xff]  ;;  %v27839_v16 = vld [vmem:[#allocation2 + $0xc2] sm:$0xff] }
 0x21a   : > { %22470 = vmatprep.mubr.msk.f32.mxu0 %vm606_vm1, %v27805_v15  ;;  %22923 = vmatprep.mubr.msk.f32.mxu1 %vm606_vm1, %v27807_v47  ;;  %v27833_v47 = vld [vmem:[#allocation3 + $0x9a] sm:$0xff]  ;;  %v27835_v15 = vld [vmem:[#allocation2 + $0xb2] sm:$0xff]  ;;  %31526 = vst [vmem:[#allocation89_spill] sm:$0xff] %v27837_v55  ;;  %31527 = vst [vmem:[#allocation90_spill] sm:$0xff] %v27839_v16 }
 0x21b   : > { %31524 = vst [vmem:[#allocation87_spill] sm:$0xff] %v27833_v47  ;;  %31525 = vst [vmem:[#allocation88_spill] sm:$0xff] %v27835_v15 }
 0x21d   : > { %22471 = vmatmul.mubr.msk.f32.gmra.mrb[10].mxu0 %vm606_vm1, %v27817_v43  ;;  %22924 = vmatmul.mubr.msk.f32.gmra.mrb[44].mxu1 %vm606_vm1, %v27819_v52  ;;  %v27853_v52 = vld [vmem:[#allocation3 + $0xc2] sm:$0xff]  ;;  %v27855_v43 = vld [vmem:[#allocation2 + $0xda] sm:$0xff] }
 0x21e   : > { %22473 = vmatprep.mubr.msk.f32.mxu0 %vm606_vm1, %v27821_v31  ;;  %22926 = vmatprep.mubr.msk.f32.mxu1 %vm606_vm1, %v27823_v23  ;;  %v27849_v23 = vld [vmem:[#allocation3 + $0xb2] sm:$0xff]  ;;  %v27851_v31 = vld [vmem:[#allocation2 + $0xca] sm:$0xff]  ;;  %31530 = vst [vmem:[#allocation93_spill] sm:$0xff] %v27853_v52  ;;  %31531 = vst [vmem:[#allocation94_spill] sm:$0xff] %v27855_v43 }
 0x21f   : > { %31528 = vst [vmem:[#allocation91_spill] sm:$0xff] %v27849_v23  ;;  %31529 = vst [vmem:[#allocation92_spill] sm:$0xff] %v27851_v31 }
 0x221   : > { %22474 = vmatmul.mubr.msk.f32.gmra.mrb[12].mxu0 %vm606_vm1, %v27833_v47  ;;  %22927 = vmatmul.mubr.msk.f32.gmra.mrb[46].mxu1 %vm606_vm1, %v27835_v15  ;;  %v27869_v15 = vld [vmem:[#allocation3 + $0xda] sm:$0xff]  ;;  %v27871_v47 = vld [vmem:[#allocation2 + $0xf2] sm:$0xff] }
 0x222   : > { %22476 = vmatprep.mubr.msk.f32.mxu0 %vm606_vm1, %v27837_v55  ;;  %22929 = vmatprep.mubr.msk.f32.mxu1 %vm606_vm1, %v27839_v16  ;;  %v27865_v16 = vld [vmem:[#allocation3 + $0xca] sm:$0xff]  ;;  %v27867_v55 = vld [vmem:[#allocation2 + $0xe2] sm:$0xff]  ;;  %31534 = vst [vmem:[#allocation97_spill] sm:$0xff] %v27869_v15  ;;  %31535 = vst [vmem:[#allocation98_spill] sm:$0xff] %v27871_v47 }
 0x223   : > { %31532 = vst [vmem:[#allocation95_spill] sm:$0xff] %v27865_v16  ;;  %31533 = vst [vmem:[#allocation96_spill] sm:$0xff] %v27867_v55 }
 0x225   : > { %22477 = vmatmul.mubr.msk.f32.gmra.mrb[14].mxu0 %vm606_vm1, %v27849_v23  ;;  %22930 = vmatmul.mubr.msk.f32.gmra.mrb[48].mxu1 %vm606_vm1, %v27851_v31  ;;  %v27885_v31 = vld [vmem:[#allocation3 + $0xf2] sm:$0xff]  ;;  %v27887_v23 = vld [vmem:[#allocation2 + $0x10a] sm:$0xff] }
 0x226   : > { %22479 = vmatprep.mubr.msk.f32.mxu0 %vm606_vm1, %v27853_v52  ;;  %22932 = vmatprep.mubr.msk.f32.mxu1 %vm606_vm1, %v27855_v43  ;;  %v27881_v43 = vld [vmem:[#allocation3 + $0xe2] sm:$0xff]  ;;  %v27883_v52 = vld [vmem:[#allocation2 + $0xfa] sm:$0xff]  ;;  %31538 = vst [vmem:[#allocation101_spill] sm:$0xff] %v27885_v31  ;;  %31539 = vst [vmem:[#allocation102_spill] sm:$0xff] %v27887_v23 }
 0x227   : > { %31536 = vst [vmem:[#allocation99_spill] sm:$0xff] %v27881_v43  ;;  %31537 = vst [vmem:[#allocation100_spill] sm:$0xff] %v27883_v52 }
 0x229   : > { %22480 = vmatmul.mubr.msk.f32.gmra.mrb[16].mxu0 %vm606_vm1, %v27865_v16  ;;  %22933 = vmatmul.mubr.msk.f32.gmra.mrb[50].mxu1 %vm606_vm1, %v27867_v55  ;;  %v27901_v55 = vld [vmem:[#allocation3 + $0x10a] sm:$0xff]  ;;  %v27903_v16 = vld [vmem:[#allocation2 + $0x122] sm:$0xff] }
 0x22a   : > { %22482 = vmatprep.mubr.msk.f32.mxu0 %vm606_vm1, %v27869_v15  ;;  %22935 = vmatprep.mubr.msk.f32.mxu1 %vm606_vm1, %v27871_v47  ;;  %v27897_v47 = vld [vmem:[#allocation3 + $0xfa] sm:$0xff]  ;;  %v27899_v15 = vld [vmem:[#allocation2 + $0x112] sm:$0xff]  ;;  %31542 = vst [vmem:[#allocation105_spill] sm:$0xff] %v27901_v55  ;;  %31543 = vst [vmem:[#allocation106_spill] sm:$0xff] %v27903_v16 }
 0x22b   : > { %31540 = vst [vmem:[#allocation103_spill] sm:$0xff] %v27897_v47  ;;  %31541 = vst [vmem:[#allocation104_spill] sm:$0xff] %v27899_v15 }
 0x22d   : > { %22483 = vmatmul.mubr.msk.f32.gmra.mrb[18].mxu0 %vm606_vm1, %v27881_v43  ;;  %22936 = vmatmul.mubr.msk.f32.gmra.mrb[52].mxu1 %vm606_vm1, %v27883_v52  ;;  %v27917_v52 = vld [vmem:[#allocation3 + $0x122] sm:$0xff]  ;;  %v27919_v43 = vld [vmem:[#allocation2 + $0x13a] sm:$0xff] }
 0x22e   : > { %22485 = vmatprep.mubr.msk.f32.mxu0 %vm606_vm1, %v27885_v31  ;;  %22938 = vmatprep.mubr.msk.f32.mxu1 %vm606_vm1, %v27887_v23  ;;  %v27913_v23 = vld [vmem:[#allocation3 + $0x112] sm:$0xff]  ;;  %v27915_v31 = vld [vmem:[#allocation2 + $0x12a] sm:$0xff]  ;;  %31546 = vst [vmem:[#allocation109_spill] sm:$0xff] %v27917_v52  ;;  %31547 = vst [vmem:[#allocation110_spill] sm:$0xff] %v27919_v43 }
 0x22f   : > { %31544 = vst [vmem:[#allocation107_spill] sm:$0xff] %v27913_v23  ;;  %31545 = vst [vmem:[#allocation108_spill] sm:$0xff] %v27915_v31 }
 0x231   : > { %22486 = vmatmul.mubr.msk.f32.gmra.mrb[20].mxu0 %vm606_vm1, %v27897_v47  ;;  %22939 = vmatmul.mubr.msk.f32.gmra.mrb[54].mxu1 %vm606_vm1, %v27899_v15  ;;  %v27933_v15 = vld [vmem:[#allocation3 + $0x13a] sm:$0xff]  ;;  %v27935_v47 = vld [vmem:[#allocation2 + $0x152] sm:$0xff] }
 0x232   : > { %22488 = vmatprep.mubr.msk.f32.mxu0 %vm606_vm1, %v27901_v55  ;;  %22941 = vmatprep.mubr.msk.f32.mxu1 %vm606_vm1, %v27903_v16  ;;  %v27929_v16 = vld [vmem:[#allocation3 + $0x12a] sm:$0xff]  ;;  %v27931_v55 = vld [vmem:[#allocation2 + $0x142] sm:$0xff]  ;;  %31550 = vst [vmem:[#allocation113_spill] sm:$0xff] %v27933_v15  ;;  %31551 = vst [vmem:[#allocation114_spill] sm:$0xff] %v27935_v47 }
 0x233   : > { %31548 = vst [vmem:[#allocation111_spill] sm:$0xff] %v27929_v16  ;;  %31549 = vst [vmem:[#allocation112_spill] sm:$0xff] %v27931_v55 }
 0x235   : > { %22489 = vmatmul.mubr.msk.f32.gmra.mrb[22].mxu0 %vm606_vm1, %v27913_v23  ;;  %22942 = vmatmul.mubr.msk.f32.gmra.mrb[56].mxu1 %vm606_vm1, %v27915_v31  ;;  %v27953_v31 = vld [vmem:[#allocation3 + $0x152] sm:$0xff] }
 0x236   : > { %22491 = vmatprep.mubr.msk.f32.mxu0 %vm606_vm1, %v27917_v52  ;;  %22944 = vmatprep.mubr.msk.f32.mxu1 %vm606_vm1, %v27919_v43  ;;  %v27949_v43 = vld [vmem:[#allocation3 + $0x142] sm:$0xff]  ;;  %v27951_v52 = vld [vmem:[#allocation2 + $0x15a] sm:$0xff]  ;;  %31554 = vst [vmem:[#allocation117_spill] sm:$0xff] %v27953_v31 }
 0x238   : > { %v27937_v57 = vpop.f32.mrb[16].mxu1 }
 0x239   : > { %31552 = vst [vmem:[#allocation115_spill] sm:$0xff] %v27937_v57  ;;  %v27939_v23 = vpop.f32.mrb[17].mxu1  ;;  %22492 = vmatmul.mubr.msk.f32.gmra.mrb[24].mxu0 %vm606_vm1, %v27929_v16  ;;  %22945 = vmatmul.mubr.msk.f32.gmra.mrb[58].mxu1 %vm606_vm1, %v27931_v55  ;;  %v27955_v57 = vld [vmem:[#allocation2 + $0x16a] sm:$0xff]  ;;  %v27973_v55 = vld [vmem:[#allocation3 + $0x16a] sm:$0xff] }
 0x23a   : > { %31553 = vst [vmem:[#allocation116_spill] sm:$0xff] %v27939_v23  ;;  %22494 = vmatprep.mubr.msk.f32.mxu0 %vm606_vm1, %v27933_v15  ;;  %22947 = vmatprep.mubr.msk.f32.mxu1 %vm606_vm1, %v27935_v47  ;;  %31555 = vst [vmem:[#allocation118_spill] sm:$0xff] %v27955_v57  ;;  %v27969_v47 = vld [vmem:[#allocation3 + $0x15a] sm:$0xff]  ;;  %v27971_v15 = vld [vmem:[#allocation2 + $0x172] sm:$0xff] }
 0x23c   : > { %v27957_v23 = vpop.f32.mrb[18].mxu1 }
 0x23d   : > { %31556 = vst [vmem:[#allocation119_spill] sm:$0xff] %v27957_v23  ;;  %v27959_v16 = vpop.f32.mrb[19].mxu1  ;;  %22495 = vmatmul.mubr.msk.f32.gmra.mrb[26].mxu0 %vm606_vm1, %v27949_v43  ;;  %22948 = vmatmul.mubr.msk.f32.gmra.mrb[60].mxu1 %vm606_vm1, %v27951_v52 }
 0x23e   : > { %31557 = vst [vmem:[#allocation120_spill] sm:$0xff] %v27959_v16  ;;  %22497 = vmatprep.mubr.msk.f32.mxu0 %vm606_vm1, %v27953_v31  ;;  %22950 = vmatprep.mubr.msk.f32.mxu1 %vm606_vm1, %v27955_v57  ;;  %v27987_v57 = vld [vmem:[#allocation3 + $0x172] sm:$0xff] }
 0x240   : > { %v27975_v23 = vpop.f32.mrb[20].mxu1 }
 0x241   : > { %31558 = vst [vmem:[#allocation121_spill] sm:$0xff] %v27975_v23  ;;  %v27977_v16 = vpop.f32.mrb[21].mxu1  ;;  %22498 = vmatmul.mubr.msk.f32.gmra.mrb[28].mxu0 %vm606_vm1, %v27969_v47  ;;  %22951 = vmatmul.mubr.msk.f32.gmra.mrb[62].mxu1 %vm606_vm1, %v27971_v15 }
 0x242   : > { %31559 = vst [vmem:[#allocation122_spill] sm:$0xff] %v27977_v16  ;;  %22500 = vmatprep.mubr.msk.f32.mxu0 %vm606_vm1, %v27973_v55  ;;  %22955 = vmatprep.mubr.msk.f32.mxu1 %vm606_vm1, %v27389_v39  ;;  %v27994_v16 = vld [vmem:[%s31026_s6 + $0x14] sm:$0xf] }
 0x244   : > { %v27989_v31 = vpop.f32.mrb[22].mxu1 }
 0x245   : > { %31560 = vst [vmem:[#allocation123_spill] sm:$0xff] %v27989_v31  ;;  %v27996_v23 = vpop.f32.mrb[23].mxu1  ;;  %22501 = vmatmul.mubr.msk.f32.gmra.mrb[30].mxu0 %vm606_vm1, %v27987_v57  ;;  %22956 = vmatmul.mubr.msk.f32.vlgmr.msra.gmra.mrb[32].mxu1 %vm606_vm1, %v27401_v30  ;;  %v28021_v30 = vld [vmem:[%s31034_s14 + $0x14] sm:$0xf]  ;;  %v28379_v31 = vld [vmem:[#allocation3 + $0x129] sm:$0xff] }
 0x246   : > { %31561 = vst [vmem:[#allocation124_spill] sm:$0xff] %v27996_v23  ;;  %23004 = vmatpush3.msk.msra.mxu1 %vm999_vm0, %v27695_v5  ;;  %22505 = vmatprep.mubr.msk.f32.mxu0 %vm606_vm1, %v27405_v22  ;;  %v28251_v5 = vld [vmem:[#allocation3 + $0x69] sm:$0xff] }
 0x247   : > { %22958 = vmatprep.mubr.msk.f32.mxu1 %vm606_vm1, %v27407_v9  ;;  %23053 = vmatprep.subr.msk.mxu1 %vm999_vm0, %v27994_v16 }
 0x248   : > { %v28010_v39 = vpop.f32.mrb[24].mxu1 }
 0x249   : > { %31562 = vst [vmem:[#allocation125_spill] sm:$0xff] %v28010_v39  ;;  %v28012_v23 = vpop.f32.mrb[25].mxu1  ;;  %22506 = vmatmul.mubr.msk.f32.vlgmr.msra.gmra.mrb[0].mxu0 %vm606_vm1, %v27423_v32  ;;  %22959 = vmatmul.mubr.msk.f32.gmra.mrb[34].mxu1 %vm606_vm1, %v27425_v17  ;;  %v28369_v39 = vld [vmem:[#allocation2 + $0x139] sm:$0xff] }
 0x24a   : > { %31563 = vst [vmem:[#allocation126_spill] sm:$0xff] %v28012_v23  ;;  %22508 = vmatprep.mubr.msk.f32.mxu0 %vm606_vm1, %v27427_v19  ;;  %22961 = vmatprep.mubr.msk.f32.mxu1 %vm606_vm1, %v27429_v20  ;;  %v28367_v23 = vld [vmem:[#allocation3 + $0x121] sm:$0xff] }
 0x24b   : > { %22554 = vmatpush3.msk.msra.mxu0 %vm999_vm0, %v27733_v42  ;;  %v28241_v42 = vld [vmem:[#allocation2 + $0x79] sm:$0xff] }
 0x24c   : > { %v28029_v22 = vpop.f32.mrb[26].mxu1  ;;  %22603 = vmatprep.subr.msk.mxu0 %vm999_vm0, %v28021_v30 }
 0x24d   : > { %31564 = vst [vmem:[#allocation127_spill] sm:$0xff] %v28029_v22  ;;  %v28033_v9 = vpop.f32.mrb[27].mxu1  ;;  %22509 = vmatmul.mubr.msk.f32.gmra.mrb[2].mxu0 %vm606_vm1, %v27443_v58  ;;  %22962 = vmatmul.mubr.msk.f32.gmra.mrb[36].mxu1 %vm606_vm1, %v27445_v7  ;;  %v31570_v58 = vld [vmem:[#allocation46_spill] sm:$0xff]  ;;  %v31571_v7 = vld [vmem:[#allocation25_spill] sm:$0xff] }
 0x24e   : > { %31565 = vst [vmem:[#allocation128_spill] sm:$0xff] %v28033_v9  ;;  %22511 = vmatprep.mubr.msk.f32.mxu0 %vm606_vm1, %v27447_v26  ;;  %22964 = vmatprep.mubr.msk.f32.mxu1 %vm606_vm1, %v27449_v13  ;;  %v31572_v26 = vld [vmem:[#allocation47_spill] sm:$0xff]  ;;  %v28363_v9 = vld [vmem:[#allocation3 + $0x111] sm:$0xff]  ;;  %v28365_v22 = vld [vmem:[#allocation2 + $0x129] sm:$0xff] }
 0x24f   : > { %v31573_v13 = vld [vmem:[#allocation31_spill] sm:$0xff] }
 0x250   : > { %v28043_v32 = vpop.f32.mrb[28].mxu1 }
 0x251   : > { %31566 = vst [vmem:[#allocation129_spill] sm:$0xff] %v28043_v32  ;;  %v28045_v17 = vpop.f32.mrb[29].mxu1  ;;  %22512 = vmatmul.mubr.msk.f32.gmra.mrb[4].mxu0 %vm606_vm1, %v27459_v25  ;;  %22965 = vmatmul.mubr.msk.f32.gmra.mrb[38].mxu1 %vm606_vm1, %v27461_v60  ;;  %v31574_v25 = vld [vmem:[#allocation26_spill] sm:$0xff]  ;;  %v28353_v32 = vld [vmem:[#allocation2 + $0x121] sm:$0xff] }
 0x252   : > { %31567 = vst [vmem:[#allocation130_spill] sm:$0xff] %v28045_v17  ;;  %22514 = vmatprep.mubr.msk.f32.mxu0 %vm606_vm1, %v27463_v33  ;;  %22967 = vmatprep.mubr.msk.f32.mxu1 %vm606_vm1, %v27465_v36  ;;  %v8011_v60 = vmul.f32 %v31574_v25, %v31573_v13  ;;  %v31575_v33 = vld [vmem:[#allocation38_spill] sm:$0xff]  ;;  %v28351_v17 = vld [vmem:[#allocation3 + $0x109] sm:$0xff] }
 0x253   : > { %v8012_v36 = vmul.f32 %v31574_v25, %v31575_v33  ;;  %v28273_v13 = vld [vmem:[#allocation2 + $0xa9] sm:$0xff]  ;;  %v28285_v33 = vld [vmem:[#allocation2 + $0xb1] sm:$0xff] }
 0x254   : > { %v28055_v19 = vpop.f32.mrb[30].mxu1 }
 0x255   : > { %31568 = vst [vmem:[#allocation131_spill] sm:$0xff] %v28055_v19  ;;  %v28057_v20 = vpop.f32.mrb[31].mxu1  ;;  %22515 = vmatmul.mubr.msk.f32.gmra.mrb[6].mxu0 %vm606_vm1, %v27475_v40  ;;  %22968 = vmatmul.mubr.msk.f32.gmra.mrb[40].mxu1 %vm606_vm1, %v27477_v38  ;;  %v31576_v40 = vld [vmem:[#allocation27_spill] sm:$0xff]  ;;  %v31577_v38 = vld [vmem:[#allocation50_spill] sm:$0xff] }
 0x256   : > { %31569 = vst [vmem:[#allocation132_spill] sm:$0xff] %v28057_v20  ;;  %22517 = vmatprep.mubr.msk.f32.mxu0 %vm606_vm1, %v27479_v8  ;;  %22970 = vmatprep.mubr.msk.f32.mxu1 %vm606_vm1, %v27481_v21  ;;  %v31578_v8 = vld [vmem:[#allocation30_spill] sm:$0xff]  ;;  %v31579_v21 = vld [vmem:[#allocation51_spill] sm:$0xff]  ;;  %31590 = vst [vmem:[#allocation27_spill] sm:$0xff] %v28351_v17 }
 0x257   : > { %v28347_v20 = vld [vmem:[#allocation3 + $0xf9] sm:$0xff]  ;;  %v28349_v19 = vld [vmem:[#allocation2 + $0x111] sm:$0xff]  ;;  %31591 = vst [vmem:[#allocation50_spill] sm:$0xff] %v28353_v32  ;;  %31592 = vst [vmem:[#allocation30_spill] sm:$0xff] %v28363_v9 }
 0x258   : > { %31588 = vst [vmem:[#allocation26_spill] sm:$0xff] %v28347_v20  ;;  %31589 = vst [vmem:[#allocation38_spill] sm:$0xff] %v28349_v19 }
 0x259   : > { %22518 = vmatmul.mubr.msk.f32.gmra.mrb[8].mxu0 %vm606_vm1, %v27491_v11  ;;  %22971 = vmatmul.mubr.msk.f32.gmra.mrb[42].mxu1 %vm606_vm1, %v27493_v10  ;;  %v31580_v11 = vld [vmem:[#allocation37_spill] sm:$0xff]  ;;  %31593 = vst [vmem:[#allocation51_spill] sm:$0xff] %v28365_v22 }
 0x25a   : > { %22520 = vmatprep.mubr.msk.f32.mxu0 %vm606_vm1, %v27495_v56  ;;  %22973 = vmatprep.mubr.msk.f32.mxu1 %vm606_vm1, %v27497_v35  ;;  %v8050_v10 = vadd.f32 %v31580_v11, %v8011_v60  ;;  %v28144_v56 = vld [vmem:[#allocation2 + $0x180] sm:$0xff]  ;;  %v8051_v35 = vadd.f32 %v31580_v11, %v8012_v36  ;;  %v28283_v60 = vld [vmem:[#allocation3 + $0x99] sm:$0xff]  ;;  %31594 = vst [vmem:[#allocation37_spill] sm:$0xff] %v28367_v23 }
 0x25b   : > { %v28287_v36 = vld [vmem:[#allocation3 + $0xa9] sm:$0xff] }
 0x25d   : > { %22521 = vmatmul.mubr.msk.f32.gmra.mrb[10].mxu0 %vm606_vm1, %v27507_v59  ;;  %22974 = vmatmul.mubr.msk.f32.gmra.mrb[44].mxu1 %vm606_vm1, %v27509_v27  ;;  %v31581_v59 = vld [vmem:[#allocation39_spill] sm:$0xff]  ;;  %v31582_v27 = vld [vmem:[#allocation34_spill] sm:$0xff] }
 0x25e   : > { %22523 = vmatprep.mubr.msk.f32.mxu0 %vm606_vm1, %v27511_v54  ;;  %22976 = vmatprep.mubr.msk.f32.mxu1 %vm606_vm1, %v27513_v62  ;;  %v28155_v54 = vld [vmem:[#allocation2 + $0x188] sm:$0xff]  ;;  %v8082_v62 = vmax.f32 %v8050_v10, 0.0  ;;  %v28305_v10 = vld [vmem:[#allocation2 + $0xd9] sm:$0xff]  ;;  %31595 = vst [vmem:[#allocation39_spill] sm:$0xff] %v28369_v39  ;;  %31596 = vst [vmem:[#allocation34_spill] sm:$0xff] %v28379_v31 }
 0x261   : > { %22524 = vmatmul.mubr.msk.f32.gmra.mrb[12].mxu0 %vm606_vm1, %v27523_v3  ;;  %22977 = vmatmul.mubr.msk.f32.gmra.mrb[46].mxu1 %vm606_vm1, %v27525_v14  ;;  %v28157_v3 = vld [vmem:[#allocation3 + $0x180] sm:$0xff]  ;;  %v9611_v14 = vld [vmem:[#allocation2 + $0x19] sm:$0xff] }
 0x262   : > { %22526 = vmatprep.mubr.msk.f32.mxu0 %vm606_vm1, %v27527_v28  ;;  %22979 = vmatprep.mubr.msk.f32.mxu1 %vm606_vm1, %v27529_v29  ;;  %v8083_v28 = vmax.f32 %v8051_v35, 0.0  ;;  %v31583_v29 = vld [vmem:[#allocation13_spill] sm:$0xff]  ;;  %v28315_v35 = vld [vmem:[#allocation3 + $0xc9] sm:$0xff] }
 0x265   : > { %22527 = vmatmul.mubr.msk.f32.gmra.mrb[14].mxu0 %vm606_vm1, %v27539_v50  ;;  %22980 = vmatmul.mubr.msk.f32.gmra.mrb[48].mxu1 %vm606_vm1, %v27541_v1  ;;  %v28163_v50 = vld [vmem:[#allocation3 + $0x188] sm:$0xff] }
 0x266   : > { %22529 = vmatprep.mubr.msk.f32.mxu0 %vm606_vm1, %v27543_v44  ;;  %22982 = vmatprep.mubr.msk.f32.mxu1 %vm606_vm1, %v27545_v51  ;;  %v28165_v1 = vld [vmem:[#allocation3 + $0x181] sm:$0xff]  ;;  %v9612_v51 = vld [vmem:[#allocation2 + $0x21] sm:$0xff] }
 0x267   : > { %31584 = vst [vmem:[#allocation46_spill] sm:$0xff] %v28165_v1  ;;  %v28167_v44 = vld [vmem:[#allocation3 + $0x182] sm:$0xff] }
 0x268   : > { %31585 = vst [vmem:[#allocation25_spill] sm:$0xff] %v28167_v44  ;;  %8114 = vst.msk [vmem:[#allocation3 + $0x181] sm:$0xff] %vm606_vm1, %v8082_v62  ;;  %v28321_v62 = vld [vmem:[#allocation2 + $0xf1] sm:$0xff] }
 0x269   : > { %22530 = vmatmul.mubr.msk.f32.gmra.mrb[16].mxu0 %vm606_vm1, %v27555_v45  ;;  %22983 = vmatmul.mubr.msk.f32.gmra.mrb[50].mxu1 %vm606_vm1, %v27557_v63  ;;  %v28172_v45 = vld [vmem:[#allocation3 + $0x189] sm:$0xff] }
 0x26a   : > { %22532 = vmatprep.mubr.msk.f32.mxu0 %vm606_vm1, %v27559_v12  ;;  %22985 = vmatprep.mubr.msk.f32.mxu1 %vm606_vm1, %v27561_v18  ;;  %31586 = vst [vmem:[#allocation47_spill] sm:$0xff] %v28172_v45  ;;  %v28174_v63 = vld [vmem:[#allocation3 + $0x18a] sm:$0xff]  ;;  %v28178_v12 = vld [vmem:[#allocation2 + $0x31] sm:$0xff] }
 0x26b   : > { %31587 = vst [vmem:[#allocation31_spill] sm:$0xff] %v28174_v63  ;;  %8115 = vst.msk [vmem:[#allocation3 + $0x189] sm:$0xff] %vm606_vm1, %v8083_v28  ;;  %v28183_v18 = vld [vmem:[%s31026_s6 + $0x18] sm:$0xf] }
 0x26c   : > { %v28333_v28 = vld [vmem:[#allocation2 + $0xf9] sm:$0xff] }
 0x26d   : > { %22533 = vmatmul.mubr.msk.f32.gmra.mrb[18].mxu0 %vm606_vm1, %v27571_v49  ;;  %22986 = vmatmul.mubr.msk.f32.gmra.mrb[52].mxu1 %vm606_vm1, %v27573_v37  ;;  %v28192_v49 = vld [vmem:[#allocation2 + $0x39] sm:$0xff]  ;;  %v28196_v37 = vld [vmem:[#allocation3 + $0x31] sm:$0xff] }
 0x26e   : > { %22535 = vmatprep.mubr.msk.f32.mxu0 %vm606_vm1, %v27575_v4  ;;  %22988 = vmatprep.mubr.msk.f32.mxu1 %vm606_vm1, %v27577_v24  ;;  %v28198_v4 = vld [vmem:[#allocation2 + $0x49] sm:$0xff]  ;;  %v28209_v24 = vld [vmem:[%s31034_s14 + $0x18] sm:$0xf] }
 0x271   : > { %22536 = vmatmul.mubr.msk.f32.gmra.mrb[20].mxu0 %vm606_vm1, %v27587_v6  ;;  %22989 = vmatmul.mubr.msk.f32.gmra.mrb[54].mxu1 %vm606_vm1, %v27589_v48  ;;  %v28215_v6 = vld [vmem:[#allocation3 + $0x39] sm:$0xff]  ;;  %v28217_v48 = vld [vmem:[#allocation2 + $0x51] sm:$0xff] }
 0x272   : > { %22538 = vmatprep.mubr.msk.f32.mxu0 %vm606_vm1, %v27591_v34  ;;  %22991 = vmatprep.mubr.msk.f32.mxu1 %vm606_vm1, %v27593_v53  ;;  %v28219_v34 = vld [vmem:[#allocation3 + $0x49] sm:$0xff]  ;;  %v28221_v53 = vld [vmem:[#allocation2 + $0x61] sm:$0xff] }
 0x275   : > { %22539 = vmatmul.mubr.msk.f32.gmra.mrb[22].mxu0 %vm606_vm1, %v27603_v41  ;;  %22992 = vmatmul.mubr.msk.f32.gmra.mrb[56].mxu1 %vm606_vm1, %v31570_v58  ;;  %v28235_v41 = vld [vmem:[#allocation3 + $0x51] sm:$0xff]  ;;  %v28267_v58 = vld [vmem:[#allocation3 + $0x81] sm:$0xff] }
 0x276   : > { %22541 = vmatprep.mubr.msk.f32.mxu0 %vm606_vm1, %v31571_v7  ;;  %22994 = vmatprep.mubr.msk.f32.mxu1 %vm606_vm1, %v31572_v26  ;;  %v28269_v7 = vld [vmem:[#allocation2 + $0x99] sm:$0xff]  ;;  %v28271_v26 = vld [vmem:[#allocation3 + $0x91] sm:$0xff] }
 0x279   : > { %22542 = vmatmul.mubr.msk.f32.gmra.mrb[24].mxu0 %vm606_vm1, %v31576_v40  ;;  %22995 = vmatmul.mubr.msk.f32.gmra.mrb[58].mxu1 %vm606_vm1, %v31577_v38  ;;  %v28289_v40 = vld [vmem:[#allocation2 + $0xc1] sm:$0xff] }
 0x27a   : > { %22544 = vmatprep.mubr.msk.f32.mxu0 %vm606_vm1, %v31578_v8  ;;  %22997 = vmatprep.mubr.msk.f32.mxu1 %vm606_vm1, %v31579_v21  ;;  %v28299_v38 = vld [vmem:[#allocation3 + $0xb1] sm:$0xff]  ;;  %v28301_v8 = vld [vmem:[#allocation2 + $0xc9] sm:$0xff]  ;;  %v28303_v21 = vld [vmem:[#allocation3 + $0xc1] sm:$0xff] }
 0x27d   : > { %22545 = vmatmul.mubr.msk.f32.gmra.mrb[26].mxu0 %vm606_vm1, %v31581_v59  ;;  %22998 = vmatmul.mubr.msk.f32.gmra.mrb[60].mxu1 %vm606_vm1, %v31582_v27  ;;  %v28317_v59 = vld [vmem:[#allocation2 + $0xe1] sm:$0xff]  ;;  %v28319_v27 = vld [vmem:[#allocation3 + $0xd9] sm:$0xff] }
 0x27e   : > { %22547 = vmatprep.mubr.msk.f32.mxu0 %vm606_vm1, %v27672_v0  ;;  %23000 = vmatprep.mubr.msk.f32.mxu1 %vm606_vm1, %v28144_v56  ;;  %v28237_v0 = vld [vmem:[#allocation2 + $0x69] sm:$0xff] }
 0x281   : > { %22548 = vmatmul.mubr.msk.f32.gmra.mrb[28].mxu0 %vm606_vm1, %v31583_v29  ;;  %23001 = vmatmul.mubr.msk.f32.gmra.mrb[62].mxu1 %vm606_vm1, %v28155_v54  ;;  %v28335_v29 = vld [vmem:[#allocation3 + $0xf1] sm:$0xff] }
 0x282   : > { %22550 = vmatprep.mubr.msk.f32.mxu0 %vm606_vm1, %v28157_v3  ;;  %23005 = vmatprep.mubr.msk.f32.mxu1 %vm606_vm1, %v9611_v14  ;;  %v28331_v14 = vld [vmem:[#allocation3 + $0xe1] sm:$0xff] }
 0x285   : > { %22551 = vmatmul.mubr.msk.f32.gmra.mrb[30].mxu0 %vm606_vm1, %v28163_v50  ;;  %23006 = vmatmul.mubr.msk.f32.vlgmr.msra.gmra.mrb[32].mxu1 %vm606_vm1, %v9612_v51  ;;  %v28337_v51 = vld [vmem:[#allocation2 + $0x109] sm:$0xff] }
 0x286   : > { %23054 = vmatpush3.msk.msra.mxu1 %vm999_vm0, %v27994_v16  ;;  %22555 = vmatprep.mubr.msk.f32.mxu0 %vm606_vm1, %v27709_v2  ;;  %v28239_v2 = vld [vmem:[#allocation3 + $0x61] sm:$0xff]  ;;  %v28253_v16 = vld [vmem:[#allocation2 + $0x81] sm:$0xff] }
 0x287   : > { %23008 = vmatprep.mubr.msk.f32.mxu1 %vm606_vm1, %v28178_v12  ;;  %23103 = vmatprep.subr.msk.mxu1 %vm999_vm0, %v28183_v18 }
 0x289   : > { %22556 = vmatmul.mubr.msk.f32.vlgmr.msra.gmra.mrb[0].mxu0 %vm606_vm1, %v27719_v61  ;;  %23009 = vmatmul.mubr.msk.f32.gmra.mrb[34].mxu1 %vm606_vm1, %v28192_v49  ;;  %v28255_v61 = vld [vmem:[#allocation3 + $0x79] sm:$0xff] }
 0x28a   : > { %22558 = vmatprep.mubr.msk.f32.mxu0 %vm606_vm1, %v28196_v37  ;;  %23011 = vmatprep.mubr.msk.f32.mxu1 %vm606_vm1, %v28198_v4 }
 0x28b   : > { %22604 = vmatpush3.msk.msra.mxu0 %vm999_vm0, %v28021_v30  ;;  %v28257_v30 = vld [vmem:[#allocation2 + $0x91] sm:$0xff] }
 0x28c   : > { %22653 = vmatprep.subr.msk.mxu0 %vm999_vm0, %v28209_v24 }
 0x28d   : > { %22559 = vmatmul.mubr.msk.f32.gmra.mrb[2].mxu0 %vm606_vm1, %v28215_v6  ;;  %23012 = vmatmul.mubr.msk.f32.gmra.mrb[36].mxu1 %vm606_vm1, %v28217_v48 }
 0x28e   : > { %22561 = vmatprep.mubr.msk.f32.mxu0 %vm606_vm1, %v28219_v34  ;;  %23014 = vmatprep.mubr.msk.f32.mxu1 %vm606_vm1, %v28221_v53 }
 0x291   : > { %22562 = vmatmul.mubr.msk.f32.gmra.mrb[4].mxu0 %vm606_vm1, %v28235_v41  ;;  %23015 = vmatmul.mubr.msk.f32.gmra.mrb[38].mxu1 %vm606_vm1, %v28237_v0 }
 0x292   : > { %22564 = vmatprep.mubr.msk.f32.mxu0 %vm606_vm1, %v28239_v2  ;;  %23017 = vmatprep.mubr.msk.f32.mxu1 %vm606_vm1, %v28241_v42 }
 0x295   : > { %22565 = vmatmul.mubr.msk.f32.gmra.mrb[6].mxu0 %vm606_vm1, %v28251_v5  ;;  %23018 = vmatmul.mubr.msk.f32.gmra.mrb[40].mxu1 %vm606_vm1, %v28253_v16 }
 0x296   : > { %22567 = vmatprep.mubr.msk.f32.mxu0 %vm606_vm1, %v28255_v61  ;;  %23020 = vmatprep.mubr.msk.f32.mxu1 %vm606_vm1, %v28257_v30 }
 0x299   : > { %22568 = vmatmul.mubr.msk.f32.gmra.mrb[8].mxu0 %vm606_vm1, %v28267_v58  ;;  %23021 = vmatmul.mubr.msk.f32.gmra.mrb[42].mxu1 %vm606_vm1, %v28269_v7 }
 0x29a   : > { %22570 = vmatprep.mubr.msk.f32.mxu0 %vm606_vm1, %v28271_v26  ;;  %23023 = vmatprep.mubr.msk.f32.mxu1 %vm606_vm1, %v28273_v13 }
 0x29d   : > { %22571 = vmatmul.mubr.msk.f32.gmra.mrb[10].mxu0 %vm606_vm1, %v28283_v60  ;;  %23024 = vmatmul.mubr.msk.f32.gmra.mrb[44].mxu1 %vm606_vm1, %v28285_v33 }
 0x29e   : > { %22573 = vmatprep.mubr.msk.f32.mxu0 %vm606_vm1, %v28287_v36  ;;  %23026 = vmatprep.mubr.msk.f32.mxu1 %vm606_vm1, %v28289_v40 }
 0x2a1   : > { %22574 = vmatmul.mubr.msk.f32.gmra.mrb[12].mxu0 %vm606_vm1, %v28299_v38  ;;  %23027 = vmatmul.mubr.msk.f32.gmra.mrb[46].mxu1 %vm606_vm1, %v28301_v8 }
 0x2a2   : > { %22576 = vmatprep.mubr.msk.f32.mxu0 %vm606_vm1, %v28303_v21  ;;  %23029 = vmatprep.mubr.msk.f32.mxu1 %vm606_vm1, %v28305_v10 }
 0x2a5   : > { %22577 = vmatmul.mubr.msk.f32.gmra.mrb[14].mxu0 %vm606_vm1, %v28315_v35  ;;  %23030 = vmatmul.mubr.msk.f32.gmra.mrb[48].mxu1 %vm606_vm1, %v28317_v59 }
 0x2a6   : > { %22579 = vmatprep.mubr.msk.f32.mxu0 %vm606_vm1, %v28319_v27  ;;  %23032 = vmatprep.mubr.msk.f32.mxu1 %vm606_vm1, %v28321_v62 }
 0x2a9   : > { %22580 = vmatmul.mubr.msk.f32.gmra.mrb[16].mxu0 %vm606_vm1, %v28331_v14  ;;  %23033 = vmatmul.mubr.msk.f32.gmra.mrb[50].mxu1 %vm606_vm1, %v28333_v28 }
 0x2aa   : > { %22582 = vmatprep.mubr.msk.f32.mxu0 %vm606_vm1, %v28335_v29  ;;  %23035 = vmatprep.mubr.msk.f32.mxu1 %vm606_vm1, %v28337_v51 }
 0x2ad   : > { %22583 = vmatmul.mubr.msk.f32.gmra.mrb[18].mxu0 %vm606_vm1, %v28347_v20  ;;  %23036 = vmatmul.mubr.msk.f32.gmra.mrb[52].mxu1 %vm606_vm1, %v28349_v19  ;;  %v28385_v19 = vld [vmem:[#allocation2 + $0x151] sm:$0xff] }
 0x2ae   : > { %22585 = vmatprep.mubr.msk.f32.mxu0 %vm606_vm1, %v28351_v17  ;;  %23038 = vmatprep.mubr.msk.f32.mxu1 %vm606_vm1, %v28353_v32  ;;  %v28381_v32 = vld [vmem:[#allocation2 + $0x141] sm:$0xff]  ;;  %v28383_v17 = vld [vmem:[#allocation3 + $0x139] sm:$0xff]  ;;  %31599 = vst [vmem:[#allocation134_spill] sm:$0xff] %v28385_v19 }
 0x2af   : > { %31597 = vst [vmem:[#allocation13_spill] sm:$0xff] %v28381_v32  ;;  %31598 = vst [vmem:[#allocation133_spill] sm:$0xff] %v28383_v17  ;;  %v6563_v20 = vld [vmem:[#allocation3 + $0x60] sm:$0xff] }
 0x2b1   : > { %22586 = vmatmul.mubr.msk.f32.gmra.mrb[20].mxu0 %vm606_vm1, %v28363_v9  ;;  %23039 = vmatmul.mubr.msk.f32.gmra.mrb[54].mxu1 %vm606_vm1, %v28365_v22  ;;  %v28399_v22 = vld [vmem:[#allocation3 + $0x151] sm:$0xff]  ;;  %v28401_v9 = vld [vmem:[#allocation2 + $0x169] sm:$0xff] }
 0x2b2   : > { %22588 = vmatprep.mubr.msk.f32.mxu0 %vm606_vm1, %v28367_v23  ;;  %23041 = vmatprep.mubr.msk.f32.mxu1 %vm606_vm1, %v28369_v39  ;;  %v28395_v39 = vld [vmem:[#allocation3 + $0x141] sm:$0xff]  ;;  %v28397_v23 = vld [vmem:[#allocation2 + $0x159] sm:$0xff]  ;;  %31602 = vst [vmem:[#allocation137_spill] sm:$0xff] %v28399_v22  ;;  %31603 = vst [vmem:[#allocation138_spill] sm:$0xff] %v28401_v9 }
 0x2b3   : > { %31600 = vst [vmem:[#allocation135_spill] sm:$0xff] %v28395_v39  ;;  %31601 = vst [vmem:[#allocation136_spill] sm:$0xff] %v28397_v23 }
 0x2b5   : > { %22589 = vmatmul.mubr.msk.f32.gmra.mrb[22].mxu0 %vm606_vm1, %v28379_v31  ;;  %23042 = vmatmul.mubr.msk.f32.gmra.mrb[56].mxu1 %vm606_vm1, %v28381_v32  ;;  %v28415_v32 = vld [vmem:[#allocation3 + $0x169] sm:$0xff]  ;;  %v28417_v31 = vld [vmem:[#allocation2 + $0x181] sm:$0xff] }
 0x2b6   : > { %22591 = vmatprep.mubr.msk.f32.mxu0 %vm606_vm1, %v28383_v17  ;;  %23044 = vmatprep.mubr.msk.f32.mxu1 %vm606_vm1, %v28385_v19  ;;  %v28411_v19 = vld [vmem:[#allocation3 + $0x159] sm:$0xff]  ;;  %v28413_v17 = vld [vmem:[#allocation2 + $0x171] sm:$0xff]  ;;  %31606 = vst [vmem:[#allocation141_spill] sm:$0xff] %v28415_v32  ;;  %31607 = vst [vmem:[#allocation142_spill] sm:$0xff] %v28417_v31 }
 0x2b7   : > { %31604 = vst [vmem:[#allocation139_spill] sm:$0xff] %v28411_v19  ;;  %31605 = vst [vmem:[#allocation140_spill] sm:$0xff] %v28413_v17 }
 0x2b9   : > { %22592 = vmatmul.mubr.msk.f32.gmra.mrb[24].mxu0 %vm606_vm1, %v28395_v39  ;;  %23045 = vmatmul.mubr.msk.f32.gmra.mrb[58].mxu1 %vm606_vm1, %v28397_v23 }
 0x2ba   : > { %22594 = vmatprep.mubr.msk.f32.mxu0 %vm606_vm1, %v28399_v22  ;;  %23047 = vmatprep.mubr.msk.f32.mxu1 %vm606_vm1, %v28401_v9  ;;  %v28427_v9 = vld [vmem:[#allocation3 + $0x171] sm:$0xff]  ;;  %v28429_v22 = vld [vmem:[#allocation2 + $0x189] sm:$0xff] }
 0x2bb   : > { %31608 = vst [vmem:[#allocation143_spill] sm:$0xff] %v28427_v9  ;;  %31609 = vst [vmem:[#allocation144_spill] sm:$0xff] %v28429_v22 }
 0x2bd   : > { %22595 = vmatmul.mubr.msk.f32.gmra.mrb[26].mxu0 %vm606_vm1, %v28411_v19  ;;  %23048 = vmatmul.mubr.msk.f32.gmra.mrb[60].mxu1 %vm606_vm1, %v28413_v17  ;;  %v31610_v17 = vld [vmem:[#allocation43_spill] sm:$0xff]  ;;  %v6559_v19 = vld [vmem:[#allocation3 + $0x30] sm:$0xff] }
 0x2be   : > { %22597 = vmatprep.mubr.msk.f32.mxu0 %vm606_vm1, %v28415_v32  ;;  %23050 = vmatprep.mubr.msk.f32.mxu1 %vm606_vm1, %v28417_v31  ;;  %v28442_v31 = vld [vmem:[%s31026_s6 + $0x1c] sm:$0xf]  ;;  %v31624_v32 = vld [vmem:[#allocation76_spill] sm:$0xff] }
 0x2c1   : > { %22598 = vmatmul.mubr.msk.f32.gmra.mrb[28].mxu0 %vm606_vm1, %v28427_v9  ;;  %23051 = vmatmul.mubr.msk.f32.gmra.mrb[62].mxu1 %vm606_vm1, %v28429_v22  ;;  %v31611_v22 = vld [vmem:[#allocation56_spill] sm:$0xff]  ;;  %v31614_v9 = vld [vmem:[#allocation62_spill] sm:$0xff] }
 0x2c2   : > { %22600 = vmatprep.mubr.msk.f32.mxu0 %vm606_vm1, %v28165_v1  ;;  %23055 = vmatprep.mubr.msk.f32.mxu1 %vm606_vm1, %v31610_v17  ;;  %v31612_v1 = vld [vmem:[#allocation15_spill] sm:$0xff]  ;;  %v31613_v17 = vld [vmem:[#allocation58_spill] sm:$0xff] }
 0x2c5   : > { %22601 = vmatmul.mubr.msk.f32.gmra.mrb[30].mxu0 %vm606_vm1, %v28172_v45  ;;  %23056 = vmatmul.mubr.msk.f32.vlgmr.msra.gmra.mrb[32].mxu1 %vm606_vm1, %v27705_v46  ;;  %v28463_v46 = vld [vmem:[%s31034_s14 + $0x1c] sm:$0xf]  ;;  %v31620_v45 = vld [vmem:[#allocation70_spill] sm:$0xff] }
 0x2c6   : > { %23104 = vmatpush3.msk.msra.mxu1 %vm999_vm0, %v28183_v18  ;;  %22605 = vmatprep.mubr.msk.f32.mxu0 %vm606_vm1, %v31611_v22  ;;  %v31615_v18 = vld [vmem:[#allocation63_spill] sm:$0xff]  ;;  %v31616_v22 = vld [vmem:[#allocation64_spill] sm:$0xff] }
 0x2c7   : > { %23058 = vmatprep.mubr.msk.f32.mxu1 %vm606_vm1, %v31612_v1  ;;  %23153 = vmatprep.subr.msk.mxu1 %vm999_vm0, %v28442_v31  ;;  %v31617_v1 = vld [vmem:[#allocation67_spill] sm:$0xff] }
 0x2c9   : > { %22606 = vmatmul.mubr.msk.f32.vlgmr.msra.gmra.mrb[0].mxu0 %vm606_vm1, %v31613_v17  ;;  %23059 = vmatmul.mubr.msk.f32.gmra.mrb[34].mxu1 %vm606_vm1, %v31614_v9  ;;  %v31618_v9 = vld [vmem:[#allocation68_spill] sm:$0xff]  ;;  %v31619_v17 = vld [vmem:[#allocation69_spill] sm:$0xff] }
 0x2ca   : > { %22608 = vmatprep.mubr.msk.f32.mxu0 %vm606_vm1, %v31615_v18  ;;  %23061 = vmatprep.mubr.msk.f32.mxu1 %vm606_vm1, %v31616_v22  ;;  %v31621_v18 = vld [vmem:[#allocation73_spill] sm:$0xff]  ;;  %v31622_v22 = vld [vmem:[#allocation74_spill] sm:$0xff] }
 0x2cb   : > { %22654 = vmatpush3.msk.msra.mxu0 %vm999_vm0, %v28209_v24  ;;  %v31623_v24 = vld [vmem:[#allocation75_spill] sm:$0xff] }
 0x2cc   : > { %22703 = vmatprep.subr.msk.mxu0 %vm999_vm0, %v28463_v46 }
 0x2cd   : > { %22609 = vmatmul.mubr.msk.f32.gmra.mrb[2].mxu0 %vm606_vm1, %v31617_v1  ;;  %23062 = vmatmul.mubr.msk.f32.gmra.mrb[36].mxu1 %vm606_vm1, %v31618_v9  ;;  %v31625_v1 = vld [vmem:[#allocation79_spill] sm:$0xff]  ;;  %v31626_v9 = vld [vmem:[#allocation80_spill] sm:$0xff] }
 0x2ce   : > { %22611 = vmatprep.mubr.msk.f32.mxu0 %vm606_vm1, %v31619_v17  ;;  %23064 = vmatprep.mubr.msk.f32.mxu1 %vm606_vm1, %v31620_v45  ;;  %v31627_v17 = vld [vmem:[#allocation81_spill] sm:$0xff]  ;;  %v31628_v45 = vld [vmem:[#allocation82_spill] sm:$0xff] }
 0x2d1   : > { %22612 = vmatmul.mubr.msk.f32.gmra.mrb[4].mxu0 %vm606_vm1, %v31621_v18  ;;  %23065 = vmatmul.mubr.msk.f32.gmra.mrb[38].mxu1 %vm606_vm1, %v31622_v22  ;;  %v31629_v18 = vld [vmem:[#allocation83_spill] sm:$0xff]  ;;  %v31630_v22 = vld [vmem:[#allocation84_spill] sm:$0xff] }
 0x2d2   : > { %22614 = vmatprep.mubr.msk.f32.mxu0 %vm606_vm1, %v31623_v24  ;;  %23067 = vmatprep.mubr.msk.f32.mxu1 %vm606_vm1, %v31624_v32  ;;  %v31631_v24 = vld [vmem:[#allocation85_spill] sm:$0xff]  ;;  %v31632_v32 = vld [vmem:[#allocation86_spill] sm:$0xff] }
 0x2d5   : > { %22615 = vmatmul.mubr.msk.f32.gmra.mrb[6].mxu0 %vm606_vm1, %v31625_v1  ;;  %23068 = vmatmul.mubr.msk.f32.gmra.mrb[40].mxu1 %vm606_vm1, %v31626_v9  ;;  %v31633_v1 = vld [vmem:[#allocation87_spill] sm:$0xff]  ;;  %v31634_v9 = vld [vmem:[#allocation88_spill] sm:$0xff] }
 0x2d6   : > { %22617 = vmatprep.mubr.msk.f32.mxu0 %vm606_vm1, %v31627_v17  ;;  %23070 = vmatprep.mubr.msk.f32.mxu1 %vm606_vm1, %v31628_v45  ;;  %v31635_v17 = vld [vmem:[#allocation89_spill] sm:$0xff]  ;;  %v31636_v45 = vld [vmem:[#allocation90_spill] sm:$0xff] }
 0x2d9   : > { %22618 = vmatmul.mubr.msk.f32.gmra.mrb[8].mxu0 %vm606_vm1, %v31629_v18  ;;  %23071 = vmatmul.mubr.msk.f32.gmra.mrb[42].mxu1 %vm606_vm1, %v31630_v22  ;;  %v31637_v18 = vld [vmem:[#allocation91_spill] sm:$0xff]  ;;  %v31638_v22 = vld [vmem:[#allocation92_spill] sm:$0xff] }
 0x2da   : > { %22620 = vmatprep.mubr.msk.f32.mxu0 %vm606_vm1, %v31631_v24  ;;  %23073 = vmatprep.mubr.msk.f32.mxu1 %vm606_vm1, %v31632_v32  ;;  %v31639_v24 = vld [vmem:[#allocation93_spill] sm:$0xff]  ;;  %v31640_v32 = vld [vmem:[#allocation94_spill] sm:$0xff] }
 0x2dd   : > { %22621 = vmatmul.mubr.msk.f32.gmra.mrb[10].mxu0 %vm606_vm1, %v31633_v1  ;;  %23074 = vmatmul.mubr.msk.f32.gmra.mrb[44].mxu1 %vm606_vm1, %v31634_v9  ;;  %v31641_v1 = vld [vmem:[#allocation95_spill] sm:$0xff]  ;;  %v31642_v9 = vld [vmem:[#allocation96_spill] sm:$0xff] }
 0x2de   : > { %22623 = vmatprep.mubr.msk.f32.mxu0 %vm606_vm1, %v31635_v17  ;;  %23076 = vmatprep.mubr.msk.f32.mxu1 %vm606_vm1, %v31636_v45  ;;  %v31643_v17 = vld [vmem:[#allocation97_spill] sm:$0xff]  ;;  %v31644_v45 = vld [vmem:[#allocation98_spill] sm:$0xff] }
 0x2e1   : > { %22624 = vmatmul.mubr.msk.f32.gmra.mrb[12].mxu0 %vm606_vm1, %v31637_v18  ;;  %23077 = vmatmul.mubr.msk.f32.gmra.mrb[46].mxu1 %vm606_vm1, %v31638_v22  ;;  %v31645_v18 = vld [vmem:[#allocation99_spill] sm:$0xff]  ;;  %v31646_v22 = vld [vmem:[#allocation100_spill] sm:$0xff] }
 0x2e2   : > { %22626 = vmatprep.mubr.msk.f32.mxu0 %vm606_vm1, %v31639_v24  ;;  %23079 = vmatprep.mubr.msk.f32.mxu1 %vm606_vm1, %v31640_v32  ;;  %v31647_v24 = vld [vmem:[#allocation101_spill] sm:$0xff]  ;;  %v31648_v32 = vld [vmem:[#allocation102_spill] sm:$0xff] }
 0x2e5   : > { %22627 = vmatmul.mubr.msk.f32.gmra.mrb[14].mxu0 %vm606_vm1, %v31641_v1  ;;  %23080 = vmatmul.mubr.msk.f32.gmra.mrb[48].mxu1 %vm606_vm1, %v31642_v9  ;;  %v31649_v1 = vld [vmem:[#allocation103_spill] sm:$0xff]  ;;  %v31650_v9 = vld [vmem:[#allocation104_spill] sm:$0xff] }
 0x2e6   : > { %22629 = vmatprep.mubr.msk.f32.mxu0 %vm606_vm1, %v31643_v17  ;;  %23082 = vmatprep.mubr.msk.f32.mxu1 %vm606_vm1, %v31644_v45  ;;  %v31651_v17 = vld [vmem:[#allocation105_spill] sm:$0xff]  ;;  %v31652_v45 = vld [vmem:[#allocation106_spill] sm:$0xff] }
 0x2e9   : > { %22630 = vmatmul.mubr.msk.f32.gmra.mrb[16].mxu0 %vm606_vm1, %v31645_v18  ;;  %23083 = vmatmul.mubr.msk.f32.gmra.mrb[50].mxu1 %vm606_vm1, %v31646_v22  ;;  %v31653_v18 = vld [vmem:[#allocation107_spill] sm:$0xff]  ;;  %v31654_v22 = vld [vmem:[#allocation108_spill] sm:$0xff] }
 0x2ea   : > { %22632 = vmatprep.mubr.msk.f32.mxu0 %vm606_vm1, %v31647_v24  ;;  %23085 = vmatprep.mubr.msk.f32.mxu1 %vm606_vm1, %v31648_v32  ;;  %v31655_v24 = vld [vmem:[#allocation109_spill] sm:$0xff]  ;;  %v31656_v32 = vld [vmem:[#allocation110_spill] sm:$0xff] }
 0x2ed   : > { %22633 = vmatmul.mubr.msk.f32.gmra.mrb[18].mxu0 %vm606_vm1, %v31649_v1  ;;  %23086 = vmatmul.mubr.msk.f32.gmra.mrb[52].mxu1 %vm606_vm1, %v31650_v9  ;;  %v31657_v1 = vld [vmem:[#allocation111_spill] sm:$0xff]  ;;  %v31658_v9 = vld [vmem:[#allocation112_spill] sm:$0xff] }
 0x2ee   : > { %22635 = vmatprep.mubr.msk.f32.mxu0 %vm606_vm1, %v31651_v17  ;;  %23088 = vmatprep.mubr.msk.f32.mxu1 %vm606_vm1, %v31652_v45  ;;  %v31659_v17 = vld [vmem:[#allocation113_spill] sm:$0xff]  ;;  %v31660_v45 = vld [vmem:[#allocation114_spill] sm:$0xff] }
 0x2f1   : > { %22636 = vmatmul.mubr.msk.f32.gmra.mrb[20].mxu0 %vm606_vm1, %v31653_v18  ;;  %23089 = vmatmul.mubr.msk.f32.gmra.mrb[54].mxu1 %vm606_vm1, %v31654_v22  ;;  %v31661_v18 = vld [vmem:[#allocation117_spill] sm:$0xff]  ;;  %v31662_v22 = vld [vmem:[#allocation118_spill] sm:$0xff] }
 0x2f2   : > { %22638 = vmatprep.mubr.msk.f32.mxu0 %vm606_vm1, %v31655_v24  ;;  %23091 = vmatprep.mubr.msk.f32.mxu1 %vm606_vm1, %v31656_v32  ;;  %v31663_v24 = vld [vmem:[#allocation6_spill] sm:$0xff] }
 0x2f3   : > { %v7983_v32 = vmul.f32 %v31574_v25, %v31663_v24 }
 0x2f5   : > { %22639 = vmatmul.mubr.msk.f32.gmra.mrb[22].mxu0 %vm606_vm1, %v31657_v1  ;;  %23092 = vmatmul.mubr.msk.f32.gmra.mrb[56].mxu1 %vm606_vm1, %v31658_v9  ;;  %v28571_v1 = vld [vmem:[#allocation2 + $0x182] sm:$0xff]  ;;  %v31665_v9 = vld [vmem:[#allocation59_spill] sm:$0xff] }
 0x2f6   : > { %22641 = vmatprep.mubr.msk.f32.mxu0 %vm606_vm1, %v31659_v17  ;;  %23094 = vmatprep.mubr.msk.f32.mxu1 %vm606_vm1, %v31660_v45  ;;  %31664 = vst [vmem:[#allocation43_spill] sm:$0xff] %v28571_v1  ;;  %v7984_v17 = vmul.f32 %v31574_v25, %v31665_v9  ;;  %v28585_v45 = vld [vmem:[#allocation2 + $0x18a] sm:$0xff] }
 0x2f7   : > { %31667 = vst [vmem:[#allocation56_spill] sm:$0xff] %v28585_v45 }
 0x2f8   : > { %v8023_v9 = vadd.f32 %v31580_v11, %v7984_v17 }
 0x2f9   : > { %22642 = vmatmul.mubr.msk.f32.gmra.mrb[24].mxu0 %vm606_vm1, %v27949_v43  ;;  %23095 = vmatmul.mubr.msk.f32.gmra.mrb[58].mxu1 %vm606_vm1, %v27951_v52  ;;  %v31666_v52 = vld [vmem:[#allocation7_spill] sm:$0xff] }
 0x2fa   : > { %22644 = vmatprep.mubr.msk.f32.mxu0 %vm606_vm1, %v31661_v18  ;;  %23097 = vmatprep.mubr.msk.f32.mxu1 %vm606_vm1, %v31662_v22  ;;  %v7985_v43 = vmul.f32 %v31574_v25, %v31666_v52  ;;  %v8022_v18 = vadd.f32 %v31580_v11, %v7983_v32  ;;  %v31668_v22 = vld [vmem:[#allocation8_spill] sm:$0xff]  ;;  %v10392_v32 = vld [vmem:[#allocation2 + $0x38] sm:$0xff]  ;;  %v8055_v23 = vmax.f32 %v8023_v9, 0.0  ;;  %v10394_v9 = vld [vmem:[#allocation2 + $0x50] sm:$0xff] }
 0x2fb   : > { %v7986_v24 = vmul.f32 %v31574_v25, %v31668_v22 }
 0x2fc   : > { %v8054_v22 = vmax.f32 %v8022_v18, 0.0 }
 0x2fd   : > { %22645 = vmatmul.mubr.msk.f32.gmra.mrb[26].mxu0 %vm606_vm1, %v27969_v47  ;;  %23098 = vmatmul.mubr.msk.f32.gmra.mrb[60].mxu1 %vm606_vm1, %v27971_v15  ;;  %v10391_v47 = vld [vmem:[#allocation2 + $0x30] sm:$0xff]  ;;  %v31669_v15 = vld [vmem:[#allocation9_spill] sm:$0xff]  ;;  %v8025_v17 = vadd.f32 %v31580_v11, %v7986_v24  ;;  %v31671_v24 = vld [vmem:[#allocation11_spill] sm:$0xff] }
 0x2fe   : > { %22647 = vmatprep.mubr.msk.f32.mxu0 %vm606_vm1, %v27973_v55  ;;  %23100 = vmatprep.mubr.msk.f32.mxu1 %vm606_vm1, %v28571_v1  ;;  %v8024_v55 = vadd.f32 %v31580_v11, %v7985_v43  ;;  %v7987_v52 = vmul.f32 %v31574_v25, %v31669_v15  ;;  %v31670_v1 = vld [vmem:[#allocation10_spill] sm:$0xff]  ;;  %v28607_v43 = vld [vmem:[%s31026_s6 + $0x20] sm:$0xf]  ;;  %v7989_v15 = vmul.f32 %v31574_v25, %v31671_v24 }
 0x2ff   : > { %v8057_v39 = vmax.f32 %v8025_v17, 0.0  ;;  %v28642_v17 = vld [vmem:[#allocation3 + $0x4a] sm:$0xff]  ;;  %v31676_v24 = vld [vmem:[#allocation14_spill] sm:$0xff] }
 0x300   : > { %v8026_v18 = vadd.f32 %v31580_v11, %v7987_v52  ;;  %v31673_v52 = vld [vmem:[#allocation12_spill] sm:$0xff]  ;;  %31675 = vst [vmem:[#allocation62_spill] sm:$0xff] %v28642_v17 }
 0x301   : > { %22648 = vmatmul.mubr.msk.f32.gmra.mrb[28].mxu0 %vm606_vm1, %v27987_v57  ;;  %23101 = vmatmul.mubr.msk.f32.gmra.mrb[62].mxu1 %vm606_vm1, %v28585_v45  ;;  %v7988_v57 = vmul.f32 %v31574_v25, %v31670_v1  ;;  %v10393_v45 = vld [vmem:[#allocation2 + $0x48] sm:$0xff] }
 0x302   : > { %22650 = vmatprep.mubr.msk.f32.mxu0 %vm606_vm1, %v28167_v44  ;;  %23105 = vmatprep.mubr.msk.f32.mxu1 %vm606_vm1, %v10391_v47  ;;  %v8056_v47 = vmax.f32 %v8024_v55, 0.0  ;;  %v6560_v1 = vld [vmem:[#allocation3 + $0x38] sm:$0xff]  ;;  %v28624_v55 = vld [vmem:[%s31024_s4] ss:$0 sm:$0xff] }
 0x303   : > { %v28618_v44 = vld [vmem:[#allocation3 + $0x32] sm:$0xff]  ;;  %v7990_v25 = vmul.f32 %v28624_v55, %v31673_v52 }
 0x304   : > { %31672 = vst [vmem:[#allocation15_spill] sm:$0xff] %v28618_v44  ;;  %8086 = vst.msk [vmem:[#allocation3 + $0x31] sm:$0xff] %vm606_vm1, %v8054_v22  ;;  %v28647_v22 = vld [vmem:[%s31025_s5] ss:$0 sm:$0xff]  ;;  %v28655_v52 = vld [vmem:[#allocation3 + $0x52] sm:$0xff] }
 0x305   : > { %22651 = vmatmul.mubr.msk.f32.gmra.mrb[30].mxu0 %vm606_vm1, %v28174_v63  ;;  %23106 = vmatmul.mubr.msk.f32.vlgmr.msra.gmra.mrb[32].mxu1 %vm606_vm1, %v10392_v32  ;;  %v8027_v63 = vadd.f32 %v31580_v11, %v7988_v57  ;;  %v10395_v32 = vld [vmem:[#allocation2 + $0x60] sm:$0xff]  ;;  %v8058_v57 = vmax.f32 %v8026_v18, 0.0  ;;  %v8029_v17 = vadd.f32 %v28647_v22, %v7990_v25 }
 0x306   : > { %23154 = vmatpush3.msk.msra.mxu1 %vm999_vm0, %v28442_v31  ;;  %22655 = vmatprep.mubr.msk.f32.mxu0 %vm606_vm1, %v6559_v19  ;;  %v6561_v31 = vld [vmem:[#allocation3 + $0x48] sm:$0xff]  ;;  %v28632_v19 = vld [vmem:[#allocation3 + $0x3a] sm:$0xff]  ;;  %v6562_v11 = vld [vmem:[#allocation3 + $0x50] sm:$0xff] }
 0x307   : > { %23108 = vmatprep.mubr.msk.f32.mxu1 %vm606_vm1, %v10393_v45  ;;  %23203 = vmatprep.subr.msk.mxu1 %vm999_vm0, %v28607_v43  ;;  %31674 = vst [vmem:[#allocation58_spill] sm:$0xff] %v28632_v19  ;;  %8087 = vst.msk [vmem:[#allocation3 + $0x39] sm:$0xff] %vm606_vm1, %v8055_v23  ;;  %v28640_v45 = vld [vmem:[%s31034_s14 + $0x20] sm:$0xf]  ;;  %v8028_v23 = vadd.f32 %v28647_v22, %v7989_v15  ;;  %v8059_v18 = vmax.f32 %v8027_v63, 0.0  ;;  %v10397_v15 = vld [vmem:[#allocation2 + $0x78] sm:$0xff] }
 0x308   : > { %8088 = vst.msk [vmem:[#allocation3 + $0x49] sm:$0xff] %vm606_vm1, %v8056_v47  ;;  %v31677_v19 = vld [vmem:[#allocation52_spill] sm:$0xff]  ;;  %8089 = vst.msk [vmem:[#allocation3 + $0x51] sm:$0xff] %vm606_vm1, %v8057_v39  ;;  %v6564_v63 = vld [vmem:[#allocation3 + $0x68] sm:$0xff] }
 0x309   : > { %22656 = vmatmul.mubr.msk.f32.vlgmr.msra.gmra.mrb[0].mxu0 %vm606_vm1, %v6560_v1  ;;  %23109 = vmatmul.mubr.msk.f32.gmra.mrb[34].mxu1 %vm606_vm1, %v10394_v9  ;;  %v7991_v1 = vmul.f32 %v28624_v55, %v31676_v24  ;;  %v10396_v9 = vld [vmem:[#allocation2 + $0x68] sm:$0xff]  ;;  %v7992_v44 = vmul.f32 %v28624_v55, %v31677_v19  ;;  %v28667_v47 = vld [vmem:[#allocation3 + $0x62] sm:$0xff]  ;;  %v8060_v25 = vmax.f32 %v8028_v23, 0.0  ;;  %v10398_v39 = vld [vmem:[#allocation2 + $0x80] sm:$0xff] }
 0x30a   : > { %22658 = vmatprep.mubr.msk.f32.mxu0 %vm606_vm1, %v6561_v31  ;;  %23111 = vmatprep.mubr.msk.f32.mxu1 %vm606_vm1, %v10395_v32  ;;  %31678 = vst [vmem:[#allocation63_spill] sm:$0xff] %v28667_v47  ;;  %v31679_v32 = vld [vmem:[#allocation16_spill] sm:$0xff]  ;;  %8090 = vst.msk [vmem:[#allocation3 + $0x61] sm:$0xff] %vm606_vm1, %v8058_v57  ;;  %v6565_v47 = vld [vmem:[#allocation3 + $0x78] sm:$0xff] }
 0x30b   : > { %22704 = vmatpush3.msk.msra.mxu0 %vm999_vm0, %v28463_v46  ;;  %v8030_v31 = vadd.f32 %v28647_v22, %v7991_v1  ;;  %v7993_v19 = vmul.f32 %v28624_v55, %v31679_v32  ;;  %v28675_v46 = vld [vmem:[#allocation3 + $0x6a] sm:$0xff]  ;;  %v8031_v24 = vadd.f32 %v28647_v22, %v7992_v44  ;;  %v10399_v1 = vld [vmem:[#allocation2 + $0x90] sm:$0xff] }
 0x30c   : > { %22753 = vmatprep.subr.msk.mxu0 %vm999_vm0, %v28640_v45  ;;  %31680 = vst [vmem:[#allocation64_spill] sm:$0xff] %v28675_v46  ;;  %8091 = vst.msk [vmem:[#allocation3 + $0x69] sm:$0xff] %vm606_vm1, %v8059_v18  ;;  %v28691_v18 = vld [vmem:[#allocation3 + $0x82] sm:$0xff]  ;;  %v31685_v46 = vld [vmem:[#allocation40_spill] sm:$0xff] }
 0x30d   : > { %22659 = vmatmul.mubr.msk.f32.gmra.mrb[2].mxu0 %vm606_vm1, %v6562_v11  ;;  %23112 = vmatmul.mubr.msk.f32.gmra.mrb[36].mxu1 %vm606_vm1, %v10396_v9  ;;  %v8061_v11 = vmax.f32 %v8029_v17, 0.0  ;;  %v31681_v9 = vld [vmem:[#allocation53_spill] sm:$0xff]  ;;  %v8062_v57 = vmax.f32 %v8030_v31, 0.0  ;;  %v8032_v32 = vadd.f32 %v28647_v22, %v7993_v19  ;;  %v31683_v17 = vld [vmem:[#allocation19_spill] sm:$0xff]  ;;  %31684 = vst [vmem:[#allocation68_spill] sm:$0xff] %v28691_v18  ;;  %v7996_v31 = vmul.f32 %v28624_v55, %v31685_v46  ;;  %v10402_v46 = vld [vmem:[#allocation2 + $0xb0] sm:$0xff] }
 0x30e   : > { %22661 = vmatprep.mubr.msk.f32.mxu0 %vm606_vm1, %v6563_v20  ;;  %23114 = vmatprep.mubr.msk.f32.mxu1 %vm606_vm1, %v10397_v15  ;;  %v7994_v23 = vmul.f32 %v28624_v55, %v31681_v9  ;;  %v6566_v20 = vld [vmem:[#allocation3 + $0x80] sm:$0xff]  ;;  %v7995_v44 = vmul.f32 %v28624_v55, %v31683_v17  ;;  %v10400_v9 = vld [vmem:[#allocation2 + $0x98] sm:$0xff]  ;;  %v10401_v19 = vld [vmem:[#allocation2 + $0xa8] sm:$0xff] }
 0x30f   : > { %v28683_v15 = vld [vmem:[#allocation3 + $0x7a] sm:$0xff] }
 0x310   : > { %31682 = vst [vmem:[#allocation67_spill] sm:$0xff] %v28683_v15  ;;  %8092 = vst.msk [vmem:[#allocation3 + $0x79] sm:$0xff] %vm606_vm1, %v8060_v25  ;;  %v6567_v15 = vld [vmem:[#allocation3 + $0x90] sm:$0xff]  ;;  %v8064_v25 = vmax.f32 %v8032_v32, 0.0  ;;  %v8034_v17 = vadd.f32 %v28647_v22, %v7995_v44  ;;  %v31689_v18 = vld [vmem:[#allocation41_spill] sm:$0xff] }
 0x311   : > { %22662 = vmatmul.mubr.msk.f32.gmra.mrb[4].mxu0 %vm606_vm1, %v6564_v63  ;;  %23115 = vmatmul.mubr.msk.f32.gmra.mrb[38].mxu1 %vm606_vm1, %v10398_v39  ;;  %v8063_v63 = vmax.f32 %v8031_v24, 0.0  ;;  %v8033_v39 = vadd.f32 %v28647_v22, %v7994_v23  ;;  %8093 = vst.msk [vmem:[#allocation3 + $0x81] sm:$0xff] %vm606_vm1, %v8061_v11  ;;  %v31687_v24 = vld [vmem:[#allocation20_spill] sm:$0xff]  ;;  %v28707_v11 = vld [vmem:[#allocation3 + $0x9a] sm:$0xff]  ;;  %v7998_v32 = vmul.f32 %v28624_v55, %v31689_v18 }
 0x312   : > { %22664 = vmatprep.mubr.msk.f32.mxu0 %vm606_vm1, %v6565_v47  ;;  %23117 = vmatprep.mubr.msk.f32.mxu1 %vm606_vm1, %v10399_v1  ;;  %v6568_v47 = vld [vmem:[#allocation3 + $0x98] sm:$0xff]  ;;  %v7997_v23 = vmul.f32 %v28624_v55, %v31687_v24  ;;  %31688 = vst [vmem:[#allocation70_spill] sm:$0xff] %v28707_v11  ;;  %v10403_v44 = vld [vmem:[#allocation2 + $0xc0] sm:$0xff] }
 0x313   : > { %v28699_v1 = vld [vmem:[#allocation3 + $0x92] sm:$0xff] }
 0x314   : > { %31686 = vst [vmem:[#allocation69_spill] sm:$0xff] %v28699_v1  ;;  %8094 = vst.msk [vmem:[#allocation3 + $0x91] sm:$0xff] %vm606_vm1, %v8062_v57  ;;  %v6569_v1 = vld [vmem:[#allocation3 + $0xa8] sm:$0xff]  ;;  %v8066_v57 = vmax.f32 %v8034_v17, 0.0  ;;  %v8036_v24 = vadd.f32 %v28647_v22, %v7997_v23  ;;  %v10404_v18 = vld [vmem:[#allocation2 + $0xc8] sm:$0xff] }
 0x315   : > { %22665 = vmatmul.mubr.msk.f32.gmra.mrb[6].mxu0 %vm606_vm1, %v6566_v20  ;;  %23118 = vmatmul.mubr.msk.f32.gmra.mrb[40].mxu1 %vm606_vm1, %v10400_v9  ;;  %v8065_v20 = vmax.f32 %v8033_v39, 0.0  ;;  %v8035_v9 = vadd.f32 %v28647_v22, %v7996_v31  ;;  %8095 = vst.msk [vmem:[#allocation3 + $0x99] sm:$0xff] %vm606_vm1, %v8063_v63  ;;  %v31691_v39 = vld [vmem:[#allocation21_spill] sm:$0xff]  ;;  %v31693_v11 = vld [vmem:[#allocation24_spill] sm:$0xff]  ;;  %v10405_v23 = vld [vmem:[#allocation2 + $0xd8] sm:$0xff] }
 0x316   : > { %22667 = vmatprep.mubr.msk.f32.mxu0 %vm606_vm1, %v6567_v15  ;;  %23120 = vmatprep.mubr.msk.f32.mxu1 %vm606_vm1, %v10401_v19  ;;  %v6570_v15 = vld [vmem:[#allocation3 + $0xb0] sm:$0xff]  ;;  %v7999_v31 = vmul.f32 %v28624_v55, %v31691_v39  ;;  %v8000_v17 = vmul.f32 %v28624_v55, %v31693_v11 }
 0x317   : > { %v28715_v19 = vld [vmem:[#allocation3 + $0xaa] sm:$0xff]  ;;  %v28723_v63 = vld [vmem:[#allocation3 + $0xb2] sm:$0xff] }
 0x318   : > { %31690 = vst [vmem:[#allocation73_spill] sm:$0xff] %v28715_v19  ;;  %8096 = vst.msk [vmem:[#allocation3 + $0xa9] sm:$0xff] %vm606_vm1, %v8064_v25  ;;  %v6571_v19 = vld [vmem:[#allocation3 + $0xc0] sm:$0xff]  ;;  %v8068_v25 = vmax.f32 %v8036_v24, 0.0  ;;  %v8038_v39 = vadd.f32 %v28647_v22, %v7999_v31  ;;  %v10406_v11 = vld [vmem:[#allocation2 + $0xe0] sm:$0xff] }
 0x319   : > { %22668 = vmatmul.mubr.msk.f32.gmra.mrb[8].mxu0 %vm606_vm1, %v6568_v47  ;;  %23121 = vmatmul.mubr.msk.f32.gmra.mrb[42].mxu1 %vm606_vm1, %v10402_v46  ;;  %31692 = vst [vmem:[#allocation74_spill] sm:$0xff] %v28723_v63  ;;  %v8067_v47 = vmax.f32 %v8035_v9, 0.0  ;;  %v8037_v46 = vadd.f32 %v28647_v22, %v7998_v32  ;;  %8097 = vst.msk [vmem:[#allocation3 + $0xb1] sm:$0xff] %vm606_vm1, %v8065_v20  ;;  %v31695_v9 = vld [vmem:[#allocation28_spill] sm:$0xff]  ;;  %v31697_v63 = vld [vmem:[#allocation17_spill] sm:$0xff] }
 0x31a   : > { %22670 = vmatprep.mubr.msk.f32.mxu0 %vm606_vm1, %v6569_v1  ;;  %23123 = vmatprep.mubr.msk.f32.mxu1 %vm606_vm1, %v10403_v44  ;;  %v6572_v1 = vld [vmem:[#allocation3 + $0xc8] sm:$0xff]  ;;  %v8001_v32 = vmul.f32 %v28624_v55, %v31695_v9  ;;  %v8002_v24 = vmul.f32 %v28624_v55, %v31697_v63  ;;  %v10407_v31 = vld [vmem:[#allocation2 + $0xf0] sm:$0xff] }
 0x31b   : > { %v28731_v44 = vld [vmem:[#allocation3 + $0xc2] sm:$0xff]  ;;  %v28739_v20 = vld [vmem:[#allocation3 + $0xca] sm:$0xff] }
 0x31c   : > { %31694 = vst [vmem:[#allocation75_spill] sm:$0xff] %v28731_v44  ;;  %8098 = vst.msk [vmem:[#allocation3 + $0xc1] sm:$0xff] %vm606_vm1, %v8066_v57  ;;  %v6573_v44 = vld [vmem:[#allocation3 + $0xd8] sm:$0xff]  ;;  %v8070_v57 = vmax.f32 %v8038_v39, 0.0  ;;  %v8040_v9 = vadd.f32 %v28647_v22, %v8001_v32  ;;  %v10408_v63 = vld [vmem:[#allocation2 + $0xf8] sm:$0xff] }
 0x31d   : > { %22671 = vmatmul.mubr.msk.f32.gmra.mrb[10].mxu0 %vm606_vm1, %v6570_v15  ;;  %23124 = vmatmul.mubr.msk.f32.gmra.mrb[44].mxu1 %vm606_vm1, %v10404_v18  ;;  %31696 = vst [vmem:[#allocation76_spill] sm:$0xff] %v28739_v20  ;;  %v8069_v15 = vmax.f32 %v8037_v46, 0.0  ;;  %v8039_v18 = vadd.f32 %v28647_v22, %v8000_v17  ;;  %8099 = vst.msk [vmem:[#allocation3 + $0xc9] sm:$0xff] %vm606_vm1, %v8067_v47  ;;  %v31699_v46 = vld [vmem:[#allocation29_spill] sm:$0xff]  ;;  %v28755_v47 = vld [vmem:[#allocation3 + $0xe2] sm:$0xff] }
 0x31e   : > { %22673 = vmatprep.mubr.msk.f32.mxu0 %vm606_vm1, %v6571_v19  ;;  %23126 = vmatprep.mubr.msk.f32.mxu1 %vm606_vm1, %v10405_v23  ;;  %v6574_v19 = vld [vmem:[#allocation3 + $0xe0] sm:$0xff]  ;;  %v8003_v17 = vmul.f32 %v28624_v55, %v31699_v46  ;;  %31700 = vst [vmem:[#allocation80_spill] sm:$0xff] %v28755_v47  ;;  %v10409_v32 = vld [vmem:[#allocation2 + $0x108] sm:$0xff]  ;;  %v31705_v47 = vld [vmem:[#allocation36_spill] sm:$0xff] }
 0x31f   : > { %v28747_v23 = vld [vmem:[#allocation3 + $0xda] sm:$0xff] }
 0x320   : > { %31698 = vst [vmem:[#allocation79_spill] sm:$0xff] %v28747_v23  ;;  %8100 = vst.msk [vmem:[#allocation3 + $0xd9] sm:$0xff] %vm606_vm1, %v8068_v25  ;;  %v31701_v20 = vld [vmem:[#allocation18_spill] sm:$0xff]  ;;  %v6575_v23 = vld [vmem:[#allocation3 + $0xf0] sm:$0xff]  ;;  %v8072_v25 = vmax.f32 %v8040_v9, 0.0  ;;  %v8042_v46 = vadd.f32 %v28647_v22, %v8003_v17  ;;  %v8006_v9 = vmul.f32 %v28624_v55, %v31705_v47 }
 0x321   : > { %22674 = vmatmul.mubr.msk.f32.gmra.mrb[12].mxu0 %vm606_vm1, %v6572_v1  ;;  %23127 = vmatmul.mubr.msk.f32.gmra.mrb[46].mxu1 %vm606_vm1, %v10406_v11  ;;  %v8071_v1 = vmax.f32 %v8039_v18, 0.0  ;;  %v8041_v11 = vadd.f32 %v28647_v22, %v8002_v24  ;;  %v8004_v39 = vmul.f32 %v28624_v55, %v31701_v20  ;;  %8101 = vst.msk [vmem:[#allocation3 + $0xe1] sm:$0xff] %vm606_vm1, %v8069_v15  ;;  %v31703_v18 = vld [vmem:[#allocation35_spill] sm:$0xff]  ;;  %v10410_v20 = vld [vmem:[#allocation2 + $0x110] sm:$0xff]  ;;  %v10411_v17 = vld [vmem:[#allocation2 + $0x120] sm:$0xff] }
 0x322   : > { %22676 = vmatprep.mubr.msk.f32.mxu0 %vm606_vm1, %v6573_v44  ;;  %23129 = vmatprep.mubr.msk.f32.mxu1 %vm606_vm1, %v10407_v31  ;;  %v6576_v44 = vld [vmem:[#allocation3 + $0xf8] sm:$0xff]  ;;  %v8005_v24 = vmul.f32 %v28624_v55, %v31703_v18 }
 0x323   : > { %v28763_v31 = vld [vmem:[#allocation3 + $0xf2] sm:$0xff]  ;;  %v28771_v15 = vld [vmem:[#allocation3 + $0xfa] sm:$0xff] }
 0x324   : > { %31702 = vst [vmem:[#allocation81_spill] sm:$0xff] %v28763_v31  ;;  %8102 = vst.msk [vmem:[#allocation3 + $0xf1] sm:$0xff] %vm606_vm1, %v8070_v57  ;;  %v6577_v31 = vld [vmem:[#allocation3 + $0x108] sm:$0xff]  ;;  %v8074_v57 = vmax.f32 %v8042_v46, 0.0  ;;  %v8044_v18 = vadd.f32 %v28647_v22, %v8005_v24  ;;  %v10412_v47 = vld [vmem:[#allocation2 + $0x128] sm:$0xff] }
 0x325   : > { %22677 = vmatmul.mubr.msk.f32.gmra.mrb[14].mxu0 %vm606_vm1, %v6574_v19  ;;  %23130 = vmatmul.mubr.msk.f32.gmra.mrb[48].mxu1 %vm606_vm1, %v10408_v63  ;;  %31704 = vst [vmem:[#allocation82_spill] sm:$0xff] %v28771_v15  ;;  %v8073_v19 = vmax.f32 %v8041_v11, 0.0  ;;  %v8043_v63 = vadd.f32 %v28647_v22, %v8004_v39  ;;  %8103 = vst.msk [vmem:[#allocation3 + $0xf9] sm:$0xff] %vm606_vm1, %v8071_v1  ;;  %v31707_v11 = vld [vmem:[#allocation44_spill] sm:$0xff]  ;;  %v31709_v15 = vld [vmem:[#allocation22_spill] sm:$0xff] }
 0x326   : > { %22679 = vmatprep.mubr.msk.f32.mxu0 %vm606_vm1, %v6575_v23  ;;  %23132 = vmatprep.mubr.msk.f32.mxu1 %vm606_vm1, %v10409_v32  ;;  %v6578_v23 = vld [vmem:[#allocation3 + $0x110] sm:$0xff]  ;;  %v8007_v39 = vmul.f32 %v28624_v55, %v31707_v11  ;;  %v8008_v46 = vmul.f32 %v28624_v55, %v31709_v15  ;;  %v10413_v24 = vld [vmem:[#allocation2 + $0x138] sm:$0xff] }
 0x327   : > { %v28779_v32 = vld [vmem:[#allocation3 + $0x10a] sm:$0xff]  ;;  %v28787_v1 = vld [vmem:[#allocation3 + $0x112] sm:$0xff] }
 0x328   : > { %31706 = vst [vmem:[#allocation83_spill] sm:$0xff] %v28779_v32  ;;  %8104 = vst.msk [vmem:[#allocation3 + $0x109] sm:$0xff] %vm606_vm1, %v8072_v25  ;;  %v6579_v32 = vld [vmem:[#allocation3 + $0x120] sm:$0xff]  ;;  %v8076_v25 = vmax.f32 %v8044_v18, 0.0  ;;  %v8046_v11 = vadd.f32 %v28647_v22, %v8007_v39  ;;  %v10414_v15 = vld [vmem:[#allocation2 + $0x140] sm:$0xff] }
 0x329   : > { %22680 = vmatmul.mubr.msk.f32.gmra.mrb[16].mxu0 %vm606_vm1, %v6576_v44  ;;  %23133 = vmatmul.mubr.msk.f32.gmra.mrb[50].mxu1 %vm606_vm1, %v10410_v20  ;;  %31708 = vst [vmem:[#allocation84_spill] sm:$0xff] %v28787_v1  ;;  %v8075_v44 = vmax.f32 %v8043_v63, 0.0  ;;  %v8045_v20 = vadd.f32 %v28647_v22, %v8006_v9  ;;  %8105 = vst.msk [vmem:[#allocation3 + $0x111] sm:$0xff] %vm606_vm1, %v8073_v19  ;;  %v31711_v63 = vld [vmem:[#allocation45_spill] sm:$0xff]  ;;  %v28803_v19 = vld [vmem:[#allocation3 + $0x12a] sm:$0xff] }
 0x32a   : > { %22682 = vmatprep.mubr.msk.f32.mxu0 %vm606_vm1, %v6577_v31  ;;  %23135 = vmatprep.mubr.msk.f32.mxu1 %vm606_vm1, %v10411_v17  ;;  %v6580_v31 = vld [vmem:[#allocation3 + $0x128] sm:$0xff]  ;;  %v8009_v9 = vmul.f32 %v28624_v55, %v31711_v63  ;;  %v10415_v39 = vld [vmem:[#allocation2 + $0x150] sm:$0xff] }
 0x32b   : > { %v28795_v17 = vld [vmem:[#allocation3 + $0x122] sm:$0xff] }
 0x32c   : > { %31710 = vst [vmem:[#allocation85_spill] sm:$0xff] %v28795_v17  ;;  %8106 = vst.msk [vmem:[#allocation3 + $0x121] sm:$0xff] %vm606_vm1, %v8074_v57  ;;  %v31712_v1 = vld [vmem:[#allocation23_spill] sm:$0xff]  ;;  %v6581_v17 = vld [vmem:[#allocation3 + $0x138] sm:$0xff]  ;;  %v8078_v57 = vmax.f32 %v8046_v11, 0.0  ;;  %v8048_v63 = vadd.f32 %v28647_v22, %v8009_v9 }
 0x32d   : > { %22683 = vmatmul.mubr.msk.f32.gmra.mrb[18].mxu0 %vm606_vm1, %v6578_v23  ;;  %23136 = vmatmul.mubr.msk.f32.gmra.mrb[52].mxu1 %vm606_vm1, %v10412_v47  ;;  %v8077_v23 = vmax.f32 %v8045_v20, 0.0  ;;  %v8047_v47 = vadd.f32 %v28647_v22, %v8008_v46  ;;  %v8010_v18 = vmul.f32 %v28624_v55, %v31712_v1  ;;  %8107 = vst.msk [vmem:[#allocation3 + $0x129] sm:$0xff] %vm606_vm1, %v8075_v44  ;;  %v10416_v20 = vld [vmem:[#allocation2 + $0x158] sm:$0xff]  ;;  %v6583_v46 = vld [vmem:[#allocation3 + $0x150] sm:$0xff]  ;;  %v6584_v11 = vld [vmem:[#allocation3 + $0x158] sm:$0xff] }
 0x32e   : > { %22685 = vmatprep.mubr.msk.f32.mxu0 %vm606_vm1, %v6579_v32  ;;  %23138 = vmatprep.mubr.msk.f32.mxu1 %vm606_vm1, %v10413_v24  ;;  %v6582_v32 = vld [vmem:[#allocation3 + $0x140] sm:$0xff]  ;;  %v8080_v9 = vmax.f32 %v8048_v63, 0.0  ;;  %v6589_v63 = vld [vmem:[#allocation3 + $0x198] sm:$0xff] }
 0x32f   : > { %v28811_v24 = vld [vmem:[#allocation3 + $0x13a] sm:$0xff]  ;;  %v28817_v55 = vld [vmem:[#allocation3 + $0x142] sm:$0xff]  ;;  %v8079_v1 = vmax.f32 %v8047_v47, 0.0  ;;  %v8049_v44 = vadd.f32 %v28647_v22, %v8010_v18  ;;  %v28833_v18 = vld [vmem:[#allocation3 + $0x16a] sm:$0xff] }
 0x330   : > { %8108 = vst.msk [vmem:[#allocation3 + $0x139] sm:$0xff] %vm606_vm1, %v8076_v25  ;;  %8109 = vst.msk [vmem:[#allocation3 + $0x141] sm:$0xff] %vm606_vm1, %v8077_v23  ;;  %v10418_v25 = vld [vmem:[#allocation2 + $0x170] sm:$0xff]  ;;  %v6585_v47 = vld [vmem:[#allocation3 + $0x168] sm:$0xff] }
 0x331   : > { %22686 = vmatmul.mubr.msk.f32.gmra.mrb[20].mxu0 %vm606_vm1, %v6580_v31  ;;  %23139 = vmatmul.mubr.msk.f32.gmra.mrb[54].mxu1 %vm606_vm1, %v10414_v15  ;;  %v10417_v31 = vld [vmem:[#allocation2 + $0x168] sm:$0xff]  ;;  %v8081_v15 = vmax.f32 %v8049_v44, 0.0  ;;  %v6586_v23 = vld [vmem:[#allocation3 + $0x170] sm:$0xff] }
 0x332   : > { %22688 = vmatprep.mubr.msk.f32.mxu0 %vm606_vm1, %v6581_v17  ;;  %23141 = vmatprep.mubr.msk.f32.mxu1 %vm606_vm1, %v10415_v39  ;;  %v28823_v17 = vld [vmem:[#allocation3 + $0x152] sm:$0xff]  ;;  %v28828_v22 = vld [vmem:[#allocation3 + $0x15a] sm:$0xff]  ;;  %8112 = vst.msk [vmem:[#allocation3 + $0x169] sm:$0xff] %vm606_vm1, %v8080_v9 }
 0x333   : > { %8110 = vst.msk [vmem:[#allocation3 + $0x151] sm:$0xff] %vm606_vm1, %v8078_v57  ;;  %8111 = vst.msk [vmem:[#allocation3 + $0x159] sm:$0xff] %vm606_vm1, %v8079_v1  ;;  %v28839_v39 = vld [vmem:[#allocation3 + $0x172] sm:$0xff]  ;;  %v11179_v1 = vld [vmem:[#allocation2 + $0x92] sm:$0xff] }
 0x334   : > { %8113 = vst.msk [vmem:[#allocation3 + $0x171] sm:$0xff] %vm606_vm1, %v8081_v15  ;;  %v10422_v57 = vld [vmem:[#allocation2 + $0x1a0] sm:$0xff]  ;;  %v31744_v9 = vld [vmem:[#allocation69_spill] sm:$0xff] }
 0x335   : > { %22689 = vmatmul.mubr.msk.f32.gmra.mrb[22].mxu0 %vm606_vm1, %v6582_v32  ;;  %23142 = vmatmul.mubr.msk.f32.gmra.mrb[56].mxu1 %vm606_vm1, %v10416_v20  ;;  %v10421_v32 = vld [vmem:[#allocation2 + $0x198] sm:$0xff]  ;;  %v11178_v20 = vld [vmem:[#allocation2 + $0x82] sm:$0xff] }
 0x336   : > { %22691 = vmatprep.mubr.msk.f32.mxu0 %vm606_vm1, %v6583_v46  ;;  %23144 = vmatprep.mubr.msk.f32.mxu1 %vm606_vm1, %v10417_v31  ;;  %v31741_v44 = vld [vmem:[#allocation64_spill] sm:$0xff]  ;;  %v31742_v46 = vld [vmem:[#allocation67_spill] sm:$0xff]  ;;  %v11181_v31 = vld [vmem:[#allocation2 + $0xaa] sm:$0xff] }
 0x337   : > { %v11183_v15 = vld [vmem:[#allocation2 + $0xc2] sm:$0xff] }
 0x339   : > { %22692 = vmatmul.mubr.msk.f32.gmra.mrb[24].mxu0 %vm606_vm1, %v6584_v11  ;;  %23145 = vmatmul.mubr.msk.f32.gmra.mrb[58].mxu1 %vm606_vm1, %v10418_v25  ;;  %v31743_v11 = vld [vmem:[#allocation68_spill] sm:$0xff]  ;;  %v11182_v25 = vld [vmem:[#allocation2 + $0xb2] sm:$0xff] }
 0x33a   : > { %22694 = vmatprep.mubr.msk.f32.mxu0 %vm606_vm1, %v6585_v47  ;;  %23147 = vmatprep.mubr.msk.f32.mxu1 %vm606_vm1, %v28144_v56  ;;  %v6590_v56 = vld [vmem:[#allocation3 + $0x1a0] sm:$0xff] }
 0x33b   : > { %v31745_v47 = vld [vmem:[#allocation70_spill] sm:$0xff] }
 0x33d   : > { %22695 = vmatmul.mubr.msk.f32.gmra.mrb[26].mxu0 %vm606_vm1, %v6586_v23  ;;  %23148 = vmatmul.mubr.msk.f32.gmra.mrb[60].mxu1 %vm606_vm1, %v28155_v54  ;;  %v28857_v54 = vld [vmem:[%s31027_s7 + $0x4] sm:$0xf]  ;;  %v31746_v23 = vld [vmem:[#allocation73_spill] sm:$0xff] }
 0x33e   : > { %22697 = vmatprep.mubr.msk.f32.mxu0 %vm606_vm1, %v28157_v3  ;;  %23150 = vmatprep.mubr.msk.f32.mxu1 %vm606_vm1, %v10421_v32  ;;  %v31713_v3 = vld [vmem:[#allocation26_spill] sm:$0xff] }
 0x33f   : > { %v11184_v32 = vld [vmem:[#allocation2 + $0xca] sm:$0xff] }
 0x341   : > { %22698 = vmatmul.mubr.msk.f32.gmra.mrb[28].mxu0 %vm606_vm1, %v28163_v50  ;;  %23151 = vmatmul.mubr.msk.f32.gmra.mrb[62].mxu1 %vm606_vm1, %v10422_v57  ;;  %v31714_v50 = vld [vmem:[#allocation38_spill] sm:$0xff]  ;;  %v11185_v57 = vld [vmem:[#allocation2 + $0xda] sm:$0xff] }
 0x342   : > { %22700 = vmatprep.mubr.msk.f32.mxu0 %vm606_vm1, %v6589_v63  ;;  %23155 = vmatprep.mubr.msk.f32.mxu1 %vm606_vm1, %v28178_v12  ;;  %v31715_v12 = vld [vmem:[#allocation27_spill] sm:$0xff]  ;;  %v31747_v63 = vld [vmem:[#allocation74_spill] sm:$0xff] }
 0x345   : > { %22701 = vmatmul.mubr.msk.f32.gmra.mrb[30].mxu0 %vm606_vm1, %v6590_v56  ;;  %23156 = vmatmul.mubr.msk.f32.vlgmr.msra.gmra.mrb[32].mxu1 %vm606_vm1, %v28192_v49  ;;  %v31716_v49 = vld [vmem:[#allocation50_spill] sm:$0xff]  ;;  %v31748_v56 = vld [vmem:[#allocation75_spill] sm:$0xff] }
 0x346   : > { %23204 = vmatpush3.msk.msra.mxu1 %vm999_vm0, %v28607_v43  ;;  %22705 = vmatprep.mubr.msk.f32.mxu0 %vm606_vm1, %v28196_v37  ;;  %v31717_v37 = vld [vmem:[#allocation30_spill] sm:$0xff]  ;;  %v11177_v43 = vld [vmem:[#allocation2 + $0x7a] sm:$0xff] }
 0x347   : > { %23158 = vmatprep.mubr.msk.f32.mxu1 %vm606_vm1, %v28198_v4  ;;  %23253 = vmatprep.subr.msk.mxu1 %vm999_vm0, %v28857_v54  ;;  %v31718_v4 = vld [vmem:[#allocation51_spill] sm:$0xff] }
 0x349   : > { %22706 = vmatmul.mubr.msk.f32.vlgmr.msra.gmra.mrb[0].mxu0 %vm606_vm1, %v28215_v6  ;;  %23159 = vmatmul.mubr.msk.f32.gmra.mrb[34].mxu1 %vm606_vm1, %v28217_v48  ;;  %v31719_v6 = vld [vmem:[#allocation37_spill] sm:$0xff]  ;;  %v31720_v48 = vld [vmem:[#allocation39_spill] sm:$0xff] }
 0x34a   : > { %22708 = vmatprep.mubr.msk.f32.mxu0 %vm606_vm1, %v28219_v34  ;;  %23161 = vmatprep.mubr.msk.f32.mxu1 %vm606_vm1, %v28221_v53  ;;  %v31721_v34 = vld [vmem:[#allocation34_spill] sm:$0xff]  ;;  %v31722_v53 = vld [vmem:[#allocation13_spill] sm:$0xff] }
 0x34b   : > { %22754 = vmatpush3.msk.msra.mxu0 %vm999_vm0, %v28640_v45  ;;  %v31740_v45 = vld [vmem:[#allocation63_spill] sm:$0xff] }
 0x34d   : > { %22709 = vmatmul.mubr.msk.f32.gmra.mrb[2].mxu0 %vm606_vm1, %v28235_v41  ;;  %23162 = vmatmul.mubr.msk.f32.gmra.mrb[36].mxu1 %vm606_vm1, %v28237_v0  ;;  %v31723_v41 = vld [vmem:[#allocation133_spill] sm:$0xff]  ;;  %v31724_v0 = vld [vmem:[#allocation134_spill] sm:$0xff] }
 0x34e   : > { %22711 = vmatprep.mubr.msk.f32.mxu0 %vm606_vm1, %v28239_v2  ;;  %23164 = vmatprep.mubr.msk.f32.mxu1 %vm606_vm1, %v28241_v42  ;;  %v31725_v2 = vld [vmem:[#allocation135_spill] sm:$0xff]  ;;  %v31726_v42 = vld [vmem:[#allocation136_spill] sm:$0xff] }
 0x351   : > { %22712 = vmatmul.mubr.msk.f32.gmra.mrb[4].mxu0 %vm606_vm1, %v28251_v5  ;;  %23165 = vmatmul.mubr.msk.f32.gmra.mrb[38].mxu1 %vm606_vm1, %v28253_v16  ;;  %v31727_v5 = vld [vmem:[#allocation137_spill] sm:$0xff]  ;;  %v31728_v16 = vld [vmem:[#allocation138_spill] sm:$0xff] }
 0x352   : > { %22714 = vmatprep.mubr.msk.f32.mxu0 %vm606_vm1, %v28255_v61  ;;  %23167 = vmatprep.mubr.msk.f32.mxu1 %vm606_vm1, %v28257_v30  ;;  %v31729_v61 = vld [vmem:[#allocation139_spill] sm:$0xff]  ;;  %v31730_v30 = vld [vmem:[#allocation140_spill] sm:$0xff] }
 0x355   : > { %22715 = vmatmul.mubr.msk.f32.gmra.mrb[6].mxu0 %vm606_vm1, %v28267_v58  ;;  %23168 = vmatmul.mubr.msk.f32.gmra.mrb[40].mxu1 %vm606_vm1, %v28269_v7  ;;  %v31731_v58 = vld [vmem:[#allocation141_spill] sm:$0xff]  ;;  %v31732_v7 = vld [vmem:[#allocation142_spill] sm:$0xff] }
 0x356   : > { %22717 = vmatprep.mubr.msk.f32.mxu0 %vm606_vm1, %v28271_v26  ;;  %23170 = vmatprep.mubr.msk.f32.mxu1 %vm606_vm1, %v28273_v13  ;;  %v10811_v26 = vld [vmem:[#allocation2 + $0x199] sm:$0xff] }
 0x357   : > { %v31733_v13 = vld [vmem:[#allocation143_spill] sm:$0xff] }
 0x359   : > { %22718 = vmatmul.mubr.msk.f32.gmra.mrb[8].mxu0 %vm606_vm1, %v28283_v60  ;;  %23171 = vmatmul.mubr.msk.f32.gmra.mrb[42].mxu1 %vm606_vm1, %v28285_v33  ;;  %v31734_v60 = vld [vmem:[#allocation144_spill] sm:$0xff]  ;;  %v31735_v33 = vld [vmem:[#allocation46_spill] sm:$0xff] }
 0x35a   : > { %22720 = vmatprep.mubr.msk.f32.mxu0 %vm606_vm1, %v28287_v36  ;;  %23173 = vmatprep.mubr.msk.f32.mxu1 %vm606_vm1, %v28289_v40  ;;  %v10812_v36 = vld [vmem:[#allocation2 + $0x1a1] sm:$0xff]  ;;  %v6979_v40 = vld [vmem:[#allocation3 + $0x199] sm:$0xff] }
 0x35d   : > { %22721 = vmatmul.mubr.msk.f32.gmra.mrb[10].mxu0 %vm606_vm1, %v28299_v38  ;;  %23174 = vmatmul.mubr.msk.f32.gmra.mrb[44].mxu1 %vm606_vm1, %v28301_v8  ;;  %v11171_v38 = vld [vmem:[#allocation2 + $0x32] sm:$0xff] }
 0x35e   : > { %22723 = vmatprep.mubr.msk.f32.mxu0 %vm606_vm1, %v28303_v21  ;;  %23176 = vmatprep.mubr.msk.f32.mxu1 %vm606_vm1, %v28305_v10  ;;  %v31736_v8 = vld [vmem:[#allocation47_spill] sm:$0xff] }
 0x35f   : > { %v6980_v21 = vld [vmem:[#allocation3 + $0x1a1] sm:$0xff]  ;;  %v11172_v10 = vld [vmem:[#allocation2 + $0x3a] sm:$0xff] }
 0x361   : > { %22724 = vmatmul.mubr.msk.f32.gmra.mrb[12].mxu0 %vm606_vm1, %v28315_v35  ;;  %23177 = vmatmul.mubr.msk.f32.gmra.mrb[46].mxu1 %vm606_vm1, %v28317_v59  ;;  %v11173_v35 = vld [vmem:[#allocation2 + $0x4a] sm:$0xff]  ;;  %v28991_v59 = vld [vmem:[%s31027_s7] sm:$0xf] }
 0x362   : > { %22726 = vmatprep.mubr.msk.f32.mxu0 %vm606_vm1, %v28319_v27  ;;  %23179 = vmatprep.mubr.msk.f32.mxu1 %vm606_vm1, %v28321_v62  ;;  %v31737_v27 = vld [vmem:[#allocation15_spill] sm:$0xff] }
 0x363   : > { %v11174_v62 = vld [vmem:[#allocation2 + $0x52] sm:$0xff] }
 0x365   : > { %22727 = vmatmul.mubr.msk.f32.gmra.mrb[14].mxu0 %vm606_vm1, %v28331_v14  ;;  %23180 = vmatmul.mubr.msk.f32.gmra.mrb[48].mxu1 %vm606_vm1, %v28333_v28  ;;  %v11175_v14 = vld [vmem:[#allocation2 + $0x62] sm:$0xff]  ;;  %v31738_v28 = vld [vmem:[#allocation58_spill] sm:$0xff] }
 0x366   : > { %22729 = vmatprep.mubr.msk.f32.mxu0 %vm606_vm1, %v28335_v29  ;;  %23182 = vmatprep.mubr.msk.f32.mxu1 %vm606_vm1, %v28337_v51  ;;  %v31739_v29 = vld [vmem:[#allocation62_spill] sm:$0xff] }
 0x367   : > { %v11176_v51 = vld [vmem:[#allocation2 + $0x6a] sm:$0xff] }
 0x369   : > { %22730 = vmatmul.mubr.msk.f32.gmra.mrb[16].mxu0 %vm606_vm1, %v31713_v3  ;;  %23183 = vmatmul.mubr.msk.f32.gmra.mrb[50].mxu1 %vm606_vm1, %v31714_v50  ;;  %v11187_v3 = vld [vmem:[#allocation2 + $0xf2] sm:$0xff]  ;;  %v31749_v50 = vld [vmem:[#allocation76_spill] sm:$0xff] }
 0x36a   : > { %22732 = vmatprep.mubr.msk.f32.mxu0 %vm606_vm1, %v31715_v12  ;;  %23185 = vmatprep.mubr.msk.f32.mxu1 %vm606_vm1, %v31716_v49  ;;  %v31750_v12 = vld [vmem:[#allocation79_spill] sm:$0xff] }
 0x36b   : > { %v11188_v49 = vld [vmem:[#allocation2 + $0xfa] sm:$0xff] }
 0x36d   : > { %22733 = vmatmul.mubr.msk.f32.gmra.mrb[18].mxu0 %vm606_vm1, %v31717_v37  ;;  %23186 = vmatmul.mubr.msk.f32.gmra.mrb[52].mxu1 %vm606_vm1, %v31718_v4  ;;  %v11189_v37 = vld [vmem:[#allocation2 + $0x10a] sm:$0xff]  ;;  %v31751_v4 = vld [vmem:[#allocation80_spill] sm:$0xff] }
 0x36e   : > { %22735 = vmatprep.mubr.msk.f32.mxu0 %vm606_vm1, %v31719_v6  ;;  %23188 = vmatprep.mubr.msk.f32.mxu1 %vm606_vm1, %v31720_v48  ;;  %v31752_v6 = vld [vmem:[#allocation81_spill] sm:$0xff]  ;;  %v11190_v48 = vld [vmem:[#allocation2 + $0x112] sm:$0xff] }
 0x371   : > { %22736 = vmatmul.mubr.msk.f32.gmra.mrb[20].mxu0 %vm606_vm1, %v31721_v34  ;;  %23189 = vmatmul.mubr.msk.f32.gmra.mrb[54].mxu1 %vm606_vm1, %v31722_v53  ;;  %v11191_v34 = vld [vmem:[#allocation2 + $0x122] sm:$0xff]  ;;  %v31753_v53 = vld [vmem:[#allocation82_spill] sm:$0xff] }
 0x372   : > { %22738 = vmatprep.mubr.msk.f32.mxu0 %vm606_vm1, %v31723_v41  ;;  %23191 = vmatprep.mubr.msk.f32.mxu1 %vm606_vm1, %v31724_v0  ;;  %v31754_v41 = vld [vmem:[#allocation83_spill] sm:$0xff]  ;;  %v11192_v0 = vld [vmem:[#allocation2 + $0x12a] sm:$0xff] }
 0x375   : > { %22739 = vmatmul.mubr.msk.f32.gmra.mrb[22].mxu0 %vm606_vm1, %v31725_v2  ;;  %23192 = vmatmul.mubr.msk.f32.gmra.mrb[56].mxu1 %vm606_vm1, %v31726_v42  ;;  %v11193_v2 = vld [vmem:[#allocation2 + $0x13a] sm:$0xff] }
 0x376   : > { %22741 = vmatprep.mubr.msk.f32.mxu0 %vm606_vm1, %v31727_v5  ;;  %23194 = vmatprep.mubr.msk.f32.mxu1 %vm606_vm1, %v31728_v16  ;;  %v31755_v42 = vld [vmem:[#allocation84_spill] sm:$0xff]  ;;  %v31756_v5 = vld [vmem:[#allocation85_spill] sm:$0xff] }
 0x377   : > { %v11194_v16 = vld [vmem:[#allocation2 + $0x142] sm:$0xff] }
 0x379   : > { %22742 = vmatmul.mubr.msk.f32.gmra.mrb[24].mxu0 %vm606_vm1, %v31729_v61  ;;  %23195 = vmatmul.mubr.msk.f32.gmra.mrb[58].mxu1 %vm606_vm1, %v31730_v30  ;;  %v11195_v61 = vld [vmem:[#allocation2 + $0x152] sm:$0xff]  ;;  %v11196_v30 = vld [vmem:[#allocation2 + $0x15a] sm:$0xff] }
 0x37a   : > { %22744 = vmatprep.mubr.msk.f32.mxu0 %vm606_vm1, %v31731_v58  ;;  %23197 = vmatprep.mubr.msk.f32.mxu1 %vm606_vm1, %v31732_v7  ;;  %v11197_v58 = vld [vmem:[#allocation2 + $0x16a] sm:$0xff]  ;;  %v31758_v7 = vld [vmem:[#allocation56_spill] sm:$0xff] }
 0x37d   : > { %22745 = vmatmul.mubr.msk.f32.gmra.mrb[26].mxu0 %vm606_vm1, %v31733_v13  ;;  %23198 = vmatmul.mubr.msk.f32.gmra.mrb[60].mxu1 %vm606_vm1, %v31734_v60  ;;  %v11594_v13 = vld [vmem:[#allocation3 + $0x1] sm:$0xff] }
 0x37e   : > { %22747 = vmatprep.mubr.msk.f32.mxu0 %vm606_vm1, %v31735_v33  ;;  %23200 = vmatprep.mubr.msk.f32.mxu1 %vm606_vm1, %v10811_v26  ;;  %v7369_v26 = vld [vmem:[#allocation3 + $0x19a] sm:$0xff]  ;;  %v31760_v60 = vld [vmem:[#allocation31_spill] sm:$0xff] }
 0x37f   : > { %v29093_v33 = vld [vmem:[#allocation3 + $0x19] sm:$0xff] }
 0x381   : > { %22748 = vmatmul.mubr.msk.f32.gmra.mrb[28].mxu0 %vm606_vm1, %v31736_v8  ;;  %23201 = vmatmul.mubr.msk.f32.gmra.mrb[62].mxu1 %vm606_vm1, %v10812_v36  ;;  %v29098_v36 = vld [vmem:[%s31027_s7 + $0x8] sm:$0xf] }
 0x382   : > { %22750 = vmatprep.mubr.msk.f32.mxu0 %vm606_vm1, %v6979_v40  ;;  %23205 = vmatprep.mubr.msk.f32.mxu1 %vm606_vm1, %v11171_v38  ;;  %v29106_v40 = vld [vmem:[#allocation3 + $0x21] sm:$0xff]  ;;  %v29108_v38 = vld [vmem:[#allocation3 + $0x31] sm:$0xff]  ;;  %v29116_v8 = vld [vmem:[#allocation3 + $0x39] sm:$0xff] }
 0x385   : > { %22751 = vmatmul.mubr.msk.f32.gmra.mrb[30].mxu0 %vm606_vm1, %v6980_v21  ;;  %23206 = vmatmul.mubr.msk.f32.vlgmr.msra.gmra.mrb[32].mxu1 %vm606_vm1, %v11172_v10  ;;  %v29118_v21 = vld [vmem:[#allocation3 + $0x49] sm:$0xff]  ;;  %v29124_v10 = vld [vmem:[#allocation3 + $0x51] sm:$0xff] }
 0x386   : > { %23254 = vmatpush3.msk.msra.mxu1 %vm999_vm0, %v28857_v54  ;;  %22755 = vmatprep.mubr.msk.f32.mxu0 %vm606_vm1, %v31737_v27  ;;  %v11186_v54 = vld [vmem:[#allocation2 + $0xe2] sm:$0xff] }
 0x387   : > { %23208 = vmatprep.mubr.msk.f32.mxu1 %vm606_vm1, %v11173_v35  ;;  %23303 = vmatprep.subr.msk.mxu1 %vm999_vm0, %v28991_v59  ;;  %v29126_v35 = vld [vmem:[#allocation3 + $0x61] sm:$0xff]  ;;  %v29134_v27 = vld [vmem:[#allocation3 + $0x79] sm:$0xff] }
 0x389   : > { %22756 = vmatmul.mubr.msk.f32.vlgmr.msra.gmra.mrb[0].mxu0 %vm606_vm1, %v31738_v28  ;;  %23209 = vmatmul.mubr.msk.f32.gmra.mrb[34].mxu1 %vm606_vm1, %v11174_v62  ;;  %v29140_v62 = vld [vmem:[#allocation3 + $0x81] sm:$0xff]  ;;  %v29148_v28 = vld [vmem:[#allocation3 + $0x99] sm:$0xff] }
 0x38a   : > { %22758 = vmatprep.mubr.msk.f32.mxu0 %vm606_vm1, %v31739_v29  ;;  %23211 = vmatprep.mubr.msk.f32.mxu1 %vm606_vm1, %v11175_v14  ;;  %v29142_v14 = vld [vmem:[#allocation3 + $0x91] sm:$0xff]  ;;  %v29150_v29 = vld [vmem:[#allocation3 + $0xa9] sm:$0xff] }
 0x38d   : > { %22759 = vmatmul.mubr.msk.f32.gmra.mrb[2].mxu0 %vm606_vm1, %v28655_v52  ;;  %23212 = vmatmul.mubr.msk.f32.gmra.mrb[36].mxu1 %vm606_vm1, %v11176_v51  ;;  %v11180_v52 = vld [vmem:[#allocation2 + $0x9a] sm:$0xff] }
 0x38e   : > { %22761 = vmatprep.mubr.msk.f32.mxu0 %vm606_vm1, %v31740_v45  ;;  %23214 = vmatprep.mubr.msk.f32.mxu1 %vm606_vm1, %v11177_v43  ;;  %v29156_v51 = vld [vmem:[#allocation3 + $0xb1] sm:$0xff]  ;;  %v29158_v43 = vld [vmem:[#allocation3 + $0xc1] sm:$0xff]  ;;  %v29164_v45 = vld [vmem:[#allocation3 + $0xc9] sm:$0xff] }
 0x391   : > { %22762 = vmatmul.mubr.msk.f32.gmra.mrb[4].mxu0 %vm606_vm1, %v31741_v44  ;;  %23215 = vmatmul.mubr.msk.f32.gmra.mrb[38].mxu1 %vm606_vm1, %v11178_v20  ;;  %v29166_v20 = vld [vmem:[#allocation3 + $0xd9] sm:$0xff]  ;;  %v29174_v44 = vld [vmem:[#allocation3 + $0xf1] sm:$0xff] }
 0x392   : > { %22764 = vmatprep.mubr.msk.f32.mxu0 %vm606_vm1, %v31742_v46  ;;  %23217 = vmatprep.mubr.msk.f32.mxu1 %vm606_vm1, %v11179_v1  ;;  %v29172_v1 = vld [vmem:[#allocation3 + $0xe1] sm:$0xff]  ;;  %31761 = vst [vmem:[#allocation86_spill] sm:$0xff] %v29174_v44  ;;  %v29180_v46 = vld [vmem:[#allocation3 + $0xf9] sm:$0xff] }
 0x393   : > { %31762 = vst [vmem:[#allocation87_spill] sm:$0xff] %v29180_v46 }
 0x395   : > { %22765 = vmatmul.mubr.msk.f32.gmra.mrb[6].mxu0 %vm606_vm1, %v31743_v11  ;;  %23218 = vmatmul.mubr.msk.f32.gmra.mrb[40].mxu1 %vm606_vm1, %v11180_v52  ;;  %v29182_v52 = vld [vmem:[#allocation3 + $0x109] sm:$0xff]  ;;  %v29190_v11 = vld [vmem:[#allocation3 + $0x121] sm:$0xff] }
 0x396   : > { %22767 = vmatprep.mubr.msk.f32.mxu0 %vm606_vm1, %v31744_v9  ;;  %23220 = vmatprep.mubr.msk.f32.mxu1 %vm606_vm1, %v11181_v31  ;;  %31763 = vst [vmem:[#allocation88_spill] sm:$0xff] %v29182_v52  ;;  %v29188_v31 = vld [vmem:[#allocation3 + $0x111] sm:$0xff]  ;;  %31765 = vst [vmem:[#allocation90_spill] sm:$0xff] %v29190_v11  ;;  %v29196_v9 = vld [vmem:[#allocation3 + $0x129] sm:$0xff] }
 0x397   : > { %31764 = vst [vmem:[#allocation89_spill] sm:$0xff] %v29188_v31  ;;  %31766 = vst [vmem:[#allocation91_spill] sm:$0xff] %v29196_v9 }
 0x399   : > { %22768 = vmatmul.mubr.msk.f32.gmra.mrb[8].mxu0 %vm606_vm1, %v31745_v47  ;;  %23221 = vmatmul.mubr.msk.f32.gmra.mrb[42].mxu1 %vm606_vm1, %v11182_v25  ;;  %v29198_v25 = vld [vmem:[#allocation3 + $0x139] sm:$0xff]  ;;  %v29206_v47 = vld [vmem:[#allocation3 + $0x151] sm:$0xff] }
 0x39a   : > { %22770 = vmatprep.mubr.msk.f32.mxu0 %vm606_vm1, %v31746_v23  ;;  %23223 = vmatprep.mubr.msk.f32.mxu1 %vm606_vm1, %v11183_v15  ;;  %31767 = vst [vmem:[#allocation92_spill] sm:$0xff] %v29198_v25  ;;  %v29204_v15 = vld [vmem:[#allocation3 + $0x141] sm:$0xff]  ;;  %31769 = vst [vmem:[#allocation94_spill] sm:$0xff] %v29206_v47  ;;  %v29212_v23 = vld [vmem:[#allocation3 + $0x159] sm:$0xff] }
 0x39b   : > { %31768 = vst [vmem:[#allocation93_spill] sm:$0xff] %v29204_v15  ;;  %31770 = vst [vmem:[#allocation95_spill] sm:$0xff] %v29212_v23 }
 0x39d   : > { %22771 = vmatmul.mubr.msk.f32.gmra.mrb[10].mxu0 %vm606_vm1, %v31747_v63  ;;  %23224 = vmatmul.mubr.msk.f32.gmra.mrb[44].mxu1 %vm606_vm1, %v11184_v32  ;;  %v29214_v32 = vld [vmem:[#allocation3 + $0x169] sm:$0xff]  ;;  %v11561_v63 = vld [vmem:[#allocation3] sm:$0xff] }
 0x39e   : > { %22773 = vmatprep.mubr.msk.f32.mxu0 %vm606_vm1, %v31748_v56  ;;  %23226 = vmatprep.mubr.msk.f32.mxu1 %vm606_vm1, %v11185_v57  ;;  %31771 = vst [vmem:[#allocation96_spill] sm:$0xff] %v29214_v32  ;;  %v29220_v57 = vld [vmem:[#allocation3 + $0x171] sm:$0xff]  ;;  %v11562_v56 = vld [vmem:[#allocation3 + $0x8] sm:$0xff] }
 0x39f   : > { %31772 = vst [vmem:[#allocation97_spill] sm:$0xff] %v29220_v57 }
 0x3a1   : > { %22774 = vmatmul.mubr.msk.f32.gmra.mrb[12].mxu0 %vm606_vm1, %v31749_v50  ;;  %23227 = vmatmul.mubr.msk.f32.gmra.mrb[46].mxu1 %vm606_vm1, %v11186_v54  ;;  %v29225_v54 = vld [vmem:[#allocation3 + $0x18] sm:$0xff]  ;;  %v29237_v50 = vld [vmem:[#allocation3 + $0x20] sm:$0xff] }
 0x3a2   : > { %22776 = vmatprep.mubr.msk.f32.mxu0 %vm606_vm1, %v31750_v12  ;;  %23229 = vmatprep.mubr.msk.f32.mxu1 %vm606_vm1, %v11187_v3  ;;  %v29230_v3 = vld [vmem:[%s31027_s7 + $0xc] sm:$0xf]  ;;  %v29239_v12 = vld [vmem:[#allocation3 + $0x30] sm:$0xff] }
 0x3a5   : > { %22777 = vmatmul.mubr.msk.f32.gmra.mrb[14].mxu0 %vm606_vm1, %v31751_v4  ;;  %23230 = vmatmul.mubr.msk.f32.gmra.mrb[48].mxu1 %vm606_vm1, %v11188_v49  ;;  %v29247_v49 = vld [vmem:[#allocation3 + $0x38] sm:$0xff]  ;;  %v29255_v4 = vld [vmem:[#allocation3 + $0x50] sm:$0xff] }
 0x3a6   : > { %22779 = vmatprep.mubr.msk.f32.mxu0 %vm606_vm1, %v31752_v6  ;;  %23232 = vmatprep.mubr.msk.f32.mxu1 %vm606_vm1, %v11189_v37  ;;  %v29249_v37 = vld [vmem:[#allocation3 + $0x48] sm:$0xff]  ;;  %v29257_v6 = vld [vmem:[#allocation3 + $0x60] sm:$0xff] }
 0x3a9   : > { %22780 = vmatmul.mubr.msk.f32.gmra.mrb[16].mxu0 %vm606_vm1, %v31753_v53  ;;  %23233 = vmatmul.mubr.msk.f32.gmra.mrb[50].mxu1 %vm606_vm1, %v11190_v48  ;;  %v29263_v48 = vld [vmem:[#allocation3 + $0x68] sm:$0xff]  ;;  %v29271_v53 = vld [vmem:[#allocation3 + $0x80] sm:$0xff] }
 0x3aa   : > { %22782 = vmatprep.mubr.msk.f32.mxu0 %vm606_vm1, %v31754_v41  ;;  %23235 = vmatprep.mubr.msk.f32.mxu1 %vm606_vm1, %v11191_v34  ;;  %v29265_v34 = vld [vmem:[#allocation3 + $0x78] sm:$0xff]  ;;  %v29273_v41 = vld [vmem:[#allocation3 + $0x90] sm:$0xff] }
 0x3ad   : > { %22783 = vmatmul.mubr.msk.f32.gmra.mrb[18].mxu0 %vm606_vm1, %v31755_v42  ;;  %23236 = vmatmul.mubr.msk.f32.gmra.mrb[52].mxu1 %vm606_vm1, %v11192_v0  ;;  %v29279_v0 = vld [vmem:[#allocation3 + $0x98] sm:$0xff]  ;;  %v29287_v42 = vld [vmem:[#allocation3 + $0xb0] sm:$0xff] }
 0x3ae   : > { %22785 = vmatprep.mubr.msk.f32.mxu0 %vm606_vm1, %v31756_v5  ;;  %23238 = vmatprep.mubr.msk.f32.mxu1 %vm606_vm1, %v11193_v2  ;;  %v29281_v2 = vld [vmem:[#allocation3 + $0xa8] sm:$0xff]  ;;  %v29289_v5 = vld [vmem:[#allocation3 + $0xc0] sm:$0xff] }
 0x3b1   : > { %22786 = vmatmul.mubr.msk.f32.gmra.mrb[20].mxu0 %vm606_vm1, %v28803_v19  ;;  %23239 = vmatmul.mubr.msk.f32.gmra.mrb[54].mxu1 %vm606_vm1, %v11194_v16  ;;  %v11198_v19 = vld [vmem:[#allocation2 + $0x172] sm:$0xff] }
 0x3b2   : > { %22788 = vmatprep.mubr.msk.f32.mxu0 %vm606_vm1, %v28811_v24  ;;  %23241 = vmatprep.mubr.msk.f32.mxu1 %vm606_vm1, %v11195_v61  ;;  %v31757_v24 = vld [vmem:[#allocation43_spill] sm:$0xff]  ;;  %v29297_v61 = vld [vmem:[#allocation3 + $0xd8] sm:$0xff] }
 0x3b3   : > { %v29295_v16 = vld [vmem:[#allocation3 + $0xc8] sm:$0xff] }
 0x3b5   : > { %22789 = vmatmul.mubr.msk.f32.gmra.mrb[22].mxu0 %vm606_vm1, %v28817_v55  ;;  %23242 = vmatmul.mubr.msk.f32.gmra.mrb[56].mxu1 %vm606_vm1, %v11196_v30  ;;  %v11201_v55 = vld [vmem:[#allocation2 + $0x19a] sm:$0xff]  ;;  %v29303_v30 = vld [vmem:[#allocation3 + $0xe0] sm:$0xff] }
 0x3b6   : > { %22791 = vmatprep.mubr.msk.f32.mxu0 %vm606_vm1, %v28823_v17  ;;  %23244 = vmatprep.mubr.msk.f32.mxu1 %vm606_vm1, %v11197_v58  ;;  %v31759_v17 = vld [vmem:[#allocation25_spill] sm:$0xff]  ;;  %v29305_v58 = vld [vmem:[#allocation3 + $0xf0] sm:$0xff] }
 0x3b9   : > { %22792 = vmatmul.mubr.msk.f32.gmra.mrb[24].mxu0 %vm606_vm1, %v28828_v22  ;;  %23245 = vmatmul.mubr.msk.f32.gmra.mrb[58].mxu1 %vm606_vm1, %v11198_v19  ;;  %v11202_v22 = vld [vmem:[#allocation2 + $0x1a2] sm:$0xff] }
 0x3ba   : > { %22794 = vmatprep.mubr.msk.f32.mxu0 %vm606_vm1, %v28833_v18  ;;  %23247 = vmatprep.mubr.msk.f32.mxu1 %vm606_vm1, %v31757_v24  ;;  %v7370_v18 = vld [vmem:[#allocation3 + $0x1a2] sm:$0xff]  ;;  %v29311_v19 = vld [vmem:[#allocation3 + $0xf8] sm:$0xff] }
 0x3bb   : > { %v29313_v24 = vld [vmem:[#allocation3 + $0x108] sm:$0xff] }
 0x3bd   : > { %22795 = vmatmul.mubr.msk.f32.gmra.mrb[26].mxu0 %vm606_vm1, %v28839_v39  ;;  %23248 = vmatmul.mubr.msk.f32.gmra.mrb[60].mxu1 %vm606_vm1, %v31758_v7  ;;  %v11595_v39 = vld [vmem:[#allocation3 + $0x9] sm:$0xff]  ;;  %v29321_v7 = vld [vmem:[#allocation3 + $0x120] sm:$0xff] }
 0x3be   : > { %22797 = vmatprep.mubr.msk.f32.mxu0 %vm606_vm1, %v31759_v17  ;;  %23250 = vmatprep.mubr.msk.f32.mxu1 %vm606_vm1, %v11201_v55  ;;  %v29319_v55 = vld [vmem:[#allocation3 + $0x110] sm:$0xff]  ;;  %v29327_v17 = vld [vmem:[#allocation3 + $0x128] sm:$0xff] }
 0x3c1   : > { %22798 = vmatmul.mubr.msk.f32.gmra.mrb[28].mxu0 %vm606_vm1, %v31760_v60  ;;  %23251 = vmatmul.mubr.msk.f32.gmra.mrb[62].mxu1 %vm606_vm1, %v11202_v22  ;;  %v29329_v22 = vld [vmem:[#allocation3 + $0x138] sm:$0xff] }
 0x3c2   : > { %22800 = vmatprep.mubr.msk.f32.mxu0 %vm606_vm1, %v7369_v26  ;;  %23255 = vmatprep.mubr.msk.f32.mxu1 %vm606_vm1, %v11594_v13  ;;  %v29335_v26 = vld [vmem:[#allocation3 + $0x140] sm:$0xff]  ;;  %v29337_v13 = vld [vmem:[#allocation3 + $0x150] sm:$0xff]  ;;  %v29343_v60 = vld [vmem:[#allocation3 + $0x158] sm:$0xff] }
 0x3c5   : > { %22801 = vmatmul.mubr.msk.f32.gmra.mrb[30].mxu0 %vm606_vm1, %v7370_v18  ;;  %23256 = vmatmul.mubr.msk.f32.vlgmr.msra.gmra.mrb[32].mxu1 %vm606_vm1, %v11595_v39  ;;  %v29345_v18 = vld [vmem:[#allocation3 + $0x168] sm:$0xff]  ;;  %v29351_v39 = vld [vmem:[#allocation3 + $0x170] sm:$0xff] }
 0x3c6   : > { %23304 = vmatpush3.msk.msra.mxu1 %vm999_vm0, %v28991_v59  ;;  %23258 = vmatprep.mubr.msk.f32.mxu1 %vm606_vm1, %v29093_v33  ;;  %v29132_v59 = vld [vmem:[#allocation3 + $0x69] sm:$0xff] }
 0x3c7   : > { %23353 = vmatprep.subr.msk.mxu1 %vm999_vm0, %v29098_v36 }
 0x3c9   : > { %23259 = vmatmul.mubr.msk.f32.gmra.mrb[34].mxu1 %vm606_vm1, %v29106_v40 }
 0x3ca   : > { %23261 = vmatprep.mubr.msk.f32.mxu1 %vm606_vm1, %v29108_v38 }
 0x3cd   : > { %23262 = vmatmul.mubr.msk.f32.gmra.mrb[36].mxu1 %vm606_vm1, %v29116_v8 }
 0x3ce   : > { %23264 = vmatprep.mubr.msk.f32.mxu1 %vm606_vm1, %v29118_v21 }
 0x3d1   : > { %23265 = vmatmul.mubr.msk.f32.gmra.mrb[38].mxu1 %vm606_vm1, %v29124_v10 }
 0x3d2   : > { %23267 = vmatprep.mubr.msk.f32.mxu1 %vm606_vm1, %v29126_v35 }
 0x3d5   : > { %23268 = vmatmul.mubr.msk.f32.gmra.mrb[40].mxu1 %vm606_vm1, %v29132_v59 }
 0x3d6   : > { %23270 = vmatprep.mubr.msk.f32.mxu1 %vm606_vm1, %v29134_v27 }
 0x3d9   : > { %23271 = vmatmul.mubr.msk.f32.gmra.mrb[42].mxu1 %vm606_vm1, %v29140_v62 }
 0x3da   : > { %23273 = vmatprep.mubr.msk.f32.mxu1 %vm606_vm1, %v29142_v14 }
 0x3dd   : > { %23274 = vmatmul.mubr.msk.f32.gmra.mrb[44].mxu1 %vm606_vm1, %v29148_v28 }
 0x3de   : > { %23276 = vmatprep.mubr.msk.f32.mxu1 %vm606_vm1, %v29150_v29 }
 0x3e1   : > { %23277 = vmatmul.mubr.msk.f32.gmra.mrb[46].mxu1 %vm606_vm1, %v29156_v51 }
 0x3e2   : > { %23279 = vmatprep.mubr.msk.f32.mxu1 %vm606_vm1, %v29158_v43 }
 0x3e5   : > { %23280 = vmatmul.mubr.msk.f32.gmra.mrb[48].mxu1 %vm606_vm1, %v29164_v45 }
 0x3e6   : > { %23282 = vmatprep.mubr.msk.f32.mxu1 %vm606_vm1, %v29166_v20 }
 0x3e9   : > { %23283 = vmatmul.mubr.msk.f32.gmra.mrb[50].mxu1 %vm606_vm1, %v29172_v1 }
 0x3ea   : > { %23285 = vmatprep.mubr.msk.f32.mxu1 %vm606_vm1, %v29174_v44 }
 0x3ed   : > { %23286 = vmatmul.mubr.msk.f32.gmra.mrb[52].mxu1 %vm606_vm1, %v29180_v46 }
 0x3ee   : > { %23288 = vmatprep.mubr.msk.f32.mxu1 %vm606_vm1, %v29182_v52 }
 0x3f1   : > { %23289 = vmatmul.mubr.msk.f32.gmra.mrb[54].mxu1 %vm606_vm1, %v29188_v31  ;;  %v29428_v31 = vld [vmem:[#allocation3 + $0xc2] sm:$0xff] }
 0x3f2   : > { %23291 = vmatprep.mubr.msk.f32.mxu1 %vm606_vm1, %v29190_v11  ;;  %31789 = vst [vmem:[#allocation112_spill] sm:$0xff] %v29428_v31 }
 0x3f5   : > { %23292 = vmatmul.mubr.msk.f32.gmra.mrb[56].mxu1 %vm606_vm1, %v29196_v9 }
 0x3f6   : > { %23294 = vmatprep.mubr.msk.f32.mxu1 %vm606_vm1, %v29198_v25 }
 0x3f9   : > { %23295 = vmatmul.mubr.msk.f32.gmra.mrb[58].mxu1 %vm606_vm1, %v29204_v15 }
 0x3fa   : > { %23297 = vmatprep.mubr.msk.f32.mxu1 %vm606_vm1, %v29206_v47 }
 0x3fd   : > { %23298 = vmatmul.mubr.msk.f32.gmra.mrb[60].mxu1 %vm606_vm1, %v29212_v23  ;;  %v29370_v23 = vld [vmem:[#allocation3 + $0x32] sm:$0xff] }
 0x3fe   : > { %23300 = vmatprep.mubr.msk.f32.mxu1 %vm606_vm1, %v29214_v32  ;;  %v29368_v32 = vld [vmem:[#allocation3 + $0x22] sm:$0xff]  ;;  %31775 = vst [vmem:[#allocation100_spill] sm:$0xff] %v29370_v23 }
 0x3ff   : > { %31774 = vst [vmem:[#allocation99_spill] sm:$0xff] %v29368_v32 }
 0x401   : > { %23301 = vmatmul.mubr.msk.f32.gmra.mrb[62].mxu1 %vm606_vm1, %v29220_v57  ;;  %v29361_v57 = vld [vmem:[%s31027_s7 + $0x10] sm:$0xf] }
 0x402   : > { %23305 = vmatprep.mubr.msk.f32.mxu1 %vm606_vm1, %v11561_v63  ;;  %v12277_v63 = vld [vmem:[#allocation3 + $0xa] sm:$0xff] }
 0x405   : > { %23306 = vmatmul.mubr.msk.f32.vlgmr.msra.gmra.mrb[32].mxu1 %vm606_vm1, %v11562_v56  ;;  %v29356_v56 = vld [vmem:[#allocation3 + $0x1a] sm:$0xff] }
 0x406   : > { %23354 = vmatpush3.msk.msra.mxu1 %vm999_vm0, %v29098_v36  ;;  %23308 = vmatprep.mubr.msk.f32.mxu1 %vm606_vm1, %v29225_v54  ;;  %v12276_v36 = vld [vmem:[#allocation3 + $0x2] sm:$0xff]  ;;  %31773 = vst [vmem:[#allocation98_spill] sm:$0xff] %v29356_v56 }
 0x407   : > { %23403 = vmatprep.subr.msk.mxu1 %vm999_vm0, %v29230_v3 }
 0x409   : > { %23309 = vmatmul.mubr.msk.f32.gmra.mrb[34].mxu1 %vm606_vm1, %v29237_v50 }
 0x40a   : > { %23311 = vmatprep.mubr.msk.f32.mxu1 %vm606_vm1, %v29239_v12 }
 0x40d   : > { %23312 = vmatmul.mubr.msk.f32.gmra.mrb[36].mxu1 %vm606_vm1, %v29247_v49 }
 0x40e   : > { %23314 = vmatprep.mubr.msk.f32.mxu1 %vm606_vm1, %v29249_v37 }
 0x411   : > { %23315 = vmatmul.mubr.msk.f32.gmra.mrb[38].mxu1 %vm606_vm1, %v29255_v4 }
 0x412   : > { %23317 = vmatprep.mubr.msk.f32.mxu1 %vm606_vm1, %v29257_v6 }
 0x415   : > { %23318 = vmatmul.mubr.msk.f32.gmra.mrb[40].mxu1 %vm606_vm1, %v29263_v48 }
 0x416   : > { %23320 = vmatprep.mubr.msk.f32.mxu1 %vm606_vm1, %v29265_v34 }
 0x419   : > { %23321 = vmatmul.mubr.msk.f32.gmra.mrb[42].mxu1 %vm606_vm1, %v29271_v53 }
 0x41a   : > { %23323 = vmatprep.mubr.msk.f32.mxu1 %vm606_vm1, %v29273_v41 }
 0x41d   : > { %23324 = vmatmul.mubr.msk.f32.gmra.mrb[44].mxu1 %vm606_vm1, %v29279_v0 }
 0x41e   : > { %23326 = vmatprep.mubr.msk.f32.mxu1 %vm606_vm1, %v29281_v2 }
 0x421   : > { %23327 = vmatmul.mubr.msk.f32.gmra.mrb[46].mxu1 %vm606_vm1, %v29287_v42 }
 0x422   : > { %23329 = vmatprep.mubr.msk.f32.mxu1 %vm606_vm1, %v29289_v5 }
 0x425   : > { %23330 = vmatmul.mubr.msk.f32.gmra.mrb[48].mxu1 %vm606_vm1, %v29295_v16 }
 0x426   : > { %23332 = vmatprep.mubr.msk.f32.mxu1 %vm606_vm1, %v29297_v61 }
 0x429   : > { %23333 = vmatmul.mubr.msk.f32.gmra.mrb[50].mxu1 %vm606_vm1, %v29303_v30 }
 0x42a   : > { %23335 = vmatprep.mubr.msk.f32.mxu1 %vm606_vm1, %v29305_v58 }
 0x42d   : > { %23336 = vmatmul.mubr.msk.f32.gmra.mrb[52].mxu1 %vm606_vm1, %v29311_v19 }
 0x42e   : > { %23338 = vmatprep.mubr.msk.f32.mxu1 %vm606_vm1, %v29313_v24 }
 0x431   : > { %23339 = vmatmul.mubr.msk.f32.gmra.mrb[54].mxu1 %vm606_vm1, %v29319_v55 }
 0x432   : > { %23341 = vmatprep.mubr.msk.f32.mxu1 %vm606_vm1, %v29321_v7 }
 0x435   : > { %23342 = vmatmul.mubr.msk.f32.gmra.mrb[56].mxu1 %vm606_vm1, %v29327_v17 }
 0x436   : > { %23344 = vmatprep.mubr.msk.f32.mxu1 %vm606_vm1, %v29329_v22 }
 0x439   : > { %23345 = vmatmul.mubr.msk.f32.gmra.mrb[58].mxu1 %vm606_vm1, %v29335_v26 }
 0x43a   : > { %23347 = vmatprep.mubr.msk.f32.mxu1 %vm606_vm1, %v29337_v13 }
 0x43d   : > { %23348 = vmatmul.mubr.msk.f32.gmra.mrb[60].mxu1 %vm606_vm1, %v29343_v60 }
 0x43e   : > { %23350 = vmatprep.mubr.msk.f32.mxu1 %vm606_vm1, %v29345_v18 }
 0x441   : > { %23351 = vmatmul.mubr.msk.f32.gmra.mrb[62].mxu1 %vm606_vm1, %v29351_v39 }
 0x442   : > { %23355 = vmatprep.mubr.msk.f32.mxu1 %vm606_vm1, %v12276_v36  ;;  %v29378_v36 = vld [vmem:[#allocation3 + $0x3a] sm:$0xff] }
 0x443   : > { %31776 = vst [vmem:[#allocation101_spill] sm:$0xff] %v29378_v36 }
 0x445   : > { %23356 = vmatmul.mubr.msk.f32.vlgmr.msra.gmra.mrb[32].mxu1 %vm606_vm1, %v12277_v63  ;;  %v29380_v63 = vld [vmem:[#allocation3 + $0x4a] sm:$0xff] }
 0x446   : > { %23404 = vmatpush3.msk.msra.mxu1 %vm999_vm0, %v29230_v3  ;;  %23358 = vmatprep.mubr.msk.f32.mxu1 %vm606_vm1, %v29356_v56  ;;  %31777 = vst [vmem:[#allocation102_spill] sm:$0xff] %v29380_v63  ;;  %v29386_v3 = vld [vmem:[#allocation3 + $0x52] sm:$0xff]  ;;  %v29388_v56 = vld [vmem:[#allocation3 + $0x62] sm:$0xff] }
 0x447   : > { %23453 = vmatprep.subr.msk.mxu1 %vm999_vm0, %v29361_v57  ;;  %31778 = vst [vmem:[#allocation103_spill] sm:$0xff] %v29386_v3  ;;  %31779 = vst [vmem:[#allocation104_spill] sm:$0xff] %v29388_v56 }
 0x449   : > { %23359 = vmatmul.mubr.msk.f32.gmra.mrb[34].mxu1 %vm606_vm1, %v29368_v32  ;;  %v29396_v32 = vld [vmem:[#allocation3 + $0x7a] sm:$0xff] }
 0x44a   : > { %23361 = vmatprep.mubr.msk.f32.mxu1 %vm606_vm1, %v29370_v23  ;;  %v29394_v23 = vld [vmem:[#allocation3 + $0x6a] sm:$0xff]  ;;  %31781 = vst [vmem:[#allocation106_spill] sm:$0xff] %v29396_v32 }
 0x44b   : > { %31780 = vst [vmem:[#allocation105_spill] sm:$0xff] %v29394_v23 }
 0x44d   : > { %23362 = vmatmul.mubr.msk.f32.gmra.mrb[36].mxu1 %vm606_vm1, %v29378_v36  ;;  %v29404_v36 = vld [vmem:[#allocation3 + $0x92] sm:$0xff] }
 0x44e   : > { %23364 = vmatprep.mubr.msk.f32.mxu1 %vm606_vm1, %v29380_v63  ;;  %v29402_v63 = vld [vmem:[#allocation3 + $0x82] sm:$0xff]  ;;  %31783 = vst [vmem:[#allocation108_spill] sm:$0xff] %v29404_v36 }
 0x44f   : > { %31782 = vst [vmem:[#allocation107_spill] sm:$0xff] %v29402_v63 }
 0x451   : > { %23365 = vmatmul.mubr.msk.f32.gmra.mrb[38].mxu1 %vm606_vm1, %v29386_v3  ;;  %v29412_v3 = vld [vmem:[#allocation3 + $0xaa] sm:$0xff] }
 0x452   : > { %23367 = vmatprep.mubr.msk.f32.mxu1 %vm606_vm1, %v29388_v56  ;;  %v29410_v56 = vld [vmem:[#allocation3 + $0x9a] sm:$0xff]  ;;  %31785 = vst [vmem:[#allocation110_spill] sm:$0xff] %v29412_v3 }
 0x453   : > { %31784 = vst [vmem:[#allocation109_spill] sm:$0xff] %v29410_v56 }
 0x455   : > { %23368 = vmatmul.mubr.msk.f32.gmra.mrb[40].mxu1 %vm606_vm1, %v29394_v23  ;;  %v29417_v23 = vld [vmem:[%s31035_s15] ss:$0 sm:$0xff] }
 0x456   : > { %23370 = vmatprep.mubr.msk.f32.mxu1 %vm606_vm1, %v29396_v32  ;;  %v31786_v32 = vld [vmem:[#allocation48_spill] sm:$0xff] }
 0x459   : > { %23371 = vmatmul.mubr.msk.f32.gmra.mrb[42].mxu1 %vm606_vm1, %v29402_v63  ;;  %v31787_v63 = vld [vmem:[#allocation49_spill] sm:$0xff] }
 0x45a   : > { %23373 = vmatprep.mubr.msk.f32.mxu1 %vm606_vm1, %v29404_v36  ;;  %v29425_v36 = vld [vmem:[#allocation3 + $0xb2] sm:$0xff] }
 0x45b   : > { %31788 = vst [vmem:[#allocation111_spill] sm:$0xff] %v29425_v36 }
 0x45c   : > { %v22757_v47 = vpop.f32.mrb[0].mxu0 }
 0x45d   : > { %v24155_v15 = vadd.f32 %v22757_v47, %v31786_v32  ;;  %v7538_v25 = vpop.f32.mrb[1].mxu0  ;;  %23374 = vmatmul.mubr.msk.f32.gmra.mrb[44].mxu1 %vm606_vm1, %v29410_v56  ;;  %v31790_v47 = vld [vmem:[#allocation32_spill] sm:$0xff] }
 0x45e   : > { %v24156_v9 = vadd.f32 %v7538_v25, %v31787_v63  ;;  %23376 = vmatprep.mubr.msk.f32.mxu1 %vm606_vm1, %v29412_v3  ;;  %v31791_v25 = vld [vmem:[#allocation33_spill] sm:$0xff] }
 0x45f   : > { %v7769_v11 = vadd.f32 %v24155_v15, %v29417_v23  ;;  %v29439_v15 = vld [vmem:[#allocation3 + $0xca] sm:$0xff]  ;;  %v29442_v3 = vld [vmem:[#allocation3 + $0xda] sm:$0xff] }
 0x460   : > { %v7768_v52 = vadd.f32 %v24156_v9, %v29417_v23  ;;  %v22760_v46 = vpop.f32.mrb[2].mxu0  ;;  %31792 = vst [vmem:[#allocation113_spill] sm:$0xff] %v29439_v15  ;;  %31793 = vst [vmem:[#allocation114_spill] sm:$0xff] %v29442_v3 }
 0x461   : > { %7801 = vst.msk [vmem:[#allocation5 + $0x8] sm:$0xff] %vm606_vm1, %v7769_v11  ;;  %v24157_v32 = vadd.f32 %v22760_v46, %v31790_v47  ;;  %v7548_v44 = vpop.f32.mrb[3].mxu0  ;;  %23377 = vmatmul.mubr.msk.f32.gmra.mrb[46].mxu1 %vm606_vm1, %v29425_v36  ;;  %v31794_v47 = vld [vmem:[#allocation55_spill] sm:$0xff] }
 0x462   : > { %7800 = vst.msk [vmem:[#allocation5] sm:$0xff] %vm606_vm1, %v7768_v52  ;;  %v24158_v63 = vadd.f32 %v7548_v44, %v31791_v25  ;;  %23379 = vmatprep.mubr.msk.f32.mxu1 %vm606_vm1, %v29428_v31  ;;  %v31795_v44 = vld [vmem:[#allocation57_spill] sm:$0xff] }
 0x463   : > { %v7771_v9 = vadd.f32 %v24157_v32, %v29417_v23  ;;  %v29453_v32 = vld [vmem:[#allocation3 + $0xe2] sm:$0xff] }
 0x464   : > { %v7770_v11 = vadd.f32 %v24158_v63, %v29417_v23  ;;  %v22763_v46 = vpop.f32.mrb[4].mxu0  ;;  %31796 = vst [vmem:[#allocation117_spill] sm:$0xff] %v29453_v32  ;;  %v29456_v63 = vld [vmem:[#allocation3 + $0xf2] sm:$0xff] }
 0x465   : > { %7803 = vst.msk [vmem:[#allocation5 + $0x18] sm:$0xff] %vm606_vm1, %v7771_v9  ;;  %v24159_v36 = vadd.f32 %v22763_v46, %v31794_v47  ;;  %v7558_v56 = vpop.f32.mrb[5].mxu0  ;;  %23380 = vmatmul.mubr.msk.f32.gmra.mrb[48].mxu1 %vm606_vm1, %v29439_v15  ;;  %31797 = vst [vmem:[#allocation118_spill] sm:$0xff] %v29456_v63  ;;  %v31798_v47 = vld [vmem:[#allocation42_spill] sm:$0xff] }
 0x466   : > { %7802 = vst.msk [vmem:[#allocation5 + $0x10] sm:$0xff] %vm606_vm1, %v7770_v11  ;;  %v24160_v52 = vadd.f32 %v7558_v56, %v31795_v44  ;;  %23382 = vmatprep.mubr.msk.f32.mxu1 %vm606_vm1, %v29442_v3  ;;  %v31799_v56 = vld [vmem:[#allocation54_spill] sm:$0xff] }
 0x467   : > { %v7773_v25 = vadd.f32 %v24159_v36, %v29417_v23  ;;  %v29467_v36 = vld [vmem:[#allocation3 + $0xfa] sm:$0xff] }
 0x468   : > { %v7772_v9 = vadd.f32 %v24160_v52, %v29417_v23  ;;  %v22766_v46 = vpop.f32.mrb[6].mxu0  ;;  %31800 = vst [vmem:[#allocation6_spill] sm:$0xff] %v29467_v36  ;;  %v29470_v52 = vld [vmem:[#allocation3 + $0x10a] sm:$0xff] }
 0x469   : > { %7805 = vst.msk [vmem:[#allocation5 + $0x28] sm:$0xff] %vm606_vm1, %v7773_v25  ;;  %v24161_v15 = vadd.f32 %v22766_v46, %v31798_v47  ;;  %v7568_v31 = vpop.f32.mrb[7].mxu0  ;;  %23383 = vmatmul.mubr.msk.f32.gmra.mrb[50].mxu1 %vm606_vm1, %v29453_v32  ;;  %31801 = vst [vmem:[#allocation59_spill] sm:$0xff] %v29470_v52  ;;  %v31802_v47 = vld [vmem:[#allocation60_spill] sm:$0xff] }
 0x46a   : > { %7804 = vst.msk [vmem:[#allocation5 + $0x20] sm:$0xff] %vm606_vm1, %v7772_v9  ;;  %v24162_v11 = vadd.f32 %v7568_v31, %v31799_v56  ;;  %23385 = vmatprep.mubr.msk.f32.mxu1 %vm606_vm1, %v29456_v63  ;;  %v31803_v31 = vld [vmem:[#allocation61_spill] sm:$0xff] }
 0x46b   : > { %v7775_v44 = vadd.f32 %v24161_v15, %v29417_v23  ;;  %v29481_v15 = vld [vmem:[#allocation3 + $0x112] sm:$0xff] }
 0x46c   : > { %v7774_v25 = vadd.f32 %v24162_v11, %v29417_v23  ;;  %v22769_v46 = vpop.f32.mrb[8].mxu0  ;;  %31804 = vst [vmem:[#allocation7_spill] sm:$0xff] %v29481_v15  ;;  %v29484_v11 = vld [vmem:[#allocation3 + $0x122] sm:$0xff] }
 0x46d   : > { %7807 = vst.msk [vmem:[#allocation5 + $0x38] sm:$0xff] %vm606_vm1, %v7775_v44  ;;  %v24163_v32 = vadd.f32 %v22769_v46, %v31802_v47  ;;  %v7578_v3 = vpop.f32.mrb[9].mxu0  ;;  %23386 = vmatmul.mubr.msk.f32.gmra.mrb[52].mxu1 %vm606_vm1, %v29467_v36  ;;  %31805 = vst [vmem:[#allocation8_spill] sm:$0xff] %v29484_v11  ;;  %v31806_v47 = vld [vmem:[#allocation65_spill] sm:$0xff] }
 0x46e   : > { %7806 = vst.msk [vmem:[#allocation5 + $0x30] sm:$0xff] %vm606_vm1, %v7774_v25  ;;  %v24164_v9 = vadd.f32 %v7578_v3, %v31803_v31  ;;  %23388 = vmatprep.mubr.msk.f32.mxu1 %vm606_vm1, %v29470_v52  ;;  %v31807_v3 = vld [vmem:[#allocation66_spill] sm:$0xff] }
 0x46f   : > { %v7777_v56 = vadd.f32 %v24163_v32, %v29417_v23  ;;  %v29495_v32 = vld [vmem:[#allocation3 + $0x12a] sm:$0xff] }
 0x470   : > { %v7776_v44 = vadd.f32 %v24164_v9, %v29417_v23  ;;  %v22772_v46 = vpop.f32.mrb[10].mxu0  ;;  %31808 = vst [vmem:[#allocation9_spill] sm:$0xff] %v29495_v32  ;;  %v29498_v9 = vld [vmem:[#allocation3 + $0x13a] sm:$0xff] }
 0x471   : > { %7809 = vst.msk [vmem:[#allocation5 + $0x48] sm:$0xff] %vm606_vm1, %v7777_v56  ;;  %v24165_v36 = vadd.f32 %v22772_v46, %v31806_v47  ;;  %v7588_v63 = vpop.f32.mrb[11].mxu0  ;;  %23389 = vmatmul.mubr.msk.f32.gmra.mrb[54].mxu1 %vm606_vm1, %v29481_v15  ;;  %31809 = vst [vmem:[#allocation10_spill] sm:$0xff] %v29498_v9  ;;  %v31810_v47 = vld [vmem:[#allocation71_spill] sm:$0xff] }
 0x472   : > { %7808 = vst.msk [vmem:[#allocation5 + $0x40] sm:$0xff] %vm606_vm1, %v7776_v44  ;;  %v24166_v25 = vadd.f32 %v7588_v63, %v31807_v3  ;;  %23391 = vmatprep.mubr.msk.f32.mxu1 %vm606_vm1, %v29484_v11  ;;  %v31811_v63 = vld [vmem:[#allocation72_spill] sm:$0xff] }
 0x473   : > { %v7779_v31 = vadd.f32 %v24165_v36, %v29417_v23  ;;  %v29509_v36 = vld [vmem:[#allocation3 + $0x142] sm:$0xff] }
 0x474   : > { %v7778_v56 = vadd.f32 %v24166_v25, %v29417_v23  ;;  %v22775_v46 = vpop.f32.mrb[12].mxu0  ;;  %31812 = vst [vmem:[#allocation11_spill] sm:$0xff] %v29509_v36  ;;  %v29512_v25 = vld [vmem:[#allocation3 + $0x152] sm:$0xff] }
 0x475   : > { %7811 = vst.msk [vmem:[#allocation5 + $0x58] sm:$0xff] %vm606_vm1, %v7779_v31  ;;  %v24167_v15 = vadd.f32 %v22775_v46, %v31810_v47  ;;  %v7598_v52 = vpop.f32.mrb[13].mxu0  ;;  %23392 = vmatmul.mubr.msk.f32.gmra.mrb[56].mxu1 %vm606_vm1, %v29495_v32  ;;  %31813 = vst [vmem:[#allocation12_spill] sm:$0xff] %v29512_v25  ;;  %v31814_v47 = vld [vmem:[#allocation77_spill] sm:$0xff] }
 0x476   : > { %7810 = vst.msk [vmem:[#allocation5 + $0x50] sm:$0xff] %vm606_vm1, %v7778_v56  ;;  %v24168_v44 = vadd.f32 %v7598_v52, %v31811_v63  ;;  %23394 = vmatprep.mubr.msk.f32.mxu1 %vm606_vm1, %v29498_v9  ;;  %v31815_v52 = vld [vmem:[#allocation78_spill] sm:$0xff] }
 0x477   : > { %v7781_v3 = vadd.f32 %v24167_v15, %v29417_v23  ;;  %v29523_v15 = vld [vmem:[#allocation3 + $0x15a] sm:$0xff] }
 0x478   : > { %v7780_v31 = vadd.f32 %v24168_v44, %v29417_v23  ;;  %v22778_v46 = vpop.f32.mrb[14].mxu0  ;;  %v29526_v44 = vld [vmem:[#allocation3 + $0x16a] sm:$0xff] }
 0x479   : > { %7813 = vst.msk [vmem:[#allocation5 + $0x68] sm:$0xff] %vm606_vm1, %v7781_v3  ;;  %v24169_v32 = vadd.f32 %v22778_v46, %v31814_v47  ;;  %v7608_v11 = vpop.f32.mrb[15].mxu0  ;;  %23395 = vmatmul.mubr.msk.f32.gmra.mrb[58].mxu1 %vm606_vm1, %v29509_v36  ;;  %v31816_v47 = vld [vmem:[#allocation115_spill] sm:$0xff] }
 0x47a   : > { %7812 = vst.msk [vmem:[#allocation5 + $0x60] sm:$0xff] %vm606_vm1, %v7780_v31  ;;  %v24170_v56 = vadd.f32 %v7608_v11, %v31815_v52  ;;  %23397 = vmatprep.mubr.msk.f32.mxu1 %vm606_vm1, %v29512_v25  ;;  %v31817_v11 = vld [vmem:[#allocation116_spill] sm:$0xff] }
 0x47b   : > { %v7783_v63 = vadd.f32 %v24169_v32, %v29417_v23  ;;  %v29537_v32 = vld [vmem:[#allocation3 + $0x172] sm:$0xff] }
 0x47c   : > { %v7782_v3 = vadd.f32 %v24170_v56, %v29417_v23  ;;  %v22781_v46 = vpop.f32.mrb[16].mxu0 }
 0x47d   : > { %7815 = vst.msk [vmem:[#allocation5 + $0x78] sm:$0xff] %vm606_vm1, %v7783_v63  ;;  %v24171_v36 = vadd.f32 %v22781_v46, %v31816_v47  ;;  %v7618_v9 = vpop.f32.mrb[17].mxu0  ;;  %23398 = vmatmul.mubr.msk.f32.gmra.mrb[60].mxu1 %vm606_vm1, %v29523_v15  ;;  %v31818_v46 = vld [vmem:[#allocation119_spill] sm:$0xff] }
 0x47e   : > { %7814 = vst.msk [vmem:[#allocation5 + $0x70] sm:$0xff] %vm606_vm1, %v7782_v3  ;;  %v24172_v31 = vadd.f32 %v7618_v9, %v31817_v11  ;;  %23400 = vmatprep.mubr.msk.f32.mxu1 %vm606_vm1, %v29526_v44  ;;  %v31819_v9 = vld [vmem:[#allocation120_spill] sm:$0xff] }
 0x47f   : > { %v7785_v52 = vadd.f32 %v24171_v36, %v29417_v23 }
 0x480   : > { %v7784_v56 = vadd.f32 %v24172_v31, %v29417_v23  ;;  %v22784_v63 = vpop.f32.mrb[18].mxu0 }
 0x481   : > { %7817 = vst.msk [vmem:[#allocation5 + $0x88] sm:$0xff] %vm606_vm1, %v7785_v52  ;;  %v24173_v47 = vadd.f32 %v22784_v63, %v31818_v46  ;;  %v7628_v25 = vpop.f32.mrb[19].mxu0  ;;  %23401 = vmatmul.mubr.msk.f32.gmra.mrb[62].mxu1 %vm606_vm1, %v29537_v32  ;;  %v29554_v52 = vld [vmem:[%s31027_s7 + $0x14] sm:$0xf]  ;;  %v31820_v63 = vld [vmem:[#allocation121_spill] sm:$0xff] }
 0x482   : > { %7816 = vst.msk [vmem:[#allocation5 + $0x80] sm:$0xff] %vm606_vm1, %v7784_v56  ;;  %v24174_v3 = vadd.f32 %v7628_v25, %v31819_v9  ;;  %23405 = vmatprep.mubr.msk.f32.mxu1 %vm606_vm1, %v29225_v54  ;;  %v31821_v54 = vld [vmem:[#allocation122_spill] sm:$0xff] }
 0x483   : > { %v7787_v36 = vadd.f32 %v24173_v47, %v29417_v23 }
 0x484   : > { %v7786_v11 = vadd.f32 %v24174_v3, %v29417_v23  ;;  %v22787_v31 = vpop.f32.mrb[20].mxu0 }
 0x485   : > { %7819 = vst.msk [vmem:[#allocation5 + $0x98] sm:$0xff] %vm606_vm1, %v7787_v36  ;;  %v24175_v46 = vadd.f32 %v22787_v31, %v31820_v63  ;;  %v7638_v56 = vpop.f32.mrb[21].mxu0  ;;  %23406 = vmatmul.mubr.msk.f32.vlgmr.msra.gmra.mrb[32].mxu1 %vm606_vm1, %v29237_v50  ;;  %v31822_v50 = vld [vmem:[#allocation123_spill] sm:$0xff] }
 0x486   : > { %7818 = vst.msk [vmem:[#allocation5 + $0x90] sm:$0xff] %vm606_vm1, %v7786_v11  ;;  %v24176_v25 = vadd.f32 %v7638_v56, %v31821_v54  ;;  %23454 = vmatpush3.msk.msra.mxu1 %vm999_vm0, %v29361_v57  ;;  %23408 = vmatprep.mubr.msk.f32.mxu1 %vm606_vm1, %v29239_v12  ;;  %v31823_v57 = vld [vmem:[#allocation124_spill] sm:$0xff]  ;;  %v31824_v54 = vld [vmem:[#allocation125_spill] sm:$0xff] }
 0x487   : > { %v7789_v47 = vadd.f32 %v24175_v46, %v29417_v23  ;;  %23503 = vmatprep.subr.msk.mxu1 %vm999_vm0, %v29554_v52 }
 0x488   : > { %v7788_v9 = vadd.f32 %v24176_v25, %v29417_v23  ;;  %v22790_v3 = vpop.f32.mrb[22].mxu0 }
 0x489   : > { %7821 = vst.msk [vmem:[#allocation5 + $0xa8] sm:$0xff] %vm606_vm1, %v7789_v47  ;;  %v24177_v36 = vadd.f32 %v22790_v3, %v31822_v50  ;;  %v7648_v11 = vpop.f32.mrb[23].mxu0  ;;  %23409 = vmatmul.mubr.msk.f32.gmra.mrb[34].mxu1 %vm606_vm1, %v29247_v49 }
 0x48a   : > { %7820 = vst.msk [vmem:[#allocation5 + $0xa0] sm:$0xff] %vm606_vm1, %v7788_v9  ;;  %v24178_v31 = vadd.f32 %v7648_v11, %v31823_v57  ;;  %23411 = vmatprep.mubr.msk.f32.mxu1 %vm606_vm1, %v29249_v37  ;;  %v31825_v9 = vld [vmem:[#allocation126_spill] sm:$0xff]  ;;  %v31826_v57 = vld [vmem:[#allocation127_spill] sm:$0xff] }
 0x48b   : > { %v7791_v63 = vadd.f32 %v24177_v36, %v29417_v23 }
 0x48c   : > { %v7790_v46 = vadd.f32 %v24178_v31, %v29417_v23  ;;  %v22793_v56 = vpop.f32.mrb[24].mxu0 }
 0x48d   : > { %7823 = vst.msk [vmem:[#allocation5 + $0xb8] sm:$0xff] %vm606_vm1, %v7791_v63  ;;  %v24179_v25 = vadd.f32 %v22793_v56, %v31824_v54  ;;  %v7658_v47 = vpop.f32.mrb[25].mxu0  ;;  %23412 = vmatmul.mubr.msk.f32.gmra.mrb[36].mxu1 %vm606_vm1, %v29255_v4 }
 0x48e   : > { %7822 = vst.msk [vmem:[#allocation5 + $0xb0] sm:$0xff] %vm606_vm1, %v7790_v46  ;;  %v24180_v3 = vadd.f32 %v7658_v47, %v31825_v9  ;;  %23414 = vmatprep.mubr.msk.f32.mxu1 %vm606_vm1, %v29257_v6  ;;  %v31827_v46 = vld [vmem:[#allocation128_spill] sm:$0xff]  ;;  %v31828_v9 = vld [vmem:[#allocation129_spill] sm:$0xff] }
 0x48f   : > { %v7793_v50 = vadd.f32 %v24179_v25, %v29417_v23 }
 0x490   : > { %v7792_v36 = vadd.f32 %v24180_v3, %v29417_v23  ;;  %v22796_v11 = vpop.f32.mrb[26].mxu0 }
 0x491   : > { %7825 = vst.msk [vmem:[#allocation5 + $0xc8] sm:$0xff] %vm606_vm1, %v7793_v50  ;;  %v24181_v31 = vadd.f32 %v22796_v11, %v31826_v57  ;;  %v7668_v63 = vpop.f32.mrb[27].mxu0  ;;  %23415 = vmatmul.mubr.msk.f32.gmra.mrb[38].mxu1 %vm606_vm1, %v29263_v48 }
 0x492   : > { %7824 = vst.msk [vmem:[#allocation5 + $0xc0] sm:$0xff] %vm606_vm1, %v7792_v36  ;;  %v24182_v56 = vadd.f32 %v7668_v63, %v31827_v46  ;;  %23417 = vmatprep.mubr.msk.f32.mxu1 %vm606_vm1, %v29265_v34  ;;  %v31829_v36 = vld [vmem:[#allocation130_spill] sm:$0xff]  ;;  %v31830_v46 = vld [vmem:[#allocation131_spill] sm:$0xff] }
 0x493   : > { %v7795_v54 = vadd.f32 %v24181_v31, %v29417_v23 }
 0x494   : > { %v7794_v25 = vadd.f32 %v24182_v56, %v29417_v23  ;;  %v22799_v47 = vpop.f32.mrb[28].mxu0 }
 0x495   : > { %7827 = vst.msk [vmem:[#allocation5 + $0xd8] sm:$0xff] %vm606_vm1, %v7795_v54  ;;  %v24183_v3 = vadd.f32 %v22799_v47, %v31828_v9  ;;  %v7678_v50 = vpop.f32.mrb[29].mxu0  ;;  %23418 = vmatmul.mubr.msk.f32.gmra.mrb[40].mxu1 %vm606_vm1, %v29271_v53 }
 0x496   : > { %7826 = vst.msk [vmem:[#allocation5 + $0xd0] sm:$0xff] %vm606_vm1, %v7794_v25  ;;  %v24184_v11 = vadd.f32 %v7678_v50, %v31829_v36  ;;  %23420 = vmatprep.mubr.msk.f32.mxu1 %vm606_vm1, %v29273_v41  ;;  %v31831_v25 = vld [vmem:[#allocation132_spill] sm:$0xff]  ;;  %v29660_v50 = vld [vmem:[#allocation3 + $0x188] sm:$0xff] }
 0x497   : > { %v7797_v57 = vadd.f32 %v24183_v3, %v29417_v23  ;;  %v20002_v36 = vld [vmem:[%s31027_s7 + $0x18] sm:$0xf] }
 0x498   : > { %v7796_v31 = vadd.f32 %v24184_v11, %v29417_v23  ;;  %v22802_v63 = vpop.f32.mrb[30].mxu0  ;;  %v31848_v11 = vld [vmem:[#allocation102_spill] sm:$0xff] }
 0x499   : > { %7829 = vst.msk [vmem:[#allocation5 + $0xe8] sm:$0xff] %vm606_vm1, %v7797_v57  ;;  %v24185_v56 = vadd.f32 %v22802_v63, %v31830_v46  ;;  %v7688_v54 = vpop.f32.mrb[31].mxu0  ;;  %23421 = vmatmul.mubr.msk.f32.gmra.mrb[42].mxu1 %vm606_vm1, %v29279_v0  ;;  %v31849_v57 = vld [vmem:[#allocation103_spill] sm:$0xff]  ;;  %v31851_v63 = vld [vmem:[#allocation105_spill] sm:$0xff]  ;;  %v31852_v46 = vld [vmem:[#allocation106_spill] sm:$0xff] }
 0x49a   : > { %7828 = vst.msk [vmem:[#allocation5 + $0xe0] sm:$0xff] %vm606_vm1, %v7796_v31  ;;  %v24186_v47 = vadd.f32 %v7688_v54, %v31831_v25  ;;  %23423 = vmatprep.mubr.msk.f32.mxu1 %vm606_vm1, %v29281_v2  ;;  %v31850_v31 = vld [vmem:[#allocation104_spill] sm:$0xff]  ;;  %v31855_v25 = vld [vmem:[#allocation109_spill] sm:$0xff] }
 0x49b   : > { %v7799_v9 = vadd.f32 %v24185_v56, %v29417_v23  ;;  %v31853_v56 = vld [vmem:[#allocation107_spill] sm:$0xff]  ;;  %v31854_v54 = vld [vmem:[#allocation108_spill] sm:$0xff] }
 0x49c   : > { %v7798_v3 = vadd.f32 %v24186_v47, %v29417_v23  ;;  %v29654_v23 = vld [vmem:[#allocation3 + $0x180] sm:$0xff] }
 0x49d   : > { %7831 = vst.msk [vmem:[#allocation5 + $0xf8] sm:$0xff] %vm606_vm1, %v7799_v9  ;;  %23424 = vmatmul.mubr.msk.f32.gmra.mrb[44].mxu1 %vm606_vm1, %v29287_v42  ;;  %v31856_v47 = vld [vmem:[#allocation110_spill] sm:$0xff]  ;;  %v31857_v9 = vld [vmem:[#allocation111_spill] sm:$0xff] }
 0x49e   : > { %7830 = vst.msk [vmem:[#allocation5 + $0xf0] sm:$0xff] %vm606_vm1, %v7798_v3  ;;  %23426 = vmatprep.mubr.msk.f32.mxu1 %vm606_vm1, %v29289_v5  ;;  %v31858_v3 = vld [vmem:[#allocation112_spill] sm:$0xff] }
 0x4a1   : > { %23427 = vmatmul.mubr.msk.f32.gmra.mrb[46].mxu1 %vm606_vm1, %v29295_v16 }
 0x4a2   : > { %23429 = vmatprep.mubr.msk.f32.mxu1 %vm606_vm1, %v29297_v61 }
 0x4a5   : > { %23430 = vmatmul.mubr.msk.f32.gmra.mrb[48].mxu1 %vm606_vm1, %v29303_v30 }
 0x4a6   : > { %23432 = vmatprep.mubr.msk.f32.mxu1 %vm606_vm1, %v29305_v58 }
 0x4a9   : > { %23433 = vmatmul.mubr.msk.f32.gmra.mrb[50].mxu1 %vm606_vm1, %v29311_v19 }
 0x4aa   : > { %23435 = vmatprep.mubr.msk.f32.mxu1 %vm606_vm1, %v29313_v24 }
 0x4ad   : > { %23436 = vmatmul.mubr.msk.f32.gmra.mrb[52].mxu1 %vm606_vm1, %v29319_v55 }
 0x4ae   : > { %23438 = vmatprep.mubr.msk.f32.mxu1 %vm606_vm1, %v29321_v7 }
 0x4b1   : > { %23439 = vmatmul.mubr.msk.f32.gmra.mrb[54].mxu1 %vm606_vm1, %v29327_v17 }
 0x4b2   : > { %23441 = vmatprep.mubr.msk.f32.mxu1 %vm606_vm1, %v29329_v22 }
 0x4b5   : > { %23442 = vmatmul.mubr.msk.f32.gmra.mrb[56].mxu1 %vm606_vm1, %v29335_v26 }
 0x4b6   : > { %23444 = vmatprep.mubr.msk.f32.mxu1 %vm606_vm1, %v29337_v13 }
 0x4b9   : > { %23445 = vmatmul.mubr.msk.f32.gmra.mrb[58].mxu1 %vm606_vm1, %v29343_v60 }
 0x4ba   : > { %23447 = vmatprep.mubr.msk.f32.mxu1 %vm606_vm1, %v29345_v18 }
 0x4bd   : > { %23448 = vmatmul.mubr.msk.f32.gmra.mrb[60].mxu1 %vm606_vm1, %v29351_v39 }
 0x4be   : > { %23450 = vmatprep.mubr.msk.f32.mxu1 %vm606_vm1, %v29654_v23 }
 0x4c1   : > { %23451 = vmatmul.mubr.msk.f32.gmra.mrb[62].mxu1 %vm606_vm1, %v29660_v50 }
 0x4c2   : > { %23455 = vmatprep.mubr.msk.f32.mxu1 %vm606_vm1, %v29093_v33  ;;  %v31832_v33 = vld [vmem:[#allocation86_spill] sm:$0xff] }
 0x4c5   : > { %23456 = vmatmul.mubr.msk.f32.vlgmr.msra.gmra.mrb[32].mxu1 %vm606_vm1, %v29106_v40  ;;  %v31833_v40 = vld [vmem:[#allocation87_spill] sm:$0xff] }
 0x4c6   : > { %23504 = vmatpush3.msk.msra.mxu1 %vm999_vm0, %v29554_v52  ;;  %23458 = vmatprep.mubr.msk.f32.mxu1 %vm606_vm1, %v29108_v38  ;;  %v31834_v38 = vld [vmem:[#allocation88_spill] sm:$0xff]  ;;  %v31847_v52 = vld [vmem:[#allocation101_spill] sm:$0xff] }
 0x4c7   : > { %23553 = vmatprep.subr.msk.mxu1 %vm999_vm0, %v20002_v36 }
 0x4c9   : > { %23459 = vmatmul.mubr.msk.f32.gmra.mrb[34].mxu1 %vm606_vm1, %v29116_v8  ;;  %v31835_v8 = vld [vmem:[#allocation89_spill] sm:$0xff] }
 0x4ca   : > { %23461 = vmatprep.mubr.msk.f32.mxu1 %vm606_vm1, %v29118_v21  ;;  %v31836_v21 = vld [vmem:[#allocation90_spill] sm:$0xff] }
 0x4cd   : > { %23462 = vmatmul.mubr.msk.f32.gmra.mrb[36].mxu1 %vm606_vm1, %v29124_v10  ;;  %v31837_v10 = vld [vmem:[#allocation91_spill] sm:$0xff] }
 0x4ce   : > { %23464 = vmatprep.mubr.msk.f32.mxu1 %vm606_vm1, %v29126_v35  ;;  %v31838_v35 = vld [vmem:[#allocation92_spill] sm:$0xff] }
 0x4d1   : > { %23465 = vmatmul.mubr.msk.f32.gmra.mrb[38].mxu1 %vm606_vm1, %v29132_v59  ;;  %v31839_v59 = vld [vmem:[#allocation93_spill] sm:$0xff] }
 0x4d2   : > { %23467 = vmatprep.mubr.msk.f32.mxu1 %vm606_vm1, %v29134_v27  ;;  %v31840_v27 = vld [vmem:[#allocation94_spill] sm:$0xff] }
 0x4d5   : > { %23468 = vmatmul.mubr.msk.f32.gmra.mrb[40].mxu1 %vm606_vm1, %v29140_v62  ;;  %v31841_v62 = vld [vmem:[#allocation95_spill] sm:$0xff] }
 0x4d6   : > { %23470 = vmatprep.mubr.msk.f32.mxu1 %vm606_vm1, %v29142_v14  ;;  %v31842_v14 = vld [vmem:[#allocation96_spill] sm:$0xff] }
 0x4d9   : > { %23471 = vmatmul.mubr.msk.f32.gmra.mrb[42].mxu1 %vm606_vm1, %v29148_v28  ;;  %v29728_v28 = vld [vmem:[#allocation3 + $0x181] sm:$0xff] }
 0x4da   : > { %23473 = vmatprep.mubr.msk.f32.mxu1 %vm606_vm1, %v29150_v29  ;;  %v31843_v29 = vld [vmem:[#allocation97_spill] sm:$0xff] }
 0x4dd   : > { %23474 = vmatmul.mubr.msk.f32.gmra.mrb[44].mxu1 %vm606_vm1, %v29156_v51  ;;  %v29734_v51 = vld [vmem:[#allocation3 + $0x189] sm:$0xff] }
 0x4de   : > { %23476 = vmatprep.mubr.msk.f32.mxu1 %vm606_vm1, %v29158_v43  ;;  %v31844_v43 = vld [vmem:[#allocation98_spill] sm:$0xff] }
 0x4e1   : > { %23477 = vmatmul.mubr.msk.f32.gmra.mrb[46].mxu1 %vm606_vm1, %v29164_v45  ;;  %v20036_v45 = vld [vmem:[%s31027_s7 + $0x1c] sm:$0xf] }
 0x4e2   : > { %23479 = vmatprep.mubr.msk.f32.mxu1 %vm606_vm1, %v29166_v20  ;;  %v31845_v20 = vld [vmem:[#allocation99_spill] sm:$0xff] }
 0x4e5   : > { %23480 = vmatmul.mubr.msk.f32.gmra.mrb[48].mxu1 %vm606_vm1, %v29172_v1  ;;  %v31846_v1 = vld [vmem:[#allocation100_spill] sm:$0xff] }
 0x4e6   : > { %23482 = vmatprep.mubr.msk.f32.mxu1 %vm606_vm1, %v31832_v33  ;;  %v31860_v33 = vld [vmem:[#allocation114_spill] sm:$0xff] }
 0x4e9   : > { %23483 = vmatmul.mubr.msk.f32.gmra.mrb[50].mxu1 %vm606_vm1, %v31833_v40  ;;  %v31861_v40 = vld [vmem:[#allocation117_spill] sm:$0xff] }
 0x4ea   : > { %23485 = vmatprep.mubr.msk.f32.mxu1 %vm606_vm1, %v31834_v38  ;;  %v31862_v38 = vld [vmem:[#allocation118_spill] sm:$0xff] }
 0x4ed   : > { %23486 = vmatmul.mubr.msk.f32.gmra.mrb[52].mxu1 %vm606_vm1, %v31835_v8  ;;  %v31863_v8 = vld [vmem:[#allocation6_spill] sm:$0xff] }
 0x4ee   : > { %23488 = vmatprep.mubr.msk.f32.mxu1 %vm606_vm1, %v31836_v21  ;;  %v31864_v21 = vld [vmem:[#allocation59_spill] sm:$0xff] }
 0x4f1   : > { %23489 = vmatmul.mubr.msk.f32.gmra.mrb[54].mxu1 %vm606_vm1, %v31837_v10  ;;  %v31865_v10 = vld [vmem:[#allocation7_spill] sm:$0xff] }
 0x4f2   : > { %23491 = vmatprep.mubr.msk.f32.mxu1 %vm606_vm1, %v31838_v35  ;;  %v31866_v35 = vld [vmem:[#allocation8_spill] sm:$0xff] }
 0x4f5   : > { %23492 = vmatmul.mubr.msk.f32.gmra.mrb[56].mxu1 %vm606_vm1, %v31839_v59  ;;  %v31867_v59 = vld [vmem:[#allocation9_spill] sm:$0xff] }
 0x4f6   : > { %23494 = vmatprep.mubr.msk.f32.mxu1 %vm606_vm1, %v31840_v27  ;;  %v31868_v27 = vld [vmem:[#allocation10_spill] sm:$0xff] }
 0x4f9   : > { %23495 = vmatmul.mubr.msk.f32.gmra.mrb[58].mxu1 %vm606_vm1, %v31841_v62  ;;  %v31869_v62 = vld [vmem:[#allocation11_spill] sm:$0xff] }
 0x4fa   : > { %23497 = vmatprep.mubr.msk.f32.mxu1 %vm606_vm1, %v31842_v14  ;;  %v31870_v14 = vld [vmem:[#allocation12_spill] sm:$0xff] }
 0x4fd   : > { %23498 = vmatmul.mubr.msk.f32.gmra.mrb[60].mxu1 %vm606_vm1, %v31843_v29  ;;  %v29801_v29 = vld [vmem:[#allocation3 + $0x182] sm:$0xff] }
 0x4fe   : > { %23500 = vmatprep.mubr.msk.f32.mxu1 %vm606_vm1, %v29728_v28 }
 0x501   : > { %23501 = vmatmul.mubr.msk.f32.gmra.mrb[62].mxu1 %vm606_vm1, %v29734_v51 }
 0x502   : > { %23505 = vmatprep.mubr.msk.f32.mxu1 %vm606_vm1, %v31844_v43  ;;  %v29807_v43 = vld [vmem:[#allocation3 + $0x18a] sm:$0xff] }
 0x505   : > { %23506 = vmatmul.mubr.msk.f32.vlgmr.msra.gmra.mrb[32].mxu1 %vm606_vm1, %v31845_v20  ;;  %v20070_v20 = vld [vmem:[%s31027_s7 + $0x20] sm:$0xf] }
 0x506   : > { %23554 = vmatpush3.msk.msra.mxu1 %vm999_vm0, %v20002_v36  ;;  %23508 = vmatprep.mubr.msk.f32.mxu1 %vm606_vm1, %v31846_v1  ;;  %v31859_v36 = vld [vmem:[#allocation113_spill] sm:$0xff] }
 0x507   : > { %23603 = vmatprep.subr.msk.mxu1 %vm999_vm0, %v20036_v45  ;;  %v14256_v1 = vld [vmem:[#allocation3 + $0x199] sm:$0xff] }
 0x509   : > { %23509 = vmatmul.mubr.msk.f32.gmra.mrb[34].mxu1 %vm606_vm1, %v31847_v52  ;;  %v14257_v52 = vld [vmem:[#allocation3 + $0x1a1] sm:$0xff] }
 0x50a   : > { %23511 = vmatprep.mubr.msk.f32.mxu1 %vm606_vm1, %v31848_v11  ;;  %v14616_v11 = vld [vmem:[#allocation3 + $0x32] sm:$0xff] }
 0x50d   : > { %23512 = vmatmul.mubr.msk.f32.gmra.mrb[36].mxu1 %vm606_vm1, %v31849_v57  ;;  %v14617_v57 = vld [vmem:[#allocation3 + $0x3a] sm:$0xff] }
 0x50e   : > { %23514 = vmatprep.mubr.msk.f32.mxu1 %vm606_vm1, %v31850_v31  ;;  %v14618_v31 = vld [vmem:[#allocation3 + $0x4a] sm:$0xff] }
 0x511   : > { %23515 = vmatmul.mubr.msk.f32.gmra.mrb[38].mxu1 %vm606_vm1, %v31851_v63  ;;  %v14619_v63 = vld [vmem:[#allocation3 + $0x52] sm:$0xff] }
 0x512   : > { %23517 = vmatprep.mubr.msk.f32.mxu1 %vm606_vm1, %v31852_v46  ;;  %v14622_v46 = vld [vmem:[#allocation3 + $0x7a] sm:$0xff] }
 0x515   : > { %23518 = vmatmul.mubr.msk.f32.gmra.mrb[40].mxu1 %vm606_vm1, %v31853_v56  ;;  %v14623_v56 = vld [vmem:[#allocation3 + $0x82] sm:$0xff] }
 0x516   : > { %23520 = vmatprep.mubr.msk.f32.mxu1 %vm606_vm1, %v31854_v54  ;;  %v14624_v54 = vld [vmem:[#allocation3 + $0x92] sm:$0xff] }
 0x519   : > { %23521 = vmatmul.mubr.msk.f32.gmra.mrb[42].mxu1 %vm606_vm1, %v31855_v25 }
 0x51a   : > { %23523 = vmatprep.mubr.msk.f32.mxu1 %vm606_vm1, %v31856_v47 }
 0x51d   : > { %23524 = vmatmul.mubr.msk.f32.gmra.mrb[44].mxu1 %vm606_vm1, %v31857_v9 }
 0x51e   : > { %23526 = vmatprep.mubr.msk.f32.mxu1 %vm606_vm1, %v31858_v3 }
 0x521   : > { %23527 = vmatmul.mubr.msk.f32.gmra.mrb[46].mxu1 %vm606_vm1, %v31859_v36 }
 0x522   : > { %23529 = vmatprep.mubr.msk.f32.mxu1 %vm606_vm1, %v31860_v33 }
 0x525   : > { %23530 = vmatmul.mubr.msk.f32.gmra.mrb[48].mxu1 %vm606_vm1, %v31861_v40 }
 0x526   : > { %23532 = vmatprep.mubr.msk.f32.mxu1 %vm606_vm1, %v31862_v38 }
 0x529   : > { %23533 = vmatmul.mubr.msk.f32.gmra.mrb[50].mxu1 %vm606_vm1, %v31863_v8 }
 0x52a   : > { %23535 = vmatprep.mubr.msk.f32.mxu1 %vm606_vm1, %v31864_v21 }
 0x52d   : > { %23536 = vmatmul.mubr.msk.f32.gmra.mrb[52].mxu1 %vm606_vm1, %v31865_v10 }
 0x52e   : > { %23538 = vmatprep.mubr.msk.f32.mxu1 %vm606_vm1, %v31866_v35 }
 0x531   : > { %23539 = vmatmul.mubr.msk.f32.gmra.mrb[54].mxu1 %vm606_vm1, %v31867_v59 }
 0x532   : > { %23541 = vmatprep.mubr.msk.f32.mxu1 %vm606_vm1, %v31868_v27 }
 0x535   : > { %23542 = vmatmul.mubr.msk.f32.gmra.mrb[56].mxu1 %vm606_vm1, %v31869_v62 }
 0x536   : > { %23544 = vmatprep.mubr.msk.f32.mxu1 %vm606_vm1, %v31870_v14 }
 0x539   : > { %23545 = vmatmul.mubr.msk.f32.gmra.mrb[58].mxu1 %vm606_vm1, %v29523_v15 }
 0x53a   : > { %23547 = vmatprep.mubr.msk.f32.mxu1 %vm606_vm1, %v29526_v44 }
 0x53d   : > { %23548 = vmatmul.mubr.msk.f32.gmra.mrb[60].mxu1 %vm606_vm1, %v29537_v32 }
 0x53e   : > { %23550 = vmatprep.mubr.msk.f32.mxu1 %vm606_vm1, %v29801_v29 }
 0x541   : > { %23551 = vmatmul.mubr.msk.f32.gmra.mrb[62].mxu1 %vm606_vm1, %v29807_v43 }
 0x542   : > { %23555 = vmatprep.mubr.msk.f32.mxu1 %vm606_vm1, %v29239_v12  ;;  %v13866_v12 = vld [vmem:[#allocation3 + $0x198] sm:$0xff] }
 0x545   : > { %23556 = vmatmul.mubr.msk.f32.vlgmr.msra.gmra.mrb[32].mxu1 %vm606_vm1, %v29247_v49  ;;  %v13867_v49 = vld [vmem:[#allocation3 + $0x1a0] sm:$0xff] }
 0x546   : > { %23604 = vmatpush3.msk.msra.mxu1 %vm999_vm0, %v20036_v45  ;;  %23558 = vmatprep.mubr.msk.f32.mxu1 %vm606_vm1, %v29249_v37  ;;  %v14226_v37 = vld [vmem:[#allocation3 + $0x31] sm:$0xff] }
 0x547   : > { %23653 = vmatprep.subr.msk.mxu1 %vm999_vm0, %v20070_v20  ;;  %v14253_v45 = vld [vmem:[#allocation3 + $0x171] sm:$0xff] }
 0x549   : > { %23559 = vmatmul.mubr.msk.f32.gmra.mrb[34].mxu1 %vm606_vm1, %v29255_v4  ;;  %v20107_v4 = vld [vmem:[%s31031_s11 + $0x4] sm:$0xf] }
 0x54a   : > { %23561 = vmatprep.mubr.msk.f32.mxu1 %vm606_vm1, %v29257_v6  ;;  %v14227_v6 = vld [vmem:[#allocation3 + $0x39] sm:$0xff]  ;;  %23703 = vmatprep.subr.msk.mxu0 %vm999_vm0, %v20107_v4 }
 0x54b   : > { %23704 = vmatpush3.msk.msra.mxu0 %vm999_vm0, %v20107_v4 }
 0x54d   : > { %23562 = vmatmul.mubr.msk.f32.gmra.mrb[36].mxu1 %vm606_vm1, %v29263_v48  ;;  %v14228_v48 = vld [vmem:[#allocation3 + $0x49] sm:$0xff] }
 0x54e   : > { %23564 = vmatprep.mubr.msk.f32.mxu1 %vm606_vm1, %v29265_v34  ;;  %v14229_v34 = vld [vmem:[#allocation3 + $0x51] sm:$0xff] }
 0x551   : > { %23565 = vmatmul.mubr.msk.f32.gmra.mrb[38].mxu1 %vm606_vm1, %v29271_v53  ;;  %v14230_v53 = vld [vmem:[#allocation3 + $0x61] sm:$0xff] }
 0x552   : > { %23567 = vmatprep.mubr.msk.f32.mxu1 %vm606_vm1, %v29273_v41  ;;  %v14231_v41 = vld [vmem:[#allocation3 + $0x69] sm:$0xff] }
 0x555   : > { %23568 = vmatmul.mubr.msk.f32.gmra.mrb[40].mxu1 %vm606_vm1, %v29279_v0  ;;  %v14232_v0 = vld [vmem:[#allocation3 + $0x79] sm:$0xff] }
 0x556   : > { %23570 = vmatprep.mubr.msk.f32.mxu1 %vm606_vm1, %v29281_v2  ;;  %v14233_v2 = vld [vmem:[#allocation3 + $0x81] sm:$0xff] }
 0x559   : > { %23571 = vmatmul.mubr.msk.f32.gmra.mrb[42].mxu1 %vm606_vm1, %v29287_v42  ;;  %v14234_v42 = vld [vmem:[#allocation3 + $0x91] sm:$0xff] }
 0x55a   : > { %23573 = vmatprep.mubr.msk.f32.mxu1 %vm606_vm1, %v29289_v5  ;;  %v14235_v5 = vld [vmem:[#allocation3 + $0x99] sm:$0xff] }
 0x55d   : > { %23574 = vmatmul.mubr.msk.f32.gmra.mrb[44].mxu1 %vm606_vm1, %v29295_v16  ;;  %v14236_v16 = vld [vmem:[#allocation3 + $0xa9] sm:$0xff] }
 0x55e   : > { %23576 = vmatprep.mubr.msk.f32.mxu1 %vm606_vm1, %v29297_v61  ;;  %v14237_v61 = vld [vmem:[#allocation3 + $0xb1] sm:$0xff] }
 0x561   : > { %23577 = vmatmul.mubr.msk.f32.gmra.mrb[46].mxu1 %vm606_vm1, %v29303_v30  ;;  %v14238_v30 = vld [vmem:[#allocation3 + $0xc1] sm:$0xff] }
 0x562   : > { %23579 = vmatprep.mubr.msk.f32.mxu1 %vm606_vm1, %v29305_v58  ;;  %v14239_v58 = vld [vmem:[#allocation3 + $0xc9] sm:$0xff] }
 0x565   : > { %23580 = vmatmul.mubr.msk.f32.gmra.mrb[48].mxu1 %vm606_vm1, %v29311_v19  ;;  %v14240_v19 = vld [vmem:[#allocation3 + $0xd9] sm:$0xff] }
 0x566   : > { %23582 = vmatprep.mubr.msk.f32.mxu1 %vm606_vm1, %v29313_v24  ;;  %v14241_v24 = vld [vmem:[#allocation3 + $0xe1] sm:$0xff] }
 0x569   : > { %23583 = vmatmul.mubr.msk.f32.gmra.mrb[50].mxu1 %vm606_vm1, %v29319_v55  ;;  %v14242_v55 = vld [vmem:[#allocation3 + $0xf1] sm:$0xff] }
 0x56a   : > { %23585 = vmatprep.mubr.msk.f32.mxu1 %vm606_vm1, %v29321_v7  ;;  %v14243_v7 = vld [vmem:[#allocation3 + $0xf9] sm:$0xff] }
 0x56d   : > { %23586 = vmatmul.mubr.msk.f32.gmra.mrb[52].mxu1 %vm606_vm1, %v29327_v17  ;;  %v14244_v17 = vld [vmem:[#allocation3 + $0x109] sm:$0xff] }
 0x56e   : > { %23588 = vmatprep.mubr.msk.f32.mxu1 %vm606_vm1, %v29329_v22  ;;  %v14245_v22 = vld [vmem:[#allocation3 + $0x111] sm:$0xff] }
 0x571   : > { %23589 = vmatmul.mubr.msk.f32.gmra.mrb[54].mxu1 %vm606_vm1, %v29335_v26  ;;  %v14246_v26 = vld [vmem:[#allocation3 + $0x121] sm:$0xff] }
 0x572   : > { %23591 = vmatprep.mubr.msk.f32.mxu1 %vm606_vm1, %v29337_v13  ;;  %v14247_v13 = vld [vmem:[#allocation3 + $0x129] sm:$0xff] }
 0x575   : > { %23592 = vmatmul.mubr.msk.f32.gmra.mrb[56].mxu1 %vm606_vm1, %v29343_v60  ;;  %v14248_v60 = vld [vmem:[#allocation3 + $0x139] sm:$0xff] }
 0x576   : > { %23594 = vmatprep.mubr.msk.f32.mxu1 %vm606_vm1, %v29345_v18  ;;  %v14249_v18 = vld [vmem:[#allocation3 + $0x141] sm:$0xff] }
 0x579   : > { %23595 = vmatmul.mubr.msk.f32.gmra.mrb[58].mxu1 %vm606_vm1, %v29351_v39  ;;  %v14250_v39 = vld [vmem:[#allocation3 + $0x151] sm:$0xff] }
 0x57a   : > { %23597 = vmatprep.mubr.msk.f32.mxu1 %vm606_vm1, %v29654_v23  ;;  %v14251_v23 = vld [vmem:[#allocation3 + $0x159] sm:$0xff] }
 0x57d   : > { %23598 = vmatmul.mubr.msk.f32.gmra.mrb[60].mxu1 %vm606_vm1, %v29660_v50  ;;  %v14252_v50 = vld [vmem:[#allocation3 + $0x169] sm:$0xff] }
 0x57e   : > { %23600 = vmatprep.mubr.msk.f32.mxu1 %vm606_vm1, %v13866_v12 }
 0x581   : > { %23601 = vmatmul.mubr.msk.f32.gmra.mrb[62].mxu1 %vm606_vm1, %v13867_v49 }
 0x582   : > { %23605 = vmatprep.mubr.msk.f32.mxu1 %vm606_vm1, %v14226_v37 }
 0x585   : > { %23606 = vmatmul.mubr.msk.f32.vlgmr.msra.gmra.mrb[32].mxu1 %vm606_vm1, %v14227_v6 }
 0x586   : > { %23654 = vmatpush3.msk.msra.mxu1 %vm999_vm0, %v20070_v20  ;;  %23608 = vmatprep.mubr.msk.f32.mxu1 %vm606_vm1, %v14228_v48 }
 0x589   : > { %23609 = vmatmul.mubr.msk.f32.gmra.mrb[34].mxu1 %vm606_vm1, %v14229_v34 }
 0x58a   : > { %23611 = vmatprep.mubr.msk.f32.mxu1 %vm606_vm1, %v14230_v53 }
 0x58d   : > { %23612 = vmatmul.mubr.msk.f32.gmra.mrb[36].mxu1 %vm606_vm1, %v14231_v41 }
 0x58e   : > { %23614 = vmatprep.mubr.msk.f32.mxu1 %vm606_vm1, %v14232_v0 }
 0x591   : > { %23615 = vmatmul.mubr.msk.f32.gmra.mrb[38].mxu1 %vm606_vm1, %v14233_v2 }
 0x592   : > { %23617 = vmatprep.mubr.msk.f32.mxu1 %vm606_vm1, %v14234_v42 }
 0x595   : > { %23618 = vmatmul.mubr.msk.f32.gmra.mrb[40].mxu1 %vm606_vm1, %v14235_v5 }
 0x596   : > { %23620 = vmatprep.mubr.msk.f32.mxu1 %vm606_vm1, %v14236_v16 }
 0x599   : > { %23621 = vmatmul.mubr.msk.f32.gmra.mrb[42].mxu1 %vm606_vm1, %v14237_v61 }
 0x59a   : > { %23623 = vmatprep.mubr.msk.f32.mxu1 %vm606_vm1, %v14238_v30 }
 0x59d   : > { %23624 = vmatmul.mubr.msk.f32.gmra.mrb[44].mxu1 %vm606_vm1, %v14239_v58 }
 0x59e   : > { %23626 = vmatprep.mubr.msk.f32.mxu1 %vm606_vm1, %v14240_v19 }
 0x5a1   : > { %23627 = vmatmul.mubr.msk.f32.gmra.mrb[46].mxu1 %vm606_vm1, %v14241_v24 }
 0x5a2   : > { %23629 = vmatprep.mubr.msk.f32.mxu1 %vm606_vm1, %v14242_v55 }
 0x5a5   : > { %23630 = vmatmul.mubr.msk.f32.gmra.mrb[48].mxu1 %vm606_vm1, %v14243_v7 }
 0x5a6   : > { %23632 = vmatprep.mubr.msk.f32.mxu1 %vm606_vm1, %v14244_v17 }
 0x5a9   : > { %23633 = vmatmul.mubr.msk.f32.gmra.mrb[50].mxu1 %vm606_vm1, %v14245_v22 }
 0x5aa   : > { %23635 = vmatprep.mubr.msk.f32.mxu1 %vm606_vm1, %v14246_v26 }
 0x5ad   : > { %23636 = vmatmul.mubr.msk.f32.gmra.mrb[52].mxu1 %vm606_vm1, %v14247_v13 }
 0x5ae   : > { %23638 = vmatprep.mubr.msk.f32.mxu1 %vm606_vm1, %v14248_v60 }
 0x5b1   : > { %23639 = vmatmul.mubr.msk.f32.gmra.mrb[54].mxu1 %vm606_vm1, %v14249_v18 }
 0x5b2   : > { %23641 = vmatprep.mubr.msk.f32.mxu1 %vm606_vm1, %v14250_v39 }
 0x5b5   : > { %23642 = vmatmul.mubr.msk.f32.gmra.mrb[56].mxu1 %vm606_vm1, %v14251_v23 }
 0x5b6   : > { %23644 = vmatprep.mubr.msk.f32.mxu1 %vm606_vm1, %v14252_v50 }
 0x5b9   : > { %23645 = vmatmul.mubr.msk.f32.gmra.mrb[58].mxu1 %vm606_vm1, %v14253_v45 }
 0x5ba   : > { %23647 = vmatprep.mubr.msk.f32.mxu1 %vm606_vm1, %v29728_v28  ;;  %v14620_v28 = vld [vmem:[#allocation3 + $0x62] sm:$0xff] }
 0x5bd   : > { %23648 = vmatmul.mubr.msk.f32.gmra.mrb[60].mxu1 %vm606_vm1, %v29734_v51  ;;  %v14621_v51 = vld [vmem:[#allocation3 + $0x6a] sm:$0xff] }
 0x5be   : > { %23650 = vmatprep.mubr.msk.f32.mxu1 %vm606_vm1, %v14256_v1 }
 0x5c1   : > { %23651 = vmatmul.mubr.msk.f32.gmra.mrb[62].mxu1 %vm606_vm1, %v14257_v52 }
 0x5c2   : > { %23655 = vmatprep.mubr.msk.f32.mxu1 %vm606_vm1, %v14616_v11 }
 0x5c5   : > { %23656 = vmatmul.mubr.msk.f32.vlgmr.msra.gmra.mrb[32].mxu1 %vm606_vm1, %v14617_v57 }
 0x5c6   : > { %23658 = vmatprep.mubr.msk.f32.mxu1 %vm606_vm1, %v14618_v31 }
 0x5c9   : > { %23659 = vmatmul.mubr.msk.f32.gmra.mrb[34].mxu1 %vm606_vm1, %v14619_v63 }
 0x5ca   : > { %23661 = vmatprep.mubr.msk.f32.mxu1 %vm606_vm1, %v14620_v28 }
 0x5cd   : > { %23662 = vmatmul.mubr.msk.f32.gmra.mrb[36].mxu1 %vm606_vm1, %v14621_v51 }
 0x5ce   : > { %23664 = vmatprep.mubr.msk.f32.mxu1 %vm606_vm1, %v14622_v46 }
 0x5d1   : > { %23665 = vmatmul.mubr.msk.f32.gmra.mrb[38].mxu1 %vm606_vm1, %v14623_v56 }
 0x5d2   : > { %23667 = vmatprep.mubr.msk.f32.mxu1 %vm606_vm1, %v14624_v54 }
 0x5d5   : > { %23668 = vmatmul.mubr.msk.f32.gmra.mrb[40].mxu1 %vm606_vm1, %v31855_v25  ;;  %v14646_v25 = vld [vmem:[#allocation3 + $0x19a] sm:$0xff] }
 0x5d6   : > { %23670 = vmatprep.mubr.msk.f32.mxu1 %vm606_vm1, %v31856_v47  ;;  %v14647_v47 = vld [vmem:[#allocation3 + $0x1a2] sm:$0xff] }
 0x5d9   : > { %23671 = vmatmul.mubr.msk.f32.gmra.mrb[42].mxu1 %vm606_vm1, %v31857_v9  ;;  %v15253_v9 = vld [vmem:[#allocation4 + $0x1] sm:$0xff] }
 0x5da   : > { %23673 = vmatprep.mubr.msk.f32.mxu1 %vm606_vm1, %v31858_v3  ;;  %23705 = vmatprep.mubr.msk.f32.mxu0 %vm606_vm1, %v15253_v9  ;;  %v29988_v3 = vld [vmem:[%s31028_s8] ss:$0 sm:$0xff] }
 0x5dd   : > { %23674 = vmatmul.mubr.msk.f32.gmra.mrb[44].mxu1 %vm606_vm1, %v31859_v36 }
 0x5de   : > { %23676 = vmatprep.mubr.msk.f32.mxu1 %vm606_vm1, %v31860_v33  ;;  %v29993_v33 = vld [vmem:[%s31029_s9] ss:$0 sm:$0xff] }
 0x5e1   : > { %23677 = vmatmul.mubr.msk.f32.gmra.mrb[46].mxu1 %vm606_vm1, %v31861_v40 }
 0x5e2   : > { %23679 = vmatprep.mubr.msk.f32.mxu1 %vm606_vm1, %v31862_v38 }
 0x5e5   : > { %23680 = vmatmul.mubr.msk.f32.gmra.mrb[48].mxu1 %vm606_vm1, %v31863_v8  ;;  %v29999_v8 = vld [vmem:[%s31030_s10] ss:$0 sm:$0xff] }
 0x5e6   : > { %23682 = vmatprep.mubr.msk.f32.mxu1 %vm606_vm1, %v31864_v21 }
 0x5e9   : > { %23683 = vmatmul.mubr.msk.f32.gmra.mrb[50].mxu1 %vm606_vm1, %v31865_v10 }
 0x5ea   : > { %23685 = vmatprep.mubr.msk.f32.mxu1 %vm606_vm1, %v31866_v35 }
 0x5ed   : > { %23686 = vmatmul.mubr.msk.f32.gmra.mrb[52].mxu1 %vm606_vm1, %v31867_v59 }
 0x5ee   : > { %23688 = vmatprep.mubr.msk.f32.mxu1 %vm606_vm1, %v31868_v27 }
 0x5f1   : > { %23689 = vmatmul.mubr.msk.f32.gmra.mrb[54].mxu1 %vm606_vm1, %v31869_v62 }
 0x5f2   : > { %23691 = vmatprep.mubr.msk.f32.mxu1 %vm606_vm1, %v31870_v14 }
 0x5f5   : > { %23692 = vmatmul.mubr.msk.f32.gmra.mrb[56].mxu1 %vm606_vm1, %v29523_v15  ;;  %v15254_v15 = vld [vmem:[#allocation4 + $0x9] sm:$0xff] }
 0x5f6   : > { %23694 = vmatprep.mubr.msk.f32.mxu1 %vm606_vm1, %v29526_v44  ;;  %23706 = vmatmul.mubr.msk.f32.vlgmr.msra.gmra.mrb[32].mxu0 %vm606_vm1, %v15254_v15  ;;  %v15252_v44 = vld [vmem:[%s31031_s11] sm:$0xf] }
 0x5f7   : > { %23753 = vmatprep.subr.msk.mxu0 %vm999_vm0, %v15252_v44 }
 0x5f8   : > { %23754 = vmatpush3.msk.msra.mxu0 %vm999_vm0, %v15252_v44 }
 0x5f9   : > { %23695 = vmatmul.mubr.msk.f32.gmra.mrb[58].mxu1 %vm606_vm1, %v29537_v32  ;;  %v29981_v32 = vld [vmem:[%s31031_s11 + $0x8] sm:$0xf] }
 0x5fa   : > { %23697 = vmatprep.mubr.msk.f32.mxu1 %vm606_vm1, %v29801_v29  ;;  %23803 = vmatprep.subr.msk.mxu0 %vm999_vm0, %v29981_v32 }
 0x5fd   : > { %23698 = vmatmul.mubr.msk.f32.gmra.mrb[60].mxu1 %vm606_vm1, %v29807_v43 }
 0x5fe   : > { %23700 = vmatprep.mubr.msk.f32.mxu1 %vm606_vm1, %v14646_v25 }
 0x601   : > { %23701 = vmatmul.mubr.msk.f32.gmra.mrb[62].mxu1 %vm606_vm1, %v14647_v47 }
 0x698   : > { %v23657_v36 = vpop.f32.mrb[32].mxu1 }
 0x699   : > { %v15046_v40 = vadd.f32 %v23657_v36, %v29988_v3  ;;  %v14815_v38 = vpop.f32.mrb[33].mxu1 }
 0x69a   : > { %v15045_v21 = vadd.f32 %v29988_v3, %v14815_v38 }
 0x69b   : > { %v15085_v10 = vmul.f32 %v29993_v33, %v15046_v40 }
 0x69c   : > { %v15084_v35 = vmul.f32 %v29993_v33, %v15045_v21  ;;  %v23660_v59 = vpop.f32.mrb[34].mxu1 }
 0x69d   : > { %v15124_v27 = vadd.f32 %v29999_v8, %v15085_v10  ;;  %v15048_v62 = vadd.f32 %v23660_v59, %v29988_v3  ;;  %v14825_v14 = vpop.f32.mrb[35].mxu1 }
 0x69e   : > { %v15123_v29 = vadd.f32 %v29999_v8, %v15084_v35  ;;  %v15047_v43 = vadd.f32 %v29988_v3, %v14825_v14 }
 0x69f   : > { %v15156_v20 = vmax.f32 %v15124_v27, 0.0  ;;  %v15087_v12 = vmul.f32 %v29993_v33, %v15048_v62 }
 0x6a0   : > { %v15155_v49 = vmax.f32 %v15123_v29, 0.0  ;;  %v15086_v37 = vmul.f32 %v29993_v33, %v15047_v43  ;;  %v23663_v4 = vpop.f32.mrb[36].mxu1 }
 0x6a1   : > { %15189 = vst.msk [vmem:[#allocation4 + $0x21] sm:$0xff] %vm606_vm1, %v15156_v20  ;;  %v15126_v6 = vadd.f32 %v29999_v8, %v15087_v12  ;;  %v15050_v48 = vadd.f32 %v23663_v4, %v29988_v3  ;;  %v14835_v34 = vpop.f32.mrb[37].mxu1 }
 0x6a2   : > { %15188 = vst.msk [vmem:[#allocation4 + $0x19] sm:$0xff] %vm606_vm1, %v15155_v49  ;;  %v15125_v53 = vadd.f32 %v29999_v8, %v15086_v37  ;;  %v15049_v41 = vadd.f32 %v29988_v3, %v14835_v34 }
 0x6a3   : > { %v15158_v0 = vmax.f32 %v15126_v6, 0.0  ;;  %v15089_v2 = vmul.f32 %v29993_v33, %v15050_v48 }
 0x6a4   : > { %v15157_v42 = vmax.f32 %v15125_v53, 0.0  ;;  %v15088_v5 = vmul.f32 %v29993_v33, %v15049_v41  ;;  %v23666_v16 = vpop.f32.mrb[38].mxu1 }
 0x6a5   : > { %15191 = vst.msk [vmem:[#allocation4 + $0x39] sm:$0xff] %vm606_vm1, %v15158_v0  ;;  %v15128_v61 = vadd.f32 %v29999_v8, %v15089_v2  ;;  %v15052_v30 = vadd.f32 %v23666_v16, %v29988_v3  ;;  %v14845_v58 = vpop.f32.mrb[39].mxu1 }
 0x6a6   : > { %15190 = vst.msk [vmem:[#allocation4 + $0x31] sm:$0xff] %vm606_vm1, %v15157_v42  ;;  %v15127_v19 = vadd.f32 %v29999_v8, %v15088_v5  ;;  %v15051_v24 = vadd.f32 %v29988_v3, %v14845_v58 }
 0x6a7   : > { %v15160_v55 = vmax.f32 %v15128_v61, 0.0  ;;  %v15091_v7 = vmul.f32 %v29993_v33, %v15052_v30 }
 0x6a8   : > { %v15159_v17 = vmax.f32 %v15127_v19, 0.0  ;;  %v15090_v22 = vmul.f32 %v29993_v33, %v15051_v24  ;;  %v23669_v26 = vpop.f32.mrb[40].mxu1  ;;  %v30036_v45 = vld [vmem:[#allocation4 + $0x21] sm:$0xff] }
 0x6a9   : > { %15193 = vst.msk [vmem:[#allocation4 + $0x51] sm:$0xff] %vm606_vm1, %v15160_v55  ;;  %v15130_v13 = vadd.f32 %v29999_v8, %v15091_v7  ;;  %v15054_v60 = vadd.f32 %v23669_v26, %v29988_v3  ;;  %v14855_v18 = vpop.f32.mrb[41].mxu1  ;;  %v30029_v39 = vld [vmem:[#allocation4 + $0x19] sm:$0xff] }
 0x6aa   : > { %15192 = vst.msk [vmem:[#allocation4 + $0x49] sm:$0xff] %vm606_vm1, %v15159_v17  ;;  %v15129_v23 = vadd.f32 %v29999_v8, %v15090_v22  ;;  %v15053_v50 = vadd.f32 %v29988_v3, %v14855_v18  ;;  %23708 = vmatprep.mubr.msk.f32.mxu0 %vm606_vm1, %v30029_v39 }
 0x6ab   : > { %v15162_v1 = vmax.f32 %v15130_v13, 0.0  ;;  %v15093_v52 = vmul.f32 %v29993_v33, %v15054_v60  ;;  %23709 = vmatmul.mubr.msk.f32.gmra.mrb[34].mxu0 %vm606_vm1, %v30036_v45 }
 0x6ac   : > { %v15161_v11 = vmax.f32 %v15129_v23, 0.0  ;;  %v15092_v57 = vmul.f32 %v29993_v33, %v15053_v50  ;;  %v23672_v31 = vpop.f32.mrb[42].mxu1  ;;  %v30052_v25 = vld [vmem:[#allocation4 + $0x39] sm:$0xff] }
 0x6ad   : > { %15195 = vst.msk [vmem:[#allocation4 + $0x69] sm:$0xff] %vm606_vm1, %v15162_v1  ;;  %v15132_v63 = vadd.f32 %v29999_v8, %v15093_v52  ;;  %v15056_v28 = vadd.f32 %v23672_v31, %v29988_v3  ;;  %v14865_v51 = vpop.f32.mrb[43].mxu1  ;;  %v30045_v46 = vld [vmem:[#allocation4 + $0x31] sm:$0xff] }
 0x6ae   : > { %15194 = vst.msk [vmem:[#allocation4 + $0x61] sm:$0xff] %vm606_vm1, %v15161_v11  ;;  %v15131_v56 = vadd.f32 %v29999_v8, %v15092_v57  ;;  %v15055_v54 = vadd.f32 %v29988_v3, %v14865_v51  ;;  %23711 = vmatprep.mubr.msk.f32.mxu0 %vm606_vm1, %v30045_v46 }
 0x6af   : > { %v15164_v47 = vmax.f32 %v15132_v63, 0.0  ;;  %v15095_v9 = vmul.f32 %v29993_v33, %v15056_v28  ;;  %23712 = vmatmul.mubr.msk.f32.gmra.mrb[36].mxu0 %vm606_vm1, %v30052_v25 }
 0x6b0   : > { %v15163_v15 = vmax.f32 %v15131_v56, 0.0  ;;  %v15094_v44 = vmul.f32 %v29993_v33, %v15055_v54  ;;  %v23675_v36 = vpop.f32.mrb[44].mxu1  ;;  %v30068_v27 = vld [vmem:[#allocation4 + $0x51] sm:$0xff] }
 0x6b1   : > { %15197 = vst.msk [vmem:[#allocation4 + $0x81] sm:$0xff] %vm606_vm1, %v15164_v47  ;;  %v15134_v40 = vadd.f32 %v29999_v8, %v15095_v9  ;;  %v15058_v38 = vadd.f32 %v23675_v36, %v29988_v3  ;;  %v14875_v21 = vpop.f32.mrb[45].mxu1  ;;  %v30061_v10 = vld [vmem:[#allocation4 + $0x49] sm:$0xff] }
 0x6b2   : > { %15196 = vst.msk [vmem:[#allocation4 + $0x79] sm:$0xff] %vm606_vm1, %v15163_v15  ;;  %v15133_v35 = vadd.f32 %v29999_v8, %v15094_v44  ;;  %v15057_v59 = vadd.f32 %v29988_v3, %v14875_v21  ;;  %23714 = vmatprep.mubr.msk.f32.mxu0 %vm606_vm1, %v30061_v10 }
 0x6b3   : > { %v15166_v62 = vmax.f32 %v15134_v40, 0.0  ;;  %v15097_v14 = vmul.f32 %v29993_v33, %v15058_v38  ;;  %23715 = vmatmul.mubr.msk.f32.gmra.mrb[38].mxu0 %vm606_vm1, %v30068_v27 }
 0x6b4   : > { %v15165_v29 = vmax.f32 %v15133_v35, 0.0  ;;  %v15096_v43 = vmul.f32 %v29993_v33, %v15057_v59  ;;  %v23678_v20 = vpop.f32.mrb[46].mxu1  ;;  %v30084_v34 = vld [vmem:[#allocation4 + $0x69] sm:$0xff] }
 0x6b5   : > { %15199 = vst.msk [vmem:[#allocation4 + $0x99] sm:$0xff] %vm606_vm1, %v15166_v62  ;;  %v15136_v12 = vadd.f32 %v29999_v8, %v15097_v14  ;;  %v15060_v49 = vadd.f32 %v23678_v20, %v29988_v3  ;;  %v14885_v37 = vpop.f32.mrb[47].mxu1  ;;  %v30077_v4 = vld [vmem:[#allocation4 + $0x61] sm:$0xff] }
 0x6b6   : > { %15198 = vst.msk [vmem:[#allocation4 + $0x91] sm:$0xff] %vm606_vm1, %v15165_v29  ;;  %v15135_v6 = vadd.f32 %v29999_v8, %v15096_v43  ;;  %v15059_v48 = vadd.f32 %v29988_v3, %v14885_v37  ;;  %23717 = vmatprep.mubr.msk.f32.mxu0 %vm606_vm1, %v30077_v4 }
 0x6b7   : > { %v15168_v53 = vmax.f32 %v15136_v12, 0.0  ;;  %v15099_v41 = vmul.f32 %v29993_v33, %v15060_v49  ;;  %23718 = vmatmul.mubr.msk.f32.gmra.mrb[40].mxu0 %vm606_vm1, %v30084_v34 }
 0x6b8   : > { %v15167_v0 = vmax.f32 %v15135_v6, 0.0  ;;  %v15098_v2 = vmul.f32 %v29993_v33, %v15059_v48  ;;  %v23681_v42 = vpop.f32.mrb[48].mxu1  ;;  %v30100_v24 = vld [vmem:[#allocation4 + $0x81] sm:$0xff] }
 0x6b9   : > { %15201 = vst.msk [vmem:[#allocation4 + $0xb1] sm:$0xff] %vm606_vm1, %v15168_v53  ;;  %v15138_v5 = vadd.f32 %v29999_v8, %v15099_v41  ;;  %v15062_v16 = vadd.f32 %v23681_v42, %v29988_v3  ;;  %v14895_v61 = vpop.f32.mrb[49].mxu1  ;;  %v30093_v30 = vld [vmem:[#allocation4 + $0x79] sm:$0xff] }
 0x6ba   : > { %15200 = vst.msk [vmem:[#allocation4 + $0xa9] sm:$0xff] %vm606_vm1, %v15167_v0  ;;  %v15137_v58 = vadd.f32 %v29999_v8, %v15098_v2  ;;  %v15061_v19 = vadd.f32 %v29988_v3, %v14895_v61  ;;  %23720 = vmatprep.mubr.msk.f32.mxu0 %vm606_vm1, %v30093_v30 }
 0x6bb   : > { %v15170_v55 = vmax.f32 %v15138_v5, 0.0  ;;  %v15101_v7 = vmul.f32 %v29993_v33, %v15062_v16  ;;  %23721 = vmatmul.mubr.msk.f32.gmra.mrb[42].mxu0 %vm606_vm1, %v30100_v24 }
 0x6bc   : > { %v15169_v17 = vmax.f32 %v15137_v58, 0.0  ;;  %v15100_v22 = vmul.f32 %v29993_v33, %v15061_v19  ;;  %v23684_v26 = vpop.f32.mrb[50].mxu1  ;;  %v30116_v52 = vld [vmem:[#allocation4 + $0x99] sm:$0xff] }
 0x6bd   : > { %15203 = vst.msk [vmem:[#allocation4 + $0xc9] sm:$0xff] %vm606_vm1, %v15170_v55  ;;  %v15140_v13 = vadd.f32 %v29999_v8, %v15101_v7  ;;  %v15064_v60 = vadd.f32 %v23684_v26, %v29988_v3  ;;  %v14905_v18 = vpop.f32.mrb[51].mxu1  ;;  %v30109_v23 = vld [vmem:[#allocation4 + $0x91] sm:$0xff] }
 0x6be   : > { %15202 = vst.msk [vmem:[#allocation4 + $0xc1] sm:$0xff] %vm606_vm1, %v15169_v17  ;;  %v15139_v50 = vadd.f32 %v29999_v8, %v15100_v22  ;;  %v15063_v1 = vadd.f32 %v29988_v3, %v14905_v18  ;;  %23723 = vmatprep.mubr.msk.f32.mxu0 %vm606_vm1, %v30109_v23 }
 0x6bf   : > { %v15172_v11 = vmax.f32 %v15140_v13, 0.0  ;;  %v15103_v57 = vmul.f32 %v29993_v33, %v15064_v60  ;;  %23724 = vmatmul.mubr.msk.f32.gmra.mrb[44].mxu0 %vm606_vm1, %v30116_v52 }
 0x6c0   : > { %v15171_v31 = vmax.f32 %v15139_v50, 0.0  ;;  %v15102_v63 = vmul.f32 %v29993_v33, %v15063_v1  ;;  %v23687_v28 = vpop.f32.mrb[52].mxu1  ;;  %v30132_v44 = vld [vmem:[#allocation4 + $0xb1] sm:$0xff] }
 0x6c1   : > { %15205 = vst.msk [vmem:[#allocation4 + $0xe1] sm:$0xff] %vm606_vm1, %v15172_v11  ;;  %v15142_v51 = vadd.f32 %v29999_v8, %v15103_v57  ;;  %v15066_v56 = vadd.f32 %v23687_v28, %v29988_v3  ;;  %v14915_v54 = vpop.f32.mrb[53].mxu1  ;;  %v30125_v47 = vld [vmem:[#allocation4 + $0xa9] sm:$0xff] }
 0x6c2   : > { %15204 = vst.msk [vmem:[#allocation4 + $0xd9] sm:$0xff] %vm606_vm1, %v15171_v31  ;;  %v15141_v9 = vadd.f32 %v29999_v8, %v15102_v63  ;;  %v15065_v15 = vadd.f32 %v29988_v3, %v14915_v54  ;;  %23726 = vmatprep.mubr.msk.f32.mxu0 %vm606_vm1, %v30125_v47 }
 0x6c3   : > { %v15174_v36 = vmax.f32 %v15142_v51, 0.0  ;;  %v15105_v40 = vmul.f32 %v29993_v33, %v15066_v56  ;;  %23727 = vmatmul.mubr.msk.f32.gmra.mrb[46].mxu0 %vm606_vm1, %v30132_v44 }
 0x6c4   : > { %v15173_v38 = vmax.f32 %v15141_v9, 0.0  ;;  %v15104_v21 = vmul.f32 %v29993_v33, %v15065_v15  ;;  %v23690_v35 = vpop.f32.mrb[54].mxu1  ;;  %v30148_v12 = vld [vmem:[#allocation4 + $0xc9] sm:$0xff] }
 0x6c5   : > { %15207 = vst.msk [vmem:[#allocation4 + $0xf9] sm:$0xff] %vm606_vm1, %v15174_v36  ;;  %v15144_v59 = vadd.f32 %v29999_v8, %v15105_v40  ;;  %v15068_v62 = vadd.f32 %v23690_v35, %v29988_v3  ;;  %v14925_v14 = vpop.f32.mrb[55].mxu1  ;;  %v30141_v29 = vld [vmem:[#allocation4 + $0xc1] sm:$0xff] }
 0x6c6   : > { %15206 = vst.msk [vmem:[#allocation4 + $0xf1] sm:$0xff] %vm606_vm1, %v15173_v38  ;;  %v15143_v43 = vadd.f32 %v29999_v8, %v15104_v21  ;;  %v15067_v20 = vadd.f32 %v29988_v3, %v14925_v14  ;;  %23729 = vmatprep.mubr.msk.f32.mxu0 %vm606_vm1, %v30141_v29 }
 0x6c7   : > { %v15176_v49 = vmax.f32 %v15144_v59, 0.0  ;;  %v15107_v37 = vmul.f32 %v29993_v33, %v15068_v62  ;;  %23730 = vmatmul.mubr.msk.f32.gmra.mrb[48].mxu0 %vm606_vm1, %v30148_v12 }
 0x6c8   : > { %v15175_v6 = vmax.f32 %v15143_v43, 0.0  ;;  %v15106_v48 = vmul.f32 %v29993_v33, %v15067_v20  ;;  %v23693_v53 = vpop.f32.mrb[56].mxu1  ;;  %v30164_v61 = vld [vmem:[#allocation4 + $0xe1] sm:$0xff] }
 0x6c9   : > { %15209 = vst.msk [vmem:[#allocation4 + $0x111] sm:$0xff] %vm606_vm1, %v15176_v49  ;;  %v15146_v41 = vadd.f32 %v29999_v8, %v15107_v37  ;;  %v15070_v0 = vadd.f32 %v23693_v53, %v29988_v3  ;;  %v14935_v2 = vpop.f32.mrb[57].mxu1  ;;  %v30157_v42 = vld [vmem:[#allocation4 + $0xd9] sm:$0xff] }
 0x6ca   : > { %15208 = vst.msk [vmem:[#allocation4 + $0x109] sm:$0xff] %vm606_vm1, %v15175_v6  ;;  %v15145_v5 = vadd.f32 %v29999_v8, %v15106_v48  ;;  %v15069_v16 = vadd.f32 %v29988_v3, %v14935_v2  ;;  %23732 = vmatprep.mubr.msk.f32.mxu0 %vm606_vm1, %v30157_v42 }
 0x6cb   : > { %v15178_v58 = vmax.f32 %v15146_v41, 0.0  ;;  %v15109_v19 = vmul.f32 %v29993_v33, %v15070_v0  ;;  %23733 = vmatmul.mubr.msk.f32.gmra.mrb[50].mxu0 %vm606_vm1, %v30164_v61 }
 0x6cc   : > { %v15177_v55 = vmax.f32 %v15145_v5, 0.0  ;;  %v15108_v7 = vmul.f32 %v29993_v33, %v15069_v16  ;;  %v23696_v17 = vpop.f32.mrb[58].mxu1  ;;  %v30180_v1 = vld [vmem:[#allocation4 + $0xf9] sm:$0xff] }
 0x6cd   : > { %15211 = vst.msk [vmem:[#allocation4 + $0x129] sm:$0xff] %vm606_vm1, %v15178_v58  ;;  %v15148_v22 = vadd.f32 %v29999_v8, %v15109_v19  ;;  %v15072_v26 = vadd.f32 %v23696_v17, %v29988_v3  ;;  %v14945_v13 = vpop.f32.mrb[59].mxu1  ;;  %v30173_v60 = vld [vmem:[#allocation4 + $0xf1] sm:$0xff]  ;;  %v15220_v17 = vld [vmem:[#allocation4] sm:$0xff] }
 0x6ce   : > { %15210 = vst.msk [vmem:[#allocation4 + $0x121] sm:$0xff] %vm606_vm1, %v15177_v55  ;;  %v15147_v18 = vadd.f32 %v29999_v8, %v15108_v7  ;;  %v15071_v50 = vadd.f32 %v29988_v3, %v14945_v13  ;;  %23735 = vmatprep.mubr.msk.f32.mxu0 %vm606_vm1, %v30173_v60  ;;  %v30252_v13 = vld [vmem:[%s31031_s11 + $0xc] sm:$0xf] }
 0x6cf   : > { %v15180_v11 = vmax.f32 %v15148_v22, 0.0  ;;  %v15111_v57 = vmul.f32 %v29993_v33, %v15072_v26  ;;  %23736 = vmatmul.mubr.msk.f32.gmra.mrb[52].mxu0 %vm606_vm1, %v30180_v1  ;;  %v15221_v26 = vld [vmem:[#allocation4 + $0x8] sm:$0xff] }
 0x6d0   : > { %v15179_v31 = vmax.f32 %v15147_v18, 0.0  ;;  %v15110_v63 = vmul.f32 %v29993_v33, %v15071_v50  ;;  %v23699_v28 = vpop.f32.mrb[60].mxu1  ;;  %v30196_v40 = vld [vmem:[#allocation4 + $0x111] sm:$0xff]  ;;  %v30263_v50 = vld [vmem:[#allocation4 + $0x20] sm:$0xff] }
 0x6d1   : > { %15213 = vst.msk [vmem:[#allocation4 + $0x141] sm:$0xff] %vm606_vm1, %v15180_v11  ;;  %v15150_v51 = vadd.f32 %v29999_v8, %v15111_v57  ;;  %v15074_v56 = vadd.f32 %v23699_v28, %v29988_v3  ;;  %v14955_v54 = vpop.f32.mrb[61].mxu1  ;;  %v30189_v9 = vld [vmem:[#allocation4 + $0x109] sm:$0xff]  ;;  %v30255_v18 = vld [vmem:[#allocation4 + $0x18] sm:$0xff] }
 0x6d2   : > { %15212 = vst.msk [vmem:[#allocation4 + $0x139] sm:$0xff] %vm606_vm1, %v15179_v31  ;;  %v15149_v15 = vadd.f32 %v29999_v8, %v15110_v63  ;;  %v15073_v36 = vadd.f32 %v29988_v3, %v14955_v54  ;;  %23738 = vmatprep.mubr.msk.f32.mxu0 %vm606_vm1, %v30189_v9  ;;  %v30267_v11 = vld [vmem:[#allocation4 + $0x30] sm:$0xff]  ;;  %v30271_v57 = vld [vmem:[#allocation4 + $0x38] sm:$0xff]  ;;  %v30283_v63 = vld [vmem:[#allocation4 + $0x60] sm:$0xff] }
 0x6d3   : > { %v15182_v38 = vmax.f32 %v15150_v51, 0.0  ;;  %v15113_v21 = vmul.f32 %v29993_v33, %v15074_v56  ;;  %23739 = vmatmul.mubr.msk.f32.gmra.mrb[54].mxu0 %vm606_vm1, %v30196_v40  ;;  %v30279_v31 = vld [vmem:[#allocation4 + $0x50] sm:$0xff]  ;;  %v30287_v28 = vld [vmem:[#allocation4 + $0x68] sm:$0xff]  ;;  %v30291_v51 = vld [vmem:[#allocation4 + $0x78] sm:$0xff] }
 0x6d4   : > { %v15181_v35 = vmax.f32 %v15149_v15, 0.0  ;;  %v15112_v59 = vmul.f32 %v29993_v33, %v15073_v36  ;;  %v23702_v62 = vpop.f32.mrb[62].mxu1  ;;  %v30212_v48 = vld [vmem:[#allocation4 + $0x129] sm:$0xff]  ;;  %v30295_v56 = vld [vmem:[#allocation4 + $0x80] sm:$0xff]  ;;  %v30303_v15 = vld [vmem:[#allocation4 + $0x98] sm:$0xff] }
 0x6d5   : > { %15215 = vst.msk [vmem:[#allocation4 + $0x159] sm:$0xff] %vm606_vm1, %v15182_v38  ;;  %v15152_v14 = vadd.f32 %v29999_v8, %v15113_v21  ;;  %v15076_v43 = vadd.f32 %v23702_v62, %v29988_v3  ;;  %v14965_v20 = vpop.f32.mrb[63].mxu1  ;;  %v30205_v49 = vld [vmem:[#allocation4 + $0x121] sm:$0xff]  ;;  %v30299_v54 = vld [vmem:[#allocation4 + $0x90] sm:$0xff] }
 0x6d6   : > { %15214 = vst.msk [vmem:[#allocation4 + $0x151] sm:$0xff] %vm606_vm1, %v15181_v35  ;;  %v15151_v37 = vadd.f32 %v29999_v8, %v15112_v59  ;;  %v15075_v6 = vadd.f32 %v29988_v3, %v14965_v20  ;;  %23741 = vmatprep.mubr.msk.f32.mxu0 %vm606_vm1, %v30205_v49  ;;  %v30307_v36 = vld [vmem:[#allocation4 + $0xa8] sm:$0xff]  ;;  %v30311_v38 = vld [vmem:[#allocation4 + $0xb0] sm:$0xff]  ;;  %v30315_v21 = vld [vmem:[#allocation4 + $0xc0] sm:$0xff] }
 0x6d7   : > { %v15184_v53 = vmax.f32 %v15152_v14, 0.0  ;;  %v15115_v41 = vmul.f32 %v29993_v33, %v15076_v43  ;;  %23742 = vmatmul.mubr.msk.f32.gmra.mrb[56].mxu0 %vm606_vm1, %v30212_v48  ;;  %v30319_v35 = vld [vmem:[#allocation4 + $0xc8] sm:$0xff]  ;;  %v30323_v59 = vld [vmem:[#allocation4 + $0xd8] sm:$0xff]  ;;  %v30327_v62 = vld [vmem:[#allocation4 + $0xe0] sm:$0xff] }
 0x6d8   : > { %v15183_v0 = vmax.f32 %v15151_v37, 0.0  ;;  %v15114_v2 = vmul.f32 %v29993_v33, %v15075_v6  ;;  %v30226_v58 = vld [vmem:[#allocation4 + $0x141] sm:$0xff]  ;;  %v30331_v14 = vld [vmem:[#allocation4 + $0xf0] sm:$0xff]  ;;  %v30335_v43 = vld [vmem:[#allocation4 + $0xf8] sm:$0xff] }
 0x6d9   : > { %15217 = vst.msk [vmem:[#allocation4 + $0x171] sm:$0xff] %vm606_vm1, %v15184_v53  ;;  %v15154_v5 = vadd.f32 %v29999_v8, %v15115_v41  ;;  %v30220_v16 = vld [vmem:[#allocation4 + $0x139] sm:$0xff]  ;;  %v30339_v20 = vld [vmem:[#allocation4 + $0x108] sm:$0xff]  ;;  %v30343_v37 = vld [vmem:[#allocation4 + $0x110] sm:$0xff] }
 0x6da   : > { %15216 = vst.msk [vmem:[#allocation4 + $0x169] sm:$0xff] %vm606_vm1, %v15183_v0  ;;  %v15153_v3 = vadd.f32 %v29999_v8, %v15114_v2  ;;  %23744 = vmatprep.mubr.msk.f32.mxu0 %vm606_vm1, %v30220_v16  ;;  %v30347_v6 = vld [vmem:[#allocation4 + $0x120] sm:$0xff]  ;;  %v30351_v53 = vld [vmem:[#allocation4 + $0x128] sm:$0xff]  ;;  %v30355_v41 = vld [vmem:[#allocation4 + $0x138] sm:$0xff] }
 0x6db   : > { %v15186_v19 = vmax.f32 %v15154_v5, 0.0  ;;  %23745 = vmatmul.mubr.msk.f32.gmra.mrb[58].mxu0 %vm606_vm1, %v30226_v58  ;;  %v30359_v0 = vld [vmem:[#allocation4 + $0x140] sm:$0xff] }
 0x6dc   : > { %v15185_v33 = vmax.f32 %v15153_v3, 0.0  ;;  %v30236_v8 = vld [vmem:[#allocation4 + $0x159] sm:$0xff] }
 0x6dd   : > { %15219 = vst.msk [vmem:[#allocation4 + $0x189] sm:$0xff] %vm606_vm1, %v15186_v19  ;;  %v30231_v55 = vld [vmem:[#allocation4 + $0x151] sm:$0xff]  ;;  %v15935_v19 = vld [vmem:[#allocation4 + $0x2] sm:$0xff] }
 0x6de   : > { %15218 = vst.msk [vmem:[#allocation4 + $0x181] sm:$0xff] %vm606_vm1, %v15185_v33  ;;  %23747 = vmatprep.mubr.msk.f32.mxu0 %vm606_vm1, %v30231_v55  ;;  %v30363_v2 = vld [vmem:[#allocation4 + $0x150] sm:$0xff]  ;;  %v30367_v5 = vld [vmem:[#allocation4 + $0x158] sm:$0xff] }
 0x6df   : > { %23748 = vmatmul.mubr.msk.f32.gmra.mrb[60].mxu0 %vm606_vm1, %v30236_v8 }
 0x6e0   : > { %v30244_v22 = vld [vmem:[#allocation4 + $0x171] sm:$0xff] }
 0x6e1   : > { %v30240_v7 = vld [vmem:[#allocation4 + $0x169] sm:$0xff]  ;;  %31872 = vst [vmem:[#allocation52_spill] sm:$0xff] %v30244_v22 }
 0x6e2   : > { %31871 = vst [vmem:[#allocation14_spill] sm:$0xff] %v30240_v7  ;;  %23750 = vmatprep.mubr.msk.f32.mxu0 %vm606_vm1, %v30240_v7  ;;  %v30371_v3 = vld [vmem:[#allocation4 + $0x168] sm:$0xff]  ;;  %v30375_v33 = vld [vmem:[#allocation4 + $0x170] sm:$0xff] }
 0x6e3   : > { %23751 = vmatmul.mubr.msk.f32.gmra.mrb[62].mxu0 %vm606_vm1, %v30244_v22  ;;  %v30386_v22 = vld [vmem:[#allocation4 + $0x1a] sm:$0xff]  ;;  %v30398_v7 = vld [vmem:[#allocation4 + $0x32] sm:$0xff] }
 0x6e4   : > { %23755 = vmatprep.mubr.msk.f32.mxu0 %vm606_vm1, %v15220_v17  ;;  %v15936_v17 = vld [vmem:[#allocation4 + $0xa] sm:$0xff]  ;;  %31873 = vst [vmem:[#allocation16_spill] sm:$0xff] %v30386_v22  ;;  %31875 = vst [vmem:[#allocation19_spill] sm:$0xff] %v30398_v7 }
 0x6e7   : > { %23756 = vmatmul.mubr.msk.f32.vlgmr.msra.gmra.mrb[32].mxu0 %vm606_vm1, %v15221_v26  ;;  %v30383_v26 = vld [vmem:[%s31031_s11 + $0x10] sm:$0xf] }
 0x6e8   : > { %23804 = vmatpush3.msk.msra.mxu0 %vm999_vm0, %v29981_v32  ;;  %23758 = vmatprep.mubr.msk.f32.mxu0 %vm606_vm1, %v30255_v18  ;;  %v30275_v32 = vld [vmem:[#allocation4 + $0x48] sm:$0xff] }
 0x6e9   : > { %23853 = vmatprep.subr.msk.mxu0 %vm999_vm0, %v30252_v13 }
 0x6eb   : > { %23759 = vmatmul.mubr.msk.f32.gmra.mrb[34].mxu0 %vm606_vm1, %v30263_v50 }
 0x6ec   : > { %23761 = vmatprep.mubr.msk.f32.mxu0 %vm606_vm1, %v30267_v11 }
 0x6ef   : > { %23762 = vmatmul.mubr.msk.f32.gmra.mrb[36].mxu0 %vm606_vm1, %v30271_v57 }
 0x6f0   : > { %23764 = vmatprep.mubr.msk.f32.mxu0 %vm606_vm1, %v30275_v32 }
 0x6f3   : > { %23765 = vmatmul.mubr.msk.f32.gmra.mrb[38].mxu0 %vm606_vm1, %v30279_v31 }
 0x6f4   : > { %23767 = vmatprep.mubr.msk.f32.mxu0 %vm606_vm1, %v30283_v63 }
 0x6f7   : > { %23768 = vmatmul.mubr.msk.f32.gmra.mrb[40].mxu0 %vm606_vm1, %v30287_v28 }
 0x6f8   : > { %23770 = vmatprep.mubr.msk.f32.mxu0 %vm606_vm1, %v30291_v51 }
 0x6fb   : > { %23771 = vmatmul.mubr.msk.f32.gmra.mrb[42].mxu0 %vm606_vm1, %v30295_v56 }
 0x6fc   : > { %23773 = vmatprep.mubr.msk.f32.mxu0 %vm606_vm1, %v30299_v54 }
 0x6ff   : > { %23774 = vmatmul.mubr.msk.f32.gmra.mrb[44].mxu0 %vm606_vm1, %v30303_v15 }
 0x700   : > { %23776 = vmatprep.mubr.msk.f32.mxu0 %vm606_vm1, %v30307_v36 }
 0x703   : > { %23777 = vmatmul.mubr.msk.f32.gmra.mrb[46].mxu0 %vm606_vm1, %v30311_v38 }
 0x704   : > { %23779 = vmatprep.mubr.msk.f32.mxu0 %vm606_vm1, %v30315_v21 }
 0x707   : > { %23780 = vmatmul.mubr.msk.f32.gmra.mrb[48].mxu0 %vm606_vm1, %v30319_v35 }
 0x708   : > { %23782 = vmatprep.mubr.msk.f32.mxu0 %vm606_vm1, %v30323_v59 }
 0x70b   : > { %23783 = vmatmul.mubr.msk.f32.gmra.mrb[50].mxu0 %vm606_vm1, %v30327_v62 }
 0x70c   : > { %23785 = vmatprep.mubr.msk.f32.mxu0 %vm606_vm1, %v30331_v14 }
 0x70f   : > { %23786 = vmatmul.mubr.msk.f32.gmra.mrb[52].mxu0 %vm606_vm1, %v30335_v43 }
 0x710   : > { %23788 = vmatprep.mubr.msk.f32.mxu0 %vm606_vm1, %v30339_v20 }
 0x713   : > { %23789 = vmatmul.mubr.msk.f32.gmra.mrb[54].mxu0 %vm606_vm1, %v30343_v37 }
 0x714   : > { %23791 = vmatprep.mubr.msk.f32.mxu0 %vm606_vm1, %v30347_v6 }
 0x717   : > { %23792 = vmatmul.mubr.msk.f32.gmra.mrb[56].mxu0 %vm606_vm1, %v30351_v53 }
 0x718   : > { %23794 = vmatprep.mubr.msk.f32.mxu0 %vm606_vm1, %v30355_v41 }
 0x71b   : > { %23795 = vmatmul.mubr.msk.f32.gmra.mrb[58].mxu0 %vm606_vm1, %v30359_v0 }
 0x71c   : > { %23797 = vmatprep.mubr.msk.f32.mxu0 %vm606_vm1, %v30363_v2 }
 0x71f   : > { %23798 = vmatmul.mubr.msk.f32.gmra.mrb[60].mxu0 %vm606_vm1, %v30367_v5 }
 0x720   : > { %23800 = vmatprep.mubr.msk.f32.mxu0 %vm606_vm1, %v30371_v3 }
 0x723   : > { %23801 = vmatmul.mubr.msk.f32.gmra.mrb[62].mxu0 %vm606_vm1, %v30375_v33 }
 0x724   : > { %23805 = vmatprep.mubr.msk.f32.mxu0 %vm606_vm1, %v15935_v19  ;;  %v30394_v19 = vld [vmem:[#allocation4 + $0x22] sm:$0xff] }
 0x725   : > { %31874 = vst [vmem:[#allocation53_spill] sm:$0xff] %v30394_v19 }
 0x727   : > { %23806 = vmatmul.mubr.msk.f32.vlgmr.msra.gmra.mrb[32].mxu0 %vm606_vm1, %v15936_v17  ;;  %v30402_v17 = vld [vmem:[#allocation4 + $0x3a] sm:$0xff] }
 0x728   : > { %23854 = vmatpush3.msk.msra.mxu0 %vm999_vm0, %v30252_v13  ;;  %23808 = vmatprep.mubr.msk.f32.mxu0 %vm606_vm1, %v30386_v22  ;;  %31876 = vst [vmem:[#allocation40_spill] sm:$0xff] %v30402_v17  ;;  %v30406_v13 = vld [vmem:[#allocation4 + $0x4a] sm:$0xff]  ;;  %v30410_v22 = vld [vmem:[#allocation4 + $0x52] sm:$0xff] }
 0x729   : > { %23903 = vmatprep.subr.msk.mxu0 %vm999_vm0, %v30383_v26  ;;  %31877 = vst [vmem:[#allocation20_spill] sm:$0xff] %v30406_v13  ;;  %31878 = vst [vmem:[#allocation41_spill] sm:$0xff] %v30410_v22 }
 0x72b   : > { %23809 = vmatmul.mubr.msk.f32.gmra.mrb[34].mxu0 %vm606_vm1, %v30394_v19  ;;  %v30414_v19 = vld [vmem:[#allocation4 + $0x62] sm:$0xff] }
 0x72c   : > { %23811 = vmatprep.mubr.msk.f32.mxu0 %vm606_vm1, %v30398_v7  ;;  %31879 = vst [vmem:[#allocation21_spill] sm:$0xff] %v30414_v19  ;;  %v30418_v7 = vld [vmem:[#allocation4 + $0x6a] sm:$0xff] }
 0x72d   : > { %31880 = vst [vmem:[#allocation24_spill] sm:$0xff] %v30418_v7 }
 0x72f   : > { %23812 = vmatmul.mubr.msk.f32.gmra.mrb[36].mxu0 %vm606_vm1, %v30402_v17  ;;  %v30422_v17 = vld [vmem:[#allocation4 + $0x7a] sm:$0xff] }
 0x730   : > { %23814 = vmatprep.mubr.msk.f32.mxu0 %vm606_vm1, %v30406_v13  ;;  %31881 = vst [vmem:[#allocation28_spill] sm:$0xff] %v30422_v17  ;;  %v30426_v13 = vld [vmem:[#allocation4 + $0x82] sm:$0xff] }
 0x731   : > { %31882 = vst [vmem:[#allocation17_spill] sm:$0xff] %v30426_v13 }
 0x733   : > { %23815 = vmatmul.mubr.msk.f32.gmra.mrb[38].mxu0 %vm606_vm1, %v30410_v22  ;;  %v30430_v22 = vld [vmem:[#allocation4 + $0x92] sm:$0xff] }
 0x734   : > { %23817 = vmatprep.mubr.msk.f32.mxu0 %vm606_vm1, %v30414_v19  ;;  %31883 = vst [vmem:[#allocation29_spill] sm:$0xff] %v30430_v22  ;;  %v30434_v19 = vld [vmem:[#allocation4 + $0x9a] sm:$0xff] }
 0x735   : > { %31884 = vst [vmem:[#allocation18_spill] sm:$0xff] %v30434_v19 }
 0x737   : > { %23818 = vmatmul.mubr.msk.f32.gmra.mrb[40].mxu0 %vm606_vm1, %v30418_v7  ;;  %v30438_v7 = vld [vmem:[#allocation4 + $0xaa] sm:$0xff] }
 0x738   : > { %23820 = vmatprep.mubr.msk.f32.mxu0 %vm606_vm1, %v30422_v17  ;;  %31885 = vst [vmem:[#allocation35_spill] sm:$0xff] %v30438_v7  ;;  %v30442_v17 = vld [vmem:[#allocation4 + $0xb2] sm:$0xff] }
 0x739   : > { %31886 = vst [vmem:[#allocation36_spill] sm:$0xff] %v30442_v17 }
 0x73b   : > { %23821 = vmatmul.mubr.msk.f32.gmra.mrb[42].mxu0 %vm606_vm1, %v30426_v13  ;;  %v30446_v13 = vld [vmem:[#allocation4 + $0xc2] sm:$0xff] }
 0x73c   : > { %23823 = vmatprep.mubr.msk.f32.mxu0 %vm606_vm1, %v30430_v22  ;;  %31887 = vst [vmem:[#allocation44_spill] sm:$0xff] %v30446_v13  ;;  %v30450_v22 = vld [vmem:[#allocation4 + $0xca] sm:$0xff] }
 0x73d   : > { %31888 = vst [vmem:[#allocation22_spill] sm:$0xff] %v30450_v22 }
 0x73f   : > { %23824 = vmatmul.mubr.msk.f32.gmra.mrb[44].mxu0 %vm606_vm1, %v30434_v19  ;;  %v30454_v19 = vld [vmem:[#allocation4 + $0xda] sm:$0xff] }
 0x740   : > { %23826 = vmatprep.mubr.msk.f32.mxu0 %vm606_vm1, %v30438_v7  ;;  %31889 = vst [vmem:[#allocation45_spill] sm:$0xff] %v30454_v19  ;;  %v30458_v7 = vld [vmem:[#allocation4 + $0xe2] sm:$0xff] }
 0x741   : > { %31890 = vst [vmem:[#allocation23_spill] sm:$0xff] %v30458_v7 }
 0x743   : > { %23827 = vmatmul.mubr.msk.f32.gmra.mrb[46].mxu0 %vm606_vm1, %v30442_v17  ;;  %v30462_v17 = vld [vmem:[#allocation4 + $0xf2] sm:$0xff] }
 0x744   : > { %23829 = vmatprep.mubr.msk.f32.mxu0 %vm606_vm1, %v30446_v13  ;;  %31891 = vst [vmem:[#allocation26_spill] sm:$0xff] %v30462_v17  ;;  %v30466_v13 = vld [vmem:[#allocation4 + $0xfa] sm:$0xff] }
 0x745   : > { %31892 = vst [vmem:[#allocation38_spill] sm:$0xff] %v30466_v13 }
 0x747   : > { %23830 = vmatmul.mubr.msk.f32.gmra.mrb[48].mxu0 %vm606_vm1, %v30450_v22  ;;  %v30470_v22 = vld [vmem:[#allocation4 + $0x10a] sm:$0xff] }
 0x748   : > { %23832 = vmatprep.mubr.msk.f32.mxu0 %vm606_vm1, %v30454_v19  ;;  %31893 = vst [vmem:[#allocation27_spill] sm:$0xff] %v30470_v22  ;;  %v30474_v19 = vld [vmem:[#allocation4 + $0x112] sm:$0xff] }
 0x749   : > { %31894 = vst [vmem:[#allocation50_spill] sm:$0xff] %v30474_v19 }
 0x74b   : > { %23833 = vmatmul.mubr.msk.f32.gmra.mrb[50].mxu0 %vm606_vm1, %v30458_v7  ;;  %v30478_v7 = vld [vmem:[#allocation4 + $0x122] sm:$0xff] }
 0x74c   : > { %23835 = vmatprep.mubr.msk.f32.mxu0 %vm606_vm1, %v30462_v17  ;;  %31895 = vst [vmem:[#allocation30_spill] sm:$0xff] %v30478_v7  ;;  %v30482_v17 = vld [vmem:[#allocation4 + $0x12a] sm:$0xff] }
 0x74d   : > { %31896 = vst [vmem:[#allocation51_spill] sm:$0xff] %v30482_v17 }
 0x74f   : > { %23836 = vmatmul.mubr.msk.f32.gmra.mrb[52].mxu0 %vm606_vm1, %v30466_v13  ;;  %v30486_v13 = vld [vmem:[#allocation4 + $0x13a] sm:$0xff] }
 0x750   : > { %23838 = vmatprep.mubr.msk.f32.mxu0 %vm606_vm1, %v30470_v22  ;;  %31897 = vst [vmem:[#allocation37_spill] sm:$0xff] %v30486_v13  ;;  %v30490_v22 = vld [vmem:[#allocation4 + $0x142] sm:$0xff] }
 0x753   : > { %23839 = vmatmul.mubr.msk.f32.gmra.mrb[54].mxu0 %vm606_vm1, %v30474_v19  ;;  %v30494_v19 = vld [vmem:[#allocation4 + $0x152] sm:$0xff] }
 0x754   : > { %23841 = vmatprep.mubr.msk.f32.mxu0 %vm606_vm1, %v30478_v7  ;;  %31898 = vst [vmem:[#allocation39_spill] sm:$0xff] %v30494_v19  ;;  %v30498_v7 = vld [vmem:[#allocation4 + $0x15a] sm:$0xff] }
 0x757   : > { %23842 = vmatmul.mubr.msk.f32.gmra.mrb[56].mxu0 %vm606_vm1, %v30482_v17  ;;  %v30502_v17 = vld [vmem:[#allocation4 + $0x16a] sm:$0xff] }
 0x758   : > { %23844 = vmatprep.mubr.msk.f32.mxu0 %vm606_vm1, %v30486_v13  ;;  %31899 = vst [vmem:[#allocation34_spill] sm:$0xff] %v30502_v17  ;;  %v30506_v13 = vld [vmem:[#allocation4 + $0x172] sm:$0xff] }
 0x75b   : > { %23845 = vmatmul.mubr.msk.f32.gmra.mrb[58].mxu0 %vm606_vm1, %v30490_v22 }
 0x75c   : > { %23847 = vmatprep.mubr.msk.f32.mxu0 %vm606_vm1, %v30494_v19  ;;  %v20276_v19 = vld [vmem:[%s31031_s11 + $0x14] sm:$0xf] }
 0x75f   : > { %23848 = vmatmul.mubr.msk.f32.gmra.mrb[60].mxu0 %vm606_vm1, %v30498_v7 }
 0x760   : > { %23850 = vmatprep.mubr.msk.f32.mxu0 %vm606_vm1, %v30502_v17 }
 0x763   : > { %23851 = vmatmul.mubr.msk.f32.gmra.mrb[62].mxu0 %vm606_vm1, %v30506_v13 }
 0x764   : > { %23855 = vmatprep.mubr.msk.f32.mxu0 %vm606_vm1, %v30255_v18  ;;  %v30576_v18 = vld [vmem:[#allocation4 + $0x180] sm:$0xff] }
 0x767   : > { %23856 = vmatmul.mubr.msk.f32.vlgmr.msra.gmra.mrb[32].mxu0 %vm606_vm1, %v30263_v50  ;;  %v30580_v50 = vld [vmem:[#allocation4 + $0x188] sm:$0xff] }
 0x768   : > { %23904 = vmatpush3.msk.msra.mxu0 %vm999_vm0, %v30383_v26  ;;  %23858 = vmatprep.mubr.msk.f32.mxu0 %vm606_vm1, %v30267_v11  ;;  %v20310_v26 = vld [vmem:[%s31031_s11 + $0x18] sm:$0xf] }
 0x769   : > { %23953 = vmatprep.subr.msk.mxu0 %vm999_vm0, %v20276_v19 }
 0x76b   : > { %23859 = vmatmul.mubr.msk.f32.gmra.mrb[34].mxu0 %vm606_vm1, %v30271_v57 }
 0x76c   : > { %23861 = vmatprep.mubr.msk.f32.mxu0 %vm606_vm1, %v30275_v32 }
 0x76f   : > { %23862 = vmatmul.mubr.msk.f32.gmra.mrb[36].mxu0 %vm606_vm1, %v30279_v31 }
 0x770   : > { %23864 = vmatprep.mubr.msk.f32.mxu0 %vm606_vm1, %v30283_v63 }
 0x773   : > { %23865 = vmatmul.mubr.msk.f32.gmra.mrb[38].mxu0 %vm606_vm1, %v30287_v28 }
 0x774   : > { %23867 = vmatprep.mubr.msk.f32.mxu0 %vm606_vm1, %v30291_v51 }
 0x777   : > { %23868 = vmatmul.mubr.msk.f32.gmra.mrb[40].mxu0 %vm606_vm1, %v30295_v56 }
 0x778   : > { %23870 = vmatprep.mubr.msk.f32.mxu0 %vm606_vm1, %v30299_v54 }
 0x77b   : > { %23871 = vmatmul.mubr.msk.f32.gmra.mrb[42].mxu0 %vm606_vm1, %v30303_v15 }
 0x77c   : > { %23873 = vmatprep.mubr.msk.f32.mxu0 %vm606_vm1, %v30307_v36 }
 0x77f   : > { %23874 = vmatmul.mubr.msk.f32.gmra.mrb[44].mxu0 %vm606_vm1, %v30311_v38 }
 0x780   : > { %23876 = vmatprep.mubr.msk.f32.mxu0 %vm606_vm1, %v30315_v21 }
 0x783   : > { %23877 = vmatmul.mubr.msk.f32.gmra.mrb[46].mxu0 %vm606_vm1, %v30319_v35 }
 0x784   : > { %23879 = vmatprep.mubr.msk.f32.mxu0 %vm606_vm1, %v30323_v59 }
 0x787   : > { %23880 = vmatmul.mubr.msk.f32.gmra.mrb[48].mxu0 %vm606_vm1, %v30327_v62 }
 0x788   : > { %23882 = vmatprep.mubr.msk.f32.mxu0 %vm606_vm1, %v30331_v14 }
 0x78b   : > { %23883 = vmatmul.mubr.msk.f32.gmra.mrb[50].mxu0 %vm606_vm1, %v30335_v43 }
 0x78c   : > { %23885 = vmatprep.mubr.msk.f32.mxu0 %vm606_vm1, %v30339_v20 }
 0x78f   : > { %23886 = vmatmul.mubr.msk.f32.gmra.mrb[52].mxu0 %vm606_vm1, %v30343_v37 }
 0x790   : > { %23888 = vmatprep.mubr.msk.f32.mxu0 %vm606_vm1, %v30347_v6 }
 0x793   : > { %23889 = vmatmul.mubr.msk.f32.gmra.mrb[54].mxu0 %vm606_vm1, %v30351_v53 }
 0x794   : > { %23891 = vmatprep.mubr.msk.f32.mxu0 %vm606_vm1, %v30355_v41 }
 0x797   : > { %23892 = vmatmul.mubr.msk.f32.gmra.mrb[56].mxu0 %vm606_vm1, %v30359_v0 }
 0x798   : > { %23894 = vmatprep.mubr.msk.f32.mxu0 %vm606_vm1, %v30363_v2 }
 0x79b   : > { %23895 = vmatmul.mubr.msk.f32.gmra.mrb[58].mxu0 %vm606_vm1, %v30367_v5 }
 0x79c   : > { %23897 = vmatprep.mubr.msk.f32.mxu0 %vm606_vm1, %v30371_v3 }
 0x79f   : > { %23898 = vmatmul.mubr.msk.f32.gmra.mrb[60].mxu0 %vm606_vm1, %v30375_v33 }
 0x7a0   : > { %23900 = vmatprep.mubr.msk.f32.mxu0 %vm606_vm1, %v30576_v18 }
 0x7a3   : > { %23901 = vmatmul.mubr.msk.f32.gmra.mrb[62].mxu0 %vm606_vm1, %v30580_v50 }
 0x7a4   : > { %23905 = vmatprep.mubr.msk.f32.mxu0 %vm606_vm1, %v30029_v39  ;;  %v31900_v39 = vld [vmem:[#allocation14_spill] sm:$0xff] }
 0x7a7   : > { %23906 = vmatmul.mubr.msk.f32.vlgmr.msra.gmra.mrb[32].mxu0 %vm606_vm1, %v30036_v45  ;;  %v31901_v45 = vld [vmem:[#allocation52_spill] sm:$0xff] }
 0x7a8   : > { %23954 = vmatpush3.msk.msra.mxu0 %vm999_vm0, %v20276_v19  ;;  %23908 = vmatprep.mubr.msk.f32.mxu0 %vm606_vm1, %v30045_v46  ;;  %v30649_v46 = vld [vmem:[#allocation4 + $0x181] sm:$0xff] }
 0x7a9   : > { %24003 = vmatprep.subr.msk.mxu0 %vm999_vm0, %v20310_v26  ;;  %v31911_v19 = vld [vmem:[#allocation17_spill] sm:$0xff] }
 0x7ab   : > { %23909 = vmatmul.mubr.msk.f32.gmra.mrb[34].mxu0 %vm606_vm1, %v30052_v25  ;;  %v30653_v25 = vld [vmem:[#allocation4 + $0x189] sm:$0xff] }
 0x7ac   : > { %23911 = vmatprep.mubr.msk.f32.mxu0 %vm606_vm1, %v30061_v10  ;;  %v31902_v10 = vld [vmem:[#allocation16_spill] sm:$0xff] }
 0x7af   : > { %23912 = vmatmul.mubr.msk.f32.gmra.mrb[36].mxu0 %vm606_vm1, %v30068_v27  ;;  %v20344_v27 = vld [vmem:[%s31031_s11 + $0x1c] sm:$0xf] }
 0x7b0   : > { %23914 = vmatprep.mubr.msk.f32.mxu0 %vm606_vm1, %v30077_v4  ;;  %v31903_v4 = vld [vmem:[#allocation53_spill] sm:$0xff] }
 0x7b3   : > { %23915 = vmatmul.mubr.msk.f32.gmra.mrb[38].mxu0 %vm606_vm1, %v30084_v34  ;;  %v31904_v34 = vld [vmem:[#allocation19_spill] sm:$0xff] }
 0x7b4   : > { %23917 = vmatprep.mubr.msk.f32.mxu0 %vm606_vm1, %v30093_v30  ;;  %v31905_v30 = vld [vmem:[#allocation40_spill] sm:$0xff] }
 0x7b7   : > { %23918 = vmatmul.mubr.msk.f32.gmra.mrb[40].mxu0 %vm606_vm1, %v30100_v24  ;;  %v31906_v24 = vld [vmem:[#allocation20_spill] sm:$0xff] }
 0x7b8   : > { %23920 = vmatprep.mubr.msk.f32.mxu0 %vm606_vm1, %v30109_v23  ;;  %v31907_v23 = vld [vmem:[#allocation41_spill] sm:$0xff] }
 0x7bb   : > { %23921 = vmatmul.mubr.msk.f32.gmra.mrb[42].mxu0 %vm606_vm1, %v30116_v52  ;;  %v31908_v52 = vld [vmem:[#allocation21_spill] sm:$0xff] }
 0x7bc   : > { %23923 = vmatprep.mubr.msk.f32.mxu0 %vm606_vm1, %v30125_v47  ;;  %v31909_v47 = vld [vmem:[#allocation24_spill] sm:$0xff] }
 0x7bf   : > { %23924 = vmatmul.mubr.msk.f32.gmra.mrb[44].mxu0 %vm606_vm1, %v30132_v44  ;;  %v31910_v44 = vld [vmem:[#allocation28_spill] sm:$0xff] }
 0x7c0   : > { %23926 = vmatprep.mubr.msk.f32.mxu0 %vm606_vm1, %v30141_v29 }
 0x7c3   : > { %23927 = vmatmul.mubr.msk.f32.gmra.mrb[46].mxu0 %vm606_vm1, %v30148_v12 }
 0x7c4   : > { %23929 = vmatprep.mubr.msk.f32.mxu0 %vm606_vm1, %v30157_v42 }
 0x7c7   : > { %23930 = vmatmul.mubr.msk.f32.gmra.mrb[48].mxu0 %vm606_vm1, %v30164_v61 }
 0x7c8   : > { %23932 = vmatprep.mubr.msk.f32.mxu0 %vm606_vm1, %v30173_v60 }
 0x7cb   : > { %23933 = vmatmul.mubr.msk.f32.gmra.mrb[50].mxu0 %vm606_vm1, %v30180_v1 }
 0x7cc   : > { %23935 = vmatprep.mubr.msk.f32.mxu0 %vm606_vm1, %v30189_v9 }
 0x7cf   : > { %23936 = vmatmul.mubr.msk.f32.gmra.mrb[52].mxu0 %vm606_vm1, %v30196_v40 }
 0x7d0   : > { %23938 = vmatprep.mubr.msk.f32.mxu0 %vm606_vm1, %v30205_v49 }
 0x7d3   : > { %23939 = vmatmul.mubr.msk.f32.gmra.mrb[54].mxu0 %vm606_vm1, %v30212_v48 }
 0x7d4   : > { %23941 = vmatprep.mubr.msk.f32.mxu0 %vm606_vm1, %v30220_v16 }
 0x7d7   : > { %23942 = vmatmul.mubr.msk.f32.gmra.mrb[56].mxu0 %vm606_vm1, %v30226_v58 }
 0x7d8   : > { %23944 = vmatprep.mubr.msk.f32.mxu0 %vm606_vm1, %v30231_v55 }
 0x7db   : > { %23945 = vmatmul.mubr.msk.f32.gmra.mrb[58].mxu0 %vm606_vm1, %v30236_v8 }
 0x7dc   : > { %23947 = vmatprep.mubr.msk.f32.mxu0 %vm606_vm1, %v31900_v39 }
 0x7df   : > { %23948 = vmatmul.mubr.msk.f32.gmra.mrb[60].mxu0 %vm606_vm1, %v31901_v45 }
 0x7e0   : > { %23950 = vmatprep.mubr.msk.f32.mxu0 %vm606_vm1, %v30649_v46 }
 0x7e3   : > { %23951 = vmatmul.mubr.msk.f32.gmra.mrb[62].mxu0 %vm606_vm1, %v30653_v25 }
 0x7e4   : > { %23955 = vmatprep.mubr.msk.f32.mxu0 %vm606_vm1, %v31902_v10  ;;  %v31913_v10 = vld [vmem:[#allocation18_spill] sm:$0xff] }
 0x7e7   : > { %23956 = vmatmul.mubr.msk.f32.vlgmr.msra.gmra.mrb[32].mxu0 %vm606_vm1, %v31903_v4  ;;  %v31914_v4 = vld [vmem:[#allocation35_spill] sm:$0xff] }
 0x7e8   : > { %24004 = vmatpush3.msk.msra.mxu0 %vm999_vm0, %v20310_v26  ;;  %23958 = vmatprep.mubr.msk.f32.mxu0 %vm606_vm1, %v31904_v34  ;;  %v31912_v26 = vld [vmem:[#allocation29_spill] sm:$0xff] }
 0x7e9   : > { %24053 = vmatprep.subr.msk.mxu0 %vm999_vm0, %v20344_v27 }
 0x7eb   : > { %23959 = vmatmul.mubr.msk.f32.gmra.mrb[34].mxu0 %vm606_vm1, %v31905_v30 }
 0x7ec   : > { %23961 = vmatprep.mubr.msk.f32.mxu0 %vm606_vm1, %v31906_v24 }
 0x7ef   : > { %23962 = vmatmul.mubr.msk.f32.gmra.mrb[36].mxu0 %vm606_vm1, %v31907_v23  ;;  %v31915_v23 = vld [vmem:[#allocation36_spill] sm:$0xff] }
 0x7f0   : > { %23964 = vmatprep.mubr.msk.f32.mxu0 %vm606_vm1, %v31908_v52  ;;  %v31916_v52 = vld [vmem:[#allocation44_spill] sm:$0xff] }
 0x7f3   : > { %23965 = vmatmul.mubr.msk.f32.gmra.mrb[38].mxu0 %vm606_vm1, %v31909_v47  ;;  %v31917_v47 = vld [vmem:[#allocation22_spill] sm:$0xff] }
 0x7f4   : > { %23967 = vmatprep.mubr.msk.f32.mxu0 %vm606_vm1, %v31910_v44  ;;  %v31918_v44 = vld [vmem:[#allocation45_spill] sm:$0xff] }
 0x7f7   : > { %23968 = vmatmul.mubr.msk.f32.gmra.mrb[40].mxu0 %vm606_vm1, %v31911_v19  ;;  %v31919_v19 = vld [vmem:[#allocation23_spill] sm:$0xff] }
 0x7f8   : > { %23970 = vmatprep.mubr.msk.f32.mxu0 %vm606_vm1, %v31912_v26  ;;  %v31920_v26 = vld [vmem:[#allocation26_spill] sm:$0xff] }
 0x7fb   : > { %23971 = vmatmul.mubr.msk.f32.gmra.mrb[42].mxu0 %vm606_vm1, %v31913_v10  ;;  %v31921_v10 = vld [vmem:[#allocation38_spill] sm:$0xff] }
 0x7fc   : > { %23973 = vmatprep.mubr.msk.f32.mxu0 %vm606_vm1, %v31914_v4  ;;  %v31922_v4 = vld [vmem:[#allocation27_spill] sm:$0xff] }
 0x7ff   : > { %23974 = vmatmul.mubr.msk.f32.gmra.mrb[44].mxu0 %vm606_vm1, %v31915_v23  ;;  %v31923_v23 = vld [vmem:[#allocation50_spill] sm:$0xff] }
 0x800   : > { %23976 = vmatprep.mubr.msk.f32.mxu0 %vm606_vm1, %v31916_v52  ;;  %v31924_v52 = vld [vmem:[#allocation30_spill] sm:$0xff] }
 0x803   : > { %23977 = vmatmul.mubr.msk.f32.gmra.mrb[46].mxu0 %vm606_vm1, %v31917_v47  ;;  %v31925_v47 = vld [vmem:[#allocation51_spill] sm:$0xff] }
 0x804   : > { %23979 = vmatprep.mubr.msk.f32.mxu0 %vm606_vm1, %v31918_v44  ;;  %v31926_v44 = vld [vmem:[#allocation37_spill] sm:$0xff] }
 0x807   : > { %23980 = vmatmul.mubr.msk.f32.gmra.mrb[48].mxu0 %vm606_vm1, %v31919_v19 }
 0x808   : > { %23982 = vmatprep.mubr.msk.f32.mxu0 %vm606_vm1, %v31920_v26  ;;  %v31927_v26 = vld [vmem:[#allocation39_spill] sm:$0xff] }
 0x80b   : > { %23983 = vmatmul.mubr.msk.f32.gmra.mrb[50].mxu0 %vm606_vm1, %v31921_v10 }
 0x80c   : > { %23985 = vmatprep.mubr.msk.f32.mxu0 %vm606_vm1, %v31922_v4 }
 0x80f   : > { %23986 = vmatmul.mubr.msk.f32.gmra.mrb[52].mxu0 %vm606_vm1, %v31923_v23 }
 0x810   : > { %23988 = vmatprep.mubr.msk.f32.mxu0 %vm606_vm1, %v31924_v52  ;;  %v30722_v52 = vld [vmem:[#allocation4 + $0x182] sm:$0xff] }
 0x813   : > { %23989 = vmatmul.mubr.msk.f32.gmra.mrb[54].mxu0 %vm606_vm1, %v31925_v47 }
 0x814   : > { %23991 = vmatprep.mubr.msk.f32.mxu0 %vm606_vm1, %v31926_v44  ;;  %v30726_v44 = vld [vmem:[#allocation4 + $0x18a] sm:$0xff] }
 0x817   : > { %23992 = vmatmul.mubr.msk.f32.gmra.mrb[56].mxu0 %vm606_vm1, %v30490_v22 }
 0x818   : > { %23994 = vmatprep.mubr.msk.f32.mxu0 %vm606_vm1, %v31927_v26 }
 0x81b   : > { %23995 = vmatmul.mubr.msk.f32.gmra.mrb[58].mxu0 %vm606_vm1, %v30498_v7 }
 0x81c   : > { %23997 = vmatprep.mubr.msk.f32.mxu0 %vm606_vm1, %v30502_v17  ;;  %v20378_v17 = vld [vmem:[%s31031_s11 + $0x20] sm:$0xf] }
 0x81f   : > { %23998 = vmatmul.mubr.msk.f32.gmra.mrb[60].mxu0 %vm606_vm1, %v30506_v13 }
 0x820   : > { %24000 = vmatprep.mubr.msk.f32.mxu0 %vm606_vm1, %v30722_v52 }
 0x823   : > { %24001 = vmatmul.mubr.msk.f32.gmra.mrb[62].mxu0 %vm606_vm1, %v30726_v44 }
 0x824   : > { %24005 = vmatprep.mubr.msk.f32.mxu0 %vm606_vm1, %v30267_v11  ;;  %v17526_v11 = vld [vmem:[#allocation4 + $0x198] sm:$0xff] }
 0x827   : > { %24006 = vmatmul.mubr.msk.f32.vlgmr.msra.gmra.mrb[32].mxu0 %vm606_vm1, %v30271_v57  ;;  %v17527_v57 = vld [vmem:[#allocation4 + $0x1a0] sm:$0xff] }
 0x828   : > { %24054 = vmatpush3.msk.msra.mxu0 %vm999_vm0, %v20344_v27  ;;  %24008 = vmatprep.mubr.msk.f32.mxu0 %vm606_vm1, %v30275_v32  ;;  %v17886_v32 = vld [vmem:[#allocation4 + $0x31] sm:$0xff] }
 0x829   : > { %24103 = vmatprep.subr.msk.mxu0 %vm999_vm0, %v20378_v17 }
 0x82b   : > { %24009 = vmatmul.mubr.msk.f32.gmra.mrb[34].mxu0 %vm606_vm1, %v30279_v31  ;;  %v17887_v31 = vld [vmem:[#allocation4 + $0x39] sm:$0xff] }
 0x82c   : > { %24011 = vmatprep.mubr.msk.f32.mxu0 %vm606_vm1, %v30283_v63  ;;  %v17888_v63 = vld [vmem:[#allocation4 + $0x49] sm:$0xff] }
 0x82f   : > { %24012 = vmatmul.mubr.msk.f32.gmra.mrb[36].mxu0 %vm606_vm1, %v30287_v28  ;;  %v17889_v28 = vld [vmem:[#allocation4 + $0x51] sm:$0xff] }
 0x830   : > { %24014 = vmatprep.mubr.msk.f32.mxu0 %vm606_vm1, %v30291_v51  ;;  %v17890_v51 = vld [vmem:[#allocation4 + $0x61] sm:$0xff] }
 0x833   : > { %24015 = vmatmul.mubr.msk.f32.gmra.mrb[38].mxu0 %vm606_vm1, %v30295_v56  ;;  %v17891_v56 = vld [vmem:[#allocation4 + $0x69] sm:$0xff] }
 0x834   : > { %24017 = vmatprep.mubr.msk.f32.mxu0 %vm606_vm1, %v30299_v54  ;;  %v17892_v54 = vld [vmem:[#allocation4 + $0x79] sm:$0xff] }
 0x837   : > { %24018 = vmatmul.mubr.msk.f32.gmra.mrb[40].mxu0 %vm606_vm1, %v30303_v15  ;;  %v17893_v15 = vld [vmem:[#allocation4 + $0x81] sm:$0xff] }
 0x838   : > { %24020 = vmatprep.mubr.msk.f32.mxu0 %vm606_vm1, %v30307_v36  ;;  %v17894_v36 = vld [vmem:[#allocation4 + $0x91] sm:$0xff] }
 0x83b   : > { %24021 = vmatmul.mubr.msk.f32.gmra.mrb[42].mxu0 %vm606_vm1, %v30311_v38  ;;  %v17895_v38 = vld [vmem:[#allocation4 + $0x99] sm:$0xff] }
 0x83c   : > { %24023 = vmatprep.mubr.msk.f32.mxu0 %vm606_vm1, %v30315_v21  ;;  %v17896_v21 = vld [vmem:[#allocation4 + $0xa9] sm:$0xff] }
 0x83f   : > { %24024 = vmatmul.mubr.msk.f32.gmra.mrb[44].mxu0 %vm606_vm1, %v30319_v35  ;;  %v17897_v35 = vld [vmem:[#allocation4 + $0xb1] sm:$0xff] }
 0x840   : > { %24026 = vmatprep.mubr.msk.f32.mxu0 %vm606_vm1, %v30323_v59  ;;  %v31940_v59 = vld [vmem:[#allocation26_spill] sm:$0xff] }
 0x843   : > { %24027 = vmatmul.mubr.msk.f32.gmra.mrb[46].mxu0 %vm606_vm1, %v30327_v62  ;;  %v31941_v62 = vld [vmem:[#allocation30_spill] sm:$0xff] }
 0x844   : > { %24029 = vmatprep.mubr.msk.f32.mxu0 %vm606_vm1, %v30331_v14  ;;  %v31942_v14 = vld [vmem:[#allocation37_spill] sm:$0xff] }
 0x847   : > { %24030 = vmatmul.mubr.msk.f32.gmra.mrb[48].mxu0 %vm606_vm1, %v30335_v43  ;;  %v31943_v43 = vld [vmem:[#allocation34_spill] sm:$0xff] }
 0x848   : > { %24032 = vmatprep.mubr.msk.f32.mxu0 %vm606_vm1, %v30339_v20  ;;  %v18306_v20 = vld [vmem:[#allocation4 + $0x19a] sm:$0xff] }
 0x84b   : > { %24033 = vmatmul.mubr.msk.f32.gmra.mrb[50].mxu0 %vm606_vm1, %v30343_v37 }
 0x84c   : > { %24035 = vmatprep.mubr.msk.f32.mxu0 %vm606_vm1, %v30347_v6 }
 0x84f   : > { %24036 = vmatmul.mubr.msk.f32.gmra.mrb[52].mxu0 %vm606_vm1, %v30351_v53 }
 0x850   : > { %24038 = vmatprep.mubr.msk.f32.mxu0 %vm606_vm1, %v30355_v41  ;;  %v18706_v41 = vld [vmem:[#allocation5 + $0x8] sm:$0xff] }
 0x853   : > { %24039 = vmatmul.mubr.msk.f32.gmra.mrb[54].mxu0 %vm606_vm1, %v30359_v0 }
 0x854   : > { %24041 = vmatprep.mubr.msk.f32.mxu0 %vm606_vm1, %v30363_v2 }
 0x857   : > { %24042 = vmatmul.mubr.msk.f32.gmra.mrb[56].mxu0 %vm606_vm1, %v30367_v5  ;;  %v18705_v5 = vld [vmem:[#allocation5] sm:$0xff] }
 0x858   : > { %24044 = vmatprep.mubr.msk.f32.mxu0 %vm606_vm1, %v30371_v3 }
 0x85b   : > { %24045 = vmatmul.mubr.msk.f32.gmra.mrb[58].mxu0 %vm606_vm1, %v30375_v33 }
 0x85c   : > { %24047 = vmatprep.mubr.msk.f32.mxu0 %vm606_vm1, %v30576_v18  ;;  %v18708_v18 = vld [vmem:[#allocation5 + $0x18] sm:$0xff] }
 0x85f   : > { %24048 = vmatmul.mubr.msk.f32.gmra.mrb[60].mxu0 %vm606_vm1, %v30580_v50 }
 0x860   : > { %24050 = vmatprep.mubr.msk.f32.mxu0 %vm606_vm1, %v17526_v11 }
 0x863   : > { %24051 = vmatmul.mubr.msk.f32.gmra.mrb[62].mxu0 %vm606_vm1, %v17527_v57  ;;  %v18711_v57 = vld [vmem:[#allocation5 + $0x30] sm:$0xff] }
 0x864   : > { %24055 = vmatprep.mubr.msk.f32.mxu0 %vm606_vm1, %v17886_v32 }
 0x867   : > { %24056 = vmatmul.mubr.msk.f32.vlgmr.msra.gmra.mrb[32].mxu0 %vm606_vm1, %v17887_v31 }
 0x868   : > { %24104 = vmatpush3.msk.msra.mxu0 %vm999_vm0, %v20378_v17  ;;  %24058 = vmatprep.mubr.msk.f32.mxu0 %vm606_vm1, %v17888_v63 }
 0x86b   : > { %24059 = vmatmul.mubr.msk.f32.gmra.mrb[34].mxu0 %vm606_vm1, %v17889_v28 }
 0x86c   : > { %24061 = vmatprep.mubr.msk.f32.mxu0 %vm606_vm1, %v17890_v51  ;;  %v18714_v51 = vld [vmem:[#allocation5 + $0x48] sm:$0xff] }
 0x86f   : > { %24062 = vmatmul.mubr.msk.f32.gmra.mrb[36].mxu0 %vm606_vm1, %v17891_v56 }
 0x870   : > { %24064 = vmatprep.mubr.msk.f32.mxu0 %vm606_vm1, %v17892_v54 }
 0x873   : > { %24065 = vmatmul.mubr.msk.f32.gmra.mrb[38].mxu0 %vm606_vm1, %v17893_v15  ;;  %v18713_v15 = vld [vmem:[#allocation5 + $0x40] sm:$0xff] }
 0x874   : > { %24067 = vmatprep.mubr.msk.f32.mxu0 %vm606_vm1, %v17894_v36 }
 0x877   : > { %24068 = vmatmul.mubr.msk.f32.gmra.mrb[40].mxu0 %vm606_vm1, %v17895_v38 }
 0x878   : > { %24070 = vmatprep.mubr.msk.f32.mxu0 %vm606_vm1, %v17896_v21 }
 0x87b   : > { %24071 = vmatmul.mubr.msk.f32.gmra.mrb[42].mxu0 %vm606_vm1, %v17897_v35 }
 0x87c   : > { %24073 = vmatprep.mubr.msk.f32.mxu0 %vm606_vm1, %v30141_v29  ;;  %v17916_v29 = vld [vmem:[#allocation4 + $0x199] sm:$0xff] }
 0x87f   : > { %24074 = vmatmul.mubr.msk.f32.gmra.mrb[44].mxu0 %vm606_vm1, %v30148_v12  ;;  %v17917_v12 = vld [vmem:[#allocation4 + $0x1a1] sm:$0xff] }
 0x880   : > { %24076 = vmatprep.mubr.msk.f32.mxu0 %vm606_vm1, %v30157_v42  ;;  %v31928_v42 = vld [vmem:[#allocation41_spill] sm:$0xff] }
 0x883   : > { %24077 = vmatmul.mubr.msk.f32.gmra.mrb[46].mxu0 %vm606_vm1, %v30164_v61  ;;  %v31929_v61 = vld [vmem:[#allocation21_spill] sm:$0xff] }
 0x884   : > { %24079 = vmatprep.mubr.msk.f32.mxu0 %vm606_vm1, %v30173_v60  ;;  %v31930_v60 = vld [vmem:[#allocation24_spill] sm:$0xff] }
 0x887   : > { %24080 = vmatmul.mubr.msk.f32.gmra.mrb[48].mxu0 %vm606_vm1, %v30180_v1  ;;  %v31931_v1 = vld [vmem:[#allocation28_spill] sm:$0xff] }
 0x888   : > { %24082 = vmatprep.mubr.msk.f32.mxu0 %vm606_vm1, %v30189_v9  ;;  %v31932_v9 = vld [vmem:[#allocation17_spill] sm:$0xff] }
 0x88b   : > { %24083 = vmatmul.mubr.msk.f32.gmra.mrb[50].mxu0 %vm606_vm1, %v30196_v40  ;;  %v31933_v40 = vld [vmem:[#allocation29_spill] sm:$0xff] }
 0x88c   : > { %24085 = vmatprep.mubr.msk.f32.mxu0 %vm606_vm1, %v30205_v49  ;;  %v31934_v49 = vld [vmem:[#allocation18_spill] sm:$0xff] }
 0x88f   : > { %24086 = vmatmul.mubr.msk.f32.gmra.mrb[52].mxu0 %vm606_vm1, %v30212_v48  ;;  %v31935_v48 = vld [vmem:[#allocation35_spill] sm:$0xff] }
 0x890   : > { %24088 = vmatprep.mubr.msk.f32.mxu0 %vm606_vm1, %v30220_v16  ;;  %v31936_v16 = vld [vmem:[#allocation36_spill] sm:$0xff] }
 0x893   : > { %24089 = vmatmul.mubr.msk.f32.gmra.mrb[54].mxu0 %vm606_vm1, %v30226_v58  ;;  %v31937_v58 = vld [vmem:[#allocation44_spill] sm:$0xff] }
 0x894   : > { %24091 = vmatprep.mubr.msk.f32.mxu0 %vm606_vm1, %v30231_v55  ;;  %v31938_v55 = vld [vmem:[#allocation22_spill] sm:$0xff] }
 0x897   : > { %24092 = vmatmul.mubr.msk.f32.gmra.mrb[56].mxu0 %vm606_vm1, %v30236_v8  ;;  %v31939_v8 = vld [vmem:[#allocation45_spill] sm:$0xff] }
 0x898   : > { %24094 = vmatprep.mubr.msk.f32.mxu0 %vm606_vm1, %v31900_v39 }
 0x89b   : > { %24095 = vmatmul.mubr.msk.f32.gmra.mrb[58].mxu0 %vm606_vm1, %v31901_v45  ;;  %v18707_v45 = vld [vmem:[#allocation5 + $0x10] sm:$0xff] }
 0x89c   : > { %24097 = vmatprep.mubr.msk.f32.mxu0 %vm606_vm1, %v30649_v46 }
 0x89f   : > { %24098 = vmatmul.mubr.msk.f32.gmra.mrb[60].mxu0 %vm606_vm1, %v30653_v25 }
 0x8a0   : > { %24100 = vmatprep.mubr.msk.f32.mxu0 %vm606_vm1, %v17916_v29  ;;  %v18716_v29 = vld [vmem:[#allocation5 + $0x58] sm:$0xff] }
 0x8a3   : > { %24101 = vmatmul.mubr.msk.f32.gmra.mrb[62].mxu0 %vm606_vm1, %v17917_v12 }
 0x8a4   : > { %24105 = vmatprep.mubr.msk.f32.mxu0 %vm606_vm1, %v31904_v34 }
 0x8a7   : > { %24106 = vmatmul.mubr.msk.f32.vlgmr.msra.gmra.mrb[32].mxu0 %vm606_vm1, %v31905_v30  ;;  %v18710_v30 = vld [vmem:[#allocation5 + $0x28] sm:$0xff] }
 0x8a8   : > { %24108 = vmatprep.mubr.msk.f32.mxu0 %vm606_vm1, %v31906_v24 }
 0x8ab   : > { %24109 = vmatmul.mubr.msk.f32.gmra.mrb[34].mxu0 %vm606_vm1, %v31928_v42 }
 0x8ac   : > { %24111 = vmatprep.mubr.msk.f32.mxu0 %vm606_vm1, %v31929_v61  ;;  %v18715_v61 = vld [vmem:[#allocation5 + $0x50] sm:$0xff] }
 0x8af   : > { %24112 = vmatmul.mubr.msk.f32.gmra.mrb[36].mxu0 %vm606_vm1, %v31930_v60 }
 0x8b0   : > { %24114 = vmatprep.mubr.msk.f32.mxu0 %vm606_vm1, %v31931_v1 }
 0x8b3   : > { %24115 = vmatmul.mubr.msk.f32.gmra.mrb[38].mxu0 %vm606_vm1, %v31932_v9 }
 0x8b4   : > { %24117 = vmatprep.mubr.msk.f32.mxu0 %vm606_vm1, %v31933_v40 }
 0x8b7   : > { %24118 = vmatmul.mubr.msk.f32.gmra.mrb[40].mxu0 %vm606_vm1, %v31934_v49  ;;  %v18718_v49 = vld [vmem:[#allocation5 + $0x68] sm:$0xff] }
 0x8b8   : > { %24120 = vmatprep.mubr.msk.f32.mxu0 %vm606_vm1, %v31935_v48 }
 0x8bb   : > { %24121 = vmatmul.mubr.msk.f32.gmra.mrb[42].mxu0 %vm606_vm1, %v31936_v16 }
 0x8bc   : > { %24123 = vmatprep.mubr.msk.f32.mxu0 %vm606_vm1, %v31937_v58  ;;  %v18717_v58 = vld [vmem:[#allocation5 + $0x60] sm:$0xff] }
 0x8bf   : > { %24124 = vmatmul.mubr.msk.f32.gmra.mrb[44].mxu0 %vm606_vm1, %v31938_v55 }
 0x8c0   : > { %24126 = vmatprep.mubr.msk.f32.mxu0 %vm606_vm1, %v31939_v8 }
 0x8c3   : > { %24127 = vmatmul.mubr.msk.f32.gmra.mrb[46].mxu0 %vm606_vm1, %v31919_v19 }
 0x8c4   : > { %24129 = vmatprep.mubr.msk.f32.mxu0 %vm606_vm1, %v31940_v59 }
 0x8c7   : > { %24130 = vmatmul.mubr.msk.f32.gmra.mrb[48].mxu0 %vm606_vm1, %v31921_v10  ;;  %v18712_v10 = vld [vmem:[#allocation5 + $0x38] sm:$0xff] }
 0x8c8   : > { %24132 = vmatprep.mubr.msk.f32.mxu0 %vm606_vm1, %v31922_v4 }
 0x8cb   : > { %24133 = vmatmul.mubr.msk.f32.gmra.mrb[50].mxu0 %vm606_vm1, %v31923_v23 }
 0x8cc   : > { %24135 = vmatprep.mubr.msk.f32.mxu0 %vm606_vm1, %v31941_v62 }
 0x8cf   : > { %24136 = vmatmul.mubr.msk.f32.gmra.mrb[52].mxu0 %vm606_vm1, %v31925_v47 }
 0x8d0   : > { %24138 = vmatprep.mubr.msk.f32.mxu0 %vm606_vm1, %v31942_v14  ;;  %v18720_v14 = vld [vmem:[#allocation5 + $0x78] sm:$0xff] }
 0x8d3   : > { %24139 = vmatmul.mubr.msk.f32.gmra.mrb[54].mxu0 %vm606_vm1, %v30490_v22  ;;  %v18307_v22 = vld [vmem:[#allocation4 + $0x1a2] sm:$0xff] }
 0x8d4   : > { %24141 = vmatprep.mubr.msk.f32.mxu0 %vm606_vm1, %v31927_v26 }
 0x8d7   : > { %24142 = vmatmul.mubr.msk.f32.gmra.mrb[56].mxu0 %vm606_vm1, %v30498_v7  ;;  %v30913_v7 = vld [vmem:[%s31032_s12] ss:$0 sm:$0xff] }
 0x8d8   : > { %24144 = vmatprep.mubr.msk.f32.mxu0 %vm606_vm1, %v31943_v43 }
 0x8db   : > { %24145 = vmatmul.mubr.msk.f32.gmra.mrb[58].mxu0 %vm606_vm1, %v30506_v13 }
 0x8dc   : > { %24147 = vmatprep.mubr.msk.f32.mxu0 %vm606_vm1, %v30722_v52  ;;  %v18709_v52 = vld [vmem:[#allocation5 + $0x20] sm:$0xff] }
 0x8df   : > { %24148 = vmatmul.mubr.msk.f32.gmra.mrb[60].mxu0 %vm606_vm1, %v30726_v44 }
 0x8e0   : > { %24150 = vmatprep.mubr.msk.f32.mxu0 %vm606_vm1, %v18306_v20 }
 0x8e3   : > { %24151 = vmatmul.mubr.msk.f32.gmra.mrb[62].mxu0 %vm606_vm1, %v18307_v22  ;;  %v18719_v22 = vld [vmem:[#allocation5 + $0x70] sm:$0xff] }
 0x97a   : > { %v24107_v37 = vpop.f32.mrb[32].mxu0 }
 0x97b   : > { %v18674_v6 = vadd.f32 %v24107_v37, %v30913_v7  ;;  %v18475_v53 = vpop.f32.mrb[33].mxu0 }
 0x97c   : > { %v18673_v0 = vadd.f32 %v30913_v7, %v18475_v53 }
 0x97d   : > { %v18738_v2 = vadd.f32 %v18706_v41, %v18674_v6 }
 0x97e   : > { %v18737_v3 = vadd.f32 %v18705_v5, %v18673_v0  ;;  %v24110_v33 = vpop.f32.mrb[34].mxu0  ;;  %v18722_v0 = vld [vmem:[#allocation5 + $0x88] sm:$0xff] }
 0x97f   : > { %18770 = vst.msk [vmem:[%s30920_s30 + $0x8] sm:$0xff] %vm606_vm1, %v18738_v2  ;;  %v18676_v17 = vadd.f32 %v24110_v33, %v30913_v7  ;;  %v18485_v13 = vpop.f32.mrb[35].mxu0 }
 0x980   : > { %18769 = vst.msk [vmem:[%s30920_s30] sm:$0xff] %vm606_vm1, %v18737_v3  ;;  %v18675_v50 = vadd.f32 %v30913_v7, %v18485_v13  ;;  %v18721_v3 = vld [vmem:[#allocation5 + $0x80] sm:$0xff] }
 0x981   : > { %v18740_v39 = vadd.f32 %v18708_v18, %v18676_v17 }
 0x982   : > { %v18739_v46 = vadd.f32 %v18707_v45, %v18675_v50  ;;  %v24113_v25 = vpop.f32.mrb[36].mxu0  ;;  %v18724_v50 = vld [vmem:[#allocation5 + $0x98] sm:$0xff] }
 0x983   : > { %18772 = vst.msk [vmem:[%s30920_s30 + $0x18] sm:$0xff] %vm606_vm1, %v18740_v39  ;;  %v18678_v27 = vadd.f32 %v24113_v25, %v30913_v7  ;;  %v18495_v34 = vpop.f32.mrb[37].mxu0 }
 0x984   : > { %18771 = vst.msk [vmem:[%s30920_s30 + $0x10] sm:$0xff] %vm606_vm1, %v18739_v46  ;;  %v18677_v24 = vadd.f32 %v30913_v7, %v18495_v34  ;;  %v18723_v46 = vld [vmem:[#allocation5 + $0x90] sm:$0xff] }
 0x985   : > { %v18742_v23 = vadd.f32 %v18710_v30, %v18678_v27 }
 0x986   : > { %v18741_v47 = vadd.f32 %v18709_v52, %v18677_v24  ;;  %v24116_v44 = vpop.f32.mrb[38].mxu0  ;;  %v18726_v24 = vld [vmem:[#allocation5 + $0xa8] sm:$0xff] }
 0x987   : > { %18774 = vst.msk [vmem:[%s30920_s30 + $0x28] sm:$0xff] %vm606_vm1, %v18742_v23  ;;  %v18680_v19 = vadd.f32 %v24116_v44, %v30913_v7  ;;  %v18505_v26 = vpop.f32.mrb[39].mxu0 }
 0x988   : > { %18773 = vst.msk [vmem:[%s30920_s30 + $0x20] sm:$0xff] %vm606_vm1, %v18741_v47  ;;  %v18679_v4 = vadd.f32 %v30913_v7, %v18505_v26  ;;  %v18725_v47 = vld [vmem:[#allocation5 + $0xa0] sm:$0xff] }
 0x989   : > { %v18744_v11 = vadd.f32 %v18712_v10, %v18680_v19 }
 0x98a   : > { %v18743_v32 = vadd.f32 %v18711_v57, %v18679_v4  ;;  %v24119_v31 = vpop.f32.mrb[40].mxu0  ;;  %v18728_v4 = vld [vmem:[#allocation5 + $0xb8] sm:$0xff] }
 0x98b   : > { %18776 = vst.msk [vmem:[%s30920_s30 + $0x38] sm:$0xff] %vm606_vm1, %v18744_v11  ;;  %v18682_v63 = vadd.f32 %v24119_v31, %v30913_v7  ;;  %v18515_v28 = vpop.f32.mrb[41].mxu0 }
 0x98c   : > { %18775 = vst.msk [vmem:[%s30920_s30 + $0x30] sm:$0xff] %vm606_vm1, %v18743_v32  ;;  %v18681_v56 = vadd.f32 %v30913_v7, %v18515_v28  ;;  %v18727_v32 = vld [vmem:[#allocation5 + $0xb0] sm:$0xff] }
 0x98d   : > { %v18746_v54 = vadd.f32 %v18714_v51, %v18682_v63 }
 0x98e   : > { %v18745_v36 = vadd.f32 %v18713_v15, %v18681_v56  ;;  %v24122_v38 = vpop.f32.mrb[42].mxu0  ;;  %v18730_v56 = vld [vmem:[#allocation5 + $0xc8] sm:$0xff] }
 0x98f   : > { %18778 = vst.msk [vmem:[%s30920_s30 + $0x48] sm:$0xff] %vm606_vm1, %v18746_v54  ;;  %v18684_v21 = vadd.f32 %v24122_v38, %v30913_v7  ;;  %v18525_v35 = vpop.f32.mrb[43].mxu0 }
 0x990   : > { %18777 = vst.msk [vmem:[%s30920_s30 + $0x40] sm:$0xff] %vm606_vm1, %v18745_v36  ;;  %v18683_v12 = vadd.f32 %v30913_v7, %v18525_v35  ;;  %v18729_v36 = vld [vmem:[#allocation5 + $0xc0] sm:$0xff] }
 0x991   : > { %v18748_v42 = vadd.f32 %v18716_v29, %v18684_v21 }
 0x992   : > { %v18747_v60 = vadd.f32 %v18715_v61, %v18683_v12  ;;  %v24125_v1 = vpop.f32.mrb[44].mxu0  ;;  %v18732_v12 = vld [vmem:[#allocation5 + $0xd8] sm:$0xff] }
 0x993   : > { %18780 = vst.msk [vmem:[%s30920_s30 + $0x58] sm:$0xff] %vm606_vm1, %v18748_v42  ;;  %v18686_v9 = vadd.f32 %v24125_v1, %v30913_v7  ;;  %v18535_v40 = vpop.f32.mrb[45].mxu0 }
 0x994   : > { %18779 = vst.msk [vmem:[%s30920_s30 + $0x50] sm:$0xff] %vm606_vm1, %v18747_v60  ;;  %v18685_v48 = vadd.f32 %v30913_v7, %v18535_v40  ;;  %v18731_v60 = vld [vmem:[#allocation5 + $0xd0] sm:$0xff] }
 0x995   : > { %v18750_v16 = vadd.f32 %v18718_v49, %v18686_v9 }
 0x996   : > { %v18749_v55 = vadd.f32 %v18717_v58, %v18685_v48  ;;  %v24128_v8 = vpop.f32.mrb[46].mxu0  ;;  %v18734_v48 = vld [vmem:[#allocation5 + $0xe8] sm:$0xff] }
 0x997   : > { %18782 = vst.msk [vmem:[%s30920_s30 + $0x68] sm:$0xff] %vm606_vm1, %v18750_v16  ;;  %v18688_v59 = vadd.f32 %v24128_v8, %v30913_v7  ;;  %v18545_v62 = vpop.f32.mrb[47].mxu0 }
 0x998   : > { %18781 = vst.msk [vmem:[%s30920_s30 + $0x60] sm:$0xff] %vm606_vm1, %v18749_v55  ;;  %v18687_v43 = vadd.f32 %v30913_v7, %v18545_v62  ;;  %v18733_v55 = vld [vmem:[#allocation5 + $0xe0] sm:$0xff] }
 0x999   : > { %v18752_v20 = vadd.f32 %v18720_v14, %v18688_v59 }
 0x99a   : > { %v18751_v37 = vadd.f32 %v18719_v22, %v18687_v43  ;;  %v24131_v6 = vpop.f32.mrb[48].mxu0  ;;  %v18736_v43 = vld [vmem:[#allocation5 + $0xf8] sm:$0xff] }
 0x99b   : > { %18784 = vst.msk [vmem:[%s30920_s30 + $0x78] sm:$0xff] %vm606_vm1, %v18752_v20  ;;  %v18690_v53 = vadd.f32 %v24131_v6, %v30913_v7  ;;  %v18555_v41 = vpop.f32.mrb[49].mxu0 }
 0x99c   : > { %18783 = vst.msk [vmem:[%s30920_s30 + $0x70] sm:$0xff] %vm606_vm1, %v18751_v37  ;;  %v18689_v2 = vadd.f32 %v30913_v7, %v18555_v41  ;;  %v18735_v37 = vld [vmem:[#allocation5 + $0xf0] sm:$0xff] }
 0x99d   : > { %v18754_v5 = vadd.f32 %v18722_v0, %v18690_v53 }
 0x99e   : > { %v18753_v33 = vadd.f32 %v18721_v3, %v18689_v2  ;;  %v24134_v17 = vpop.f32.mrb[50].mxu0 }
 0x99f   : > { %18786 = vst.msk [vmem:[%s30920_s30 + $0x88] sm:$0xff] %vm606_vm1, %v18754_v5  ;;  %v18692_v13 = vadd.f32 %v24134_v17, %v30913_v7  ;;  %v18565_v18 = vpop.f32.mrb[51].mxu0 }
 0x9a0   : > { %18785 = vst.msk [vmem:[%s30920_s30 + $0x80] sm:$0xff] %vm606_vm1, %v18753_v33  ;;  %v18691_v39 = vadd.f32 %v30913_v7, %v18565_v18 }
 0x9a1   : > { %v18756_v45 = vadd.f32 %v18724_v50, %v18692_v13 }
 0x9a2   : > { %v18755_v25 = vadd.f32 %v18723_v46, %v18691_v39  ;;  %v24137_v27 = vpop.f32.mrb[52].mxu0 }
 0x9a3   : > { %18788 = vst.msk [vmem:[%s30920_s30 + $0x98] sm:$0xff] %vm606_vm1, %v18756_v45  ;;  %v18694_v34 = vadd.f32 %v24137_v27, %v30913_v7  ;;  %v18575_v30 = vpop.f32.mrb[53].mxu0 }
 0x9a4   : > { %18787 = vst.msk [vmem:[%s30920_s30 + $0x90] sm:$0xff] %vm606_vm1, %v18755_v25  ;;  %v18693_v23 = vadd.f32 %v30913_v7, %v18575_v30 }
 0x9a5   : > { %v18758_v52 = vadd.f32 %v18726_v24, %v18694_v34 }
 0x9a6   : > { %v18757_v44 = vadd.f32 %v18725_v47, %v18693_v23  ;;  %v24140_v19 = vpop.f32.mrb[54].mxu0 }
 0x9a7   : > { %18790 = vst.msk [vmem:[%s30920_s30 + $0xa8] sm:$0xff] %vm606_vm1, %v18758_v52  ;;  %v18696_v26 = vadd.f32 %v24140_v19, %v30913_v7  ;;  %v18585_v10 = vpop.f32.mrb[55].mxu0 }
 0x9a8   : > { %18789 = vst.msk [vmem:[%s30920_s30 + $0xa0] sm:$0xff] %vm606_vm1, %v18757_v44  ;;  %v18695_v11 = vadd.f32 %v30913_v7, %v18585_v10 }
 0x9a9   : > { %v18760_v57 = vadd.f32 %v18728_v4, %v18696_v26 }
 0x9aa   : > { %v18759_v31 = vadd.f32 %v18727_v32, %v18695_v11  ;;  %v24143_v63 = vpop.f32.mrb[56].mxu0 }
 0x9ab   : > { %18792 = vst.msk [vmem:[%s30920_s30 + $0xb8] sm:$0xff] %vm606_vm1, %v18760_v57  ;;  %v18698_v28 = vadd.f32 %v24143_v63, %v30913_v7  ;;  %v18595_v51 = vpop.f32.mrb[57].mxu0 }
 0x9ac   : > { %18791 = vst.msk [vmem:[%s30920_s30 + $0xb0] sm:$0xff] %vm606_vm1, %v18759_v31  ;;  %v18697_v54 = vadd.f32 %v30913_v7, %v18595_v51 }
 0x9ad   : > { %v18762_v15 = vadd.f32 %v18730_v56, %v18698_v28 }
 0x9ae   : > { %v18761_v38 = vadd.f32 %v18729_v36, %v18697_v54  ;;  %v24146_v21 = vpop.f32.mrb[58].mxu0 }
 0x9af   : > { %18794 = vst.msk [vmem:[%s30920_s30 + $0xc8] sm:$0xff] %vm606_vm1, %v18762_v15  ;;  %v18700_v35 = vadd.f32 %v24146_v21, %v30913_v7  ;;  %v18605_v29 = vpop.f32.mrb[59].mxu0 }
 0x9b0   : > { %18793 = vst.msk [vmem:[%s30920_s30 + $0xc0] sm:$0xff] %vm606_vm1, %v18761_v38  ;;  %v18699_v42 = vadd.f32 %v30913_v7, %v18605_v29 }
 0x9b1   : > { %v18764_v61 = vadd.f32 %v18732_v12, %v18700_v35 }
 0x9b2   : > { %v18763_v1 = vadd.f32 %v18731_v60, %v18699_v42  ;;  %v24149_v9 = vpop.f32.mrb[60].mxu0 }
 0x9b3   : > { %18796 = vst.msk [vmem:[%s30920_s30 + $0xd8] sm:$0xff] %vm606_vm1, %v18764_v61  ;;  %v18702_v40 = vadd.f32 %v24149_v9, %v30913_v7  ;;  %v18615_v49 = vpop.f32.mrb[61].mxu0 }
 0x9b4   : > { %18795 = vst.msk [vmem:[%s30920_s30 + $0xd0] sm:$0xff] %vm606_vm1, %v18763_v1  ;;  %v18701_v16 = vadd.f32 %v30913_v7, %v18615_v49 }
 0x9b5   : > { %v18766_v58 = vadd.f32 %v18734_v48, %v18702_v40 }
 0x9b6   : > { %v18765_v8 = vadd.f32 %v18733_v55, %v18701_v16  ;;  %v24152_v59 = vpop.f32.mrb[62].mxu0 }
 0x9b7   : > { %18798 = vst.msk [vmem:[%s30920_s30 + $0xe8] sm:$0xff] %vm606_vm1, %v18766_v58  ;;  %v18704_v62 = vadd.f32 %v24152_v59, %v30913_v7  ;;  %v18625_v14 = vpop.f32.mrb[63].mxu0 }
 0x9b8   : > { %18797 = vst.msk [vmem:[%s30920_s30 + $0xe0] sm:$0xff] %vm606_vm1, %v18765_v8  ;;  %v18703_v20 = vadd.f32 %v30913_v7, %v18625_v14 }
 0x9b9   : > { %v18768_v22 = vadd.f32 %v18736_v43, %v18704_v62 }
 0x9ba   : > { %v18767_v6 = vadd.f32 %v18735_v37, %v18703_v20 }
 0x9bb   : > { %18800 = vst.msk [vmem:[%s30920_s30 + $0xf8] sm:$0xff] %vm606_vm1, %v18768_v22 }
 0x9bc   : > { %18799 = vst.msk [vmem:[%s30920_s30 + $0xf0] sm:$0xff] %vm606_vm1, %v18767_v6 }
 0x9bd PF: > { %s26_s21 = sadd.s32 1, %s25517_s21  }
 0x9be   : > { %p23_p4 = scmp.ge.s32.totalorder %s26_s21, 4  }
 0x9c0   :  { %25 = sbr.rel (!%p23_p4) target bundleno = 2 (0x2), region = 163 }

</bundles_post_ra>
